<compile_context>
chip_gen: v7x
topology: tpu7x:2x2x1
jax: 0.10.0
libtpu: 0.0.40
codegen_flags: <defaults>
</compile_context>

<pallas_src>
import functools

import jax
import jax.numpy as jnp
from jax import lax
from jax.experimental import pallas as pl
from jax.experimental.pallas import tpu as pltpu

MXU_DTYPE = jnp.bfloat16        # MXU operand dtype (accumulation stays f32)
ACT_DTYPE = jnp.bfloat16        # intermediate activations in HBM
BN_ROW_TILE = 1024
ATTN_Q_TILE = 256
LEAKY_SLOPE = 0.2
BN_EPS = 1e-5


def _round_up(x, m):
    return ((x + m - 1) // m) * m


def _nbytes(dt):
    return jnp.dtype(dt).itemsize


def _vmem_limit(*block_byte_counts):
    """Scoped-VMEM limit derived from the per-step block footprint.

    Blocks are double-buffered by the pipeline and the kernels build small VMEM
    temporaries (window slices, f32 accumulators), so take 4x the block bytes plus
    slack, floor it generously and cap at 32 MiB so the same setting is safe on
    v7x (64 MiB VMEM per TC) as well as v5e/v6e (128 MiB).
    """
    need = 4 * sum(int(b) for b in block_byte_counts) + (4 << 20)
    return int(max(16 << 20, min(need, 32 << 20)))


# ---------------------------------------------------------------------------
# Direct convolution kernel (shared by 3x3 convs, phase-merged stride-2 transposed
# convs and 1x1 attention projections).  Fuses bias, BatchNorm statistics and an
# optional sigmoid epilogue.  No HBM im2col.
# ---------------------------------------------------------------------------

def _conv_kernel(x_ref, w_ref, b_ref, o_ref, sum_ref, sq_ref, *,
                 offsets, ho, wo, activation):
    """One batch element:  out[h*wo+w, :] = sum_t xpad[h+u_t, w+v_t, :] @ w[t]  (+bias).

    x_ref:   (1, Hp, Wp, Cin)   padded input, bf16
    w_ref:   (T, Cin, P)        per-window-tap weights, bf16
    b_ref:   (1, P)             bias, f32
    o_ref:   (1, ho*wo, P)      output
    sum/sq:  (1, 1, P)          per-batch per-column stats of the pre-activation output
    """
    x = x_ref[0]                                            # (Hp, Wp, Cin)
    p = w_ref.shape[2]
    acc = jnp.zeros((ho * wo, p), jnp.float32)
    for t, (u, v) in enumerate(offsets):                    # static taps (1 or 9)
        win = x[u:u + ho, v:v + wo, :].reshape(ho * wo, -1)
        acc = acc + jnp.dot(win, w_ref[t], preferred_element_type=jnp.float32)
    y = acc + b_ref[...]                                    # (1, P) broadcasts over rows
    # fused train-mode BatchNorm statistics (reduced over batch in XLA afterwards)
    sum_ref[0] = jnp.sum(y, axis=0, keepdims=True)
    sq_ref[0] = jnp.sum(y * y, axis=0, keepdims=True)
    if activation == "sigmoid":
        y = jax.nn.sigmoid(y)
    o_ref[0] = y.astype(o_ref.dtype)


def conv_window(x_nhwc, w_taps, bias, *, pad, activation=None, out_dtype=ACT_DTYPE):
    """Direct convolution with a (2*pad+1)^2 window and same spatial output size.

    w_taps: (T, Cin, P), taps in (u, v) row-major order (T=1, pad=0 for 1x1 convs).
    Returns (out (N, H*W, P), sum (N, 1, P), sumsq (N, 1, P)).
    """
    N, H, W, Cin = x_nhwc.shape
    T, Cin2, P = w_taps.shape
    assert Cin2 == Cin
    k = int(round(T ** 0.5))
    assert k * k == T and k == 2 * pad + 1

    xp = x_nhwc.astype(MXU_DTYPE)
    if pad:
        xp = jnp.pad(xp, ((0, 0), (pad, pad), (pad, pad), (0, 0)))
    Hp, Wp = H + 2 * pad, W + 2 * pad
    ho, wo = Hp - k + 1, Wp - k + 1                          # == H, W
    offsets = tuple((u, v) for u in range(k) for v in range(k))

    w_taps = w_taps.astype(MXU_DTYPE)
    bias2 = bias.astype(jnp.float32).reshape(1, P)

    blk = (Hp * Wp * Cin * 2, T * Cin * P * 2, P * 4,
           ho * wo * P * _nbytes(out_dtype), 2 * P * 4,
           ho * wo * P * 4)                                  # f32 accumulator temp
    kern = functools.partial(_conv_kernel, offsets=offsets, ho=ho, wo=wo,
                             activation=activation)
    # Grid over batch only: each step's M is the full per-image spatial extent (large,
    # lane-dense blocks); batch >= 2 keeps both v7x TensorCores busy.
    out, s, q = pl.pallas_call(
        kern,
        grid=(N,),
        out_shape=(jax.ShapeDtypeStruct((N, ho * wo, P), out_dtype),
                   jax.ShapeDtypeStruct((N, 1, P), jnp.float32),
                   jax.ShapeDtypeStruct((N, 1, P), jnp.float32)),
        in_specs=[pl.BlockSpec((1, Hp, Wp, Cin), lambda n: (n, 0, 0, 0)),
                  pl.BlockSpec((T, Cin, P), lambda n: (0, 0, 0)),
                  pl.BlockSpec((1, P), lambda n: (0, 0))],
        out_specs=(pl.BlockSpec((1, ho * wo, P), lambda n: (n, 0, 0)),
                   pl.BlockSpec((1, 1, P), lambda n: (n, 0, 0)),
                   pl.BlockSpec((1, 1, P), lambda n: (n, 0, 0))),
        compiler_params=pltpu.CompilerParams(
            dimension_semantics=("parallel",),
            vmem_limit_bytes=_vmem_limit(*blk)),
    )(xp, w_taps, bias2)
    return out, s, q


# ---------------------------------------------------------------------------
# BatchNorm: scale/shift precomputed once in XLA from the conv-fused statistics,
# then a single row-tiled apply (+residual, +LeakyReLU) Pallas pass.
# ---------------------------------------------------------------------------

def bn_scale_shift(stats_sum, stats_sq, count, gamma, beta, *, n_phase=1, eps=BN_EPS):
    s = jnp.sum(stats_sum, axis=(0, 1))                      # (P,)
    q = jnp.sum(stats_sq, axis=(0, 1))
    if n_phase > 1:                                          # pool sub-pixel phases
        s = jnp.sum(s.reshape(n_phase, -1), axis=0)
        q = jnp.sum(q.reshape(n_phase, -1), axis=0)
    mean = s / count
    var = jnp.maximum(q / count - mean * mean, 0.0)          # biased var (train mode)
    scale = gamma.astype(jnp.float32) * lax.rsqrt(var + eps)
    shift = beta.astype(jnp.float32) - mean * scale
    if n_phase > 1:                                          # back to the phase layout
        scale = jnp.tile(scale, n_phase)
        shift = jnp.tile(shift, n_phase)
    c = scale.shape[0]
    return scale.reshape(1, c), shift.reshape(1, c)


def _bn_apply_kernel(x_ref, scale_ref, shift_ref, *rest, act, has_res):
    if has_res:
        res_ref, o_ref = rest
    else:
        (o_ref,) = rest
    y = x_ref[...].astype(jnp.float32) * scale_ref[...] + shift_ref[...]
    if has_res:
        y = y + res_ref[...].astype(jnp.float32)
    if act == "leaky":
        y = jnp.where(y >= 0, y, LEAKY_SLOPE * y)
    o_ref[...] = y.astype(o_ref.dtype)


def bn_apply(x2d, scale, shift, *, act=None, residual=None, out_dtype=ACT_DTYPE):
    M, C = x2d.shape
    tr = min(BN_ROW_TILE, _round_up(M, 8))
    Mp = _round_up(M, tr)
    xp = jnp.pad(x2d, ((0, Mp - M), (0, 0))) if Mp != M else x2d

    inputs = [xp, scale, shift]
    in_specs = [pl.BlockSpec((tr, C), lambda i: (i, 0)),
                pl.BlockSpec((1, C), lambda i: (0, 0)),
                pl.BlockSpec((1, C), lambda i: (0, 0))]
    has_res = residual is not None
    if has_res:
        rp = jnp.pad(residual, ((0, Mp - M), (0, 0))) if Mp != M else residual
        inputs.append(rp)
        in_specs.append(pl.BlockSpec((tr, C), lambda i: (i, 0)))

    blk = [tr * C * _nbytes(x2d.dtype), 2 * C * 4, tr * C * _nbytes(out_dtype),
           tr * C * 4]
    if has_res:
        blk.append(tr * C * _nbytes(residual.dtype))
    kern = functools.partial(_bn_apply_kernel, act=act, has_res=has_res)
    out = pl.pallas_call(
        kern,
        grid=(Mp // tr,),
        out_shape=jax.ShapeDtypeStruct((Mp, C), out_dtype),
        in_specs=in_specs,
        out_specs=pl.BlockSpec((tr, C), lambda i: (i, 0)),
        compiler_params=pltpu.CompilerParams(
            dimension_semantics=("parallel",),
            vmem_limit_bytes=_vmem_limit(*blk)),
    )(*inputs)
    return out[:M] if Mp != M else out


# ---------------------------------------------------------------------------
# Self-attention core (per batch, tiled over query rows)
# ---------------------------------------------------------------------------

def _attn_kernel(gamma_ref, q_ref, k_ref, v_ref, x_ref, o_ref):
    q = q_ref[0]                                             # (tq, Cq) bf16
    k = k_ref[0]                                             # (HW, Cq) bf16
    v = v_ref[0]                                             # (HW, C)  bf16
    # energy[i, j] = <q_i, k_j> : contract last dims directly (no k.T transpose)
    energy = lax.dot_general(q, k, (((1,), (1,)), ((), ())),
                             preferred_element_type=jnp.float32)
    energy = energy - jnp.max(energy, axis=-1, keepdims=True)
    p = jnp.exp(energy)
    att = p * pl.reciprocal(jnp.sum(p, axis=-1, keepdims=True), approx=True)
    out = jnp.dot(att.astype(v.dtype), v, preferred_element_type=jnp.float32)
    o_ref[0] = (gamma_ref[0, 0] * out + x_ref[0].astype(jnp.float32)).astype(o_ref.dtype)


def self_attention(h_nhwc, params):
    N, H, W, C = h_nhwc.shape
    HW = H * W
    Cq = params["q_w"].shape[1]

    # fused q/k/v 1x1 projections -> one lane-dense pass of the direct-conv kernel
    w_qkv = jnp.concatenate([params["q_w"], params["k_w"], params["v_w"]], axis=1)
    b_qkv = jnp.concatenate([params["q_b"], params["k_b"], params["v_b"]])
    qkv, _, _ = conv_window(h_nhwc, w_qkv[None], b_qkv, pad=0)   # (N, HW, 2Cq+C) bf16
    # TODO(synk): slice q/k/v inside the attention kernel (pass qkv twice with different
    # BlockSpecs) to avoid these lane-unaligned XLA slices; they are small at Cq=C//8.
    q = qkv[:, :, :Cq]
    k = qkv[:, :, Cq:2 * Cq]
    v = qkv[:, :, 2 * Cq:]
    x3 = h_nhwc.reshape(N, HW, C)

    tq = ATTN_Q_TILE if HW % ATTN_Q_TILE == 0 else HW
    gamma = params["att_gamma"].astype(jnp.float32).reshape(1, 1)

    blk = (tq * Cq * 2, HW * Cq * 2, HW * C * 2, tq * C * 2, tq * C * 2,
           tq * HW * 4)                                       # f32 energy temp
    out = pl.pallas_call(
        _attn_kernel,
        grid=(N, HW // tq),
        out_shape=jax.ShapeDtypeStruct((N, HW, C), ACT_DTYPE),
        in_specs=[pl.BlockSpec(memory_space=pltpu.MemorySpace.SMEM),   # gamma scalar
                  pl.BlockSpec((1, tq, Cq), lambda b, i: (b, i, 0)),
                  pl.BlockSpec((1, HW, Cq), lambda b, i: (b, 0, 0)),
                  pl.BlockSpec((1, HW, C), lambda b, i: (b, 0, 0)),
                  pl.BlockSpec((1, tq, C), lambda b, i: (b, i, 0))],
        out_specs=pl.BlockSpec((1, tq, C), lambda b, i: (b, i, 0)),
        compiler_params=pltpu.CompilerParams(
            dimension_semantics=("parallel", "parallel"),
            vmem_limit_bytes=_vmem_limit(*blk)),
    )(gamma, q, k, v, x3)
    return out.reshape(N, H, W, C)


# ---------------------------------------------------------------------------
# Weight preparation (per-tap matrices for the direct-conv kernel)
# ---------------------------------------------------------------------------

def conv2d_taps(w_oihw):
    """nn.Conv2d weight (Cout, Cin, kh, kw) -> (kh*kw, Cin, Cout)."""
    Cout, Cin, kh, kw = w_oihw.shape
    return jnp.transpose(w_oihw, (2, 3, 1, 0)).reshape(kh * kw, Cin, Cout)


def convtranspose_s1_taps(w_iohw):
    """ConvTranspose2d stride-1 (Cin, Cout, kh, kw) == conv with flipped kernel."""
    Cin, Cout, kh, kw = w_iohw.shape
    w = jnp.flip(w_iohw, axis=(2, 3))
    return jnp.transpose(w, (2, 3, 0, 1)).reshape(kh * kw, Cin, Cout)


def convtranspose_s2_taps(w_iohw):
    """ConvTranspose2d(k=4, s=2, p=1) -> merged sub-pixel-phase taps (9, Cin, 4*Cout).

    out[2h+rh, 2w+rw] = sum_{a,b in {0,1}} xpad[h+rh+a, w+rw+b] . w[:, :, 3-rh-2a, 3-rw-2b]
    All 4 phases share the same 3x3 window; columns ordered (rh, rw, cout).
    """
    Cin, Cout, kh, kw = w_iohw.shape
    assert (kh, kw) == (4, 4)
    wm = jnp.zeros((3, 3, Cin, 2, 2, Cout), w_iohw.dtype)
    for rh in range(2):
        for rw in range(2):
            for a in range(2):
                for b in range(2):
                    wm = wm.at[rh + a, rw + b, :, rh, rw, :].set(
                        w_iohw[:, :, 3 - rh - 2 * a, 3 - rw - 2 * b])
    return wm.reshape(9, Cin, 4 * Cout)


def pixel_shuffle_2x(x_phase_nhwc):
    """(N, H, W, 4*Cout) with channel order (rh, rw, cout) -> (N, 2H, 2W, Cout)."""
    N, H, W, P4 = x_phase_nhwc.shape
    C = P4 // 4
    x = x_phase_nhwc.reshape(N, H, W, 2, 2, C)
    x = jnp.transpose(x, (0, 1, 3, 2, 4, 5))
    return x.reshape(N, 2 * H, 2 * W, C)


# ---------------------------------------------------------------------------
# Decoder forward
# ---------------------------------------------------------------------------

def conv_bn_leaky(x_nhwc, w_taps, bias, bn_gamma, bn_beta, *, pad, n_phase=1,
                  residual=None):
    """direct conv (fused stats) -> train-mode BN -> (+residual) -> LeakyReLU(0.2)."""
    N, H, W, _ = x_nhwc.shape
    P = w_taps.shape[2]
    out, s, q = conv_window(x_nhwc, w_taps, bias, pad=pad)
    M = N * H * W
    scale, shift = bn_scale_shift(s, q, float(M) * n_phase, bn_gamma, bn_beta,
                                  n_phase=n_phase)
    res2d = residual.reshape(M, P) if residual is not None else None
    y = bn_apply(out.reshape(M, P), scale, shift, act="leaky", residual=res2d)
    return y.reshape(N, H, W, P)


def residual_block(h, p):
    o = conv_bn_leaky(h, conv2d_taps(p["conv1_w"]), p["conv1_b"],
                      p["bn1_g"], p["bn1_b"], pad=1)
    # out = LeakyReLU(bn2(conv2(out)) + residual)   (matches the PyTorch block)
    o = conv_bn_leaky(o, conv2d_taps(p["conv2_w"]), p["conv2_b"],
                      p["bn2_g"], p["bn2_b"], pad=1, residual=h)
    return o


def decoder_forward(x_nchw, params):
    x = jnp.transpose(x_nchw, (0, 2, 3, 1))                        # NCHW -> NHWC

    # conv1 (ConvTranspose2d k3 s1 p1) -> bn1 -> LeakyReLU(0.2)
    h = conv_bn_leaky(x, convtranspose_s1_taps(params["conv1_w"]), params["conv1_b"],
                      params["bn1_g"], params["bn1_b"], pad=1)

    # self-attention (fused q/k/v projection + Pallas softmax core)
    h = self_attention(h, params)

    # two residual blocks
    for rb in params["res_blocks"]:
        h = residual_block(h, rb)

    # conv2 (ConvTranspose2d k4 s2 p1) -> bn2 -> LeakyReLU(0.2)   [phase layout, then shuffle]
    hph = conv_bn_leaky(h, convtranspose_s2_taps(params["conv2_w"]),
                        jnp.tile(params["conv2_b"], 4),
                        params["bn2_g"], params["bn2_b"], pad=1, n_phase=4)
    h = pixel_shuffle_2x(hph)

    # conv3 (ConvTranspose2d k4 s2 p1) -> sigmoid (fused in the conv kernel epilogue)
    N3, H3, W3, _ = h.shape
    out_ch = params["conv3_w"].shape[1]
    o, _, _ = conv_window(h, convtranspose_s2_taps(params["conv3_w"]),
                          jnp.tile(params["conv3_b"], 4), pad=1,
                          activation="sigmoid", out_dtype=jnp.float32)
    # TODO(synk): fold this pixel shuffle + NHWC->NCHW into the conv kernel's out_spec
    # (strided, lane-dense final store) instead of the small XLA epilogue.
    o = pixel_shuffle_2x(o.reshape(N3, H3, W3, 4 * out_ch))        # (N, 2H, 2W, out_ch)
    return jnp.transpose(o, (0, 3, 1, 2))                          # NHWC -> NCHW


# ---------------------------------------------------------------------------
# Deterministic parameter init (shapes follow the PyTorch __init__)
# ---------------------------------------------------------------------------

def init_params(key, embedding_dim, hidden, out_channels):
    keys = iter(jax.random.split(key, 64))

    def nrm(shape, scale=0.1):
        return scale * jax.random.normal(next(keys), shape, jnp.float32)

    def res_block(c):
        return {
            "conv1_w": nrm((c, c, 3, 3)), "conv1_b": nrm((c,)),
            "bn1_g": jnp.ones((c,), jnp.float32), "bn1_b": jnp.zeros((c,), jnp.float32),
            "conv2_w": nrm((c, c, 3, 3)), "conv2_b": nrm((c,)),
            "bn2_g": jnp.ones((c,), jnp.float32), "bn2_b": jnp.zeros((c,), jnp.float32),
        }

    return {
        "conv1_w": nrm((embedding_dim, hidden, 3, 3)),  # ConvTranspose2d (Cin,Cout,k,k)
        "conv1_b": nrm((hidden,)),
        "bn1_g": jnp.ones((hidden,), jnp.float32),
        "bn1_b": jnp.zeros((hidden,), jnp.float32),
        # 1x1 conv weights stored directly as (Cin, Cout) matmul matrices
        "q_w": nrm((hidden, hidden // 8)), "q_b": nrm((hidden // 8,)),
        "k_w": nrm((hidden, hidden // 8)), "k_b": nrm((hidden // 8,)),
        "v_w": nrm((hidden, hidden)), "v_b": nrm((hidden,)),
        "att_gamma": jnp.zeros((1,), jnp.float32),      # nn.Parameter(torch.zeros(1))
        "res_blocks": [res_block(hidden), res_block(hidden)],
        "conv2_w": nrm((hidden, hidden // 2, 4, 4)), "conv2_b": nrm((hidden // 2,)),
        "bn2_g": jnp.ones((hidden // 2,), jnp.float32),
        "bn2_b": jnp.zeros((hidden // 2,), jnp.float32),
        "conv3_w": nrm((hidden // 2, out_channels, 4, 4)), "conv3_b": nrm((out_channels,)),
    }


if __name__ == "__main__":
    # small shapes consistent with the module: embedding_dim=32, hidden=16, out=1
    B, EMB, HID, OUT, S = 2, 32, 16, 1, 8
    key = jax.random.PRNGKey(0)
    kp, kx = jax.random.split(key)
    params = init_params(kp, EMB, HID, OUT)
    x = jax.random.normal(kx, (B, EMB, S, S), jnp.float32)         # NCHW like PyTorch

    fwd = jax.jit(decoder_forward)
    y = jax.block_until_ready(fwd(x, params))
    assert y.shape == (B, OUT, 4 * S, 4 * S), y.shape
    assert bool(jnp.all(jnp.isfinite(y)))
    assert bool(jnp.all((y >= 0.0) & (y <= 1.0)))                  # sigmoid output range
    print("KERNEL_OK")
</pallas_src>

<mosaic_0001>
module attributes {stable_mosaic.version = 11 : i64} {
  func.func @_conv_kernel(%arg0: i32, %arg1: memref<1x10x10x32xbf16, #tpu.memory_space<vmem>>, %arg2: memref<9x32x16xbf16, #tpu.memory_space<vmem>>, %arg3: memref<1x16xf32, #tpu.memory_space<vmem>>, %arg4: memref<1x64x16xbf16, #tpu.memory_space<vmem>>, %arg5: memref<1x1x16xf32, #tpu.memory_space<vmem>>, %arg6: memref<1x1x16xf32, #tpu.memory_space<vmem>>) attributes {dimension_semantics = [#tpu.dimension_semantics<parallel>], iteration_bounds = array<i64: 2>, scalar_prefetch = 0 : i64, scratch_operands = 0 : i64, tpu.core_type = #tpu.core_type<tc>, window_params = [{transform_indices = @transform_0, window_bounds = array<i64: 1, 10, 10, 32>}, {pipeline_mode = #tpu.pipeline_mode<synchronous>, transform_indices = @transform_1, window_bounds = array<i64: 9, 32, 16>}, {pipeline_mode = #tpu.pipeline_mode<synchronous>, transform_indices = @transform_2, window_bounds = array<i64: 1, 16>}, {transform_indices = @transform_3, window_bounds = array<i64: 1, 64, 16>}, {transform_indices = @transform_4, window_bounds = array<i64: 1, 1, 16>}, {transform_indices = @transform_5, window_bounds = array<i64: 1, 1, 16>}]} {
    %c0 = arith.constant 0 : index
    %c0_0 = arith.constant 0 : index
    %c0_1 = arith.constant 0 : index
    %c0_2 = arith.constant 0 : index
    %0 = vector.load %arg1[%c0, %c0_0, %c0_1, %c0_2] : memref<1x10x10x32xbf16, #tpu.memory_space<vmem>>, vector<1x10x10x32xbf16>
    %1 = vector.shape_cast %0 : vector<1x10x10x32xbf16> to vector<10x10x32xbf16>
    %cst = arith.constant 0.000000e+00 : f32
    %2 = vector.broadcast %cst : f32 to vector<64x16xf32>
    %3 = vector.extract_strided_slice %1 {offsets = [0, 0, 0], sizes = [8, 8, 32], strides = [1, 1, 1]} : vector<10x10x32xbf16> to vector<8x8x32xbf16>
    %4 = vector.shape_cast %3 : vector<8x8x32xbf16> to vector<64x32xbf16>
    %c0_3 = arith.constant 0 : index
    %c0_4 = arith.constant 0 : index
    %c0_5 = arith.constant 0 : index
    %5 = vector.load %arg2[%c0_3, %c0_4, %c0_5] : memref<9x32x16xbf16, #tpu.memory_space<vmem>>, vector<1x32x16xbf16>
    %6 = vector.shape_cast %5 : vector<1x32x16xbf16> to vector<32x16xbf16>
    %cst_6 = arith.constant dense<0.000000e+00> : vector<64x16xf32>
    %7 = tpu.matmul %4, %6, %cst_6 {dimension_numbers = #tpu.dot_dimension_numbers<[1], [0], [0], [1], [0, 0, 1, 1], [], []>} : vector<64x32xbf16>, vector<32x16xbf16>, vector<64x16xf32> -> vector<64x16xf32>
    %8 = arith.addf %2, %7 : vector<64x16xf32>
    %9 = vector.extract_strided_slice %1 {offsets = [0, 1, 0], sizes = [8, 8, 32], strides = [1, 1, 1]} : vector<10x10x32xbf16> to vector<8x8x32xbf16>
    %10 = vector.shape_cast %9 : vector<8x8x32xbf16> to vector<64x32xbf16>
    %c1 = arith.constant 1 : index
    %c0_7 = arith.constant 0 : index
    %c0_8 = arith.constant 0 : index
    %11 = vector.load %arg2[%c1, %c0_7, %c0_8] : memref<9x32x16xbf16, #tpu.memory_space<vmem>>, vector<1x32x16xbf16>
    %12 = vector.shape_cast %11 : vector<1x32x16xbf16> to vector<32x16xbf16>
    %cst_9 = arith.constant dense<0.000000e+00> : vector<64x16xf32>
    %13 = tpu.matmul %10, %12, %cst_9 {dimension_numbers = #tpu.dot_dimension_numbers<[1], [0], [0], [1], [0, 0, 1, 1], [], []>} : vector<64x32xbf16>, vector<32x16xbf16>, vector<64x16xf32> -> vector<64x16xf32>
    %14 = arith.addf %8, %13 : vector<64x16xf32>
    %15 = vector.extract_strided_slice %1 {offsets = [0, 2, 0], sizes = [8, 8, 32], strides = [1, 1, 1]} : vector<10x10x32xbf16> to vector<8x8x32xbf16>
    %16 = vector.shape_cast %15 : vector<8x8x32xbf16> to vector<64x32xbf16>
    %c2 = arith.constant 2 : index
    %c0_10 = arith.constant 0 : index
    %c0_11 = arith.constant 0 : index
    %17 = vector.load %arg2[%c2, %c0_10, %c0_11] : memref<9x32x16xbf16, #tpu.memory_space<vmem>>, vector<1x32x16xbf16>
    %18 = vector.shape_cast %17 : vector<1x32x16xbf16> to vector<32x16xbf16>
    %cst_12 = arith.constant dense<0.000000e+00> : vector<64x16xf32>
    %19 = tpu.matmul %16, %18, %cst_12 {dimension_numbers = #tpu.dot_dimension_numbers<[1], [0], [0], [1], [0, 0, 1, 1], [], []>} : vector<64x32xbf16>, vector<32x16xbf16>, vector<64x16xf32> -> vector<64x16xf32>
    %20 = arith.addf %14, %19 : vector<64x16xf32>
    %21 = vector.extract_strided_slice %1 {offsets = [1, 0, 0], sizes = [8, 8, 32], strides = [1, 1, 1]} : vector<10x10x32xbf16> to vector<8x8x32xbf16>
    %22 = vector.shape_cast %21 : vector<8x8x32xbf16> to vector<64x32xbf16>
    %c3 = arith.constant 3 : index
    %c0_13 = arith.constant 0 : index
    %c0_14 = arith.constant 0 : index
    %23 = vector.load %arg2[%c3, %c0_13, %c0_14] : memref<9x32x16xbf16, #tpu.memory_space<vmem>>, vector<1x32x16xbf16>
    %24 = vector.shape_cast %23 : vector<1x32x16xbf16> to vector<32x16xbf16>
    %cst_15 = arith.constant dense<0.000000e+00> : vector<64x16xf32>
    %25 = tpu.matmul %22, %24, %cst_15 {dimension_numbers = #tpu.dot_dimension_numbers<[1], [0], [0], [1], [0, 0, 1, 1], [], []>} : vector<64x32xbf16>, vector<32x16xbf16>, vector<64x16xf32> -> vector<64x16xf32>
    %26 = arith.addf %20, %25 : vector<64x16xf32>
    %27 = vector.extract_strided_slice %1 {offsets = [1, 1, 0], sizes = [8, 8, 32], strides = [1, 1, 1]} : vector<10x10x32xbf16> to vector<8x8x32xbf16>
    %28 = vector.shape_cast %27 : vector<8x8x32xbf16> to vector<64x32xbf16>
    %c4 = arith.constant 4 : index
    %c0_16 = arith.constant 0 : index
    %c0_17 = arith.constant 0 : index
    %29 = vector.load %arg2[%c4, %c0_16, %c0_17] : memref<9x32x16xbf16, #tpu.memory_space<vmem>>, vector<1x32x16xbf16>
    %30 = vector.shape_cast %29 : vector<1x32x16xbf16> to vector<32x16xbf16>
    %cst_18 = arith.constant dense<0.000000e+00> : vector<64x16xf32>
    %31 = tpu.matmul %28, %30, %cst_18 {dimension_numbers = #tpu.dot_dimension_numbers<[1], [0], [0], [1], [0, 0, 1, 1], [], []>} : vector<64x32xbf16>, vector<32x16xbf16>, vector<64x16xf32> -> vector<64x16xf32>
    %32 = arith.addf %26, %31 : vector<64x16xf32>
    %33 = vector.extract_strided_slice %1 {offsets = [1, 2, 0], sizes = [8, 8, 32], strides = [1, 1, 1]} : vector<10x10x32xbf16> to vector<8x8x32xbf16>
    %34 = vector.shape_cast %33 : vector<8x8x32xbf16> to vector<64x32xbf16>
    %c5 = arith.constant 5 : index
    %c0_19 = arith.constant 0 : index
    %c0_20 = arith.constant 0 : index
    %35 = vector.load %arg2[%c5, %c0_19, %c0_20] : memref<9x32x16xbf16, #tpu.memory_space<vmem>>, vector<1x32x16xbf16>
    %36 = vector.shape_cast %35 : vector<1x32x16xbf16> to vector<32x16xbf16>
    %cst_21 = arith.constant dense<0.000000e+00> : vector<64x16xf32>
    %37 = tpu.matmul %34, %36, %cst_21 {dimension_numbers = #tpu.dot_dimension_numbers<[1], [0], [0], [1], [0, 0, 1, 1], [], []>} : vector<64x32xbf16>, vector<32x16xbf16>, vector<64x16xf32> -> vector<64x16xf32>
    %38 = arith.addf %32, %37 : vector<64x16xf32>
    %39 = vector.extract_strided_slice %1 {offsets = [2, 0, 0], sizes = [8, 8, 32], strides = [1, 1, 1]} : vector<10x10x32xbf16> to vector<8x8x32xbf16>
    %40 = vector.shape_cast %39 : vector<8x8x32xbf16> to vector<64x32xbf16>
    %c6 = arith.constant 6 : index
    %c0_22 = arith.constant 0 : index
    %c0_23 = arith.constant 0 : index
    %41 = vector.load %arg2[%c6, %c0_22, %c0_23] : memref<9x32x16xbf16, #tpu.memory_space<vmem>>, vector<1x32x16xbf16>
    %42 = vector.shape_cast %41 : vector<1x32x16xbf16> to vector<32x16xbf16>
    %cst_24 = arith.constant dense<0.000000e+00> : vector<64x16xf32>
    %43 = tpu.matmul %40, %42, %cst_24 {dimension_numbers = #tpu.dot_dimension_numbers<[1], [0], [0], [1], [0, 0, 1, 1], [], []>} : vector<64x32xbf16>, vector<32x16xbf16>, vector<64x16xf32> -> vector<64x16xf32>
    %44 = arith.addf %38, %43 : vector<64x16xf32>
    %45 = vector.extract_strided_slice %1 {offsets = [2, 1, 0], sizes = [8, 8, 32], strides = [1, 1, 1]} : vector<10x10x32xbf16> to vector<8x8x32xbf16>
    %46 = vector.shape_cast %45 : vector<8x8x32xbf16> to vector<64x32xbf16>
    %c7 = arith.constant 7 : index
    %c0_25 = arith.constant 0 : index
    %c0_26 = arith.constant 0 : index
    %47 = vector.load %arg2[%c7, %c0_25, %c0_26] : memref<9x32x16xbf16, #tpu.memory_space<vmem>>, vector<1x32x16xbf16>
    %48 = vector.shape_cast %47 : vector<1x32x16xbf16> to vector<32x16xbf16>
    %cst_27 = arith.constant dense<0.000000e+00> : vector<64x16xf32>
    %49 = tpu.matmul %46, %48, %cst_27 {dimension_numbers = #tpu.dot_dimension_numbers<[1], [0], [0], [1], [0, 0, 1, 1], [], []>} : vector<64x32xbf16>, vector<32x16xbf16>, vector<64x16xf32> -> vector<64x16xf32>
    %50 = arith.addf %44, %49 : vector<64x16xf32>
    %51 = vector.extract_strided_slice %1 {offsets = [2, 2, 0], sizes = [8, 8, 32], strides = [1, 1, 1]} : vector<10x10x32xbf16> to vector<8x8x32xbf16>
    %52 = vector.shape_cast %51 : vector<8x8x32xbf16> to vector<64x32xbf16>
    %c8 = arith.constant 8 : index
    %c0_28 = arith.constant 0 : index
    %c0_29 = arith.constant 0 : index
    %53 = vector.load %arg2[%c8, %c0_28, %c0_29] : memref<9x32x16xbf16, #tpu.memory_space<vmem>>, vector<1x32x16xbf16>
    %54 = vector.shape_cast %53 : vector<1x32x16xbf16> to vector<32x16xbf16>
    %cst_30 = arith.constant dense<0.000000e+00> : vector<64x16xf32>
    %55 = tpu.matmul %52, %54, %cst_30 {dimension_numbers = #tpu.dot_dimension_numbers<[1], [0], [0], [1], [0, 0, 1, 1], [], []>} : vector<64x32xbf16>, vector<32x16xbf16>, vector<64x16xf32> -> vector<64x16xf32>
    %56 = arith.addf %50, %55 : vector<64x16xf32>
    %c0_31 = arith.constant 0 : index
    %c0_32 = arith.constant 0 : index
    %57 = vector.load %arg3[%c0_31, %c0_32] : memref<1x16xf32, #tpu.memory_space<vmem>>, vector<1x16xf32>
    %58 = vector.broadcast %57 : vector<1x16xf32> to vector<64x16xf32>
    %59 = arith.addf %56, %58 : vector<64x16xf32>
    %cst_33 = arith.constant dense<0.000000e+00> : vector<16xf32>
    %60 = vector.multi_reduction <add>, %59, %cst_33 [0] : vector<64x16xf32> to vector<16xf32>
    %61 = vector.shape_cast %60 : vector<16xf32> to vector<1x16xf32>
    %c0_34 = arith.constant 0 : index
    %c0_35 = arith.constant 0 : index
    %c0_36 = arith.constant 0 : index
    %62 = vector.load %arg5[%c0_34, %c0_35, %c0_36] : memref<1x1x16xf32, #tpu.memory_space<vmem>>, vector<1x1x16xf32>
    %63 = vector.shape_cast %62 : vector<1x1x16xf32> to vector<1x16xf32>
    %64 = vector.shape_cast %61 : vector<1x16xf32> to vector<1x1x16xf32>
    tpu.vector_store %arg5[%c0_34, %c0_35, %c0_36], %64 {strides = array<i32>} : memref<1x1x16xf32, #tpu.memory_space<vmem>>, vector<1x1x16xf32>,
    %65 = arith.mulf %59, %59 : vector<64x16xf32>
    %cst_37 = arith.constant dense<0.000000e+00> : vector<16xf32>
    %66 = vector.multi_reduction <add>, %65, %cst_37 [0] : vector<64x16xf32> to vector<16xf32>
    %67 = vector.shape_cast %66 : vector<16xf32> to vector<1x16xf32>
    %c0_38 = arith.constant 0 : index
    %c0_39 = arith.constant 0 : index
    %c0_40 = arith.constant 0 : index
    %68 = vector.load %arg6[%c0_38, %c0_39, %c0_40] : memref<1x1x16xf32, #tpu.memory_space<vmem>>, vector<1x1x16xf32>
    %69 = vector.shape_cast %68 : vector<1x1x16xf32> to vector<1x16xf32>
    %70 = vector.shape_cast %67 : vector<1x16xf32> to vector<1x1x16xf32>
    tpu.vector_store %arg6[%c0_38, %c0_39, %c0_40], %70 {strides = array<i32>} : memref<1x1x16xf32, #tpu.memory_space<vmem>>, vector<1x1x16xf32>,
    %71 = arith.truncf %59 : vector<64x16xf32> to vector<64x16xbf16>
    %c0_41 = arith.constant 0 : index
    %c0_42 = arith.constant 0 : index
    %c0_43 = arith.constant 0 : index
    %72 = vector.load %arg4[%c0_41, %c0_42, %c0_43] : memref<1x64x16xbf16, #tpu.memory_space<vmem>>, vector<1x64x16xbf16>
    %73 = vector.shape_cast %72 : vector<1x64x16xbf16> to vector<64x16xbf16>
    %74 = vector.shape_cast %71 : vector<64x16xbf16> to vector<1x64x16xbf16>
    tpu.vector_store %arg4[%c0_41, %c0_42, %c0_43], %74 {strides = array<i32>} : memref<1x64x16xbf16, #tpu.memory_space<vmem>>, vector<1x64x16xbf16>,
    return
  }
  func.func @transform_0(%arg0: i32) -> (i32, i32, i32, i32) {
    %c0_i32 = arith.constant 0 : i32
    %c0_i32_0 = arith.constant 0 : i32
    %c0_i32_1 = arith.constant 0 : i32
    %c0_i32_2 = arith.constant 0 : i32
    return %arg0, %c0_i32, %c0_i32_0, %c0_i32_1 : i32, i32, i32, i32
  }
  func.func @transform_1(%arg0: i32) -> (i32, i32, i32) {
    %c0_i32 = arith.constant 0 : i32
    %c0_i32_0 = arith.constant 0 : i32
    %c0_i32_1 = arith.constant 0 : i32
    %c0_i32_2 = arith.constant 0 : i32
    return %c0_i32, %c0_i32_0, %c0_i32_1 : i32, i32, i32
  }
  func.func @transform_2(%arg0: i32) -> (i32, i32) {
    %c0_i32 = arith.constant 0 : i32
    %c0_i32_0 = arith.constant 0 : i32
    %c0_i32_1 = arith.constant 0 : i32
    return %c0_i32, %c0_i32_0 : i32, i32
  }
  func.func @transform_3(%arg0: i32) -> (i32, i32, i32) {
    %c0_i32 = arith.constant 0 : i32
    %c0_i32_0 = arith.constant 0 : i32
    %c0_i32_1 = arith.constant 0 : i32
    return %arg0, %c0_i32, %c0_i32_0 : i32, i32, i32
  }
  func.func @transform_4(%arg0: i32) -> (i32, i32, i32) {
    %c0_i32 = arith.constant 0 : i32
    %c0_i32_0 = arith.constant 0 : i32
    %c0_i32_1 = arith.constant 0 : i32
    return %arg0, %c0_i32, %c0_i32_0 : i32, i32, i32
  }
  func.func @transform_5(%arg0: i32) -> (i32, i32, i32) {
    %c0_i32 = arith.constant 0 : i32
    %c0_i32_0 = arith.constant 0 : i32
    %c0_i32_1 = arith.constant 0 : i32
    return %arg0, %c0_i32, %c0_i32_0 : i32, i32, i32
  }
}

module attributes {stable_mosaic.version = 11 : i64} {
  func.func @_bn_apply_kernel(%arg0: i32, %arg1: memref<128x16xbf16, #tpu.memory_space<vmem>>, %arg2: memref<1x16xf32, #tpu.memory_space<vmem>>, %arg3: memref<1x16xf32, #tpu.memory_space<vmem>>, %arg4: memref<128x16xbf16, #tpu.memory_space<vmem>>) attributes {dimension_semantics = [#tpu.dimension_semantics<parallel>], iteration_bounds = array<i64: 1>, scalar_prefetch = 0 : i64, scratch_operands = 0 : i64, tpu.core_type = #tpu.core_type<tc>, window_params = [{transform_indices = @transform_0, window_bounds = array<i64: 128, 16>}, {pipeline_mode = #tpu.pipeline_mode<synchronous>, transform_indices = @transform_1, window_bounds = array<i64: 1, 16>}, {pipeline_mode = #tpu.pipeline_mode<synchronous>, transform_indices = @transform_2, window_bounds = array<i64: 1, 16>}, {transform_indices = @transform_3, window_bounds = array<i64: 128, 16>}]} {
    %c0 = arith.constant 0 : index
    %c0_0 = arith.constant 0 : index
    %0 = vector.load %arg1[%c0, %c0_0] : memref<128x16xbf16, #tpu.memory_space<vmem>>, vector<128x16xbf16>
    %1 = arith.extf %0 : vector<128x16xbf16> to vector<128x16xf32>
    %c0_1 = arith.constant 0 : index
    %c0_2 = arith.constant 0 : index
    %2 = vector.load %arg2[%c0_1, %c0_2] : memref<1x16xf32, #tpu.memory_space<vmem>>, vector<1x16xf32>
    %3 = vector.broadcast %2 : vector<1x16xf32> to vector<128x16xf32>
    %4 = arith.mulf %1, %3 : vector<128x16xf32>
    %c0_3 = arith.constant 0 : index
    %c0_4 = arith.constant 0 : index
    %5 = vector.load %arg3[%c0_3, %c0_4] : memref<1x16xf32, #tpu.memory_space<vmem>>, vector<1x16xf32>
    %6 = vector.broadcast %5 : vector<1x16xf32> to vector<128x16xf32>
    %7 = arith.addf %4, %6 : vector<128x16xf32>
    %cst = arith.constant 0.000000e+00 : f32
    %8 = vector.broadcast %cst : f32 to vector<128x16xf32>
    %9 = arith.cmpf oge, %7, %8 : vector<128x16xf32>
    %cst_5 = arith.constant 2.000000e-01 : f32
    %10 = vector.broadcast %cst_5 : f32 to vector<128x16xf32>
    %11 = arith.mulf %10, %7 : vector<128x16xf32>
    %12 = arith.select %9, %7, %11 : vector<128x16xi1>, vector<128x16xf32>
    %13 = arith.truncf %12 : vector<128x16xf32> to vector<128x16xbf16>
    %c0_6 = arith.constant 0 : index
    %c0_7 = arith.constant 0 : index
    %14 = vector.load %arg4[%c0_6, %c0_7] : memref<128x16xbf16, #tpu.memory_space<vmem>>, vector<128x16xbf16>
    tpu.vector_store %arg4[%c0_6, %c0_7], %13 {strides = array<i32>} : memref<128x16xbf16, #tpu.memory_space<vmem>>, vector<128x16xbf16>,
    return
  }
  func.func @transform_0(%arg0: i32) -> (i32, i32) {
    %c0_i32 = arith.constant 0 : i32
    %c0_i32_0 = arith.constant 0 : i32
    return %arg0, %c0_i32 : i32, i32
  }
  func.func @transform_1(%arg0: i32) -> (i32, i32) {
    %c0_i32 = arith.constant 0 : i32
    %c0_i32_0 = arith.constant 0 : i32
    %c0_i32_1 = arith.constant 0 : i32
    return %c0_i32, %c0_i32_0 : i32, i32
  }
  func.func @transform_2(%arg0: i32) -> (i32, i32) {
    %c0_i32 = arith.constant 0 : i32
    %c0_i32_0 = arith.constant 0 : i32
    %c0_i32_1 = arith.constant 0 : i32
    return %c0_i32, %c0_i32_0 : i32, i32
  }
  func.func @transform_3(%arg0: i32) -> (i32, i32) {
    %c0_i32 = arith.constant 0 : i32
    %c0_i32_0 = arith.constant 0 : i32
    return %arg0, %c0_i32 : i32, i32
  }
}

module attributes {stable_mosaic.version = 11 : i64} {
  func.func @_conv_kernel(%arg0: i32, %arg1: memref<1x8x8x16xbf16, #tpu.memory_space<vmem>>, %arg2: memref<1x16x20xbf16, #tpu.memory_space<vmem>>, %arg3: memref<1x20xf32, #tpu.memory_space<vmem>>, %arg4: memref<1x64x20xbf16, #tpu.memory_space<vmem>>, %arg5: memref<1x1x20xf32, #tpu.memory_space<vmem>>, %arg6: memref<1x1x20xf32, #tpu.memory_space<vmem>>) attributes {dimension_semantics = [#tpu.dimension_semantics<parallel>], iteration_bounds = array<i64: 2>, scalar_prefetch = 0 : i64, scratch_operands = 0 : i64, tpu.core_type = #tpu.core_type<tc>, window_params = [{transform_indices = @transform_0, window_bounds = array<i64: 1, 8, 8, 16>}, {pipeline_mode = #tpu.pipeline_mode<synchronous>, transform_indices = @transform_1, window_bounds = array<i64: 1, 16, 20>}, {pipeline_mode = #tpu.pipeline_mode<synchronous>, transform_indices = @transform_2, window_bounds = array<i64: 1, 20>}, {transform_indices = @transform_3, window_bounds = array<i64: 1, 64, 20>}, {transform_indices = @transform_4, window_bounds = array<i64: 1, 1, 20>}, {transform_indices = @transform_5, window_bounds = array<i64: 1, 1, 20>}]} {
    %c0 = arith.constant 0 : index
    %c0_0 = arith.constant 0 : index
    %c0_1 = arith.constant 0 : index
    %c0_2 = arith.constant 0 : index
    %0 = vector.load %arg1[%c0, %c0_0, %c0_1, %c0_2] : memref<1x8x8x16xbf16, #tpu.memory_space<vmem>>, vector<1x8x8x16xbf16>
    %1 = vector.shape_cast %0 : vector<1x8x8x16xbf16> to vector<8x8x16xbf16>
    %cst = arith.constant 0.000000e+00 : f32
    %2 = vector.broadcast %cst : f32 to vector<64x20xf32>
    %3 = vector.shape_cast %1 : vector<8x8x16xbf16> to vector<64x16xbf16>
    %c0_3 = arith.constant 0 : index
    %c0_4 = arith.constant 0 : index
    %c0_5 = arith.constant 0 : index
    %4 = vector.load %arg2[%c0_3, %c0_4, %c0_5] : memref<1x16x20xbf16, #tpu.memory_space<vmem>>, vector<1x16x20xbf16>
    %5 = vector.shape_cast %4 : vector<1x16x20xbf16> to vector<16x20xbf16>
    %cst_6 = arith.constant dense<0.000000e+00> : vector<64x20xf32>
    %6 = tpu.matmul %3, %5, %cst_6 {dimension_numbers = #tpu.dot_dimension_numbers<[1], [0], [0], [1], [0, 0, 1, 1], [], []>} : vector<64x16xbf16>, vector<16x20xbf16>, vector<64x20xf32> -> vector<64x20xf32>
    %7 = arith.addf %2, %6 : vector<64x20xf32>
    %c0_7 = arith.constant 0 : index
    %c0_8 = arith.constant 0 : index
    %8 = vector.load %arg3[%c0_7, %c0_8] : memref<1x20xf32, #tpu.memory_space<vmem>>, vector<1x20xf32>
    %9 = vector.broadcast %8 : vector<1x20xf32> to vector<64x20xf32>
    %10 = arith.addf %7, %9 : vector<64x20xf32>
    %cst_9 = arith.constant dense<0.000000e+00> : vector<20xf32>
    %11 = vector.multi_reduction <add>, %10, %cst_9 [0] : vector<64x20xf32> to vector<20xf32>
    %12 = vector.shape_cast %11 : vector<20xf32> to vector<1x20xf32>
    %c0_10 = arith.constant 0 : index
    %c0_11 = arith.constant 0 : index
    %c0_12 = arith.constant 0 : index
    %13 = vector.load %arg5[%c0_10, %c0_11, %c0_12] : memref<1x1x20xf32, #tpu.memory_space<vmem>>, vector<1x1x20xf32>
    %14 = vector.shape_cast %13 : vector<1x1x20xf32> to vector<1x20xf32>
    %15 = vector.shape_cast %12 : vector<1x20xf32> to vector<1x1x20xf32>
    tpu.vector_store %arg5[%c0_10, %c0_11, %c0_12], %15 {strides = array<i32>} : memref<1x1x20xf32, #tpu.memory_space<vmem>>, vector<1x1x20xf32>,
    %16 = arith.mulf %10, %10 : vector<64x20xf32>
    %cst_13 = arith.constant dense<0.000000e+00> : vector<20xf32>
    %17 = vector.multi_reduction <add>, %16, %cst_13 [0] : vector<64x20xf32> to vector<20xf32>
    %18 = vector.shape_cast %17 : vector<20xf32> to vector<1x20xf32>
    %c0_14 = arith.constant 0 : index
    %c0_15 = arith.constant 0 : index
    %c0_16 = arith.constant 0 : index
    %19 = vector.load %arg6[%c0_14, %c0_15, %c0_16] : memref<1x1x20xf32, #tpu.memory_space<vmem>>, vector<1x1x20xf32>
    %20 = vector.shape_cast %19 : vector<1x1x20xf32> to vector<1x20xf32>
    %21 = vector.shape_cast %18 : vector<1x20xf32> to vector<1x1x20xf32>
    tpu.vector_store %arg6[%c0_14, %c0_15, %c0_16], %21 {strides = array<i32>} : memref<1x1x20xf32, #tpu.memory_space<vmem>>, vector<1x1x20xf32>,
    %22 = arith.truncf %10 : vector<64x20xf32> to vector<64x20xbf16>
    %c0_17 = arith.constant 0 : index
    %c0_18 = arith.constant 0 : index
    %c0_19 = arith.constant 0 : index
    %23 = vector.load %arg4[%c0_17, %c0_18, %c0_19] : memref<1x64x20xbf16, #tpu.memory_space<vmem>>, vector<1x64x20xbf16>
    %24 = vector.shape_cast %23 : vector<1x64x20xbf16> to vector<64x20xbf16>
    %25 = vector.shape_cast %22 : vector<64x20xbf16> to vector<1x64x20xbf16>
    tpu.vector_store %arg4[%c0_17, %c0_18, %c0_19], %25 {strides = array<i32>} : memref<1x64x20xbf16, #tpu.memory_space<vmem>>, vector<1x64x20xbf16>,
    return
  }
  func.func @transform_0(%arg0: i32) -> (i32, i32, i32, i32) {
    %c0_i32 = arith.constant 0 : i32
    %c0_i32_0 = arith.constant 0 : i32
    %c0_i32_1 = arith.constant 0 : i32
    %c0_i32_2 = arith.constant 0 : i32
    return %arg0, %c0_i32, %c0_i32_0, %c0_i32_1 : i32, i32, i32, i32
  }
  func.func @transform_1(%arg0: i32) -> (i32, i32, i32) {
    %c0_i32 = arith.constant 0 : i32
    %c0_i32_0 = arith.constant 0 : i32
    %c0_i32_1 = arith.constant 0 : i32
    %c0_i32_2 = arith.constant 0 : i32
    return %c0_i32, %c0_i32_0, %c0_i32_1 : i32, i32, i32
  }
  func.func @transform_2(%arg0: i32) -> (i32, i32) {
    %c0_i32 = arith.constant 0 : i32
    %c0_i32_0 = arith.constant 0 : i32
    %c0_i32_1 = arith.constant 0 : i32
    return %c0_i32, %c0_i32_0 : i32, i32
  }
  func.func @transform_3(%arg0: i32) -> (i32, i32, i32) {
    %c0_i32 = arith.constant 0 : i32
    %c0_i32_0 = arith.constant 0 : i32
    %c0_i32_1 = arith.constant 0 : i32
    return %arg0, %c0_i32, %c0_i32_0 : i32, i32, i32
  }
  func.func @transform_4(%arg0: i32) -> (i32, i32, i32) {
    %c0_i32 = arith.constant 0 : i32
    %c0_i32_0 = arith.constant 0 : i32
    %c0_i32_1 = arith.constant 0 : i32
    return %arg0, %c0_i32, %c0_i32_0 : i32, i32, i32
  }
  func.func @transform_5(%arg0: i32) -> (i32, i32, i32) {
    %c0_i32 = arith.constant 0 : i32
    %c0_i32_0 = arith.constant 0 : i32
    %c0_i32_1 = arith.constant 0 : i32
    return %arg0, %c0_i32, %c0_i32_0 : i32, i32, i32
  }
}

module attributes {stable_mosaic.version = 11 : i64} {
  func.func @_attn_kernel(%arg0: i32, %arg1: i32, %arg2: memref<1x1xf32, #tpu.memory_space<smem>>, %arg3: memref<1x64x2xbf16, #tpu.memory_space<vmem>>, %arg4: memref<1x64x2xbf16, #tpu.memory_space<vmem>>, %arg5: memref<1x64x16xbf16, #tpu.memory_space<vmem>>, %arg6: memref<1x64x16xbf16, #tpu.memory_space<vmem>>, %arg7: memref<1x64x16xbf16, #tpu.memory_space<vmem>>) attributes {dimension_semantics = [#tpu.dimension_semantics<parallel>, #tpu.dimension_semantics<parallel>], iteration_bounds = array<i64: 2, 1>, scalar_prefetch = 0 : i64, scratch_operands = 0 : i64, tpu.core_type = #tpu.core_type<tc>, window_params = [{transform_indices = @transform_0, window_bounds = array<i64: 1, 1>}, {transform_indices = @transform_1, window_bounds = array<i64: 1, 64, 2>}, {transform_indices = @transform_2, window_bounds = array<i64: 1, 64, 2>}, {transform_indices = @transform_3, window_bounds = array<i64: 1, 64, 16>}, {transform_indices = @transform_4, window_bounds = array<i64: 1, 64, 16>}, {transform_indices = @transform_5, window_bounds = array<i64: 1, 64, 16>}]} {
    %c0 = arith.constant 0 : index
    %c0_0 = arith.constant 0 : index
    %c0_1 = arith.constant 0 : index
    %0 = vector.load %arg3[%c0, %c0_0, %c0_1] : memref<1x64x2xbf16, #tpu.memory_space<vmem>>, vector<1x64x2xbf16>
    %1 = vector.shape_cast %0 : vector<1x64x2xbf16> to vector<64x2xbf16>
    %c0_2 = arith.constant 0 : index
    %c0_3 = arith.constant 0 : index
    %c0_4 = arith.constant 0 : index
    %2 = vector.load %arg4[%c0_2, %c0_3, %c0_4] : memref<1x64x2xbf16, #tpu.memory_space<vmem>>, vector<1x64x2xbf16>
    %3 = vector.shape_cast %2 : vector<1x64x2xbf16> to vector<64x2xbf16>
    %c0_5 = arith.constant 0 : index
    %c0_6 = arith.constant 0 : index
    %c0_7 = arith.constant 0 : index
    %4 = vector.load %arg5[%c0_5, %c0_6, %c0_7] : memref<1x64x16xbf16, #tpu.memory_space<vmem>>, vector<1x64x16xbf16>
    %5 = vector.shape_cast %4 : vector<1x64x16xbf16> to vector<64x16xbf16>
    %cst = arith.constant dense<0.000000e+00> : vector<64x64xf32>
    %6 = tpu.matmul %1, %3, %cst {dimension_numbers = #tpu.dot_dimension_numbers<[1], [1], [0], [0], [0, 0, 1, 0], [], []>} : vector<64x2xbf16>, vector<64x2xbf16>, vector<64x64xf32> -> vector<64x64xf32>
    %cst_8 = arith.constant dense<0xFF800000> : vector<64xf32>
    %7 = vector.multi_reduction <maximumf>, %6, %cst_8 [1] : vector<64x64xf32> to vector<64xf32>
    %8 = vector.shape_cast %7 : vector<64xf32> to vector<64x1xf32>
    %9 = vector.broadcast %8 : vector<64x1xf32> to vector<64x64xf32>
    %10 = arith.subf %6, %9 : vector<64x64xf32>
    %11 = math.exp %10 : vector<64x64xf32>
    %cst_9 = arith.constant dense<0.000000e+00> : vector<64xf32>
    %12 = vector.multi_reduction <add>, %11, %cst_9 [1] : vector<64x64xf32> to vector<64xf32>
    %13 = vector.shape_cast %12 : vector<64xf32> to vector<64x1xf32>
    %14 = tpu.reciprocal %13 {approx = true} : vector<64x1xf32> -> vector<64x1xf32>
    %15 = vector.broadcast %14 : vector<64x1xf32> to vector<64x64xf32>
    %16 = arith.mulf %11, %15 : vector<64x64xf32>
    %17 = arith.truncf %16 : vector<64x64xf32> to vector<64x64xbf16>
    %cst_10 = arith.constant dense<0.000000e+00> : vector<64x16xf32>
    %18 = tpu.matmul %17, %5, %cst_10 {dimension_numbers = #tpu.dot_dimension_numbers<[1], [0], [0], [1], [0, 0, 1, 1], [], []>} : vector<64x64xbf16>, vector<64x16xbf16>, vector<64x16xf32> -> vector<64x16xf32>
    %c0_11 = arith.constant 0 : index
    %c0_12 = arith.constant 0 : index
    %19 = memref.load %arg2[%c0_11, %c0_12] : memref<1x1xf32, #tpu.memory_space<smem>>
    %20 = vector.broadcast %19 : f32 to vector<64x16xf32>
    %21 = arith.mulf %20, %18 : vector<64x16xf32>
    %c0_13 = arith.constant 0 : index
    %c0_14 = arith.constant 0 : index
    %c0_15 = arith.constant 0 : index
    %22 = vector.load %arg6[%c0_13, %c0_14, %c0_15] : memref<1x64x16xbf16, #tpu.memory_space<vmem>>, vector<1x64x16xbf16>
    %23 = vector.shape_cast %22 : vector<1x64x16xbf16> to vector<64x16xbf16>
    %24 = arith.extf %23 : vector<64x16xbf16> to vector<64x16xf32>
    %25 = arith.addf %21, %24 : vector<64x16xf32>
    %26 = arith.truncf %25 : vector<64x16xf32> to vector<64x16xbf16>
    %c0_16 = arith.constant 0 : index
    %c0_17 = arith.constant 0 : index
    %c0_18 = arith.constant 0 : index
    %27 = vector.load %arg7[%c0_16, %c0_17, %c0_18] : memref<1x64x16xbf16, #tpu.memory_space<vmem>>, vector<1x64x16xbf16>
    %28 = vector.shape_cast %27 : vector<1x64x16xbf16> to vector<64x16xbf16>
    %29 = vector.shape_cast %26 : vector<64x16xbf16> to vector<1x64x16xbf16>
    tpu.vector_store %arg7[%c0_16, %c0_17, %c0_18], %29 {strides = array<i32>} : memref<1x64x16xbf16, #tpu.memory_space<vmem>>, vector<1x64x16xbf16>,
    return
  }
  func.func @transform_0(%arg0: i32, %arg1: i32) -> (i32, i32) {
    %c0_i32 = arith.constant 0 : i32
    %c0_i32_0 = arith.constant 0 : i32
    %c0_i32_1 = arith.constant 0 : i32
    return %c0_i32, %c0_i32_0 : i32, i32
  }
  func.func @transform_1(%arg0: i32, %arg1: i32) -> (i32, i32, i32) {
    %c0_i32 = arith.constant 0 : i32
    %c0_i32_0 = arith.constant 0 : i32
    return %arg0, %arg1, %c0_i32 : i32, i32, i32
  }
  func.func @transform_2(%arg0: i32, %arg1: i32) -> (i32, i32, i32) {
    %c0_i32 = arith.constant 0 : i32
    %c0_i32_0 = arith.constant 0 : i32
    %c0_i32_1 = arith.constant 0 : i32
    return %arg0, %c0_i32, %c0_i32_0 : i32, i32, i32
  }
  func.func @transform_3(%arg0: i32, %arg1: i32) -> (i32, i32, i32) {
    %c0_i32 = arith.constant 0 : i32
    %c0_i32_0 = arith.constant 0 : i32
    %c0_i32_1 = arith.constant 0 : i32
    return %arg0, %c0_i32, %c0_i32_0 : i32, i32, i32
  }
  func.func @transform_4(%arg0: i32, %arg1: i32) -> (i32, i32, i32) {
    %c0_i32 = arith.constant 0 : i32
    %c0_i32_0 = arith.constant 0 : i32
    return %arg0, %arg1, %c0_i32 : i32, i32, i32
  }
  func.func @transform_5(%arg0: i32, %arg1: i32) -> (i32, i32, i32) {
    %c0_i32 = arith.constant 0 : i32
    %c0_i32_0 = arith.constant 0 : i32
    return %arg0, %arg1, %c0_i32 : i32, i32, i32
  }
}

module attributes {stable_mosaic.version = 11 : i64} {
  func.func @_conv_kernel(%arg0: i32, %arg1: memref<1x10x10x16xbf16, #tpu.memory_space<vmem>>, %arg2: memref<9x16x16xbf16, #tpu.memory_space<vmem>>, %arg3: memref<1x16xf32, #tpu.memory_space<vmem>>, %arg4: memref<1x64x16xbf16, #tpu.memory_space<vmem>>, %arg5: memref<1x1x16xf32, #tpu.memory_space<vmem>>, %arg6: memref<1x1x16xf32, #tpu.memory_space<vmem>>) attributes {dimension_semantics = [#tpu.dimension_semantics<parallel>], iteration_bounds = array<i64: 2>, scalar_prefetch = 0 : i64, scratch_operands = 0 : i64, tpu.core_type = #tpu.core_type<tc>, window_params = [{transform_indices = @transform_0, window_bounds = array<i64: 1, 10, 10, 16>}, {pipeline_mode = #tpu.pipeline_mode<synchronous>, transform_indices = @transform_1, window_bounds = array<i64: 9, 16, 16>}, {pipeline_mode = #tpu.pipeline_mode<synchronous>, transform_indices = @transform_2, window_bounds = array<i64: 1, 16>}, {transform_indices = @transform_3, window_bounds = array<i64: 1, 64, 16>}, {transform_indices = @transform_4, window_bounds = array<i64: 1, 1, 16>}, {transform_indices = @transform_5, window_bounds = array<i64: 1, 1, 16>}]} {
    %c0 = arith.constant 0 : index
    %c0_0 = arith.constant 0 : index
    %c0_1 = arith.constant 0 : index
    %c0_2 = arith.constant 0 : index
    %0 = vector.load %arg1[%c0, %c0_0, %c0_1, %c0_2] : memref<1x10x10x16xbf16, #tpu.memory_space<vmem>>, vector<1x10x10x16xbf16>
    %1 = vector.shape_cast %0 : vector<1x10x10x16xbf16> to vector<10x10x16xbf16>
    %cst = arith.constant 0.000000e+00 : f32
    %2 = vector.broadcast %cst : f32 to vector<64x16xf32>
    %3 = vector.extract_strided_slice %1 {offsets = [0, 0, 0], sizes = [8, 8, 16], strides = [1, 1, 1]} : vector<10x10x16xbf16> to vector<8x8x16xbf16>
    %4 = vector.shape_cast %3 : vector<8x8x16xbf16> to vector<64x16xbf16>
    %c0_3 = arith.constant 0 : index
    %c0_4 = arith.constant 0 : index
    %c0_5 = arith.constant 0 : index
    %5 = vector.load %arg2[%c0_3, %c0_4, %c0_5] : memref<9x16x16xbf16, #tpu.memory_space<vmem>>, vector<1x16x16xbf16>
    %6 = vector.shape_cast %5 : vector<1x16x16xbf16> to vector<16x16xbf16>
    %cst_6 = arith.constant dense<0.000000e+00> : vector<64x16xf32>
    %7 = tpu.matmul %4, %6, %cst_6 {dimension_numbers = #tpu.dot_dimension_numbers<[1], [0], [0], [1], [0, 0, 1, 1], [], []>} : vector<64x16xbf16>, vector<16x16xbf16>, vector<64x16xf32> -> vector<64x16xf32>
    %8 = arith.addf %2, %7 : vector<64x16xf32>
    %9 = vector.extract_strided_slice %1 {offsets = [0, 1, 0], sizes = [8, 8, 16], strides = [1, 1, 1]} : vector<10x10x16xbf16> to vector<8x8x16xbf16>
    %10 = vector.shape_cast %9 : vector<8x8x16xbf16> to vector<64x16xbf16>
    %c1 = arith.constant 1 : index
    %c0_7 = arith.constant 0 : index
    %c0_8 = arith.constant 0 : index
    %11 = vector.load %arg2[%c1, %c0_7, %c0_8] : memref<9x16x16xbf16, #tpu.memory_space<vmem>>, vector<1x16x16xbf16>
    %12 = vector.shape_cast %11 : vector<1x16x16xbf16> to vector<16x16xbf16>
    %cst_9 = arith.constant dense<0.000000e+00> : vector<64x16xf32>
    %13 = tpu.matmul %10, %12, %cst_9 {dimension_numbers = #tpu.dot_dimension_numbers<[1], [0], [0], [1], [0, 0, 1, 1], [], []>} : vector<64x16xbf16>, vector<16x16xbf16>, vector<64x16xf32> -> vector<64x16xf32>
    %14 = arith.addf %8, %13 : vector<64x16xf32>
    %15 = vector.extract_strided_slice %1 {offsets = [0, 2, 0], sizes = [8, 8, 16], strides = [1, 1, 1]} : vector<10x10x16xbf16> to vector<8x8x16xbf16>
    %16 = vector.shape_cast %15 : vector<8x8x16xbf16> to vector<64x16xbf16>
    %c2 = arith.constant 2 : index
    %c0_10 = arith.constant 0 : index
    %c0_11 = arith.constant 0 : index
    %17 = vector.load %arg2[%c2, %c0_10, %c0_11] : memref<9x16x16xbf16, #tpu.memory_space<vmem>>, vector<1x16x16xbf16>
    %18 = vector.shape_cast %17 : vector<1x16x16xbf16> to vector<16x16xbf16>
    %cst_12 = arith.constant dense<0.000000e+00> : vector<64x16xf32>
    %19 = tpu.matmul %16, %18, %cst_12 {dimension_numbers = #tpu.dot_dimension_numbers<[1], [0], [0], [1], [0, 0, 1, 1], [], []>} : vector<64x16xbf16>, vector<16x16xbf16>, vector<64x16xf32> -> vector<64x16xf32>
    %20 = arith.addf %14, %19 : vector<64x16xf32>
    %21 = vector.extract_strided_slice %1 {offsets = [1, 0, 0], sizes = [8, 8, 16], strides = [1, 1, 1]} : vector<10x10x16xbf16> to vector<8x8x16xbf16>
    %22 = vector.shape_cast %21 : vector<8x8x16xbf16> to vector<64x16xbf16>
    %c3 = arith.constant 3 : index
    %c0_13 = arith.constant 0 : index
    %c0_14 = arith.constant 0 : index
    %23 = vector.load %arg2[%c3, %c0_13, %c0_14] : memref<9x16x16xbf16, #tpu.memory_space<vmem>>, vector<1x16x16xbf16>
    %24 = vector.shape_cast %23 : vector<1x16x16xbf16> to vector<16x16xbf16>
    %cst_15 = arith.constant dense<0.000000e+00> : vector<64x16xf32>
    %25 = tpu.matmul %22, %24, %cst_15 {dimension_numbers = #tpu.dot_dimension_numbers<[1], [0], [0], [1], [0, 0, 1, 1], [], []>} : vector<64x16xbf16>, vector<16x16xbf16>, vector<64x16xf32> -> vector<64x16xf32>
    %26 = arith.addf %20, %25 : vector<64x16xf32>
    %27 = vector.extract_strided_slice %1 {offsets = [1, 1, 0], sizes = [8, 8, 16], strides = [1, 1, 1]} : vector<10x10x16xbf16> to vector<8x8x16xbf16>
    %28 = vector.shape_cast %27 : vector<8x8x16xbf16> to vector<64x16xbf16>
    %c4 = arith.constant 4 : index
    %c0_16 = arith.constant 0 : index
    %c0_17 = arith.constant 0 : index
    %29 = vector.load %arg2[%c4, %c0_16, %c0_17] : memref<9x16x16xbf16, #tpu.memory_space<vmem>>, vector<1x16x16xbf16>
    %30 = vector.shape_cast %29 : vector<1x16x16xbf16> to vector<16x16xbf16>
    %cst_18 = arith.constant dense<0.000000e+00> : vector<64x16xf32>
    %31 = tpu.matmul %28, %30, %cst_18 {dimension_numbers = #tpu.dot_dimension_numbers<[1], [0], [0], [1], [0, 0, 1, 1], [], []>} : vector<64x16xbf16>, vector<16x16xbf16>, vector<64x16xf32> -> vector<64x16xf32>
    %32 = arith.addf %26, %31 : vector<64x16xf32>
    %33 = vector.extract_strided_slice %1 {offsets = [1, 2, 0], sizes = [8, 8, 16], strides = [1, 1, 1]} : vector<10x10x16xbf16> to vector<8x8x16xbf16>
    %34 = vector.shape_cast %33 : vector<8x8x16xbf16> to vector<64x16xbf16>
    %c5 = arith.constant 5 : index
    %c0_19 = arith.constant 0 : index
    %c0_20 = arith.constant 0 : index
    %35 = vector.load %arg2[%c5, %c0_19, %c0_20] : memref<9x16x16xbf16, #tpu.memory_space<vmem>>, vector<1x16x16xbf16>
    %36 = vector.shape_cast %35 : vector<1x16x16xbf16> to vector<16x16xbf16>
    %cst_21 = arith.constant dense<0.000000e+00> : vector<64x16xf32>
    %37 = tpu.matmul %34, %36, %cst_21 {dimension_numbers = #tpu.dot_dimension_numbers<[1], [0], [0], [1], [0, 0, 1, 1], [], []>} : vector<64x16xbf16>, vector<16x16xbf16>, vector<64x16xf32> -> vector<64x16xf32>
    %38 = arith.addf %32, %37 : vector<64x16xf32>
    %39 = vector.extract_strided_slice %1 {offsets = [2, 0, 0], sizes = [8, 8, 16], strides = [1, 1, 1]} : vector<10x10x16xbf16> to vector<8x8x16xbf16>
    %40 = vector.shape_cast %39 : vector<8x8x16xbf16> to vector<64x16xbf16>
    %c6 = arith.constant 6 : index
    %c0_22 = arith.constant 0 : index
    %c0_23 = arith.constant 0 : index
    %41 = vector.load %arg2[%c6, %c0_22, %c0_23] : memref<9x16x16xbf16, #tpu.memory_space<vmem>>, vector<1x16x16xbf16>
    %42 = vector.shape_cast %41 : vector<1x16x16xbf16> to vector<16x16xbf16>
    %cst_24 = arith.constant dense<0.000000e+00> : vector<64x16xf32>
    %43 = tpu.matmul %40, %42, %cst_24 {dimension_numbers = #tpu.dot_dimension_numbers<[1], [0], [0], [1], [0, 0, 1, 1], [], []>} : vector<64x16xbf16>, vector<16x16xbf16>, vector<64x16xf32> -> vector<64x16xf32>
    %44 = arith.addf %38, %43 : vector<64x16xf32>
    %45 = vector.extract_strided_slice %1 {offsets = [2, 1, 0], sizes = [8, 8, 16], strides = [1, 1, 1]} : vector<10x10x16xbf16> to vector<8x8x16xbf16>
    %46 = vector.shape_cast %45 : vector<8x8x16xbf16> to vector<64x16xbf16>
    %c7 = arith.constant 7 : index
    %c0_25 = arith.constant 0 : index
    %c0_26 = arith.constant 0 : index
    %47 = vector.load %arg2[%c7, %c0_25, %c0_26] : memref<9x16x16xbf16, #tpu.memory_space<vmem>>, vector<1x16x16xbf16>
    %48 = vector.shape_cast %47 : vector<1x16x16xbf16> to vector<16x16xbf16>
    %cst_27 = arith.constant dense<0.000000e+00> : vector<64x16xf32>
    %49 = tpu.matmul %46, %48, %cst_27 {dimension_numbers = #tpu.dot_dimension_numbers<[1], [0], [0], [1], [0, 0, 1, 1], [], []>} : vector<64x16xbf16>, vector<16x16xbf16>, vector<64x16xf32> -> vector<64x16xf32>
    %50 = arith.addf %44, %49 : vector<64x16xf32>
    %51 = vector.extract_strided_slice %1 {offsets = [2, 2, 0], sizes = [8, 8, 16], strides = [1, 1, 1]} : vector<10x10x16xbf16> to vector<8x8x16xbf16>
    %52 = vector.shape_cast %51 : vector<8x8x16xbf16> to vector<64x16xbf16>
    %c8 = arith.constant 8 : index
    %c0_28 = arith.constant 0 : index
    %c0_29 = arith.constant 0 : index
    %53 = vector.load %arg2[%c8, %c0_28, %c0_29] : memref<9x16x16xbf16, #tpu.memory_space<vmem>>, vector<1x16x16xbf16>
    %54 = vector.shape_cast %53 : vector<1x16x16xbf16> to vector<16x16xbf16>
    %cst_30 = arith.constant dense<0.000000e+00> : vector<64x16xf32>
    %55 = tpu.matmul %52, %54, %cst_30 {dimension_numbers = #tpu.dot_dimension_numbers<[1], [0], [0], [1], [0, 0, 1, 1], [], []>} : vector<64x16xbf16>, vector<16x16xbf16>, vector<64x16xf32> -> vector<64x16xf32>
    %56 = arith.addf %50, %55 : vector<64x16xf32>
    %c0_31 = arith.constant 0 : index
    %c0_32 = arith.constant 0 : index
    %57 = vector.load %arg3[%c0_31, %c0_32] : memref<1x16xf32, #tpu.memory_space<vmem>>, vector<1x16xf32>
    %58 = vector.broadcast %57 : vector<1x16xf32> to vector<64x16xf32>
    %59 = arith.addf %56, %58 : vector<64x16xf32>
    %cst_33 = arith.constant dense<0.000000e+00> : vector<16xf32>
    %60 = vector.multi_reduction <add>, %59, %cst_33 [0] : vector<64x16xf32> to vector<16xf32>
    %61 = vector.shape_cast %60 : vector<16xf32> to vector<1x16xf32>
    %c0_34 = arith.constant 0 : index
    %c0_35 = arith.constant 0 : index
    %c0_36 = arith.constant 0 : index
    %62 = vector.load %arg5[%c0_34, %c0_35, %c0_36] : memref<1x1x16xf32, #tpu.memory_space<vmem>>, vector<1x1x16xf32>
    %63 = vector.shape_cast %62 : vector<1x1x16xf32> to vector<1x16xf32>
    %64 = vector.shape_cast %61 : vector<1x16xf32> to vector<1x1x16xf32>
    tpu.vector_store %arg5[%c0_34, %c0_35, %c0_36], %64 {strides = array<i32>} : memref<1x1x16xf32, #tpu.memory_space<vmem>>, vector<1x1x16xf32>,
    %65 = arith.mulf %59, %59 : vector<64x16xf32>
    %cst_37 = arith.constant dense<0.000000e+00> : vector<16xf32>
    %66 = vector.multi_reduction <add>, %65, %cst_37 [0] : vector<64x16xf32> to vector<16xf32>
    %67 = vector.shape_cast %66 : vector<16xf32> to vector<1x16xf32>
    %c0_38 = arith.constant 0 : index
    %c0_39 = arith.constant 0 : index
    %c0_40 = arith.constant 0 : index
    %68 = vector.load %arg6[%c0_38, %c0_39, %c0_40] : memref<1x1x16xf32, #tpu.memory_space<vmem>>, vector<1x1x16xf32>
    %69 = vector.shape_cast %68 : vector<1x1x16xf32> to vector<1x16xf32>
    %70 = vector.shape_cast %67 : vector<1x16xf32> to vector<1x1x16xf32>
    tpu.vector_store %arg6[%c0_38, %c0_39, %c0_40], %70 {strides = array<i32>} : memref<1x1x16xf32, #tpu.memory_space<vmem>>, vector<1x1x16xf32>,
    %71 = arith.truncf %59 : vector<64x16xf32> to vector<64x16xbf16>
    %c0_41 = arith.constant 0 : index
    %c0_42 = arith.constant 0 : index
    %c0_43 = arith.constant 0 : index
    %72 = vector.load %arg4[%c0_41, %c0_42, %c0_43] : memref<1x64x16xbf16, #tpu.memory_space<vmem>>, vector<1x64x16xbf16>
    %73 = vector.shape_cast %72 : vector<1x64x16xbf16> to vector<64x16xbf16>
    %74 = vector.shape_cast %71 : vector<64x16xbf16> to vector<1x64x16xbf16>
    tpu.vector_store %arg4[%c0_41, %c0_42, %c0_43], %74 {strides = array<i32>} : memref<1x64x16xbf16, #tpu.memory_space<vmem>>, vector<1x64x16xbf16>,
    return
  }
  func.func @transform_0(%arg0: i32) -> (i32, i32, i32, i32) {
    %c0_i32 = arith.constant 0 : i32
    %c0_i32_0 = arith.constant 0 : i32
    %c0_i32_1 = arith.constant 0 : i32
    %c0_i32_2 = arith.constant 0 : i32
    return %arg0, %c0_i32, %c0_i32_0, %c0_i32_1 : i32, i32, i32, i32
  }
  func.func @transform_1(%arg0: i32) -> (i32, i32, i32) {
    %c0_i32 = arith.constant 0 : i32
    %c0_i32_0 = arith.constant 0 : i32
    %c0_i32_1 = arith.constant 0 : i32
    %c0_i32_2 = arith.constant 0 : i32
    return %c0_i32, %c0_i32_0, %c0_i32_1 : i32, i32, i32
  }
  func.func @transform_2(%arg0: i32) -> (i32, i32) {
    %c0_i32 = arith.constant 0 : i32
    %c0_i32_0 = arith.constant 0 : i32
    %c0_i32_1 = arith.constant 0 : i32
    return %c0_i32, %c0_i32_0 : i32, i32
  }
  func.func @transform_3(%arg0: i32) -> (i32, i32, i32) {
    %c0_i32 = arith.constant 0 : i32
    %c0_i32_0 = arith.constant 0 : i32
    %c0_i32_1 = arith.constant 0 : i32
    return %arg0, %c0_i32, %c0_i32_0 : i32, i32, i32
  }
  func.func @transform_4(%arg0: i32) -> (i32, i32, i32) {
    %c0_i32 = arith.constant 0 : i32
    %c0_i32_0 = arith.constant 0 : i32
    %c0_i32_1 = arith.constant 0 : i32
    return %arg0, %c0_i32, %c0_i32_0 : i32, i32, i32
  }
  func.func @transform_5(%arg0: i32) -> (i32, i32, i32) {
    %c0_i32 = arith.constant 0 : i32
    %c0_i32_0 = arith.constant 0 : i32
    %c0_i32_1 = arith.constant 0 : i32
    return %arg0, %c0_i32, %c0_i32_0 : i32, i32, i32
  }
}

module attributes {stable_mosaic.version = 11 : i64} {
  func.func @_bn_apply_kernel(%arg0: i32, %arg1: memref<128x16xbf16, #tpu.memory_space<vmem>>, %arg2: memref<1x16xf32, #tpu.memory_space<vmem>>, %arg3: memref<1x16xf32, #tpu.memory_space<vmem>>, %arg4: memref<128x16xbf16, #tpu.memory_space<vmem>>, %arg5: memref<128x16xbf16, #tpu.memory_space<vmem>>) attributes {dimension_semantics = [#tpu.dimension_semantics<parallel>], iteration_bounds = array<i64: 1>, scalar_prefetch = 0 : i64, scratch_operands = 0 : i64, tpu.core_type = #tpu.core_type<tc>, window_params = [{transform_indices = @transform_0, window_bounds = array<i64: 128, 16>}, {pipeline_mode = #tpu.pipeline_mode<synchronous>, transform_indices = @transform_1, window_bounds = array<i64: 1, 16>}, {pipeline_mode = #tpu.pipeline_mode<synchronous>, transform_indices = @transform_2, window_bounds = array<i64: 1, 16>}, {transform_indices = @transform_3, window_bounds = array<i64: 128, 16>}, {transform_indices = @transform_4, window_bounds = array<i64: 128, 16>}]} {
    %c0 = arith.constant 0 : index
    %c0_0 = arith.constant 0 : index
    %0 = vector.load %arg1[%c0, %c0_0] : memref<128x16xbf16, #tpu.memory_space<vmem>>, vector<128x16xbf16>
    %1 = arith.extf %0 : vector<128x16xbf16> to vector<128x16xf32>
    %c0_1 = arith.constant 0 : index
    %c0_2 = arith.constant 0 : index
    %2 = vector.load %arg2[%c0_1, %c0_2] : memref<1x16xf32, #tpu.memory_space<vmem>>, vector<1x16xf32>
    %3 = vector.broadcast %2 : vector<1x16xf32> to vector<128x16xf32>
    %4 = arith.mulf %1, %3 : vector<128x16xf32>
    %c0_3 = arith.constant 0 : index
    %c0_4 = arith.constant 0 : index
    %5 = vector.load %arg3[%c0_3, %c0_4] : memref<1x16xf32, #tpu.memory_space<vmem>>, vector<1x16xf32>
    %6 = vector.broadcast %5 : vector<1x16xf32> to vector<128x16xf32>
    %7 = arith.addf %4, %6 : vector<128x16xf32>
    %c0_5 = arith.constant 0 : index
    %c0_6 = arith.constant 0 : index
    %8 = vector.load %arg4[%c0_5, %c0_6] : memref<128x16xbf16, #tpu.memory_space<vmem>>, vector<128x16xbf16>
    %9 = arith.extf %8 : vector<128x16xbf16> to vector<128x16xf32>
    %10 = arith.addf %7, %9 : vector<128x16xf32>
    %cst = arith.constant 0.000000e+00 : f32
    %11 = vector.broadcast %cst : f32 to vector<128x16xf32>
    %12 = arith.cmpf oge, %10, %11 : vector<128x16xf32>
    %cst_7 = arith.constant 2.000000e-01 : f32
    %13 = vector.broadcast %cst_7 : f32 to vector<128x16xf32>
    %14 = arith.mulf %13, %10 : vector<128x16xf32>
    %15 = arith.select %12, %10, %14 : vector<128x16xi1>, vector<128x16xf32>
    %16 = arith.truncf %15 : vector<128x16xf32> to vector<128x16xbf16>
    %c0_8 = arith.constant 0 : index
    %c0_9 = arith.constant 0 : index
    %17 = vector.load %arg5[%c0_8, %c0_9] : memref<128x16xbf16, #tpu.memory_space<vmem>>, vector<128x16xbf16>
    tpu.vector_store %arg5[%c0_8, %c0_9], %16 {strides = array<i32>} : memref<128x16xbf16, #tpu.memory_space<vmem>>, vector<128x16xbf16>,
    return
  }
  func.func @transform_0(%arg0: i32) -> (i32, i32) {
    %c0_i32 = arith.constant 0 : i32
    %c0_i32_0 = arith.constant 0 : i32
    return %arg0, %c0_i32 : i32, i32
  }
  func.func @transform_1(%arg0: i32) -> (i32, i32) {
    %c0_i32 = arith.constant 0 : i32
    %c0_i32_0 = arith.constant 0 : i32
    %c0_i32_1 = arith.constant 0 : i32
    return %c0_i32, %c0_i32_0 : i32, i32
  }
  func.func @transform_2(%arg0: i32) -> (i32, i32) {
    %c0_i32 = arith.constant 0 : i32
    %c0_i32_0 = arith.constant 0 : i32
    %c0_i32_1 = arith.constant 0 : i32
    return %c0_i32, %c0_i32_0 : i32, i32
  }
  func.func @transform_3(%arg0: i32) -> (i32, i32) {
    %c0_i32 = arith.constant 0 : i32
    %c0_i32_0 = arith.constant 0 : i32
    return %arg0, %c0_i32 : i32, i32
  }
  func.func @transform_4(%arg0: i32) -> (i32, i32) {
    %c0_i32 = arith.constant 0 : i32
    %c0_i32_0 = arith.constant 0 : i32
    return %arg0, %c0_i32 : i32, i32
  }
}

module attributes {stable_mosaic.version = 11 : i64} {
  func.func @_conv_kernel(%arg0: i32, %arg1: memref<1x10x10x16xbf16, #tpu.memory_space<vmem>>, %arg2: memref<9x16x32xbf16, #tpu.memory_space<vmem>>, %arg3: memref<1x32xf32, #tpu.memory_space<vmem>>, %arg4: memref<1x64x32xbf16, #tpu.memory_space<vmem>>, %arg5: memref<1x1x32xf32, #tpu.memory_space<vmem>>, %arg6: memref<1x1x32xf32, #tpu.memory_space<vmem>>) attributes {dimension_semantics = [#tpu.dimension_semantics<parallel>], iteration_bounds = array<i64: 2>, scalar_prefetch = 0 : i64, scratch_operands = 0 : i64, tpu.core_type = #tpu.core_type<tc>, window_params = [{transform_indices = @transform_0, window_bounds = array<i64: 1, 10, 10, 16>}, {pipeline_mode = #tpu.pipeline_mode<synchronous>, transform_indices = @transform_1, window_bounds = array<i64: 9, 16, 32>}, {pipeline_mode = #tpu.pipeline_mode<synchronous>, transform_indices = @transform_2, window_bounds = array<i64: 1, 32>}, {transform_indices = @transform_3, window_bounds = array<i64: 1, 64, 32>}, {transform_indices = @transform_4, window_bounds = array<i64: 1, 1, 32>}, {transform_indices = @transform_5, window_bounds = array<i64: 1, 1, 32>}]} {
    %c0 = arith.constant 0 : index
    %c0_0 = arith.constant 0 : index
    %c0_1 = arith.constant 0 : index
    %c0_2 = arith.constant 0 : index
    %0 = vector.load %arg1[%c0, %c0_0, %c0_1, %c0_2] : memref<1x10x10x16xbf16, #tpu.memory_space<vmem>>, vector<1x10x10x16xbf16>
    %1 = vector.shape_cast %0 : vector<1x10x10x16xbf16> to vector<10x10x16xbf16>
    %cst = arith.constant 0.000000e+00 : f32
    %2 = vector.broadcast %cst : f32 to vector<64x32xf32>
    %3 = vector.extract_strided_slice %1 {offsets = [0, 0, 0], sizes = [8, 8, 16], strides = [1, 1, 1]} : vector<10x10x16xbf16> to vector<8x8x16xbf16>
    %4 = vector.shape_cast %3 : vector<8x8x16xbf16> to vector<64x16xbf16>
    %c0_3 = arith.constant 0 : index
    %c0_4 = arith.constant 0 : index
    %c0_5 = arith.constant 0 : index
    %5 = vector.load %arg2[%c0_3, %c0_4, %c0_5] : memref<9x16x32xbf16, #tpu.memory_space<vmem>>, vector<1x16x32xbf16>
    %6 = vector.shape_cast %5 : vector<1x16x32xbf16> to vector<16x32xbf16>
    %cst_6 = arith.constant dense<0.000000e+00> : vector<64x32xf32>
    %7 = tpu.matmul %4, %6, %cst_6 {dimension_numbers = #tpu.dot_dimension_numbers<[1], [0], [0], [1], [0, 0, 1, 1], [], []>} : vector<64x16xbf16>, vector<16x32xbf16>, vector<64x32xf32> -> vector<64x32xf32>
    %8 = arith.addf %2, %7 : vector<64x32xf32>
    %9 = vector.extract_strided_slice %1 {offsets = [0, 1, 0], sizes = [8, 8, 16], strides = [1, 1, 1]} : vector<10x10x16xbf16> to vector<8x8x16xbf16>
    %10 = vector.shape_cast %9 : vector<8x8x16xbf16> to vector<64x16xbf16>
    %c1 = arith.constant 1 : index
    %c0_7 = arith.constant 0 : index
    %c0_8 = arith.constant 0 : index
    %11 = vector.load %arg2[%c1, %c0_7, %c0_8] : memref<9x16x32xbf16, #tpu.memory_space<vmem>>, vector<1x16x32xbf16>
    %12 = vector.shape_cast %11 : vector<1x16x32xbf16> to vector<16x32xbf16>
    %cst_9 = arith.constant dense<0.000000e+00> : vector<64x32xf32>
    %13 = tpu.matmul %10, %12, %cst_9 {dimension_numbers = #tpu.dot_dimension_numbers<[1], [0], [0], [1], [0, 0, 1, 1], [], []>} : vector<64x16xbf16>, vector<16x32xbf16>, vector<64x32xf32> -> vector<64x32xf32>
    %14 = arith.addf %8, %13 : vector<64x32xf32>
    %15 = vector.extract_strided_slice %1 {offsets = [0, 2, 0], sizes = [8, 8, 16], strides = [1, 1, 1]} : vector<10x10x16xbf16> to vector<8x8x16xbf16>
    %16 = vector.shape_cast %15 : vector<8x8x16xbf16> to vector<64x16xbf16>
    %c2 = arith.constant 2 : index
    %c0_10 = arith.constant 0 : index
    %c0_11 = arith.constant 0 : index
    %17 = vector.load %arg2[%c2, %c0_10, %c0_11] : memref<9x16x32xbf16, #tpu.memory_space<vmem>>, vector<1x16x32xbf16>
    %18 = vector.shape_cast %17 : vector<1x16x32xbf16> to vector<16x32xbf16>
    %cst_12 = arith.constant dense<0.000000e+00> : vector<64x32xf32>
    %19 = tpu.matmul %16, %18, %cst_12 {dimension_numbers = #tpu.dot_dimension_numbers<[1], [0], [0], [1], [0, 0, 1, 1], [], []>} : vector<64x16xbf16>, vector<16x32xbf16>, vector<64x32xf32> -> vector<64x32xf32>
    %20 = arith.addf %14, %19 : vector<64x32xf32>
    %21 = vector.extract_strided_slice %1 {offsets = [1, 0, 0], sizes = [8, 8, 16], strides = [1, 1, 1]} : vector<10x10x16xbf16> to vector<8x8x16xbf16>
    %22 = vector.shape_cast %21 : vector<8x8x16xbf16> to vector<64x16xbf16>
    %c3 = arith.constant 3 : index
    %c0_13 = arith.constant 0 : index
    %c0_14 = arith.constant 0 : index
    %23 = vector.load %arg2[%c3, %c0_13, %c0_14] : memref<9x16x32xbf16, #tpu.memory_space<vmem>>, vector<1x16x32xbf16>
    %24 = vector.shape_cast %23 : vector<1x16x32xbf16> to vector<16x32xbf16>
    %cst_15 = arith.constant dense<0.000000e+00> : vector<64x32xf32>
    %25 = tpu.matmul %22, %24, %cst_15 {dimension_numbers = #tpu.dot_dimension_numbers<[1], [0], [0], [1], [0, 0, 1, 1], [], []>} : vector<64x16xbf16>, vector<16x32xbf16>, vector<64x32xf32> -> vector<64x32xf32>
    %26 = arith.addf %20, %25 : vector<64x32xf32>
    %27 = vector.extract_strided_slice %1 {offsets = [1, 1, 0], sizes = [8, 8, 16], strides = [1, 1, 1]} : vector<10x10x16xbf16> to vector<8x8x16xbf16>
    %28 = vector.shape_cast %27 : vector<8x8x16xbf16> to vector<64x16xbf16>
    %c4 = arith.constant 4 : index
    %c0_16 = arith.constant 0 : index
    %c0_17 = arith.constant 0 : index
    %29 = vector.load %arg2[%c4, %c0_16, %c0_17] : memref<9x16x32xbf16, #tpu.memory_space<vmem>>, vector<1x16x32xbf16>
    %30 = vector.shape_cast %29 : vector<1x16x32xbf16> to vector<16x32xbf16>
    %cst_18 = arith.constant dense<0.000000e+00> : vector<64x32xf32>
    %31 = tpu.matmul %28, %30, %cst_18 {dimension_numbers = #tpu.dot_dimension_numbers<[1], [0], [0], [1], [0, 0, 1, 1], [], []>} : vector<64x16xbf16>, vector<16x32xbf16>, vector<64x32xf32> -> vector<64x32xf32>
    %32 = arith.addf %26, %31 : vector<64x32xf32>
    %33 = vector.extract_strided_slice %1 {offsets = [1, 2, 0], sizes = [8, 8, 16], strides = [1, 1, 1]} : vector<10x10x16xbf16> to vector<8x8x16xbf16>
    %34 = vector.shape_cast %33 : vector<8x8x16xbf16> to vector<64x16xbf16>
    %c5 = arith.constant 5 : index
    %c0_19 = arith.constant 0 : index
    %c0_20 = arith.constant 0 : index
    %35 = vector.load %arg2[%c5, %c0_19, %c0_20] : memref<9x16x32xbf16, #tpu.memory_space<vmem>>, vector<1x16x32xbf16>
    %36 = vector.shape_cast %35 : vector<1x16x32xbf16> to vector<16x32xbf16>
    %cst_21 = arith.constant dense<0.000000e+00> : vector<64x32xf32>
    %37 = tpu.matmul %34, %36, %cst_21 {dimension_numbers = #tpu.dot_dimension_numbers<[1], [0], [0], [1], [0, 0, 1, 1], [], []>} : vector<64x16xbf16>, vector<16x32xbf16>, vector<64x32xf32> -> vector<64x32xf32>
    %38 = arith.addf %32, %37 : vector<64x32xf32>
    %39 = vector.extract_strided_slice %1 {offsets = [2, 0, 0], sizes = [8, 8, 16], strides = [1, 1, 1]} : vector<10x10x16xbf16> to vector<8x8x16xbf16>
    %40 = vector.shape_cast %39 : vector<8x8x16xbf16> to vector<64x16xbf16>
    %c6 = arith.constant 6 : index
    %c0_22 = arith.constant 0 : index
    %c0_23 = arith.constant 0 : index
    %41 = vector.load %arg2[%c6, %c0_22, %c0_23] : memref<9x16x32xbf16, #tpu.memory_space<vmem>>, vector<1x16x32xbf16>
    %42 = vector.shape_cast %41 : vector<1x16x32xbf16> to vector<16x32xbf16>
    %cst_24 = arith.constant dense<0.000000e+00> : vector<64x32xf32>
    %43 = tpu.matmul %40, %42, %cst_24 {dimension_numbers = #tpu.dot_dimension_numbers<[1], [0], [0], [1], [0, 0, 1, 1], [], []>} : vector<64x16xbf16>, vector<16x32xbf16>, vector<64x32xf32> -> vector<64x32xf32>
    %44 = arith.addf %38, %43 : vector<64x32xf32>
    %45 = vector.extract_strided_slice %1 {offsets = [2, 1, 0], sizes = [8, 8, 16], strides = [1, 1, 1]} : vector<10x10x16xbf16> to vector<8x8x16xbf16>
    %46 = vector.shape_cast %45 : vector<8x8x16xbf16> to vector<64x16xbf16>
    %c7 = arith.constant 7 : index
    %c0_25 = arith.constant 0 : index
    %c0_26 = arith.constant 0 : index
    %47 = vector.load %arg2[%c7, %c0_25, %c0_26] : memref<9x16x32xbf16, #tpu.memory_space<vmem>>, vector<1x16x32xbf16>
    %48 = vector.shape_cast %47 : vector<1x16x32xbf16> to vector<16x32xbf16>
    %cst_27 = arith.constant dense<0.000000e+00> : vector<64x32xf32>
    %49 = tpu.matmul %46, %48, %cst_27 {dimension_numbers = #tpu.dot_dimension_numbers<[1], [0], [0], [1], [0, 0, 1, 1], [], []>} : vector<64x16xbf16>, vector<16x32xbf16>, vector<64x32xf32> -> vector<64x32xf32>
    %50 = arith.addf %44, %49 : vector<64x32xf32>
    %51 = vector.extract_strided_slice %1 {offsets = [2, 2, 0], sizes = [8, 8, 16], strides = [1, 1, 1]} : vector<10x10x16xbf16> to vector<8x8x16xbf16>
    %52 = vector.shape_cast %51 : vector<8x8x16xbf16> to vector<64x16xbf16>
    %c8 = arith.constant 8 : index
    %c0_28 = arith.constant 0 : index
    %c0_29 = arith.constant 0 : index
    %53 = vector.load %arg2[%c8, %c0_28, %c0_29] : memref<9x16x32xbf16, #tpu.memory_space<vmem>>, vector<1x16x32xbf16>
    %54 = vector.shape_cast %53 : vector<1x16x32xbf16> to vector<16x32xbf16>
    %cst_30 = arith.constant dense<0.000000e+00> : vector<64x32xf32>
    %55 = tpu.matmul %52, %54, %cst_30 {dimension_numbers = #tpu.dot_dimension_numbers<[1], [0], [0], [1], [0, 0, 1, 1], [], []>} : vector<64x16xbf16>, vector<16x32xbf16>, vector<64x32xf32> -> vector<64x32xf32>
    %56 = arith.addf %50, %55 : vector<64x32xf32>
    %c0_31 = arith.constant 0 : index
    %c0_32 = arith.constant 0 : index
    %57 = vector.load %arg3[%c0_31, %c0_32] : memref<1x32xf32, #tpu.memory_space<vmem>>, vector<1x32xf32>
    %58 = vector.broadcast %57 : vector<1x32xf32> to vector<64x32xf32>
    %59 = arith.addf %56, %58 : vector<64x32xf32>
    %cst_33 = arith.constant dense<0.000000e+00> : vector<32xf32>
    %60 = vector.multi_reduction <add>, %59, %cst_33 [0] : vector<64x32xf32> to vector<32xf32>
    %61 = vector.shape_cast %60 : vector<32xf32> to vector<1x32xf32>
    %c0_34 = arith.constant 0 : index
    %c0_35 = arith.constant 0 : index
    %c0_36 = arith.constant 0 : index
    %62 = vector.load %arg5[%c0_34, %c0_35, %c0_36] : memref<1x1x32xf32, #tpu.memory_space<vmem>>, vector<1x1x32xf32>
    %63 = vector.shape_cast %62 : vector<1x1x32xf32> to vector<1x32xf32>
    %64 = vector.shape_cast %61 : vector<1x32xf32> to vector<1x1x32xf32>
    tpu.vector_store %arg5[%c0_34, %c0_35, %c0_36], %64 {strides = array<i32>} : memref<1x1x32xf32, #tpu.memory_space<vmem>>, vector<1x1x32xf32>,
    %65 = arith.mulf %59, %59 : vector<64x32xf32>
    %cst_37 = arith.constant dense<0.000000e+00> : vector<32xf32>
    %66 = vector.multi_reduction <add>, %65, %cst_37 [0] : vector<64x32xf32> to vector<32xf32>
    %67 = vector.shape_cast %66 : vector<32xf32> to vector<1x32xf32>
    %c0_38 = arith.constant 0 : index
    %c0_39 = arith.constant 0 : index
    %c0_40 = arith.constant 0 : index
    %68 = vector.load %arg6[%c0_38, %c0_39, %c0_40] : memref<1x1x32xf32, #tpu.memory_space<vmem>>, vector<1x1x32xf32>
    %69 = vector.shape_cast %68 : vector<1x1x32xf32> to vector<1x32xf32>
    %70 = vector.shape_cast %67 : vector<1x32xf32> to vector<1x1x32xf32>
    tpu.vector_store %arg6[%c0_38, %c0_39, %c0_40], %70 {strides = array<i32>} : memref<1x1x32xf32, #tpu.memory_space<vmem>>, vector<1x1x32xf32>,
    %71 = arith.truncf %59 : vector<64x32xf32> to vector<64x32xbf16>
    %c0_41 = arith.constant 0 : index
    %c0_42 = arith.constant 0 : index
    %c0_43 = arith.constant 0 : index
    %72 = vector.load %arg4[%c0_41, %c0_42, %c0_43] : memref<1x64x32xbf16, #tpu.memory_space<vmem>>, vector<1x64x32xbf16>
    %73 = vector.shape_cast %72 : vector<1x64x32xbf16> to vector<64x32xbf16>
    %74 = vector.shape_cast %71 : vector<64x32xbf16> to vector<1x64x32xbf16>
    tpu.vector_store %arg4[%c0_41, %c0_42, %c0_43], %74 {strides = array<i32>} : memref<1x64x32xbf16, #tpu.memory_space<vmem>>, vector<1x64x32xbf16>,
    return
  }
  func.func @transform_0(%arg0: i32) -> (i32, i32, i32, i32) {
    %c0_i32 = arith.constant 0 : i32
    %c0_i32_0 = arith.constant 0 : i32
    %c0_i32_1 = arith.constant 0 : i32
    %c0_i32_2 = arith.constant 0 : i32
    return %arg0, %c0_i32, %c0_i32_0, %c0_i32_1 : i32, i32, i32, i32
  }
  func.func @transform_1(%arg0: i32) -> (i32, i32, i32) {
    %c0_i32 = arith.constant 0 : i32
    %c0_i32_0 = arith.constant 0 : i32
    %c0_i32_1 = arith.constant 0 : i32
    %c0_i32_2 = arith.constant 0 : i32
    return %c0_i32, %c0_i32_0, %c0_i32_1 : i32, i32, i32
  }
  func.func @transform_2(%arg0: i32) -> (i32, i32) {
    %c0_i32 = arith.constant 0 : i32
    %c0_i32_0 = arith.constant 0 : i32
    %c0_i32_1 = arith.constant 0 : i32
    return %c0_i32, %c0_i32_0 : i32, i32
  }
  func.func @transform_3(%arg0: i32) -> (i32, i32, i32) {
    %c0_i32 = arith.constant 0 : i32
    %c0_i32_0 = arith.constant 0 : i32
    %c0_i32_1 = arith.constant 0 : i32
    return %arg0, %c0_i32, %c0_i32_0 : i32, i32, i32
  }
  func.func @transform_4(%arg0: i32) -> (i32, i32, i32) {
    %c0_i32 = arith.constant 0 : i32
    %c0_i32_0 = arith.constant 0 : i32
    %c0_i32_1 = arith.constant 0 : i32
    return %arg0, %c0_i32, %c0_i32_0 : i32, i32, i32
  }
  func.func @transform_5(%arg0: i32) -> (i32, i32, i32) {
    %c0_i32 = arith.constant 0 : i32
    %c0_i32_0 = arith.constant 0 : i32
    %c0_i32_1 = arith.constant 0 : i32
    return %arg0, %c0_i32, %c0_i32_0 : i32, i32, i32
  }
}

module attributes {stable_mosaic.version = 11 : i64} {
  func.func @_bn_apply_kernel(%arg0: i32, %arg1: memref<128x32xbf16, #tpu.memory_space<vmem>>, %arg2: memref<1x32xf32, #tpu.memory_space<vmem>>, %arg3: memref<1x32xf32, #tpu.memory_space<vmem>>, %arg4: memref<128x32xbf16, #tpu.memory_space<vmem>>) attributes {dimension_semantics = [#tpu.dimension_semantics<parallel>], iteration_bounds = array<i64: 1>, scalar_prefetch = 0 : i64, scratch_operands = 0 : i64, tpu.core_type = #tpu.core_type<tc>, window_params = [{transform_indices = @transform_0, window_bounds = array<i64: 128, 32>}, {pipeline_mode = #tpu.pipeline_mode<synchronous>, transform_indices = @transform_1, window_bounds = array<i64: 1, 32>}, {pipeline_mode = #tpu.pipeline_mode<synchronous>, transform_indices = @transform_2, window_bounds = array<i64: 1, 32>}, {transform_indices = @transform_3, window_bounds = array<i64: 128, 32>}]} {
    %c0 = arith.constant 0 : index
    %c0_0 = arith.constant 0 : index
    %0 = vector.load %arg1[%c0, %c0_0] : memref<128x32xbf16, #tpu.memory_space<vmem>>, vector<128x32xbf16>
    %1 = arith.extf %0 : vector<128x32xbf16> to vector<128x32xf32>
    %c0_1 = arith.constant 0 : index
    %c0_2 = arith.constant 0 : index
    %2 = vector.load %arg2[%c0_1, %c0_2] : memref<1x32xf32, #tpu.memory_space<vmem>>, vector<1x32xf32>
    %3 = vector.broadcast %2 : vector<1x32xf32> to vector<128x32xf32>
    %4 = arith.mulf %1, %3 : vector<128x32xf32>
    %c0_3 = arith.constant 0 : index
    %c0_4 = arith.constant 0 : index
    %5 = vector.load %arg3[%c0_3, %c0_4] : memref<1x32xf32, #tpu.memory_space<vmem>>, vector<1x32xf32>
    %6 = vector.broadcast %5 : vector<1x32xf32> to vector<128x32xf32>
    %7 = arith.addf %4, %6 : vector<128x32xf32>
    %cst = arith.constant 0.000000e+00 : f32
    %8 = vector.broadcast %cst : f32 to vector<128x32xf32>
    %9 = arith.cmpf oge, %7, %8 : vector<128x32xf32>
    %cst_5 = arith.constant 2.000000e-01 : f32
    %10 = vector.broadcast %cst_5 : f32 to vector<128x32xf32>
    %11 = arith.mulf %10, %7 : vector<128x32xf32>
    %12 = arith.select %9, %7, %11 : vector<128x32xi1>, vector<128x32xf32>
    %13 = arith.truncf %12 : vector<128x32xf32> to vector<128x32xbf16>
    %c0_6 = arith.constant 0 : index
    %c0_7 = arith.constant 0 : index
    %14 = vector.load %arg4[%c0_6, %c0_7] : memref<128x32xbf16, #tpu.memory_space<vmem>>, vector<128x32xbf16>
    tpu.vector_store %arg4[%c0_6, %c0_7], %13 {strides = array<i32>} : memref<128x32xbf16, #tpu.memory_space<vmem>>, vector<128x32xbf16>,
    return
  }
  func.func @transform_0(%arg0: i32) -> (i32, i32) {
    %c0_i32 = arith.constant 0 : i32
    %c0_i32_0 = arith.constant 0 : i32
    return %arg0, %c0_i32 : i32, i32
  }
  func.func @transform_1(%arg0: i32) -> (i32, i32) {
    %c0_i32 = arith.constant 0 : i32
    %c0_i32_0 = arith.constant 0 : i32
    %c0_i32_1 = arith.constant 0 : i32
    return %c0_i32, %c0_i32_0 : i32, i32
  }
  func.func @transform_2(%arg0: i32) -> (i32, i32) {
    %c0_i32 = arith.constant 0 : i32
    %c0_i32_0 = arith.constant 0 : i32
    %c0_i32_1 = arith.constant 0 : i32
    return %c0_i32, %c0_i32_0 : i32, i32
  }
  func.func @transform_3(%arg0: i32) -> (i32, i32) {
    %c0_i32 = arith.constant 0 : i32
    %c0_i32_0 = arith.constant 0 : i32
    return %arg0, %c0_i32 : i32, i32
  }
}

module attributes {stable_mosaic.version = 11 : i64} {
  func.func @_conv_kernel(%arg0: i32, %arg1: memref<1x18x18x8xbf16, #tpu.memory_space<vmem>>, %arg2: memref<9x8x4xbf16, #tpu.memory_space<vmem>>, %arg3: memref<1x4xf32, #tpu.memory_space<vmem>>, %arg4: memref<1x256x4xf32, #tpu.memory_space<vmem>>, %arg5: memref<1x1x4xf32, #tpu.memory_space<vmem>>, %arg6: memref<1x1x4xf32, #tpu.memory_space<vmem>>) attributes {dimension_semantics = [#tpu.dimension_semantics<parallel>], iteration_bounds = array<i64: 2>, scalar_prefetch = 0 : i64, scratch_operands = 0 : i64, tpu.core_type = #tpu.core_type<tc>, window_params = [{transform_indices = @transform_0, window_bounds = array<i64: 1, 18, 18, 8>}, {pipeline_mode = #tpu.pipeline_mode<synchronous>, transform_indices = @transform_1, window_bounds = array<i64: 9, 8, 4>}, {pipeline_mode = #tpu.pipeline_mode<synchronous>, transform_indices = @transform_2, window_bounds = array<i64: 1, 4>}, {transform_indices = @transform_3, window_bounds = array<i64: 1, 256, 4>}, {transform_indices = @transform_4, window_bounds = array<i64: 1, 1, 4>}, {transform_indices = @transform_5, window_bounds = array<i64: 1, 1, 4>}]} {
    %c0 = arith.constant 0 : index
    %c0_0 = arith.constant 0 : index
    %c0_1 = arith.constant 0 : index
    %c0_2 = arith.constant 0 : index
    %0 = vector.load %arg1[%c0, %c0_0, %c0_1, %c0_2] : memref<1x18x18x8xbf16, #tpu.memory_space<vmem>>, vector<1x18x18x8xbf16>
    %1 = vector.shape_cast %0 : vector<1x18x18x8xbf16> to vector<18x18x8xbf16>
    %cst = arith.constant 0.000000e+00 : f32
    %2 = vector.broadcast %cst : f32 to vector<256x4xf32>
    %3 = vector.extract_strided_slice %1 {offsets = [0, 0, 0], sizes = [16, 16, 8], strides = [1, 1, 1]} : vector<18x18x8xbf16> to vector<16x16x8xbf16>
    %4 = vector.shape_cast %3 : vector<16x16x8xbf16> to vector<256x8xbf16>
    %c0_3 = arith.constant 0 : index
    %c0_4 = arith.constant 0 : index
    %c0_5 = arith.constant 0 : index
    %5 = vector.load %arg2[%c0_3, %c0_4, %c0_5] : memref<9x8x4xbf16, #tpu.memory_space<vmem>>, vector<1x8x4xbf16>
    %6 = vector.shape_cast %5 : vector<1x8x4xbf16> to vector<8x4xbf16>
    %cst_6 = arith.constant dense<0.000000e+00> : vector<256x4xf32>
    %7 = tpu.matmul %4, %6, %cst_6 {dimension_numbers = #tpu.dot_dimension_numbers<[1], [0], [0], [1], [0, 0, 1, 1], [], []>} : vector<256x8xbf16>, vector<8x4xbf16>, vector<256x4xf32> -> vector<256x4xf32>
    %8 = arith.addf %2, %7 : vector<256x4xf32>
    %9 = vector.extract_strided_slice %1 {offsets = [0, 1, 0], sizes = [16, 16, 8], strides = [1, 1, 1]} : vector<18x18x8xbf16> to vector<16x16x8xbf16>
    %10 = vector.shape_cast %9 : vector<16x16x8xbf16> to vector<256x8xbf16>
    %c1 = arith.constant 1 : index
    %c0_7 = arith.constant 0 : index
    %c0_8 = arith.constant 0 : index
    %11 = vector.load %arg2[%c1, %c0_7, %c0_8] : memref<9x8x4xbf16, #tpu.memory_space<vmem>>, vector<1x8x4xbf16>
    %12 = vector.shape_cast %11 : vector<1x8x4xbf16> to vector<8x4xbf16>
    %cst_9 = arith.constant dense<0.000000e+00> : vector<256x4xf32>
    %13 = tpu.matmul %10, %12, %cst_9 {dimension_numbers = #tpu.dot_dimension_numbers<[1], [0], [0], [1], [0, 0, 1, 1], [], []>} : vector<256x8xbf16>, vector<8x4xbf16>, vector<256x4xf32> -> vector<256x4xf32>
    %14 = arith.addf %8, %13 : vector<256x4xf32>
    %15 = vector.extract_strided_slice %1 {offsets = [0, 2, 0], sizes = [16, 16, 8], strides = [1, 1, 1]} : vector<18x18x8xbf16> to vector<16x16x8xbf16>
    %16 = vector.shape_cast %15 : vector<16x16x8xbf16> to vector<256x8xbf16>
    %c2 = arith.constant 2 : index
    %c0_10 = arith.constant 0 : index
    %c0_11 = arith.constant 0 : index
    %17 = vector.load %arg2[%c2, %c0_10, %c0_11] : memref<9x8x4xbf16, #tpu.memory_space<vmem>>, vector<1x8x4xbf16>
    %18 = vector.shape_cast %17 : vector<1x8x4xbf16> to vector<8x4xbf16>
    %cst_12 = arith.constant dense<0.000000e+00> : vector<256x4xf32>
    %19 = tpu.matmul %16, %18, %cst_12 {dimension_numbers = #tpu.dot_dimension_numbers<[1], [0], [0], [1], [0, 0, 1, 1], [], []>} : vector<256x8xbf16>, vector<8x4xbf16>, vector<256x4xf32> -> vector<256x4xf32>
    %20 = arith.addf %14, %19 : vector<256x4xf32>
    %21 = vector.extract_strided_slice %1 {offsets = [1, 0, 0], sizes = [16, 16, 8], strides = [1, 1, 1]} : vector<18x18x8xbf16> to vector<16x16x8xbf16>
    %22 = vector.shape_cast %21 : vector<16x16x8xbf16> to vector<256x8xbf16>
    %c3 = arith.constant 3 : index
    %c0_13 = arith.constant 0 : index
    %c0_14 = arith.constant 0 : index
    %23 = vector.load %arg2[%c3, %c0_13, %c0_14] : memref<9x8x4xbf16, #tpu.memory_space<vmem>>, vector<1x8x4xbf16>
    %24 = vector.shape_cast %23 : vector<1x8x4xbf16> to vector<8x4xbf16>
    %cst_15 = arith.constant dense<0.000000e+00> : vector<256x4xf32>
    %25 = tpu.matmul %22, %24, %cst_15 {dimension_numbers = #tpu.dot_dimension_numbers<[1], [0], [0], [1], [0, 0, 1, 1], [], []>} : vector<256x8xbf16>, vector<8x4xbf16>, vector<256x4xf32> -> vector<256x4xf32>
    %26 = arith.addf %20, %25 : vector<256x4xf32>
    %27 = vector.extract_strided_slice %1 {offsets = [1, 1, 0], sizes = [16, 16, 8], strides = [1, 1, 1]} : vector<18x18x8xbf16> to vector<16x16x8xbf16>
    %28 = vector.shape_cast %27 : vector<16x16x8xbf16> to vector<256x8xbf16>
    %c4 = arith.constant 4 : index
    %c0_16 = arith.constant 0 : index
    %c0_17 = arith.constant 0 : index
    %29 = vector.load %arg2[%c4, %c0_16, %c0_17] : memref<9x8x4xbf16, #tpu.memory_space<vmem>>, vector<1x8x4xbf16>
    %30 = vector.shape_cast %29 : vector<1x8x4xbf16> to vector<8x4xbf16>
    %cst_18 = arith.constant dense<0.000000e+00> : vector<256x4xf32>
    %31 = tpu.matmul %28, %30, %cst_18 {dimension_numbers = #tpu.dot_dimension_numbers<[1], [0], [0], [1], [0, 0, 1, 1], [], []>} : vector<256x8xbf16>, vector<8x4xbf16>, vector<256x4xf32> -> vector<256x4xf32>
    %32 = arith.addf %26, %31 : vector<256x4xf32>
    %33 = vector.extract_strided_slice %1 {offsets = [1, 2, 0], sizes = [16, 16, 8], strides = [1, 1, 1]} : vector<18x18x8xbf16> to vector<16x16x8xbf16>
    %34 = vector.shape_cast %33 : vector<16x16x8xbf16> to vector<256x8xbf16>
    %c5 = arith.constant 5 : index
    %c0_19 = arith.constant 0 : index
    %c0_20 = arith.constant 0 : index
    %35 = vector.load %arg2[%c5, %c0_19, %c0_20] : memref<9x8x4xbf16, #tpu.memory_space<vmem>>, vector<1x8x4xbf16>
    %36 = vector.shape_cast %35 : vector<1x8x4xbf16> to vector<8x4xbf16>
    %cst_21 = arith.constant dense<0.000000e+00> : vector<256x4xf32>
    %37 = tpu.matmul %34, %36, %cst_21 {dimension_numbers = #tpu.dot_dimension_numbers<[1], [0], [0], [1], [0, 0, 1, 1], [], []>} : vector<256x8xbf16>, vector<8x4xbf16>, vector<256x4xf32> -> vector<256x4xf32>
    %38 = arith.addf %32, %37 : vector<256x4xf32>
    %39 = vector.extract_strided_slice %1 {offsets = [2, 0, 0], sizes = [16, 16, 8], strides = [1, 1, 1]} : vector<18x18x8xbf16> to vector<16x16x8xbf16>
    %40 = vector.shape_cast %39 : vector<16x16x8xbf16> to vector<256x8xbf16>
    %c6 = arith.constant 6 : index
    %c0_22 = arith.constant 0 : index
    %c0_23 = arith.constant 0 : index
    %41 = vector.load %arg2[%c6, %c0_22, %c0_23] : memref<9x8x4xbf16, #tpu.memory_space<vmem>>, vector<1x8x4xbf16>
    %42 = vector.shape_cast %41 : vector<1x8x4xbf16> to vector<8x4xbf16>
    %cst_24 = arith.constant dense<0.000000e+00> : vector<256x4xf32>
    %43 = tpu.matmul %40, %42, %cst_24 {dimension_numbers = #tpu.dot_dimension_numbers<[1], [0], [0], [1], [0, 0, 1, 1], [], []>} : vector<256x8xbf16>, vector<8x4xbf16>, vector<256x4xf32> -> vector<256x4xf32>
    %44 = arith.addf %38, %43 : vector<256x4xf32>
    %45 = vector.extract_strided_slice %1 {offsets = [2, 1, 0], sizes = [16, 16, 8], strides = [1, 1, 1]} : vector<18x18x8xbf16> to vector<16x16x8xbf16>
    %46 = vector.shape_cast %45 : vector<16x16x8xbf16> to vector<256x8xbf16>
    %c7 = arith.constant 7 : index
    %c0_25 = arith.constant 0 : index
    %c0_26 = arith.constant 0 : index
    %47 = vector.load %arg2[%c7, %c0_25, %c0_26] : memref<9x8x4xbf16, #tpu.memory_space<vmem>>, vector<1x8x4xbf16>
    %48 = vector.shape_cast %47 : vector<1x8x4xbf16> to vector<8x4xbf16>
    %cst_27 = arith.constant dense<0.000000e+00> : vector<256x4xf32>
    %49 = tpu.matmul %46, %48, %cst_27 {dimension_numbers = #tpu.dot_dimension_numbers<[1], [0], [0], [1], [0, 0, 1, 1], [], []>} : vector<256x8xbf16>, vector<8x4xbf16>, vector<256x4xf32> -> vector<256x4xf32>
    %50 = arith.addf %44, %49 : vector<256x4xf32>
    %51 = vector.extract_strided_slice %1 {offsets = [2, 2, 0], sizes = [16, 16, 8], strides = [1, 1, 1]} : vector<18x18x8xbf16> to vector<16x16x8xbf16>
    %52 = vector.shape_cast %51 : vector<16x16x8xbf16> to vector<256x8xbf16>
    %c8 = arith.constant 8 : index
    %c0_28 = arith.constant 0 : index
    %c0_29 = arith.constant 0 : index
    %53 = vector.load %arg2[%c8, %c0_28, %c0_29] : memref<9x8x4xbf16, #tpu.memory_space<vmem>>, vector<1x8x4xbf16>
    %54 = vector.shape_cast %53 : vector<1x8x4xbf16> to vector<8x4xbf16>
    %cst_30 = arith.constant dense<0.000000e+00> : vector<256x4xf32>
    %55 = tpu.matmul %52, %54, %cst_30 {dimension_numbers = #tpu.dot_dimension_numbers<[1], [0], [0], [1], [0, 0, 1, 1], [], []>} : vector<256x8xbf16>, vector<8x4xbf16>, vector<256x4xf32> -> vector<256x4xf32>
    %56 = arith.addf %50, %55 : vector<256x4xf32>
    %c0_31 = arith.constant 0 : index
    %c0_32 = arith.constant 0 : index
    %57 = vector.load %arg3[%c0_31, %c0_32] : memref<1x4xf32, #tpu.memory_space<vmem>>, vector<1x4xf32>
    %58 = vector.broadcast %57 : vector<1x4xf32> to vector<256x4xf32>
    %59 = arith.addf %56, %58 : vector<256x4xf32>
    %cst_33 = arith.constant dense<0.000000e+00> : vector<4xf32>
    %60 = vector.multi_reduction <add>, %59, %cst_33 [0] : vector<256x4xf32> to vector<4xf32>
    %61 = vector.shape_cast %60 : vector<4xf32> to vector<1x4xf32>
    %c0_34 = arith.constant 0 : index
    %c0_35 = arith.constant 0 : index
    %c0_36 = arith.constant 0 : index
    %62 = vector.load %arg5[%c0_34, %c0_35, %c0_36] : memref<1x1x4xf32, #tpu.memory_space<vmem>>, vector<1x1x4xf32>
    %63 = vector.shape_cast %62 : vector<1x1x4xf32> to vector<1x4xf32>
    %64 = vector.shape_cast %61 : vector<1x4xf32> to vector<1x1x4xf32>
    tpu.vector_store %arg5[%c0_34, %c0_35, %c0_36], %64 {strides = array<i32>} : memref<1x1x4xf32, #tpu.memory_space<vmem>>, vector<1x1x4xf32>,
    %65 = arith.mulf %59, %59 : vector<256x4xf32>
    %cst_37 = arith.constant dense<0.000000e+00> : vector<4xf32>
    %66 = vector.multi_reduction <add>, %65, %cst_37 [0] : vector<256x4xf32> to vector<4xf32>
    %67 = vector.shape_cast %66 : vector<4xf32> to vector<1x4xf32>
    %c0_38 = arith.constant 0 : index
    %c0_39 = arith.constant 0 : index
    %c0_40 = arith.constant 0 : index
    %68 = vector.load %arg6[%c0_38, %c0_39, %c0_40] : memref<1x1x4xf32, #tpu.memory_space<vmem>>, vector<1x1x4xf32>
    %69 = vector.shape_cast %68 : vector<1x1x4xf32> to vector<1x4xf32>
    %70 = vector.shape_cast %67 : vector<1x4xf32> to vector<1x1x4xf32>
    tpu.vector_store %arg6[%c0_38, %c0_39, %c0_40], %70 {strides = array<i32>} : memref<1x1x4xf32, #tpu.memory_space<vmem>>, vector<1x1x4xf32>,
    %71 = arith.negf %59 : vector<256x4xf32>
    %72 = math.exp %71 : vector<256x4xf32>
    %cst_41 = arith.constant 1.000000e+00 : f32
    %73 = vector.broadcast %cst_41 : f32 to vector<256x4xf32>
    %74 = arith.addf %73, %72 : vector<256x4xf32>
    %75 = arith.divf %73, %74 : vector<256x4xf32>
    %c0_42 = arith.constant 0 : index
    %c0_43 = arith.constant 0 : index
    %c0_44 = arith.constant 0 : index
    %76 = vector.load %arg4[%c0_42, %c0_43, %c0_44] : memref<1x256x4xf32, #tpu.memory_space<vmem>>, vector<1x256x4xf32>
    %77 = vector.shape_cast %76 : vector<1x256x4xf32> to vector<256x4xf32>
    %78 = vector.shape_cast %75 : vector<256x4xf32> to vector<1x256x4xf32>
    tpu.vector_store %arg4[%c0_42, %c0_43, %c0_44], %78 {strides = array<i32>} : memref<1x256x4xf32, #tpu.memory_space<vmem>>, vector<1x256x4xf32>,
    return
  }
  func.func @transform_0(%arg0: i32) -> (i32, i32, i32, i32) {
    %c0_i32 = arith.constant 0 : i32
    %c0_i32_0 = arith.constant 0 : i32
    %c0_i32_1 = arith.constant 0 : i32
    %c0_i32_2 = arith.constant 0 : i32
    return %arg0, %c0_i32, %c0_i32_0, %c0_i32_1 : i32, i32, i32, i32
  }
  func.func @transform_1(%arg0: i32) -> (i32, i32, i32) {
    %c0_i32 = arith.constant 0 : i32
    %c0_i32_0 = arith.constant 0 : i32
    %c0_i32_1 = arith.constant 0 : i32
    %c0_i32_2 = arith.constant 0 : i32
    return %c0_i32, %c0_i32_0, %c0_i32_1 : i32, i32, i32
  }
  func.func @transform_2(%arg0: i32) -> (i32, i32) {
    %c0_i32 = arith.constant 0 : i32
    %c0_i32_0 = arith.constant 0 : i32
    %c0_i32_1 = arith.constant 0 : i32
    return %c0_i32, %c0_i32_0 : i32, i32
  }
  func.func @transform_3(%arg0: i32) -> (i32, i32, i32) {
    %c0_i32 = arith.constant 0 : i32
    %c0_i32_0 = arith.constant 0 : i32
    %c0_i32_1 = arith.constant 0 : i32
    return %arg0, %c0_i32, %c0_i32_0 : i32, i32, i32
  }
  func.func @transform_4(%arg0: i32) -> (i32, i32, i32) {
    %c0_i32 = arith.constant 0 : i32
    %c0_i32_0 = arith.constant 0 : i32
    %c0_i32_1 = arith.constant 0 : i32
    return %arg0, %c0_i32, %c0_i32_0 : i32, i32, i32
  }
  func.func @transform_5(%arg0: i32) -> (i32, i32, i32) {
    %c0_i32 = arith.constant 0 : i32
    %c0_i32_0 = arith.constant 0 : i32
    %c0_i32_1 = arith.constant 0 : i32
    return %arg0, %c0_i32, %c0_i32_0 : i32, i32, i32
  }
}

</mosaic_0001>

<bundles_post_ra>
// kernel: tile.23
= control target key start
LH: loop header
LB: loop body
LE: loop exit
PB: predicated region body
PF: predicated region fallthrough
CT: control target
= control target key end

     0   :  { %s22_s0 = inlined_call_operand.vmem [shape: f32[8], index: 0, kind: input, shape index: {}]   ;;  %s23_s1 = inlined_call_operand.vmem [shape: f32[4,8], index: 1, kind: output, shape index: {}]  }
   0x1   :  { %v4_v0 = vld [vmem:[%s22_s0] ss:$0 sm:$0xff] }
   0x2   :  { %5 = vst [vmem:[%s23_s1] sm:$0xf] %v4_v0 }

// kernel: tile.24
= control target key start
LH: loop header
LB: loop body
LE: loop exit
PB: predicated region body
PF: predicated region fallthrough
CT: control target
= control target key end

     0   :  { %vm7_vm0 = vcmask 64512   ;;  %s37_s8 = smov 8   ;;  %s38_s9 = smov 16   ;;  %vm13_vm1 = vcmask 261312   ;;  %vm19_vm2 = vcmask 195712   ;;  %vm25_vm3 = vcmask 130112   ;;  %s55_s0 = inlined_call_operand.vmem [shape: f32[4,8], index: 0, kind: input, shape index: {}]   ;;  %s56_s1 = inlined_call_operand.vmem [shape: f32[1,32], index: 1, kind: output, shape index: {}]  }
   0x1   :  { %v4_v0 = vld [vmem:[%s55_s0] sm:$0xf]  ;;  %s36_s0 = smov 24  }
   0x2   :  { %5 = vst [vmem:[#allocation1] sm:$0xf] %v4_v0 }
   0x9   :  { %v10_v1 = vld [vmem:[#allocation1 + $0x3] sm:$0x1]   ;;  %v22_v2 = vld [vmem:[#allocation1 + $0x1] sm:$0x1]   ;;  %v6_v3 = vld [vmem:[#allocation1] sm:$0x1]  }
   0xa   :  { %11 = vrot.lane.b32.xlu0 %v10_v1, %s36_s0  ;;  %23 = vrot.lane.b32.xlu1 %v22_v2, %s37_s8  ;;  %v16_v4 = vld [vmem:[#allocation1 + $0x2] sm:$0x1]   ;;  %8 = vst.msk [vmem:[#allocation0] sm:$0x1] %vm7_vm0, %v6_v3  }
   0xe   :  { %17 = vrot.lane.b32.xlu0 %v16_v4, %s38_s9 }
  0x7c   :  { %v12_v5 = vpop.permute.xlu0 %11   ;;  %v24_v6 = vpop.permute.xlu1 %23  }
  0x7d   :  { %14 = vst.msk [vmem:[#allocation0] sm:$0x1] %vm13_vm1, %v12_v5  }
  0x80   :  { %v18_v7 = vpop.permute.xlu0 %17  }
  0x81   :  { %20 = vst.msk [vmem:[#allocation0] sm:$0x1] %vm19_vm2, %v18_v7  }
  0x82   :  { %26 = vst.msk [vmem:[#allocation0] sm:$0x1] %vm25_vm3, %v24_v6  }
  0x89   :  { %v30_v8 = vld [vmem:[#allocation0] sm:$0x1] }
  0x8a   :  { %32 = vst [vmem:[%s56_s1] sm:$0x1] %v30_v8 }

// kernel: decoder_forward.17
= control target key start
LH: loop header
LB: loop body
LE: loop exit
PB: predicated region body
PF: predicated region fallthrough
CT: control target
= control target key end

     0   :  { %11 = vsyncpa [#allocation3], 0  ;;  %s1024_s0 = inlined_call_operand.vmem [shape: bf16[2,8,8,16], index: 0, kind: input, shape index: {}]   ;;  %s1025_s1 = inlined_call_operand.vmem [shape: bf16[1,16,20], index: 1, kind: input, shape index: {}]   ;;  %s1026_s2 = inlined_call_operand.vmem [shape: f32[1,20], index: 2, kind: input, shape index: {}]   ;;  %s1027_s3 = inlined_call_operand.vmem [shape: bf16[2,64,20], index: 3, kind: output, shape index: {0}]   ;;  %s1028_s4 = inlined_call_operand.hbm [shape: f32[2,1,20], index: 4, kind: output, shape index: {1}]   ;;  %s1029_s5 = inlined_call_operand.hbm [shape: f32[2,1,20], index: 5, kind: output, shape index: {2}]  }
   0x1   :  { %13 = vsyncpa [#allocation3 + $0x1], 0 }
   0x2   :  { %14 = vsyncpa [#allocation5], 0 }
   0x3   :  { %16 = vsyncpa [#allocation5 + $0x1], 0  ;;  %s841_s18 = smov 0   ;;  %s843_s19 = smov 0  }
   0x4   :  { %s845_s20 = smov 0   ;;  %s847_s21 = smov 0  }
   0x5 LB: > { %s862_s22 = sadd.s32 4294967295, %s807_s21   ;;  %s607_s23 = sadd.s32 4294967294, %s807_s21   ;;  %s807_s21 = sphi %s847_s21, %s1035_s21   ;;  %s803_s20 = sphi %s845_s20, %s1034_s20   ;;  %s799_s19 = sphi %s843_s19, %s1033_s19   ;;  %s795_s18 = sphi %s841_s18, %s1032_s18  }
   0x6   : > { %s866_s24 = sadd.s32 1, %s807_s21   ;;  %s123_s25 = sadd.s32 1, %s803_s20 }
   0x7   : > { %s120_s26 = ssub.s32 %s807_s21, %s866_s24  ;;  %p133_p0 = scmp.ne.s32.totalorder %s803_s20, %s799_s19 }
   0x8   : > { %p121_p1 = scmp.eq.s32.totalorder %s120_s26, 0  ;;  %p134_p2 = scmp.eq.s32.totalorder %s862_s22, 1 }
   0x9   : > { %p139_p3 = scmp.ne.s32.totalorder %s799_s19, %s795_s18  ;;  %p140_p4 = scmp.eq.s32.totalorder %s607_s23, 1 }
   0xa   : > { %s877_s27 = scalar_select %p121_p1, %s803_s20, %s123_s25  }
   0xb   : > { %p879_p5 = por %p134_p2, %p133_p0  ;;  %p883_p6 = por %p140_p4, %p139_p3 }
   0xc   : > { %p610_p7 = scmp.ge.s32.totalorder %s807_s21, 1  ;;  %p198_p8 = scmp.lt.s32.totalorder %s807_s21, 3 }
   0xe   : > { %p199_p9 = pnand %p610_p7, %p198_p8 }
   0xf   : > { %v708_v0 = vld [vmem:[%s1025_s1] sm:$0xff] (!%p199_p9)   ;;  %p234_p10 = scmp.lt.s32.totalorder (!%p199_p9), %s862_s22, 1  ;;  %vm288_vm0 = vcmask (!%p199_p9), 130048   ;;  %vm366_vm1 = vcmask (!%p199_p9), 162816   ;;  %vm452_vm2 = vcmask (!%p199_p9), 158720   ;;  %s938_s17 = sand.u32 (!%p199_p9), 1, %s799_s19  }
  0x10   : > { %202 = sbr.rel (%p199_p9) target bundleno = 310 (0x136), region = 32  ;;  %652 = vmatprep.subr.bf16.mxu0 (!%p199_p9), %v708_v0  ;;  %662 = vmatprep.subr.bf16.mxu1 (!%p199_p9), %v708_v0  ;;  %v615_v5 = vld [vmem:[%s1026_s2] ss:$0 sm:$0xff] (!%p199_p9)  ;;  %s633_s23 = sshll.u32 (!%p199_p9), %s862_s22, 4  ;;  %vm388_vm3 = vcmask (!%p199_p9), 155648  }
  0x11   : > { %653 = vmatpush3.bf16.msra.mxu0 (!%p199_p9), %v708_v0  ;;  %663 = vmatpush3.bf16.msra.mxu1 (!%p199_p9), %v708_v0  ;;  %s227_s25 = scalar_lea.vmem (!%p199_p9), [#allocation2], %s938_s17  ;;  %s233_s30 = scalar_lea.vmem (!%p199_p9), [#allocation4], %s938_s17 }
  0x12   : > { %s486_s26 = sshll.u32 (!%p199_p9), %s227_s25, 4  ;;  %s499_s6 = sshll.u32 (!%p199_p9), %s233_s30, 4  ;;  %s950_s26 = int_to_ptr.vmem [resolvable:$true] %s486_s26  ;;  %s958_s6 = int_to_ptr.vmem [resolvable:$true] %s499_s6 }
  0x13   : > { %s948_s9 = scalar_lea.hbm (!%p199_p9), %s1028_s4, %s633_s23  ;;  %s467_s12 = scalar_lea.sflag (!%p199_p9), [#allocation3], %s938_s17 }
  0x14   : > { %s713_s13 = scalar_lea.vmem (!%p199_p9), %s950_s26, 16  ;;  %s809_s14 = smov (!%p199_p9), [#allocation2]  }
  0x15   : > { %p714_p11 = scmp.ne.s32.totalorder (!%p199_p9), %s950_s26, %s713_s13  ;;  %s717_s15 = sshll.u32 (!%p199_p9), %s809_s14, 4  ;;  %s718_s15 = int_to_ptr.vmem [resolvable:$false] %s717_s15 }
  0x16   : > { %p720_p0 = scmp.lt.s32.totalorder (!%p199_p9), %s950_s26, %s718_s15 }
  0x17   : > { %s235_s7 = scalar_select %p234_p10, %s862_s22, 1 }
  0x18   : > { %p715_p12 = pnand %p714_p11, %p879_p5 }
  0x19   : > { %s637_s8 = sshll.u32 %s235_s7, 5 }
  0x1a   : > { %s238_s11 = scalar_lea.vmem %s1024_s0, %s637_s8  ;;  %s903_s16 = scalar_lea.vmem %s1027_s3, %s637_s8 }
  0x1b   : > { %v709_v1 = vld [vmem:[%s238_s11] sm:$0xff]   ;;  %v710_v2 = vld [vmem:[%s238_s11 + $0x8] sm:$0xff]   ;;  %v711_v3 = vld [vmem:[%s238_s11 + $0x10] sm:$0xff]   ;;  %p716_p13 = pneg %p715_p12 }
  0x1c   : > { %654 = vmatprep.mubr.msk.bf16.mxu0 %vm288_vm0, %v709_v1  ;;  %v712_v4 = vld [vmem:[%s238_s11 + $0x18] sm:$0xff]   ;;  %658 = vmatprep.mubr.msk.bf16.mxu1 %vm288_vm0, %v711_v3  ;;  %s956_s11 = scalar_lea.hbm %s1029_s5, %s633_s23 }
  0x1d   : > { %655 = vmatmul.mubr.msk.bf16.vlgmr.msra.gmra.mrb[0].mxu0 %vm288_vm0, %v710_v2  ;;  %659 = vmatmul.mubr.msk.bf16.vlgmr.msra.gmra.mrb[0].mxu1 %vm288_vm0, %v712_v4 }
  0xf0   : > { %v656_v6 = vpop.f32.mrb[0].mxu0  ;;  %v660_v11 = vpop.f32.mrb[0].mxu1 }
  0xf1   : > { %v344_v7 = vadd.f32 %v656_v6, %v615_v5  ;;  %v335_v8 = vpop.f32.mrb[1].mxu0  ;;  %v351_v16 = vpop.f32.mrb[1].mxu1  ;;  %v360_v30 = vadd.f32 %v660_v11, %v615_v5 }
  0xf2   : > { %v336_v9 = vadd.f32 %v615_v5, %v335_v8  ;;  %v657_v10 = vpop.f32.mrb[2].mxu0  ;;  %v661_v20 = vpop.f32.mrb[2].mxu1  ;;  %v352_v31 = vadd.f32 %v615_v5, %v351_v16 }
  0xf3   : > { %v392_v12 = vmul.f32 %v344_v7, %v344_v7  ;;  %v641_v13 = vpack.c.bf16 %v344_v7, %v344_v7  ;;  %v347_v14 = vadd.f32 %v657_v10, %v615_v5  ;;  %v338_v15 = vpop.f32.mrb[3].mxu0  ;;  %v370_v21 = vsel %vm366_vm1, %v344_v7, 0.0  ;;  %v354_v23 = vpop.f32.mrb[3].mxu1 }
  0xf4   : > { %v390_v17 = vmul.f32 %v336_v9, %v336_v9  ;;  %v639_v18 = vpack.c.bf16 %v336_v9, %v336_v9  ;;  %v339_v19 = vadd.f32 %v615_v5, %v338_v15  ;;  %v367_v24 = vsel %vm366_vm1, %v336_v9, 0.0 }
  0xf5   : > { %455 = vst.msk [vmem:[%s903_s16 + $0x8] sm:$0xf] %vm452_vm2, %v641_v13  ;;  %v642_v22 = vpack.c.bf16 %v347_v14, %v347_v14  ;;  %v401_v28 = vsel %vm366_vm1, %v392_v12, 0.0  ;;  %v393_v33 = vmul.f32 %v347_v14, %v347_v14  ;;  %v363_v35 = vadd.f32 %v661_v20, %v615_v5 }
  0xf6   : > { %453 = vst.msk [vmem:[%s903_s16] sm:$0xf] %vm452_vm2, %v639_v18  ;;  %v368_v25 = vsel %vm366_vm1, %v339_v19, 0.0  ;;  %v391_v26 = vmul.f32 %v339_v19, %v339_v19  ;;  %v640_v27 = vpack.c.bf16 %v339_v19, %v339_v19  ;;  %v398_v32 = vsel %vm366_vm1, %v390_v17, 0.0 }
  0xf7   : > { %456 = vst.msk [vmem:[%s903_s16 + $0xc] sm:$0xf] %vm452_vm2, %v642_v22  ;;  %v369_v29 = vadd.f32 %v368_v25, %v367_v24  ;;  %v372_v36 = vsel %vm366_vm1, %v347_v14, 0.0  ;;  %v355_v39 = vadd.f32 %v615_v5, %v354_v23  ;;  %v645_v40 = vpack.c.bf16 %v360_v30, %v360_v30 }
  0xf8   : > { %v399_v34 = vsel %vm366_vm1, %v391_v26, 0.0  ;;  %454 = vst.msk [vmem:[%s903_s16 + $0x4] sm:$0xf] %vm452_vm2, %v640_v27  ;;  %v374_v41 = vsel %vm366_vm1, %v352_v31, 0.0  ;;  %v394_v42 = vmul.f32 %v352_v31, %v352_v31  ;;  %v643_v43 = vpack.c.bf16 %v352_v31, %v352_v31 }
  0xf9   : > { %v371_v37 = vadd.f32 %v370_v21, %v369_v29  ;;  %v400_v38 = vadd.f32 %v399_v34, %v398_v32  ;;  %v403_v46 = vsel %vm366_vm1, %v393_v33, 0.0  ;;  %459 = vst.msk [vmem:[%s903_s16 + $0x18] sm:$0xf] %vm452_vm2, %v645_v40  ;;  %v646_v48 = vpack.c.bf16 %v363_v35, %v363_v35 }
  0xfa   : > { %v405_v47 = vsel %vm366_vm1, %v394_v42, 0.0  ;;  %457 = vst.msk [vmem:[%s903_s16 + $0x10] sm:$0xf] %vm452_vm2, %v643_v43  ;;  %v395_v51 = vmul.f32 %v355_v39, %v355_v39  ;;  %v644_v52 = vpack.c.bf16 %v355_v39, %v355_v39  ;;  %v396_v53 = vmul.f32 %v360_v30, %v360_v30 }
  0xfb   : > { %v402_v44 = vadd.f32 %v401_v28, %v400_v38  ;;  %v373_v45 = vadd.f32 %v372_v36, %v371_v37  ;;  %460 = vst.msk [vmem:[%s903_s16 + $0x1c] sm:$0xf] %vm452_vm2, %v646_v48  ;;  %v376_v54 = vsel %vm366_vm1, %v355_v39, 0.0  ;;  %v378_v57 = vsel %vm366_vm1, %v360_v30, 0.0 }
  0xfc   : > { %458 = vst.msk [vmem:[%s903_s16 + $0x14] sm:$0xf] %vm452_vm2, %v644_v52  ;;  %v397_v58 = vmul.f32 %v363_v35, %v363_v35  ;;  %v407_v59 = vsel %vm366_vm1, %v395_v51, 0.0  ;;  %v409_v62 = vsel %vm366_vm1, %v396_v53, 0.0  ;;  %v380_v63 = vsel %vm366_vm1, %v363_v35, 0.0  ;;  %s719_s16 = scalar_lea.vmem %s718_s15, 32 }
  0xfd   : > { %v375_v49 = vadd.f32 %v374_v41, %v373_v45  ;;  %v404_v50 = vadd.f32 %v403_v46, %v402_v44  ;;  %p721_p1 = scmp.lt.s32.totalorder %s719_s16, %s713_s13 }
  0xfe   : > { %v411_v2 = vsel %vm366_vm1, %v397_v58, 0.0 }
  0xff   : > { %v406_v55 = vadd.f32 %v405_v47, %v404_v50  ;;  %v377_v56 = vadd.f32 %v376_v54, %v375_v49  ;;  %p722_p2 = por %p721_p1, %p720_p0 }
 0x101   : > { %v379_v60 = vadd.f32 %v378_v57, %v377_v56  ;;  %v408_v61 = vadd.f32 %v407_v59, %v406_v55  ;;  %p723_p3 = pnand %p722_p2, %p716_p13 }
 0x103   : > { %v381_v0 = vadd.f32 %v380_v63, %v379_v60  ;;  %v410_v1 = vadd.f32 %v409_v62, %v408_v61 }
 0x105   : > { %v382_v3 = vrot.slane %v381_v0, 4  ;;  %v412_v4 = vadd.f32 %v411_v2, %v410_v1 }
 0x107   : > { %v383_v5 = vadd.f32 %v382_v3, %v381_v0  ;;  %v413_v6 = vrot.slane %v412_v4, 4 }
 0x109   : > { %v384_v7 = vrot.slane %v383_v5, 2  ;;  %v414_v8 = vadd.f32 %v413_v6, %v412_v4 }
 0x10b   : > { %v385_v9 = vadd.f32 %v384_v7, %v383_v5  ;;  %v415_v10 = vrot.slane %v414_v8, 2 }
 0x10d   : > { %v386_v11 = vrot.slane %v385_v9, 1  ;;  %v416_v12 = vadd.f32 %v415_v10, %v414_v8 }
 0x10f   : > { %v387_v13 = vadd.f32 %v386_v11, %v385_v9  ;;  %v417_v14 = vrot.slane %v416_v12, 1 }
 0x111   : > { %389 = vst.msk [vmem:[%s227_s25] sm:$0x1] %vm388_vm3, %v387_v13  ;;  %v418_v15 = vadd.f32 %v417_v14, %v416_v12 }
 0x112   : > { %726 = shalt.err (!%p723_p3)
}
 0x113   : > { %s727_s23 = scalar_lea.hbm %s948_s9, 16  ;;  %s731_s8 = scalar_lea.hbm %s1028_s4, 32 }
 0x114   : > { %p728_p4 = scmp.ne.s32.totalorder %s948_s9, %s727_s23  ;;  %p732_p9 = scmp.lt.u32.totalorder %s948_s9, %s1028_s4 }
 0x115   : > { %p733_p10 = scmp.lt.u32.totalorder %s731_s8, %s727_s23  ;;  %p735_p12 = scmp.lt.u32.totalorder %s727_s23, %s948_s9 }
 0x116   : > { %p729_p7 = pnand %p728_p4, %p879_p5 }
 0x117   : > { %p734_p11 = por %p733_p10, %p732_p9 }
 0x118   : > { %p730_p8 = pneg %p729_p7 }
 0x119   : > { %p736_p13 = por %p735_p12, %p734_p11 }
 0x11b   : > { %p737_p0 = pnand %p736_p13, %p730_p8 }
 0x11d   : > { %740 = shalt.err (!%p737_p0)
}
 0x11e   : > { %664 = dma.vmem_to_hbm [thread:$0]  (%p879_p5), %s950_s26, 16, %s948_s9, %s467_s12   ;;  %419 = vst.msk [vmem:[%s233_s30] sm:$0x1] %vm388_vm3, %v418_v15 }
 0x11f   : > { %s471_s13 = scalar_lea.sflag [#allocation5], %s938_s17  ;;  %s741_s14 = scalar_lea.vmem %s958_s6, 16 }
 0x120   : > { %p742_p1 = scmp.ne.s32.totalorder %s958_s6, %s741_s14  ;;  %s810_s15 = smov [#allocation4]  }
 0x121   : > { %s745_s16 = sshll.u32 %s810_s15, 4  ;;  %s746_s16 = int_to_ptr.vmem [resolvable:$false] %s745_s16 }
 0x122   : > { %p743_p2 = pnand %p742_p1, %p879_p5  ;;  %s747_s23 = scalar_lea.vmem %s746_s16, 32 }
 0x123   : > { %p748_p4 = scmp.lt.s32.totalorder %s958_s6, %s746_s16  ;;  %p749_p7 = scmp.lt.s32.totalorder %s747_s23, %s741_s14 }
 0x124   : > { %p744_p3 = pneg %p743_p2 }
 0x125   : > { %p750_p8 = por %p749_p7, %p748_p4 }
 0x127   : > { %p751_p9 = pnand %p750_p8, %p744_p3 }
 0x129   : > { %754 = shalt.err (!%p751_p9)
}
 0x12a   : > { %s755_s17 = scalar_lea.hbm %s956_s11, 16  ;;  %s759_s9 = scalar_lea.hbm %s1029_s5, 32 }
 0x12b   : > { %p756_p10 = scmp.ne.s32.totalorder %s956_s11, %s755_s17  ;;  %p760_p13 = scmp.lt.u32.totalorder %s956_s11, %s1029_s5 }
 0x12c   : > { %p761_p0 = scmp.lt.u32.totalorder %s759_s9, %s755_s17  ;;  %p763_p2 = scmp.lt.u32.totalorder %s755_s17, %s956_s11 }
 0x12d   : > { %p757_p11 = pnand %p756_p10, %p879_p5 }
 0x12e   : > { %p762_p1 = por %p761_p0, %p760_p13 }
 0x12f   : > { %p758_p12 = pneg %p757_p11 }
 0x130   : > { %p764_p3 = por %p763_p2, %p762_p1 }
 0x132   : > { %p765_p4 = pnand %p764_p3, %p758_p12 }
 0x134   : > { %768 = shalt.err (!%p765_p4)
}
 0x135   : > { %665 = dma.vmem_to_hbm [thread:$0]  (%p879_p5), %s958_s6, 16, %s956_s11, %s471_s13  }
 0x136 PF: > { %p675_p7 = scmp.ge.s32.totalorder %s807_s21, 2  ;;  %s519_s7 = sand.u32 1, %s795_s18  }
 0x137   : > { %s520_s8 = scalar_lea.sflag [#allocation3], %s519_s7 }
 0x138   : > { %p669_p8 = pnand %p675_p7, %p883_p6 }
 0x13a   : > { %786 = dma.done.wait (!%p669_p8), %s520_s8, 16  }
 0x13b   : > { %788 = vsyncadd (!%p669_p8), %s520_s8, 4294967280  ;;  %s528_s22 = scalar_lea.sflag [#allocation5], %s519_s7 }
 0x13c   : > { %790 = dma.done.wait (!%p669_p8), %s528_s22, 16  }
 0x13d   : > { %792 = vsyncadd (!%p669_p8), %s528_s22, 4294967280  ;;  %p19_p5 = scmp.ge.s32.totalorder %s866_s24, 4   ;;  %s1032_s18 = smov %s799_s19 }
 0x13e   : > { %s1033_s19 = smov %s803_s20  ;;  %s1034_s20 = smov %s877_s27 }
 0x13f   : > { %s1035_s21 = smov %s866_s24  ;;  %21 = sbr.rel (!%p19_p5) target bundleno = 5 (0x5), region = 96 }
 0x146   :  { %532 = vsyncpa [#allocation3], 1 }
 0x147   :  { %534 = vsyncpa [#allocation3 + $0x1], 1 }
 0x148   :  { %535 = vsyncpa [#allocation5], 1 }
 0x149   :  { %537 = vsyncpa [#allocation5 + $0x1], 1 }

// kernel: decoder_forward.16
= control target key start
LH: loop header
LB: loop body
LE: loop exit
PB: predicated region body
PF: predicated region fallthrough
CT: control target
= control target key end

     0   :  { %vm204_vm0 = vcmask 125952   ;;  %s448_s0 = inlined_call_operand.vmem [shape: bf16[128,16], index: 0, kind: input, shape index: {}]   ;;  %s449_s1 = inlined_call_operand.vmem [shape: f32[1,16], index: 1, kind: input, shape index: {}]   ;;  %s450_s2 = inlined_call_operand.vmem [shape: f32[1,16], index: 2, kind: input, shape index: {}]   ;;  %s451_s3 = inlined_call_operand.vmem [shape: bf16[128,16], index: 3, kind: output, shape index: {}]  }
   0x1   :  { %v260_v0 = vld [vmem:[%s448_s0] sm:$0xff]   ;;  %v291_v4 = vld [vmem:[%s448_s0 + $0x8] sm:$0xff]   ;;  %v292_v5 = vld [vmem:[%s448_s0 + $0x10] sm:$0xff]  }
   0x2   :  { %v324_v1 = vld [vmem:[%s449_s1] ss:$0 sm:$0xff]  ;;  %v261_v2 = vunpack.c.l.bf16 %v260_v0  ;;  %v262_v3 = vunpack.c.h.bf16 %v260_v0  ;;  %v293_v6 = vld [vmem:[%s448_s0 + $0x18] sm:$0xff]   ;;  %v265_v8 = vunpack.c.l.bf16 %v291_v4  ;;  %v266_v9 = vunpack.c.h.bf16 %v291_v4  ;;  %v295_v40 = vld [vmem:[%s448_s0 + $0x28] sm:$0xff]  }
   0x3   :  { %v338_v7 = vld [vmem:[%s450_s2] ss:$0 sm:$0xff]  ;;  %v269_v10 = vunpack.c.l.bf16 %v292_v5  ;;  %v270_v11 = vunpack.c.h.bf16 %v292_v5  ;;  %v273_v14 = vunpack.c.l.bf16 %v293_v6  ;;  %v274_v15 = vunpack.c.h.bf16 %v293_v6  ;;  %v296_v52 = vld [vmem:[%s448_s0 + $0x30] sm:$0xff]  }
   0x4   :  { %v53_v12 = vmul.f32 %v261_v2, %v324_v1  ;;  %v54_v13 = vmul.f32 %v262_v3, %v324_v1  ;;  %v55_v16 = vmul.f32 %v265_v8, %v324_v1  ;;  %v56_v17 = vmul.f32 %v266_v9, %v324_v1  ;;  %v294_v39 = vld [vmem:[%s448_s0 + $0x20] sm:$0xff]  }
   0x5   :  { %v57_v18 = vmul.f32 %v269_v10, %v324_v1  ;;  %v58_v19 = vmul.f32 %v270_v11, %v324_v1  ;;  %v59_v22 = vmul.f32 %v273_v14, %v324_v1  ;;  %v60_v23 = vmul.f32 %v274_v15, %v324_v1 }
   0x6   :  { %v76_v20 = vadd.f32 %v338_v7, %v53_v12  ;;  %v77_v21 = vadd.f32 %v338_v7, %v54_v13  ;;  %v78_v24 = vadd.f32 %v338_v7, %v55_v16  ;;  %v79_v25 = vadd.f32 %v338_v7, %v56_v17  ;;  %v297_v17 = vld [vmem:[%s448_s0 + $0x38] sm:$0xff]  }
   0x7   :  { %v80_v26 = vadd.f32 %v338_v7, %v57_v18  ;;  %v81_v27 = vadd.f32 %v338_v7, %v58_v19  ;;  %v82_v46 = vadd.f32 %v338_v7, %v59_v22  ;;  %v83_v47 = vadd.f32 %v338_v7, %v60_v23 }
   0x8   :  { %vm92_vm1 = vcmp.ge.f32.partialorder %v76_v20, 0.0  ;;  %v108_v28 = vmul.f32 0.2, %v76_v20  ;;  %vm93_vm2 = vcmp.ge.f32.partialorder %v77_v21, 0.0  ;;  %v109_v29 = vmul.f32 0.2, %v77_v21 }
   0x9   :  { %vm94_vm3 = vcmp.ge.f32.partialorder %v78_v24, 0.0  ;;  %v110_v30 = vmul.f32 0.2, %v78_v24  ;;  %vm95_vm4 = vcmp.ge.f32.partialorder %v79_v25, 0.0  ;;  %v111_v31 = vmul.f32 0.2, %v79_v25 }
   0xa   :  { %v124_v32 = vsel %vm92_vm1, %v76_v20, %v108_v28  ;;  %v125_v33 = vsel %vm93_vm2, %v77_v21, %v109_v29  ;;  %vm96_vm5 = vcmp.ge.f32.partialorder %v80_v26, 0.0  ;;  %v112_v34 = vmul.f32 0.2, %v80_v26 }
   0xb   :  { %v243_v35 = vpack.c.bf16 %v124_v32, %v124_v32  ;;  %v244_v36 = vpack.c.bf16 %v125_v33, %v125_v33  ;;  %v126_v37 = vsel %vm94_vm3, %v78_v24, %v110_v30  ;;  %v127_v38 = vsel %vm95_vm4, %v79_v25, %v111_v31 }
   0xc   :  { %v245_v41 = vpack.c.bf16 %v126_v37, %v126_v37  ;;  %v246_v42 = vpack.c.bf16 %v127_v38, %v127_v38  ;;  %v128_v43 = vsel %vm96_vm5, %v80_v26, %v112_v34  ;;  %vm97_vm6 = vcmp.ge.f32.partialorder %v81_v27, 0.0 }
   0xd   :  { %205 = vst.msk [vmem:[%s451_s3] sm:$0xf] %vm204_vm0, %v243_v35  ;;  %206 = vst.msk [vmem:[%s451_s3 + $0x4] sm:$0xf] %vm204_vm0, %v244_v36  ;;  %v247_v44 = vpack.c.bf16 %v128_v43, %v128_v43  ;;  %v113_v45 = vmul.f32 0.2, %v81_v27  ;;  %v277_v48 = vunpack.c.l.bf16 %v294_v39  ;;  %v278_v49 = vunpack.c.h.bf16 %v294_v39 }
   0xe   :  { %207 = vst.msk [vmem:[%s451_s3 + $0x8] sm:$0xf] %vm204_vm0, %v245_v41  ;;  %208 = vst.msk [vmem:[%s451_s3 + $0xc] sm:$0xf] %vm204_vm0, %v246_v42  ;;  %v281_v50 = vunpack.c.l.bf16 %v295_v40  ;;  %v282_v51 = vunpack.c.h.bf16 %v295_v40  ;;  %vm98_vm7 = vcmp.ge.f32.partialorder %v82_v46, 0.0  ;;  %vm99_vm8 = vcmp.ge.f32.partialorder %v83_v47, 0.0 }
   0xf   :  { %209 = vst.msk [vmem:[%s451_s3 + $0x10] sm:$0xf] %vm204_vm0, %v247_v44  ;;  %v129_v53 = vsel %vm97_vm6, %v81_v27, %v113_v45  ;;  %v114_v54 = vmul.f32 0.2, %v82_v46  ;;  %v115_v56 = vmul.f32 0.2, %v83_v47  ;;  %v61_v57 = vmul.f32 %v277_v48, %v324_v1 }
  0x10   :  { %v248_v55 = vpack.c.bf16 %v129_v53, %v129_v53  ;;  %v62_v58 = vmul.f32 %v278_v49, %v324_v1  ;;  %v63_v60 = vmul.f32 %v281_v50, %v324_v1  ;;  %v64_v61 = vmul.f32 %v282_v51, %v324_v1 }
  0x11   :  { %v130_v59 = vsel %vm98_vm7, %v82_v46, %v114_v54  ;;  %v285_v62 = vunpack.c.l.bf16 %v296_v52  ;;  %v131_v0 = vsel %vm99_vm8, %v83_v47, %v115_v56  ;;  %v84_v2 = vadd.f32 %v338_v7, %v61_v57 }
  0x12   :  { %210 = vst.msk [vmem:[%s451_s3 + $0x14] sm:$0xf] %vm204_vm0, %v248_v55  ;;  %v249_v63 = vpack.c.bf16 %v130_v59, %v130_v59  ;;  %v85_v3 = vadd.f32 %v338_v7, %v62_v58  ;;  %v250_v4 = vpack.c.bf16 %v131_v0, %v131_v0  ;;  %v86_v5 = vadd.f32 %v338_v7, %v63_v60 }
  0x13   :  { %v87_v6 = vadd.f32 %v338_v7, %v64_v61  ;;  %v65_v8 = vmul.f32 %v285_v62, %v324_v1  ;;  %vm100_vm9 = vcmp.ge.f32.partialorder %v84_v2, 0.0  ;;  %v116_v9 = vmul.f32 0.2, %v84_v2 }
  0x14   :  { %211 = vst.msk [vmem:[%s451_s3 + $0x18] sm:$0xf] %vm204_vm0, %v249_v63  ;;  %vm101_vm10 = vcmp.ge.f32.partialorder %v85_v3, 0.0  ;;  %v117_v10 = vmul.f32 0.2, %v85_v3  ;;  %vm102_vm11 = vcmp.ge.f32.partialorder %v86_v5, 0.0  ;;  %v286_v16 = vunpack.c.h.bf16 %v296_v52 }
  0x15   :  { %212 = vst.msk [vmem:[%s451_s3 + $0x1c] sm:$0xf] %vm204_vm0, %v250_v4  ;;  %v118_v11 = vmul.f32 0.2, %v86_v5  ;;  %vm103_vm12 = vcmp.ge.f32.partialorder %v87_v6, 0.0  ;;  %v132_v13 = vsel %vm100_vm9, %v84_v2, %v116_v9  ;;  %v88_v15 = vadd.f32 %v338_v7, %v65_v8 }
  0x16   :  { %v119_v12 = vmul.f32 0.2, %v87_v6  ;;  %v133_v14 = vsel %vm101_vm10, %v85_v3, %v117_v10  ;;  %v251_v18 = vpack.c.bf16 %v132_v13, %v132_v13  ;;  %v66_v25 = vmul.f32 %v286_v16, %v324_v1 }
  0x17   :  { %v252_v19 = vpack.c.bf16 %v133_v14, %v133_v14  ;;  %v134_v20 = vsel %vm102_vm11, %v86_v5, %v118_v11  ;;  %vm104_vm13 = vcmp.ge.f32.partialorder %v88_v15, 0.0  ;;  %v120_v24 = vmul.f32 0.2, %v88_v15 }
  0x18   :  { %v135_v21 = vsel %vm103_vm12, %v87_v6, %v119_v12  ;;  %v253_v22 = vpack.c.bf16 %v134_v20, %v134_v20  ;;  %213 = vst.msk [vmem:[%s451_s3 + $0x20] sm:$0xf] %vm204_vm0, %v251_v18  ;;  %v289_v26 = vunpack.c.l.bf16 %v297_v17  ;;  %v290_v27 = vunpack.c.h.bf16 %v297_v17 }
  0x19   :  { %v254_v23 = vpack.c.bf16 %v135_v21, %v135_v21  ;;  %214 = vst.msk [vmem:[%s451_s3 + $0x24] sm:$0xf] %vm204_vm0, %v252_v19  ;;  %v136_v28 = vsel %vm104_vm13, %v88_v15, %v120_v24  ;;  %v89_v30 = vadd.f32 %v338_v7, %v66_v25 }
  0x1a   :  { %215 = vst.msk [vmem:[%s451_s3 + $0x28] sm:$0xf] %vm204_vm0, %v253_v22  ;;  %v255_v29 = vpack.c.bf16 %v136_v28, %v136_v28  ;;  %v67_v31 = vmul.f32 %v289_v26, %v324_v1  ;;  %v68_v32 = vmul.f32 %v290_v27, %v324_v1 }
  0x1b   :  { %216 = vst.msk [vmem:[%s451_s3 + $0x2c] sm:$0xf] %vm204_vm0, %v254_v23  ;;  %vm105_vm14 = vcmp.ge.f32.partialorder %v89_v30, 0.0  ;;  %v121_v33 = vmul.f32 0.2, %v89_v30 }
  0x1c   :  { %217 = vst.msk [vmem:[%s451_s3 + $0x30] sm:$0xf] %vm204_vm0, %v255_v29  ;;  %v90_v34 = vadd.f32 %v338_v7, %v67_v31  ;;  %v91_v35 = vadd.f32 %v338_v7, %v68_v32 }
  0x1d   :  { %v137_v36 = vsel %vm105_vm14, %v89_v30, %v121_v33 }
  0x1e   :  { %vm106_vm15 = vcmp.ge.f32.partialorder %v90_v34, 0.0  ;;  %v122_v37 = vmul.f32 0.2, %v90_v34  ;;  %vm107_vm1 = vcmp.ge.f32.partialorder %v91_v35, 0.0  ;;  %v256_v38 = vpack.c.bf16 %v137_v36, %v137_v36 }
  0x1f   :  { %v123_v39 = vmul.f32 0.2, %v91_v35 }
  0x20   :  { %v138_v40 = vsel %vm106_vm15, %v90_v34, %v122_v37  ;;  %218 = vst.msk [vmem:[%s451_s3 + $0x34] sm:$0xf] %vm204_vm0, %v256_v38 }
  0x21   :  { %v257_v1 = vpack.c.bf16 %v138_v40, %v138_v40  ;;  %v139_v41 = vsel %vm107_vm1, %v91_v35, %v123_v39 }
  0x22   :  { %v258_v42 = vpack.c.bf16 %v139_v41, %v139_v41 }
  0x23   :  { %219 = vst.msk [vmem:[%s451_s3 + $0x38] sm:$0xf] %vm204_vm0, %v257_v1 }
  0x24   :  { %220 = vst.msk [vmem:[%s451_s3 + $0x3c] sm:$0xf] %vm204_vm0, %v258_v42 }

// kernel: decoder_forward.18
= control target key start
LH: loop header
LB: loop body
LE: loop exit
PB: predicated region body
PF: predicated region fallthrough
CT: control target
= control target key end

     0   :  { %s1148_s20 = smov 0   ;;  %s1150_s21 = smov 0   ;;  %s1247_s0 = inlined_call_operand.<no memory space> [shape: f32[1,1], index: 0, kind: input, shape index: {}]   ;;  %s1248_s1 = inlined_call_operand.vmem [shape: bf16[2,64,2], index: 1, kind: input, shape index: {}]   ;;  %s1249_s2 = inlined_call_operand.vmem [shape: bf16[2,64,2], index: 2, kind: input, shape index: {}]   ;;  %s1250_s3 = inlined_call_operand.vmem [shape: bf16[2,64,16], index: 3, kind: input, shape index: {}]   ;;  %s1251_s4 = inlined_call_operand.vmem [shape: bf16[2,64,16], index: 4, kind: input, shape index: {}]   ;;  %s1252_s5 = inlined_call_operand.vmem [shape: bf16[2,64,16], index: 5, kind: output, shape index: {}]  }
   0x1   :  { %10 = sst [smem:[#allocation2]] %s1247_s0  ;;  %s1152_s22 = smov 0  }
   0x2 LB: > { %s28_s0 = sadd.s32 1, %s1109_s21  ;;  %p898_p0 = scmp.ge.s32.totalorder %s1113_s22, 1  ;;  %s1113_s22 = sphi %s1152_s22, %s16_s22   ;;  %s1109_s21 = sphi %s1150_s21, %s1254_s21   ;;  %s1105_s20 = sphi %s1148_s20, %s1253_s20  }
   0x3   : > { %p30_p1 = scmp.ge.s32.totalorder %s28_s0, 2  ;;  %p246_p2 = scmp.lt.s32.totalorder %s1113_s22, 3 }
   0x5   : > { %s1256_s0 = smov (%p30_p1, %s28_s0), 0  ;;  %p247_p3 = pnand %p898_p0, %p246_p2 }
   0x6   : > { %p302_p4 = scmp.lt.s32.totalorder (!%p247_p3), %s1105_s20, 1  ;;  %vm406_vm0 = vcmask (!%p247_p3), 15360   ;;  %vm496_vm1 = vcmask (!%p247_p3), 523264   ;;  %s690_s8 = sld [smem:[#allocation2]] (!%p247_p3)  ;;  %vm756_vm2 = vcmask (!%p247_p3), 125952  }
   0x7   : > { %250 = sbr.rel (%p247_p3) target bundleno = 817 (0x331), region = 40 }
   0xe   : > { %s1258_s20 = smov (!%p302_p4, %s1105_s20), 1 }
   0xf   : > { %s1166_s23 = sshll.u32 %s1258_s20, 5 }
  0x10   : > { %s315_s26 = scalar_lea.vmem %s1249_s2, %s1166_s23  ;;  %s309_s29 = scalar_lea.vmem %s1248_s1, %s1166_s23 }
  0x11   : > { %v1047_v0 = vld [vmem:[%s315_s26] sm:$0xff]   ;;  %v1048_v1 = vld [vmem:[%s315_s26 + $0x8] sm:$0xff]   ;;  %v1049_v5 = vld [vmem:[%s315_s26 + $0x10] sm:$0xff]   ;;  %s320_s7 = scalar_lea.vmem %s1250_s3, %s1166_s23  ;;  %s329_s11 = scalar_lea.vmem %s1251_s4, %s1166_s23 }
  0x12   : > { %1019 = vmatprep.subr.msk.bf16.mxu0 %vm406_vm0, %v1047_v0  ;;  %v420_v2 = vsel %vm406_vm0, %v1047_v0, 0  ;;  %v1051_v3 = vld [vmem:[%s309_s29] sm:$0xff]   ;;  %v423_v4 = vsel %vm406_vm0, %v1048_v1, 0  ;;  %v426_v6 = vsel %vm406_vm0, %v1049_v5, 0  ;;  %v1050_v7 = vld [vmem:[%s315_s26 + $0x18] sm:$0xff]   ;;  %v1052_v9 = vld [vmem:[%s309_s29 + $0x8] sm:$0xff]   ;;  %s1220_s14 = scalar_lea.vmem %s1252_s5, %s1166_s23 }
  0x13   : > { %988 = vmatpush3.bf16.xpose.msra.mxu0 %v420_v2  ;;  %995 = vmatprep.mubr.msk.bf16.mxu0 %vm406_vm0, %v1051_v3  ;;  %v429_v8 = vsel %vm406_vm0, %v1050_v7, 0  ;;  %v1053_v10 = vld [vmem:[%s309_s29 + $0x10] sm:$0xff]   ;;  %v1054_v11 = vld [vmem:[%s309_s29 + $0x18] sm:$0xff]  }
  0x14   : > { %1020 = vmatprep.subr.msk.bf16.mxu0 %vm406_vm0, %v1048_v1 }
  0x1b   : > { %990 = vmatpush3.bf16.xpose.msra.mxu0 %v423_v4  ;;  %v1055_v4 = vld [vmem:[%s320_s7] sm:$0xff]  }
  0x1c   : > { %1021 = vmatprep.subr.msk.bf16.mxu0 %vm406_vm0, %v1049_v5  ;;  %1003 = vmatprep.subr.bf16.mxu1 %v1055_v4  ;;  %v1056_v5 = vld [vmem:[%s320_s7 + $0x8] sm:$0xff]  }
  0x1d   : > { %1004 = vmatpush3.bf16.msra.mxu1 %v1055_v4 }
  0x1e   : > { %1005 = vmatprep.subr.bf16.mxu1 %v1056_v5 }
  0x21   : > { %1006 = vmatpush3.bf16.msra.mxu1 %v1056_v5 }
  0x23   : > { %992 = vmatpush3.bf16.xpose.msra.mxu0 %v426_v6  ;;  %v1057_v6 = vld [vmem:[%s320_s7 + $0x10] sm:$0xff]  }
  0x24   : > { %1022 = vmatprep.subr.msk.bf16.mxu0 %vm406_vm0, %v1050_v7  ;;  %1007 = vmatprep.subr.bf16.mxu1 %v1057_v6  ;;  %v1058_v7 = vld [vmem:[%s320_s7 + $0x18] sm:$0xff]  }
  0x25   : > { %1008 = vmatpush3.bf16.msra.mxu1 %v1057_v6 }
  0x26   : > { %1009 = vmatprep.subr.bf16.mxu1 %v1058_v7 }
  0x29   : > { %1010 = vmatpush3.bf16.msra.mxu1 %v1058_v7 }
  0x2b   : > { %994 = vmatpush3.bf16.xpose.msra.mxu0 %v429_v8 }
  0x32   : > { %996 = vmatmul.mubr.msk.bf16.vlgmr.msra.gmra.mrb[0].mxu0 %vm406_vm0, %v1052_v9 }
  0x33   : > { %999 = vmatprep.mubr.msk.bf16.mxu0 %vm406_vm0, %v1053_v10 }
  0x3a   : > { %1000 = vmatmul.mubr.msk.bf16.gmra.mrb[4].mxu0 %vm406_vm0, %v1054_v11 }
 0x105   : > { %v997_v12 = vpop.f32.mrb[0].mxu0 }
 0x106   : > { %v465_v13 = vpop.f32.mrb[1].mxu0  ;;  %v503_v14 = vsel %vm496_vm1, %v997_v12, -inf }
 0x107   : > { %504 = vmax.xlane.f32.xlu1 %v503_v14  ;;  %v998_v15 = vpop.f32.mrb[2].mxu0  ;;  %v497_v16 = vsel %vm496_vm1, %v465_v13, -inf }
 0x108   : > { %498 = vmax.xlane.f32.xlu0 %v497_v16  ;;  %v468_v17 = vpop.f32.mrb[3].mxu0  ;;  %v506_v18 = vsel %vm496_vm1, %v998_v15, -inf }
 0x109   : > { %v500_v19 = vsel %vm496_vm1, %v468_v17, -inf }
 0x10b   : > { %507 = vmax.xlane.f32.xlu1 %v506_v18 }
 0x10c   : > { %501 = vmax.xlane.f32.xlu0 %v500_v19 }
 0x10d   : > { %v1001_v20 = vpop.f32.mrb[4].mxu0 }
 0x10e   : > { %v481_v21 = vpop.f32.mrb[5].mxu0  ;;  %v515_v26 = vsel %vm496_vm1, %v1001_v20, -inf }
 0x10f   : > { %v1002_v22 = vpop.f32.mrb[6].mxu0  ;;  %v509_v23 = vsel %vm496_vm1, %v481_v21, -inf }
 0x110   : > { %510 = vmax.xlane.f32.xlu0 %v509_v23  ;;  %v484_v24 = vpop.f32.mrb[7].mxu0  ;;  %v518_v27 = vsel %vm496_vm1, %v1002_v22, -inf }
 0x111   : > { %v512_v25 = vsel %vm496_vm1, %v484_v24, -inf }
 0x112   : > { %513 = vmax.xlane.f32.xlu1 %v512_v25 }
 0x114   : > { %516 = vmax.xlane.f32.xlu0 %v515_v26 }
 0x116   : > { %519 = vmax.xlane.f32.xlu1 %v518_v27 }
 0x194   : > { %v505_v28 = vpop.xlane.xlu1 %504 }
 0x195   : > { %v523_v29 = vsub.f32 %v997_v12, %v505_v28  ;;  %v499_v30 = vpop.xlane.xlu0 %498 }
 0x196   : > { %v521_v31 = vsub.f32 %v465_v13, %v499_v30 }
 0x197   : > { %v533_v32 = vmul.f32 1.442695, %v523_v29 }
 0x198   : > { %v529_v33 = vmul.f32 1.442695, %v521_v31  ;;  %v508_v34 = vpop.xlane.xlu1 %507 }
 0x199   : > { %v524_v35 = vsub.f32 %v998_v15, %v508_v34  ;;  %v502_v36 = vpop.xlane.xlu0 %501 }
 0x19a   : > { %1059 = vpow2.f32 %v529_v33  ;;  %v522_v37 = vsub.f32 %v468_v17, %v502_v36  ;;  %v968_v36 = vld [vmem:[%s329_s11 + $0x8] sm:$0xff]  }
 0x19b   : > { %1061 = vpow2.f32 %v533_v32  ;;  %v535_v38 = vmul.f32 1.442695, %v524_v35 }
 0x19c   : > { %v531_v39 = vmul.f32 1.442695, %v522_v37  ;;  %v953_v37 = vld [vmem:[%s329_s11] sm:$0xff]  }
 0x19d   : > { %v511_v40 = vpop.xlane.xlu0 %510 }
 0x19e   : > { %1063 = vpow2.f32 %v531_v39  ;;  %v525_v41 = vsub.f32 %v481_v21, %v511_v40  ;;  %v958_v39 = vunpack.c.l.bf16 %v968_v36 }
 0x19f   : > { %v514_v42 = vpop.xlane.xlu1 %513  ;;  %1065 = vpow2.f32 %v535_v38  ;;  %v691_v38 = vstv %s690_s8 }
 0x1a0   : > { %v537_v43 = vmul.f32 1.442695, %v525_v41  ;;  %v526_v44 = vsub.f32 %v484_v24, %v514_v42  ;;  %v954_v41 = vunpack.c.l.bf16 %v953_v37 }
 0x1a1   : > { %v517_v45 = vpop.xlane.xlu0 %516 }
 0x1a2   : > { %1067 = vpow2.f32 %v537_v43  ;;  %v539_v46 = vmul.f32 1.442695, %v526_v44  ;;  %v527_v47 = vsub.f32 %v1001_v20, %v517_v45  ;;  %v959_v44 = vunpack.c.h.bf16 %v968_v36 }
 0x1a3   : > { %v520_v48 = vpop.xlane.xlu1 %519 }
 0x1a4   : > { %v1060_v49 = vpop.eup %1059  ;;  %1069 = vpow2.f32 %v539_v46  ;;  %v541_v50 = vmul.f32 1.442695, %v527_v47  ;;  %v528_v51 = vsub.f32 %v1002_v22, %v520_v48  ;;  %v955_v47 = vunpack.c.h.bf16 %v953_v37 }
 0x1a5   : > { %v545_v52 = vsel %vm496_vm1, %v1060_v49, 0.0  ;;  %v1062_v53 = vpop.eup %1061 }
 0x1a6   : > { %1071 = vpow2.f32 %v541_v50  ;;  %v543_v54 = vmul.f32 1.442695, %v528_v51  ;;  %546 = vadd.xlane.f32.xlu0 %v545_v52  ;;  %v551_v56 = vsel %vm496_vm1, %v1062_v53, 0.0 }
 0x1a8   : > { %v1064_v55 = vpop.eup %1063  ;;  %1073 = vpow2.f32 %v543_v54 }
 0x1a9   : > { %v548_v57 = vsel %vm496_vm1, %v1064_v55, 0.0  ;;  %v1066_v58 = vpop.eup %1065 }
 0x1aa   : > { %552 = vadd.xlane.f32.xlu0 %v551_v56  ;;  %549 = vadd.xlane.f32.xlu1 %v548_v57  ;;  %v554_v61 = vsel %vm496_vm1, %v1066_v58, 0.0  ;;  %v969_v56 = vld [vmem:[%s329_s11 + $0x10] sm:$0xff]  }
 0x1ab   : > { %v963_v5 = vunpack.c.h.bf16 %v969_v56 }
 0x1ac   : > { %v1068_v59 = vpop.eup %1067 }
 0x1ad   : > { %v557_v60 = vsel %vm496_vm1, %v1068_v59, 0.0 }
 0x1ae   : > { %v1070_v62 = vpop.eup %1069  ;;  %558 = vadd.xlane.f32.xlu0 %v557_v60  ;;  %555 = vadd.xlane.f32.xlu1 %v554_v61 }
 0x1af   : > { %v560_v1 = vsel %vm496_vm1, %v1070_v62, 0.0 }
 0x1b0   : > { %v1072_v63 = vpop.eup %1071 }
 0x1b1   : > { %v563_v0 = vsel %vm496_vm1, %v1072_v63, 0.0 }
 0x1b2   : > { %v1074_v2 = vpop.eup %1073  ;;  %564 = vadd.xlane.f32.xlu0 %v563_v0  ;;  %561 = vadd.xlane.f32.xlu1 %v560_v1 }
 0x1b3   : > { %v566_v3 = vsel %vm496_vm1, %v1074_v2, 0.0 }
 0x1b6   : > { %567 = vadd.xlane.f32.xlu1 %v566_v3 }
 0x233   : > { %v547_v8 = vpop.xlane.xlu0 %546 }
 0x234   : > { %1075 = vrcp.f32 %v547_v8 }
 0x237   : > { %v553_v9 = vpop.xlane.xlu0 %552  ;;  %v550_v10 = vpop.xlane.xlu1 %549 }
 0x238   : > { %1077 = vrcp.f32 %v550_v10 }
 0x239   : > { %1079 = vrcp.f32 %v553_v9 }
 0x23b   : > { %v559_v11 = vpop.xlane.xlu0 %558  ;;  %v556_v12 = vpop.xlane.xlu1 %555 }
 0x23c   : > { %1081 = vrcp.f32 %v556_v12 }
 0x23d   : > { %1083 = vrcp.f32 %v559_v11 }
 0x23e   : > { %v1076_v15 = vpop.eup %1075 }
 0x23f   : > { %v565_v13 = vpop.xlane.xlu0 %564  ;;  %v562_v14 = vpop.xlane.xlu1 %561  ;;  %v577_v18 = vmul.f32 %v1076_v15, %v1060_v49 }
 0x240   : > { %1085 = vrcp.f32 %v562_v14 }
 0x241   : > { %1087 = vrcp.f32 %v565_v13 }
 0x242   : > { %v1078_v16 = vpop.eup %1077 }
 0x243   : > { %v568_v17 = vpop.xlane.xlu1 %567  ;;  %v578_v19 = vmul.f32 %v1078_v16, %v1064_v55  ;;  %v1080_v20 = vpop.eup %1079 }
 0x244   : > { %1089 = vrcp.f32 %v568_v17  ;;  %v579_v23 = vmul.f32 %v1080_v20, %v1062_v53  ;;  %v970_v53 = vld [vmem:[%s329_s11 + $0x18] sm:$0xff]  }
 0x245   : > { %v585_v21 = vpack.c.bf16 %v578_v19, %v577_v18  ;;  %v966_v60 = vunpack.c.l.bf16 %v970_v53 }
 0x246   : > { %v1082_v22 = vpop.eup %1081 }
 0x247   : > { %1011 = vmatprep.mubr.msk.bf16.mxu1 %vm496_vm1, %v585_v21  ;;  %v580_v24 = vmul.f32 %v1082_v22, %v1066_v58  ;;  %v1084_v25 = vpop.eup %1083 }
 0x248   : > { %v581_v29 = vmul.f32 %v1084_v25, %v1068_v59 }
 0x249   : > { %v586_v26 = vpack.c.bf16 %v580_v24, %v579_v23 }
 0x24a   : > { %v1086_v27 = vpop.eup %1085 }
 0x24b   : > { %v1088_v28 = vpop.eup %1087  ;;  %1012 = vmatmul.mubr.msk.bf16.vlgmr.msra.gmra.mrb[0].mxu1 %vm496_vm1, %v586_v26  ;;  %v582_v30 = vmul.f32 %v1086_v27, %v1070_v62 }
 0x24c   : > { %v583_v33 = vmul.f32 %v1088_v28, %v1072_v63  ;;  %v962_v63 = vunpack.c.l.bf16 %v969_v56 }
 0x24d   : > { %v587_v32 = vpack.c.bf16 %v582_v30, %v581_v29 }
 0x24e   : > { %v1090_v31 = vpop.eup %1089 }
 0x24f   : > { %v584_v34 = vmul.f32 %v1090_v31, %v1074_v2  ;;  %1015 = vmatprep.mubr.msk.bf16.mxu1 %vm496_vm1, %v587_v32  ;;  %v967_v2 = vunpack.c.h.bf16 %v970_v53 }
 0x251   : > { %v588_v35 = vpack.c.bf16 %v584_v34, %v583_v33 }
 0x253   : > { %1016 = vmatmul.mubr.msk.bf16.gmra.mrb[4].mxu1 %vm496_vm1, %v588_v35 }
 0x31e   : > { %v1013_v40 = vpop.f32.mrb[0].mxu1 }
 0x31f   : > { %v694_v42 = vmul.f32 %v1013_v40, %v691_v38  ;;  %v659_v43 = vpop.f32.mrb[1].mxu1 }
 0x320   : > { %v692_v45 = vmul.f32 %v691_v38, %v659_v43  ;;  %v1014_v46 = vpop.f32.mrb[2].mxu1 }
 0x321   : > { %v718_v48 = vadd.f32 %v958_v39, %v694_v42  ;;  %v695_v49 = vmul.f32 %v1014_v46, %v691_v38  ;;  %v662_v50 = vpop.f32.mrb[3].mxu1 }
 0x322   : > { %v716_v51 = vadd.f32 %v954_v41, %v692_v45  ;;  %v693_v52 = vmul.f32 %v691_v38, %v662_v50 }
 0x323   : > { %v946_v54 = vpack.c.bf16 %v718_v48, %v718_v48  ;;  %v719_v55 = vadd.f32 %v959_v44, %v695_v49 }
 0x324   : > { %v944_v57 = vpack.c.bf16 %v716_v51, %v716_v51  ;;  %v717_v58 = vadd.f32 %v955_v47, %v693_v52 }
 0x325   : > { %759 = vst.msk [vmem:[%s1220_s14 + $0x8] sm:$0xf] %vm756_vm2, %v946_v54  ;;  %v947_v59 = vpack.c.bf16 %v719_v55, %v719_v55 }
 0x326   : > { %757 = vst.msk [vmem:[%s1220_s14] sm:$0xf] %vm756_vm2, %v944_v57  ;;  %v945_v61 = vpack.c.bf16 %v717_v58, %v717_v58  ;;  %v1017_v62 = vpop.f32.mrb[4].mxu1 }
 0x327   : > { %760 = vst.msk [vmem:[%s1220_s14 + $0xc] sm:$0xf] %vm756_vm2, %v947_v59  ;;  %v698_v0 = vmul.f32 %v1017_v62, %v691_v38  ;;  %v675_v1 = vpop.f32.mrb[5].mxu1 }
 0x328   : > { %758 = vst.msk [vmem:[%s1220_s14 + $0x4] sm:$0xf] %vm756_vm2, %v945_v61  ;;  %v696_v3 = vmul.f32 %v691_v38, %v675_v1  ;;  %v1018_v4 = vpop.f32.mrb[6].mxu1 }
 0x329   : > { %v722_v6 = vadd.f32 %v966_v60, %v698_v0  ;;  %v699_v7 = vmul.f32 %v1018_v4, %v691_v38  ;;  %v678_v8 = vpop.f32.mrb[7].mxu1 }
 0x32a   : > { %v720_v9 = vadd.f32 %v962_v63, %v696_v3  ;;  %v697_v10 = vmul.f32 %v691_v38, %v678_v8 }
 0x32b   : > { %v950_v11 = vpack.c.bf16 %v722_v6, %v722_v6  ;;  %v723_v12 = vadd.f32 %v967_v2, %v699_v7 }
 0x32c   : > { %v948_v13 = vpack.c.bf16 %v720_v9, %v720_v9  ;;  %v721_v14 = vadd.f32 %v963_v5, %v697_v10 }
 0x32d   : > { %763 = vst.msk [vmem:[%s1220_s14 + $0x18] sm:$0xf] %vm756_vm2, %v950_v11  ;;  %v951_v15 = vpack.c.bf16 %v723_v12, %v723_v12 }
 0x32e   : > { %761 = vst.msk [vmem:[%s1220_s14 + $0x10] sm:$0xf] %vm756_vm2, %v948_v13  ;;  %v949_v16 = vpack.c.bf16 %v721_v14, %v721_v14 }
 0x32f   : > { %764 = vst.msk [vmem:[%s1220_s14 + $0x1c] sm:$0xf] %vm756_vm2, %v951_v15 }
 0x330   : > { %762 = vst.msk [vmem:[%s1220_s14 + $0x14] sm:$0xf] %vm756_vm2, %v949_v16 }
 0x331 PF: > { %s16_s22 = sadd.s32 1, %s1113_s22   ;;  %s1253_s20 = smov %s1109_s21 }
 0x332   : > { %p13_p5 = scmp.ge.s32.totalorder %s16_s22, 4   ;;  %s1254_s21 = smov %s1256_s0 }
 0x334   :  { %15 = sbr.rel (!%p13_p5) target bundleno = 2 (0x2), region = 79 }

// kernel: decoder_forward.15
= control target key start
LH: loop header
LB: loop body
LE: loop exit
PB: predicated region body
PF: predicated region fallthrough
CT: control target
= control target key end

     0   :  { %s2071_s18 = smov 0   ;;  %s2472_s0 = inlined_call_operand.vmem [shape: bf16[2,10,10,32], index: 0, kind: input, shape index: {}]   ;;  %s2473_s1 = inlined_call_operand.vmem [shape: bf16[9,32,16], index: 1, kind: input, shape index: {}]   ;;  %s2474_s2 = inlined_call_operand.vmem [shape: f32[1,16], index: 2, kind: input, shape index: {}]   ;;  %s2475_s3 = inlined_call_operand.vmem [shape: bf16[2,64,16], index: 3, kind: output, shape index: {0}]   ;;  %s2476_s4 = inlined_call_operand.vmem [shape: f32[2,1,16], index: 4, kind: output, shape index: {1}]   ;;  %s2477_s5 = inlined_call_operand.vmem [shape: f32[2,1,16], index: 5, kind: output, shape index: {2}]  }
   0x1 LB: > { %s1616_s19 = sadd.s32 4294967295, %s2039_s18   ;;  %p1620_p0 = scmp.ge.s32.totalorder %s2039_s18, 1  ;;  %s2039_s18 = sphi %s2071_s18, %s16_s18  }
   0x2   : > { %p192_p1 = scmp.lt.s32.totalorder %s2039_s18, 3 }
   0x4   : > { %p193_p2 = pnand %p1620_p0, %p192_p1 }
   0x5   : > { %v2006_v0 = vld [vmem:[%s2473_s1 + $0x10] sm:$0xff] (!%p193_p2)   ;;  %p226_p3 = scmp.lt.s32.totalorder (!%p193_p2), %s1616_s19, 1  ;;  %v2085_v1 = vld [vmem:[%s2473_s1 + $0x40] sm:$0xff] (!%p193_p2)   ;;  %v2008_v2 = vld [vmem:[%s2473_s1 + $0x18] sm:$0xff] (!%p193_p2)   ;;  %vm267_vm0 = vsmask.f32 (!%p193_p2), 3328 }
   0x6   : > { %196 = sbr.rel (%p193_p2) target bundleno = 347 (0x15b), region = 32  ;;  %1821 = vmatprep.subr.bf16.mxu1 (!%p193_p2), %v2006_v0  ;;  %1869 = vmatprep.subr.bf16.mxu0 (!%p193_p2), %v2085_v1  ;;  %v2096_v3 = vld [vmem:[%s2473_s1 + $0x48] sm:$0xff] (!%p193_p2)   ;;  %v2103_v4 = vld [vmem:[%s2473_s1] sm:$0xff] (!%p193_p2)   ;;  %vm268_vm1 = vsmask.f32 (!%p193_p2), 7440  ;;  %v2114_v5 = vld [vmem:[%s2473_s1 + $0x50] sm:$0xff] (!%p193_p2)  }
   0x7   : > { %1822 = vmatpush3.bf16.msra.mxu1 (!%p193_p2), %v2006_v0  ;;  %1870 = vmatpush3.bf16.msra.mxu0 (!%p193_p2), %v2085_v1  ;;  %vm411_vm2 = vcmask (!%p193_p2), 261120   ;;  %vm2160_vm3 = vmor (!%p193_p2), %vm267_vm0, %vm268_vm1  ;;  %vm606_vm4 = vcmask (!%p193_p2), 1042432   ;;  %vm607_vm5 = vcmask (!%p193_p2), 1046532   ;;  %vm1502_vm7 = vcmask (!%p193_p2), 125952  }
   0x8   : > { %1823 = vmatprep.subr.bf16.mxu1 (!%p193_p2), %v2008_v2  ;;  %1871 = vmatprep.subr.bf16.mxu0 (!%p193_p2), %v2096_v3  ;;  %vm2226_vm6 = vmor (!%p193_p2), %vm606_vm4, %vm607_vm5  ;;  %vm1416_vm8 = vcmask (!%p193_p2), 130048   ;;  %vm1438_vm9 = vcmask (!%p193_p2), 122880  }
   0xb   : > { %1824 = vmatpush3.bf16.msra.mxu1 (!%p193_p2), %v2008_v2  ;;  %1872 = vmatpush3.bf16.msra.mxu0 (!%p193_p2), %v2096_v3 }
   0xc   : > { %1833 = vmatprep.subr.bf16.mxu1 (!%p193_p2), %v2103_v4  ;;  %1881 = vmatprep.subr.bf16.mxu0 (!%p193_p2), %v2114_v5 }
   0xd   : > { %s2483_s19 = smov (!%p226_p3, %s1616_s19), 1 }
   0xe   : > { %s1997_s28 = smul.u32 80, %s2483_s19  ;;  %s1758_s14 = sshll.u32 %s2483_s19, 5 }
   0xf   : > { %s2427_s17 = scalar_lea.vmem %s2475_s3, %s1758_s14  ;;  %s238_s22 = scalar_lea.vmem %s2476_s4, %s2483_s19 }
  0x10   : > { %s2109_s8 = scalar_lea.vmem %s2472_s0, %s1997_s28  ;;  %s241_s25 = scalar_lea.vmem %s2477_s5, %s2483_s19 }
  0x11   : > { %v2117_v6 = vld [vmem:[%s2109_s8] sm:$0xf]  ;;  %v2120_v7 = vld [vmem:[%s2109_s8 + $0x4] sm:$0x1]  ;;  %v2123_v8 = vld [vmem:[%s2109_s8 + $0x8] sm:$0xf] }
  0x12   : > { %v2127_v9 = vld [vmem:[%s2109_s8 + $0xc] sm:$0x1]  ;;  %v271_v10 = vshrl.u32 %v2117_v6, 16  ;;  %v274_v11 = vshll.u32 %v2117_v6, 16  ;;  %v280_v12 = vshll.u32 %v2120_v7, 16  ;;  %v285_v13 = vshrl.u32 %v2123_v8, 16 }
  0x13   : > { %v288_v14 = vshll.u32 %v2123_v8, 16  ;;  %v294_v15 = vshll.u32 %v2127_v9, 16  ;;  %v615_v16 = vrot.slane %v2127_v9, 5  ;;  %v2138_v17 = vld [vmem:[%s2109_s8 + $0x10] sm:$0xf] }
  0x14   : > { %v273_v18 = vrot.slane %v271_v10, 4  ;;  %v276_v19 = vrot.slane %v274_v11, 5  ;;  %v282_v20 = vrot.slane %v280_v12, 5  ;;  %v287_v21 = vrot.slane %v285_v13, 4  ;;  %v2142_v22 = vld [vmem:[%s2109_s8 + $0x14] sm:$0x1] }
  0x15   : > { %v290_v23 = vrot.slane %v288_v14, 5  ;;  %v296_v24 = vrot.slane %v294_v15, 5  ;;  %v2145_v25 = vld [vmem:[%s2109_s8 + $0x18] sm:$0xf]  ;;  %v2148_v26 = vld [vmem:[%s2109_s8 + $0x1c] sm:$0x1] }
  0x16   : > { %v277_v27 = vor.u32 %v276_v19, %v273_v18  ;;  %v2151_v28 = vld [vmem:[%s2109_s8 + $0x20] sm:$0xf]  ;;  %v2154_v29 = vld [vmem:[%s2109_s8 + $0x24] sm:$0x1]  ;;  %v299_v30 = vshrl.u32 %v2138_v17, 16  ;;  %v302_v31 = vshll.u32 %v2138_v17, 16 }
  0x17   : > { %v291_v33 = vor.u32 %v290_v23, %v287_v21  ;;  %v308_v34 = vshll.u32 %v2142_v22, 16  ;;  %v313_v35 = vshrl.u32 %v2145_v25, 16  ;;  %v316_v36 = vshll.u32 %v2145_v25, 16  ;;  %v2172_v49 = vld [vmem:[%s2109_s8 + $0x28] sm:$0xf] }
  0x18   : > { %v278_v37 = vrot.slane %v277_v27, 4  ;;  %v301_v38 = vrot.slane %v299_v30, 4  ;;  %v304_v39 = vrot.slane %v302_v31, 5  ;;  %v322_v40 = vshll.u32 %v2148_v26, 16  ;;  %v2179_v54 = vld [vmem:[%s2109_s8 + $0x2c] sm:$0x1] }
  0x19   : > { %v292_v41 = vrot.slane %v291_v33, 4  ;;  %v310_v42 = vrot.slane %v308_v34, 5  ;;  %v315_v43 = vrot.slane %v313_v35, 4  ;;  %v318_v44 = vrot.slane %v316_v36, 5  ;;  %v2183_v59 = vld [vmem:[%s2109_s8 + $0x30] sm:$0xf] }
  0x1a   : > { %v283_v45 = vsel %vm2160_vm3, %v278_v37, %v282_v20  ;;  %v305_v46 = vor.u32 %v304_v39, %v301_v38  ;;  %v324_v47 = vrot.slane %v322_v40, 5  ;;  %v327_v48 = vshrl.u32 %v2151_v28, 16  ;;  %v2187_v0 = vld [vmem:[%s2109_s8 + $0x34] sm:$0x1]  ;;  %v2196_v13 = vld [vmem:[%s2109_s8 + $0x38] sm:$0xf] }
  0x1b   : > { %v297_v50 = vsel %vm2160_vm3, %v292_v41, %v296_v24  ;;  %v319_v51 = vor.u32 %v318_v44, %v315_v43  ;;  %v330_v52 = vshll.u32 %v2151_v28, 16  ;;  %v336_v53 = vshll.u32 %v2154_v29, 16  ;;  %v2202_v20 = vld [vmem:[%s2109_s8 + $0x3c] sm:$0x1]  ;;  %v2013_v24 = vld [vmem:[%s2473_s1 + $0x8] sm:$0xff]  }
  0x1c   : > { %v1628_v55 = vcombine.low %v283_v45, %v297_v50  ;;  %v306_v56 = vrot.slane %v305_v46, 4  ;;  %v329_v57 = vrot.slane %v327_v48, 4  ;;  %v619_v58 = vrot.slane %v2142_v22, 5  ;;  %v2012_v40 = vld [vmem:[%s2473_s1 + $0x58] sm:$0xff]  }
  0x1d   : > { %v320_v60 = vrot.slane %v319_v51, 4  ;;  %v332_v61 = vrot.slane %v330_v52, 5  ;;  %v338_v62 = vrot.slane %v336_v53, 5  ;;  %v623_v63 = vrot.slane %v2148_v26, 5  ;;  %v2024_v48 = vld [vmem:[%s2473_s1 + $0x78] sm:$0xff]  }
  0x1e   : > { %1825 = vmatprep.mubr.msk.bf16.mxu1 %vm411_vm2, %v1628_v55  ;;  %v311_v2 = vsel %vm2160_vm3, %v306_v56, %v310_v42  ;;  %v627_v10 = vrot.slane %v2154_v29, 5  ;;  %v341_v11 = vshrl.u32 %v2172_v49, 16  ;;  %v344_v12 = vshll.u32 %v2172_v49, 16 }
  0x1f   : > { %v325_v14 = vsel %vm2160_vm3, %v320_v60, %v324_v47  ;;  %v333_v15 = vor.u32 %v332_v61, %v329_v57  ;;  %v1688_v18 = vcombine.low %v297_v50, %v311_v2  ;;  %v350_v19 = vshll.u32 %v2179_v54, 16 }
  0x20   : > { %v2204_v21 = vcombine.low %v311_v2, %v325_v14  ;;  %v343_v22 = vrot.slane %v341_v11, 4  ;;  %v346_v23 = vrot.slane %v344_v12, 5  ;;  %v355_v27 = vshrl.u32 %v2183_v59, 16 }
  0x21   : > { %v334_v30 = vrot.slane %v333_v15, 4  ;;  %1873 = vmatprep.mubr.msk.bf16.mxu0 %vm411_vm2, %v1688_v18  ;;  %v352_v31 = vrot.slane %v350_v19, 5  ;;  %v358_v33 = vshll.u32 %v2183_v59, 16  ;;  %v364_v34 = vshll.u32 %v2187_v0, 16 }
  0x22   : > { %1826 = vmatmul.mubr.msk.bf16.vlgmr.msra.gmra.mrb[0].mxu1 %vm411_vm2, %v2204_v21  ;;  %v347_v35 = vor.u32 %v346_v23, %v343_v22  ;;  %v357_v36 = vrot.slane %v355_v27, 4  ;;  %v369_v37 = vshrl.u32 %v2196_v13, 16  ;;  %v372_v38 = vshll.u32 %v2196_v13, 16 }
  0x23   : > { %v339_v39 = vsel %vm2160_vm3, %v334_v30, %v338_v62  ;;  %1834 = vmatpush3.bf16.msra.mxu1 %v2103_v4  ;;  %v360_v41 = vrot.slane %v358_v33, 5  ;;  %v366_v42 = vrot.slane %v364_v34, 5  ;;  %v378_v43 = vshll.u32 %v2202_v20, 16  ;;  %v2233_v4 = vld [vmem:[%s2473_s1 + $0x20] sm:$0xff]  }
  0x24   : > { %v1689_v44 = vcombine.low %v325_v14, %v339_v39  ;;  %v348_v45 = vrot.slane %v347_v35, 4  ;;  %1835 = vmatprep.subr.bf16.mxu1 %v2013_v24  ;;  %v371_v46 = vrot.slane %v369_v37, 4  ;;  %v374_v47 = vrot.slane %v372_v38, 5  ;;  %v2014_v14 = vld [vmem:[%s2473_s1 + $0x60] sm:$0xff]   ;;  %v2018_v35 = vld [vmem:[%s2473_s1 + $0x68] sm:$0xff]  }
  0x25   : > { %v361_v50 = vor.u32 %v360_v41, %v357_v36  ;;  %v380_v51 = vrot.slane %v378_v43, 5  ;;  %v1649_v52 = vrot.slane %v2123_v8, 9  ;;  %v1650_v53 = vrot.slane %v2138_v17, 9  ;;  %v261_v41 = vld [vmem:[%s2109_s8 + $0x48] sm:$0xf]  ;;  %v2022_v43 = vld [vmem:[%s2473_s1 + $0x70] sm:$0xff]  }
  0x26   : > { %1874 = vmatmul.mubr.msk.bf16.vlgmr.msra.gmra.mrb[0].mxu0 %vm411_vm2, %v1689_v44  ;;  %v2240_v55 = vsel %vm2160_vm3, %v348_v45, %v352_v31  ;;  %v375_v56 = vor.u32 %v374_v47, %v371_v46  ;;  %v1651_v57 = vrot.slane %v2145_v25, 9  ;;  %v1652_v60 = vrot.slane %v2151_v28, 9  ;;  %v2303_v31 = vld [vmem:[%s2109_s8 + $0x44] sm:$0x1] }
  0x27   : > { %1882 = vmatpush3.bf16.msra.mxu0 %v2114_v5  ;;  %v2246_v61 = vcombine.low %v339_v39, %v2240_v55  ;;  %v362_v62 = vrot.slane %v361_v50, 4  ;;  %1836 = vmatpush3.bf16.msra.mxu1 %v2013_v24  ;;  %v2252_v2 = vsel %vm2226_vm6, %v1649_v52, %v615_v16  ;;  %v2256_v11 = vsel %vm2226_vm6, %v1650_v53, %v619_v58  ;;  %v2023_v50 = vld [vmem:[%s2473_s1 + $0x30] sm:$0xff]  }
  0x28   : > { %1883 = vmatprep.subr.bf16.mxu0 %v2012_v40  ;;  %v376_v12 = vrot.slane %v375_v56, 4  ;;  %v1703_v5 = vcombine.low %v2252_v2, %v2256_v11  ;;  %1845 = vmatprep.subr.bf16.mxu1 %v2233_v4  ;;  %v1638_v16 = vcombine.low %v2117_v6, %v2123_v8  ;;  %v1653_v58 = vrot.slane %v2172_v49, 9 }
  0x29   : > { %1829 = vmatprep.mubr.msk.bf16.mxu1 %vm411_vm2, %v2246_v61  ;;  %v2268_v9 = vsel %vm2160_vm3, %v362_v62, %v366_v42  ;;  %v631_v18 = vrot.slane %v2179_v54, 5  ;;  %v1654_v19 = vrot.slane %v2183_v59, 9  ;;  %v635_v22 = vrot.slane %v2187_v0, 5  ;;  %v2294_v54 = vld [vmem:[%s2109_s8 + $0x40] sm:$0xf] }
  0x2a   : > { %v2275_v15 = vsel %vm2160_vm3, %v376_v12, %v380_v51  ;;  %1885 = vmatprep.mubr.msk.bf16.mxu0 %vm411_vm2, %v1703_v5  ;;  %v624_v24 = vsel %vm2226_vm6, %v1651_v57, %v623_v63  ;;  %v628_v27 = vsel %vm2226_vm6, %v1652_v60, %v627_v10  ;;  %v1655_v29 = vrot.slane %v2196_v13, 9  ;;  %v262_v42 = vld [vmem:[%s2109_s8 + $0x4c] sm:$0x1]  ;;  %v2026_v60 = vld [vmem:[%s2473_s1 + $0x38] sm:$0xff]  }
  0x2b   : > { %1884 = vmatpush3.bf16.msra.mxu0 %v2012_v40  ;;  %v2283_v23 = vcombine.low %v2268_v9, %v2275_v15  ;;  %v632_v0 = vsel %vm2226_vm6, %v1653_v58, %v631_v18  ;;  %v2300_v30 = vsel %vm2226_vm6, %v1654_v19, %v635_v22  ;;  %v1704_v26 = vcombine.low %v624_v24, %v628_v27  ;;  %v2020_v40 = vld [vmem:[%s2473_s1 + $0x28] sm:$0xff]  }
  0x2c   : > { %1893 = vmatprep.subr.bf16.mxu0 %v2014_v14  ;;  %v1705_v63 = vcombine.low %v632_v0, %v2300_v30  ;;  %v639_v10 = vrot.slane %v2202_v20, 5  ;;  %v1698_v33 = vrot.slane %v2294_v54, 9  ;;  %v987_v34 = vrot.slane %v2303_v31, 5 }
  0x2d   : > { %1830 = vmatmul.mubr.msk.bf16.gmra.mrb[4].mxu1 %vm411_vm2, %v2283_v23  ;;  %v1639_v36 = vcombine.low %v2138_v17, %v2145_v25  ;;  %v611_v37 = vrot.slane %v2120_v7, 5  ;;  %v1640_v38 = vcombine.low %v2151_v28, %v2172_v49  ;;  %v1648_v7 = vrot.slane %v2117_v6, 9 }
  0x2e   : > { %1837 = vmatprep.mubr.msk.bf16.mxu1 %vm411_vm2, %v1638_v16  ;;  %v640_v20 = vsel %vm2226_vm6, %v1655_v29, %v639_v10  ;;  %v2327_v39 = vsel %vm2226_vm6, %v1698_v33, %v987_v34  ;;  %v1735_v44 = vrot.slane %v261_v41, 9  ;;  %v1304_v45 = vrot.slane %v262_v42, 5 }
  0x2f   : > { %v1706_v46 = vcombine.low %v640_v20, %v2327_v39  ;;  %v612_v47 = vsel %vm2226_vm6, %v1648_v7, %v611_v37  ;;  %v1661_v52 = vcombine.low %v2256_v11, %v624_v24  ;;  %v1662_v53 = vcombine.low %v628_v27, %v632_v0  ;;  %v2027_v11 = vld [vmem:[%s2473_s1 + $0x80] sm:$0xff]  }
  0x30   : > { %v2344_v6 = vsel %vm2226_vm6, %v1735_v44, %v1304_v45  ;;  %v1660_v51 = vcombine.low %v612_v47, %v2252_v2  ;;  %v1193_v56 = vshrl.u32 %v261_v41, 16  ;;  %v1196_v57 = vshll.u32 %v261_v41, 16 }
  0x31   : > { %v864_v62 = vshrl.u32 %v2294_v54, 16  ;;  %v867_v2 = vshll.u32 %v2294_v54, 16  ;;  %v1717_v12 = vcombine.low %v2294_v54, %v261_v41  ;;  %v1663_v18 = vcombine.low %v2300_v30, %v640_v20 }
  0x32   : > { %1886 = vmatmul.mubr.msk.bf16.vlgmr.msra.gmra.mrb[0].mxu0 %vm411_vm2, %v1704_v26  ;;  %v1195_v16 = vrot.slane %v1193_v56, 4  ;;  %v1198_v58 = vrot.slane %v1196_v57, 5  ;;  %v1674_v19 = vcombine.low %v2123_v8, %v2138_v17  ;;  %v873_v24 = vshll.u32 %v2303_v31, 16  ;;  %v2030_v8 = vld [vmem:[%s2473_s1 + $0x88] sm:$0xff]  }
  0x33   : > { %1894 = vmatpush3.bf16.msra.mxu0 %v2014_v14  ;;  %1889 = vmatprep.mubr.msk.bf16.mxu0 %vm411_vm2, %v1705_v63  ;;  %v866_v5 = vrot.slane %v864_v62, 4  ;;  %v869_v14 = vrot.slane %v867_v2, 5  ;;  %v1202_v0 = vshll.u32 %v262_v42, 16  ;;  %v1675_v17 = vcombine.low %v2145_v25, %v2151_v28 }
  0x34   : > { %1895 = vmatprep.subr.bf16.mxu0 %v2018_v35  ;;  %v1199_v27 = vor.u32 %v1198_v58, %v1195_v16  ;;  %v875_v26 = vrot.slane %v873_v24, 5  ;;  %v1677_v28 = vcombine.low %v2196_v13, %v2294_v54  ;;  %v1690_v32 = vcombine.low %v2240_v55, %v2268_v9  ;;  %v1747_v9 = vld [vmem:[%s2474_s2] ss:$0 sm:$0xff] }
  0x35   : > { %1838 = vmatmul.mubr.msk.bf16.vlgmr.msra.gmra.mrb[0].mxu1 %vm411_vm2, %v1639_v36  ;;  %v870_v22 = vor.u32 %v869_v14, %v866_v5  ;;  %v1204_v63 = vrot.slane %v1202_v0, 5 }
  0x36   : > { %1846 = vmatpush3.bf16.msra.mxu1 %v2233_v4  ;;  %1841 = vmatprep.mubr.msk.bf16.mxu1 %vm411_vm2, %v1640_v38  ;;  %v1641_v4 = vcombine.low %v2183_v59, %v2196_v13  ;;  %v1200_v29 = vrot.slane %v1199_v27, 4 }
  0x37   : > { %1896 = vmatpush3.bf16.msra.mxu0 %v2018_v35  ;;  %1847 = vmatprep.subr.bf16.mxu1 %v2020_v40  ;;  %v871_v30 = vrot.slane %v870_v22, 4 }
  0x38   : > { %1905 = vmatprep.subr.bf16.mxu0 %v2022_v43  ;;  %v1205_v10 = vsel %vm2160_vm3, %v1200_v29, %v1204_v63 }
  0x39   : > { %v876_v31 = vsel %vm2160_vm3, %v871_v30, %v875_v26 }
  0x3a   : > { %1890 = vmatmul.mubr.msk.bf16.gmra.mrb[4].mxu0 %vm411_vm2, %v1706_v46  ;;  %1848 = vmatpush3.bf16.msra.mxu1 %v2020_v40  ;;  %v1728_v25 = vcombine.low %v876_v31, %v1205_v10 }
  0x3b   : > { %1897 = vmatprep.mubr.msk.bf16.mxu0 %vm411_vm2, %v1639_v36  ;;  %1857 = vmatprep.subr.bf16.mxu1 %v2023_v50 }
  0x3d   : > { %1842 = vmatmul.mubr.msk.bf16.gmra.mrb[4].mxu1 %vm411_vm2, %v1641_v4 }
  0x3e   : > { %1849 = vmatprep.mubr.msk.bf16.mxu1 %vm411_vm2, %v1660_v51 }
  0x42   : > { %1898 = vmatmul.mubr.msk.bf16.vlgmr.msra.gmra.mrb[0].mxu0 %vm411_vm2, %v1640_v38 }
  0x43   : > { %1906 = vmatpush3.bf16.msra.mxu0 %v2022_v43  ;;  %1901 = vmatprep.mubr.msk.bf16.mxu0 %vm411_vm2, %v1641_v4 }
  0x44   : > { %1907 = vmatprep.subr.bf16.mxu0 %v2024_v48 }
  0x45   : > { %1850 = vmatmul.mubr.msk.bf16.vlgmr.msra.gmra.mrb[0].mxu1 %vm411_vm2, %v1661_v52 }
  0x46   : > { %1858 = vmatpush3.bf16.msra.mxu1 %v2023_v50  ;;  %1853 = vmatprep.mubr.msk.bf16.mxu1 %vm411_vm2, %v1662_v53 }
  0x47   : > { %1908 = vmatpush3.bf16.msra.mxu0 %v2024_v48  ;;  %1859 = vmatprep.subr.bf16.mxu1 %v2026_v60 }
  0x48   : > { %1917 = vmatprep.subr.bf16.mxu0 %v2027_v11 }
  0x4a   : > { %1902 = vmatmul.mubr.msk.bf16.gmra.mrb[4].mxu0 %vm411_vm2, %v1717_v12  ;;  %1860 = vmatpush3.bf16.msra.mxu1 %v2026_v60 }
  0x4b   : > { %1909 = vmatprep.mubr.msk.bf16.mxu0 %vm411_vm2, %v2204_v21  ;;  %1929 = vmatprep.subr.bf16.mxu1 %v2085_v1  ;;  %v1676_v21 = vcombine.low %v2172_v49, %v2183_v59  ;;  %v1740_v49 = vcombine.low %v2327_v39, %v2344_v6 }
  0x4d   : > { %1854 = vmatmul.mubr.msk.bf16.gmra.mrb[4].mxu1 %vm411_vm2, %v1663_v18 }
  0x4e   : > { %1861 = vmatprep.mubr.msk.bf16.mxu1 %vm411_vm2, %v1674_v19 }
  0x52   : > { %1910 = vmatmul.mubr.msk.bf16.vlgmr.msra.gmra.mrb[0].mxu0 %vm411_vm2, %v2246_v61 }
  0x53   : > { %1918 = vmatpush3.bf16.msra.mxu0 %v2027_v11  ;;  %1913 = vmatprep.mubr.msk.bf16.mxu0 %vm411_vm2, %v2283_v23 }
  0x54   : > { %1919 = vmatprep.subr.bf16.mxu0 %v2030_v8 }
  0x55   : > { %1862 = vmatmul.mubr.msk.bf16.vlgmr.msra.gmra.mrb[0].mxu1 %vm411_vm2, %v1675_v17 }
  0x56   : > { %1931 = vmatpush3.bf16.msra.mxu1 %v2085_v1  ;;  %1865 = vmatprep.mubr.msk.bf16.mxu1 %vm411_vm2, %v1676_v21  ;;  %v1691_v1 = vcombine.low %v2275_v15, %v876_v31 }
  0x57   : > { %1920 = vmatpush3.bf16.msra.mxu0 %v2030_v8  ;;  %1930 = vmatprep.subr.bf16.mxu1 %v2096_v3 }
  0x5a   : > { %1914 = vmatmul.mubr.msk.bf16.gmra.mrb[4].mxu0 %vm411_vm2, %v1728_v25  ;;  %1932 = vmatpush3.bf16.msra.mxu1 %v2096_v3 }
  0x5b   : > { %1921 = vmatprep.mubr.msk.bf16.mxu0 %vm411_vm2, %v1661_v52 }
  0x5d   : > { %1866 = vmatmul.mubr.msk.bf16.gmra.mrb[4].mxu1 %vm411_vm2, %v1677_v28 }
  0x5e   : > { %1877 = vmatprep.mubr.msk.bf16.mxu1 %vm411_vm2, %v1690_v32 }
  0x62   : > { %1922 = vmatmul.mubr.msk.bf16.vlgmr.msra.gmra.mrb[0].mxu0 %vm411_vm2, %v1662_v53 }
  0x63   : > { %1925 = vmatprep.mubr.msk.bf16.mxu0 %vm411_vm2, %v1663_v18 }
  0x69   : > { %1878 = vmatmul.mubr.msk.bf16.vlgmr.msra.gmra.mrb[4].mxu1 %vm411_vm2, %v1691_v1 }
  0x6a   : > { %1926 = vmatmul.mubr.msk.bf16.gmra.mrb[4].mxu0 %vm411_vm2, %v1740_v49 }
 0x128   : > { %v1863_v3 = vpop.f32.mrb[0].mxu1 }
 0x129   : > { %v824_v59 = vpop.f32.mrb[1].mxu1 }
 0x12a   : > { %v1864_v13 = vpop.f32.mrb[2].mxu1 }
 0x12b   : > { %v827_v55 = vpop.f32.mrb[3].mxu1 }
 0x135   : > { %v1923_v61 = vpop.f32.mrb[0].mxu0 }
 0x136   : > { %v1933_v23 = vadd.f32 %v1923_v61, %v1863_v3  ;;  %v1362_v54 = vpop.f32.mrb[1].mxu0 }
 0x137   : > { %v1934_v15 = vadd.f32 %v1362_v54, %v824_v59  ;;  %v1924_v33 = vpop.f32.mrb[2].mxu0 }
 0x138   : > { %v1410_v34 = vadd.f32 %v1933_v23, %v1747_v9  ;;  %v1935_v35 = vadd.f32 %v1924_v33, %v1864_v13  ;;  %v1365_v36 = vpop.f32.mrb[3].mxu0 }
 0x139   : > { %v1408_v37 = vadd.f32 %v1934_v15, %v1747_v9  ;;  %v1936_v38 = vadd.f32 %v1365_v36, %v827_v55 }
 0x13a   : > { %v1761_v20 = vpack.c.bf16 %v1410_v34, %v1410_v34  ;;  %v1411_v39 = vadd.f32 %v1935_v35, %v1747_v9  ;;  %v1442_v42 = vmul.f32 %v1410_v34, %v1410_v34  ;;  %v1420_v57 = vsel %vm1416_vm8, %v1410_v34, 0.0 }
 0x13b   : > { %v1440_v40 = vmul.f32 %v1408_v37, %v1408_v37  ;;  %v1759_v7 = vpack.c.bf16 %v1408_v37, %v1408_v37  ;;  %v1409_v41 = vadd.f32 %v1936_v38, %v1747_v9  ;;  %v1417_v45 = vsel %vm1416_vm8, %v1408_v37, 0.0 }
 0x13c   : > { %1505 = vst.msk [vmem:[%s2427_s17 + $0x8] sm:$0xf] %vm1502_vm7, %v1761_v20  ;;  %v1762_v43 = vpack.c.bf16 %v1411_v39, %v1411_v39  ;;  %v1879_v44 = vpop.f32.mrb[4].mxu1  ;;  %v1443_v51 = vmul.f32 %v1411_v39, %v1411_v39  ;;  %v1451_v19 = vsel %vm1416_vm8, %v1442_v42, 0.0  ;;  %v1422_v27 = vsel %vm1416_vm8, %v1411_v39, 0.0 }
 0x13d   : > { %1503 = vst.msk [vmem:[%s2427_s17] sm:$0xf] %vm1502_vm7, %v1759_v7  ;;  %v1418_v46 = vsel %vm1416_vm8, %v1409_v41, 0.0  ;;  %v1441_v6 = vmul.f32 %v1409_v41, %v1409_v41  ;;  %v1760_v47 = vpack.c.bf16 %v1409_v41, %v1409_v41  ;;  %v1927_v50 = vpop.f32.mrb[4].mxu0  ;;  %v961_v4 = vpop.f32.mrb[5].mxu1  ;;  %v1448_v60 = vsel %vm1416_vm8, %v1440_v40, 0.0 }
 0x13e   : > { %1506 = vst.msk [vmem:[%s2427_s17 + $0xc] sm:$0xf] %vm1502_vm7, %v1762_v43  ;;  %v1419_v48 = vadd.f32 %v1418_v46, %v1417_v45  ;;  %v1937_v52 = vadd.f32 %v1927_v50, %v1879_v44  ;;  %v1378_v53 = vpop.f32.mrb[5].mxu0  ;;  %v1880_v56 = vpop.f32.mrb[6].mxu1  ;;  %v1453_v0 = vsel %vm1416_vm8, %v1443_v51, 0.0 }
 0x13f   : > { %v1449_v62 = vsel %vm1416_vm8, %v1441_v6, 0.0  ;;  %1504 = vst.msk [vmem:[%s2427_s17 + $0x4] sm:$0xf] %vm1502_vm7, %v1760_v47  ;;  %v1938_v2 = vadd.f32 %v1378_v53, %v961_v4  ;;  %v1928_v11 = vpop.f32.mrb[6].mxu0  ;;  %v964_v12 = vpop.f32.mrb[7].mxu1 }
 0x140   : > { %v1421_v5 = vadd.f32 %v1420_v57, %v1419_v48  ;;  %v1450_v14 = vadd.f32 %v1449_v62, %v1448_v60  ;;  %v1414_v16 = vadd.f32 %v1937_v52, %v1747_v9  ;;  %v1939_v58 = vadd.f32 %v1928_v11, %v1880_v56  ;;  %v1381_v18 = vpop.f32.mrb[7].mxu0 }
 0x141   : > { %v1412_v22 = vadd.f32 %v1938_v2, %v1747_v9  ;;  %v1940_v24 = vadd.f32 %v1381_v18, %v964_v12 }
 0x142   : > { %v1452_v30 = vadd.f32 %v1451_v19, %v1450_v14  ;;  %v1765_v26 = vpack.c.bf16 %v1414_v16, %v1414_v16  ;;  %v1423_v29 = vadd.f32 %v1422_v27, %v1421_v5  ;;  %v1415_v31 = vadd.f32 %v1939_v58, %v1747_v9 }
 0x143   : > { %v1424_v63 = vsel %vm1416_vm8, %v1412_v22, 0.0  ;;  %v1444_v8 = vmul.f32 %v1412_v22, %v1412_v22  ;;  %v1763_v17 = vpack.c.bf16 %v1412_v22, %v1412_v22  ;;  %v1413_v10 = vadd.f32 %v1940_v24, %v1747_v9 }
 0x144   : > { %1509 = vst.msk [vmem:[%s2427_s17 + $0x18] sm:$0xf] %vm1502_vm7, %v1765_v26  ;;  %v1454_v21 = vadd.f32 %v1453_v0, %v1452_v30  ;;  %v1425_v25 = vadd.f32 %v1424_v63, %v1423_v29  ;;  %v1766_v1 = vpack.c.bf16 %v1415_v31, %v1415_v31  ;;  %v1446_v49 = vmul.f32 %v1414_v16, %v1414_v16 }
 0x145   : > { %v1455_v28 = vsel %vm1416_vm8, %v1444_v8, 0.0  ;;  %1507 = vst.msk [vmem:[%s2427_s17 + $0x10] sm:$0xf] %vm1502_vm7, %v1763_v17  ;;  %v1426_v3 = vsel %vm1416_vm8, %v1413_v10, 0.0  ;;  %v1445_v59 = vmul.f32 %v1413_v10, %v1413_v10  ;;  %v1764_v13 = vpack.c.bf16 %v1413_v10, %v1413_v10 }
 0x146   : > { %v1456_v32 = vadd.f32 %v1455_v28, %v1454_v21  ;;  %1510 = vst.msk [vmem:[%s2427_s17 + $0x1c] sm:$0xf] %vm1502_vm7, %v1766_v1  ;;  %v1427_v55 = vadd.f32 %v1426_v3, %v1425_v25  ;;  %v1428_v61 = vsel %vm1416_vm8, %v1414_v16, 0.0  ;;  %v1447_v23 = vmul.f32 %v1415_v31, %v1415_v31 }
 0x147   : > { %v1457_v9 = vsel %vm1416_vm8, %v1445_v59, 0.0  ;;  %1508 = vst.msk [vmem:[%s2427_s17 + $0x14] sm:$0xf] %vm1502_vm7, %v1764_v13  ;;  %v1459_v33 = vsel %vm1416_vm8, %v1446_v49, 0.0  ;;  %v1430_v34 = vsel %vm1416_vm8, %v1415_v31, 0.0 }
 0x148   : > { %v1429_v54 = vadd.f32 %v1428_v61, %v1427_v55  ;;  %v1458_v15 = vadd.f32 %v1457_v9, %v1456_v32  ;;  %v1461_v37 = vsel %vm1416_vm8, %v1447_v23, 0.0 }
 0x14a   : > { %v1431_v35 = vadd.f32 %v1430_v34, %v1429_v54  ;;  %v1460_v36 = vadd.f32 %v1459_v33, %v1458_v15 }
 0x14c   : > { %v1432_v38 = vrot.slane %v1431_v35, 4  ;;  %v1462_v20 = vadd.f32 %v1461_v37, %v1460_v36 }
 0x14e   : > { %v1433_v39 = vadd.f32 %v1432_v38, %v1431_v35  ;;  %v1463_v40 = vrot.slane %v1462_v20, 4 }
 0x150   : > { %v1434_v7 = vrot.slane %v1433_v39, 2  ;;  %v1464_v41 = vadd.f32 %v1463_v40, %v1462_v20 }
 0x152   : > { %v1435_v42 = vadd.f32 %v1434_v7, %v1433_v39  ;;  %v1465_v43 = vrot.slane %v1464_v41, 2 }
 0x154   : > { %v1436_v44 = vrot.slane %v1435_v42, 1  ;;  %v1466_v45 = vadd.f32 %v1465_v43, %v1464_v41 }
 0x156   : > { %v1437_v46 = vadd.f32 %v1436_v44, %v1435_v42  ;;  %v1467_v6 = vrot.slane %v1466_v45, 1 }
 0x158   : > { %1439 = vst.msk [vmem:[%s238_s22] sm:$0x1] %vm1438_vm9, %v1437_v46  ;;  %v1468_v47 = vadd.f32 %v1467_v6, %v1466_v45 }
 0x15a   : > { %1469 = vst.msk [vmem:[%s241_s25] sm:$0x1] %vm1438_vm9, %v1468_v47 }
 0x15b PF: > { %s16_s18 = sadd.s32 1, %s2039_s18  }
 0x15c   : > { %p13_p4 = scmp.ge.s32.totalorder %s16_s18, 4  }
 0x15e   :  { %15 = sbr.rel (!%p13_p4) target bundleno = 1 (0x1), region = 94 }

// kernel: decoder_forward.22
= control target key start
LH: loop header
LB: loop body
LE: loop exit
PB: predicated region body
PF: predicated region fallthrough
CT: control target
= control target key end

     0   :  { %vm255_vm0 = vcmask 125952   ;;  %s575_s0 = inlined_call_operand.vmem [shape: bf16[128,16], index: 0, kind: input, shape index: {}]   ;;  %s576_s1 = inlined_call_operand.vmem [shape: f32[1,16], index: 1, kind: input, shape index: {}]   ;;  %s577_s2 = inlined_call_operand.vmem [shape: f32[1,16], index: 2, kind: input, shape index: {}]   ;;  %s578_s3 = inlined_call_operand.vmem [shape: bf16[128,16], index: 3, kind: input, shape index: {}]   ;;  %s579_s4 = inlined_call_operand.vmem [shape: bf16[128,16], index: 4, kind: output, shape index: {}]  }
   0x1   :  { %v311_v0 = vld [vmem:[%s575_s0] sm:$0xff]   ;;  %v374_v5 = vld [vmem:[%s575_s0 + $0x8] sm:$0xff]   ;;  %v375_v12 = vld [vmem:[%s575_s0 + $0x10] sm:$0xff]  }
   0x2   :  { %v419_v1 = vld [vmem:[%s576_s1] ss:$0 sm:$0xff]  ;;  %v312_v2 = vunpack.c.l.bf16 %v311_v0  ;;  %v313_v4 = vunpack.c.h.bf16 %v311_v0  ;;  %v381_v6 = vld [vmem:[%s578_s3 + $0x8] sm:$0xff]   ;;  %v316_v10 = vunpack.c.l.bf16 %v374_v5  ;;  %v382_v13 = vld [vmem:[%s578_s3 + $0x10] sm:$0xff]   ;;  %v317_v16 = vunpack.c.h.bf16 %v374_v5 }
   0x3   :  { %v343_v3 = vld [vmem:[%s578_s3] sm:$0xff]   ;;  %v348_v11 = vunpack.c.l.bf16 %v381_v6  ;;  %v349_v17 = vunpack.c.h.bf16 %v381_v6  ;;  %v446_v18 = vld [vmem:[%s575_s0 + $0x18] sm:$0xff]   ;;  %v320_v20 = vunpack.c.l.bf16 %v375_v12  ;;  %v352_v21 = vunpack.c.l.bf16 %v382_v13  ;;  %v378_v0 = vld [vmem:[%s575_s0 + $0x28] sm:$0xff]  }
   0x4   :  { %v433_v7 = vld [vmem:[%s577_s2] ss:$0 sm:$0xff]  ;;  %v344_v8 = vunpack.c.l.bf16 %v343_v3  ;;  %v345_v9 = vunpack.c.h.bf16 %v343_v3  ;;  %v56_v14 = vmul.f32 %v312_v2, %v419_v1  ;;  %v57_v15 = vmul.f32 %v313_v4, %v419_v1  ;;  %v452_v23 = vld [vmem:[%s578_s3 + $0x18] sm:$0xff]   ;;  %v385_v5 = vld [vmem:[%s578_s3 + $0x28] sm:$0xff]  }
   0x5   :  { %v58_v19 = vmul.f32 %v316_v10, %v419_v1  ;;  %v321_v22 = vunpack.c.h.bf16 %v375_v12  ;;  %v59_v26 = vmul.f32 %v317_v16, %v419_v1  ;;  %v353_v27 = vunpack.c.h.bf16 %v382_v13  ;;  %v377_v52 = vld [vmem:[%s575_s0 + $0x20] sm:$0xff]  }
   0x6   :  { %v79_v24 = vadd.f32 %v433_v7, %v56_v14  ;;  %v80_v25 = vadd.f32 %v433_v7, %v57_v15  ;;  %v60_v29 = vmul.f32 %v320_v20, %v419_v1  ;;  %v324_v31 = vunpack.c.l.bf16 %v446_v18  ;;  %v384_v63 = vld [vmem:[%s578_s3 + $0x20] sm:$0xff]   ;;  %v379_v15 = vld [vmem:[%s575_s0 + $0x30] sm:$0xff]  }
   0x7   :  { %v81_v28 = vadd.f32 %v433_v7, %v58_v19  ;;  %v61_v30 = vmul.f32 %v321_v22, %v419_v1  ;;  %v82_v34 = vadd.f32 %v433_v7, %v59_v26  ;;  %v356_v35 = vunpack.c.l.bf16 %v452_v23 }
   0x8   :  { %v127_v32 = vadd.f32 %v344_v8, %v79_v24  ;;  %v128_v33 = vadd.f32 %v345_v9, %v80_v25  ;;  %v83_v37 = vadd.f32 %v433_v7, %v60_v29  ;;  %v62_v39 = vmul.f32 %v324_v31, %v419_v1  ;;  %v386_v31 = vld [vmem:[%s578_s3 + $0x30] sm:$0xff]  }
   0x9   :  { %v129_v36 = vadd.f32 %v348_v11, %v81_v28  ;;  %v84_v38 = vadd.f32 %v433_v7, %v61_v30  ;;  %v130_v43 = vadd.f32 %v349_v17, %v82_v34  ;;  %v325_v58 = vunpack.c.h.bf16 %v446_v18 }
   0xa   :  { %vm143_vm1 = vcmp.ge.f32.partialorder %v127_v32, 0.0  ;;  %v159_v40 = vmul.f32 0.2, %v127_v32  ;;  %vm144_vm2 = vcmp.ge.f32.partialorder %v128_v33, 0.0  ;;  %v160_v41 = vmul.f32 0.2, %v128_v33 }
   0xb   :  { %vm145_vm3 = vcmp.ge.f32.partialorder %v129_v36, 0.0  ;;  %v161_v42 = vmul.f32 0.2, %v129_v36  ;;  %v131_v44 = vadd.f32 %v352_v21, %v83_v37  ;;  %v132_v47 = vadd.f32 %v353_v27, %v84_v38 }
   0xc   :  { %v175_v45 = vsel %vm143_vm1, %v127_v32, %v159_v40  ;;  %v176_v46 = vsel %vm144_vm2, %v128_v33, %v160_v41  ;;  %v85_v48 = vadd.f32 %v433_v7, %v62_v39  ;;  %vm146_vm4 = vcmp.ge.f32.partialorder %v130_v43, 0.0 }
   0xd   :  { %v294_v49 = vpack.c.bf16 %v175_v45, %v175_v45  ;;  %v295_v50 = vpack.c.bf16 %v176_v46, %v176_v46  ;;  %v177_v51 = vsel %vm145_vm3, %v129_v36, %v161_v42  ;;  %v162_v54 = vmul.f32 0.2, %v130_v43  ;;  %v380_v42 = vld [vmem:[%s575_s0 + $0x38] sm:$0xff]  }
   0xe   :  { %v296_v53 = vpack.c.bf16 %v177_v51, %v177_v51  ;;  %vm147_vm5 = vcmp.ge.f32.partialorder %v131_v44, 0.0  ;;  %v163_v55 = vmul.f32 0.2, %v131_v44  ;;  %vm148_vm6 = vcmp.ge.f32.partialorder %v132_v47, 0.0 }
   0xf   :  { %256 = vst.msk [vmem:[%s579_s4] sm:$0xf] %vm255_vm0, %v294_v49  ;;  %257 = vst.msk [vmem:[%s579_s4 + $0x4] sm:$0xf] %vm255_vm0, %v295_v50  ;;  %v164_v56 = vmul.f32 0.2, %v132_v47  ;;  %v133_v57 = vadd.f32 %v356_v35, %v85_v48  ;;  %v178_v59 = vsel %vm146_vm4, %v130_v43, %v162_v54  ;;  %v357_v61 = vunpack.c.h.bf16 %v452_v23 }
  0x10   :  { %258 = vst.msk [vmem:[%s579_s4 + $0x8] sm:$0xf] %vm255_vm0, %v296_v53  ;;  %v179_v60 = vsel %vm147_vm5, %v131_v44, %v163_v55  ;;  %v328_v62 = vunpack.c.l.bf16 %v377_v52  ;;  %v297_v2 = vpack.c.bf16 %v178_v59, %v178_v59  ;;  %v63_v9 = vmul.f32 %v325_v58, %v419_v1  ;;  %v387_v53 = vld [vmem:[%s578_s3 + $0x38] sm:$0xff]  }
  0x11   :  { %v298_v3 = vpack.c.bf16 %v179_v60, %v179_v60  ;;  %v180_v4 = vsel %vm148_vm6, %v132_v47, %v164_v56  ;;  %vm149_vm7 = vcmp.ge.f32.partialorder %v133_v57, 0.0  ;;  %v165_v8 = vmul.f32 0.2, %v133_v57 }
  0x12   :  { %v299_v6 = vpack.c.bf16 %v180_v4, %v180_v4  ;;  %v64_v10 = vmul.f32 %v328_v62, %v419_v1  ;;  %259 = vst.msk [vmem:[%s579_s4 + $0xc] sm:$0xf] %vm255_vm0, %v297_v2  ;;  %v360_v11 = vunpack.c.l.bf16 %v384_v63  ;;  %v329_v12 = vunpack.c.h.bf16 %v377_v52 }
  0x13   :  { %260 = vst.msk [vmem:[%s579_s4 + $0x10] sm:$0xf] %vm255_vm0, %v298_v3  ;;  %v361_v13 = vunpack.c.h.bf16 %v384_v63  ;;  %v332_v14 = vunpack.c.l.bf16 %v378_v0  ;;  %v181_v16 = vsel %vm149_vm7, %v133_v57, %v165_v8  ;;  %v86_v17 = vadd.f32 %v433_v7, %v63_v9 }
  0x14   :  { %261 = vst.msk [vmem:[%s579_s4 + $0x14] sm:$0xf] %vm255_vm0, %v299_v6  ;;  %v87_v18 = vadd.f32 %v433_v7, %v64_v10  ;;  %v364_v19 = vunpack.c.l.bf16 %v385_v5  ;;  %v300_v20 = vpack.c.bf16 %v181_v16, %v181_v16  ;;  %v65_v21 = vmul.f32 %v329_v12, %v419_v1 }
  0x15   :  { %v66_v22 = vmul.f32 %v332_v14, %v419_v1  ;;  %v333_v23 = vunpack.c.h.bf16 %v378_v0  ;;  %v134_v24 = vadd.f32 %v357_v61, %v86_v17  ;;  %v336_v26 = vunpack.c.l.bf16 %v379_v15 }
  0x16   :  { %v135_v25 = vadd.f32 %v360_v11, %v87_v18  ;;  %262 = vst.msk [vmem:[%s579_s4 + $0x18] sm:$0xf] %vm255_vm0, %v300_v20  ;;  %v88_v27 = vadd.f32 %v433_v7, %v65_v21  ;;  %v365_v30 = vunpack.c.h.bf16 %v385_v5  ;;  %v368_v40 = vunpack.c.l.bf16 %v386_v31 }
  0x17   :  { %v89_v28 = vadd.f32 %v433_v7, %v66_v22  ;;  %v67_v29 = vmul.f32 %v333_v23, %v419_v1  ;;  %vm150_vm8 = vcmp.ge.f32.partialorder %v134_v24, 0.0  ;;  %v166_v32 = vmul.f32 0.2, %v134_v24 }
  0x18   :  { %vm151_vm9 = vcmp.ge.f32.partialorder %v135_v25, 0.0  ;;  %v167_v33 = vmul.f32 0.2, %v135_v25  ;;  %v136_v34 = vadd.f32 %v361_v13, %v88_v27  ;;  %v68_v37 = vmul.f32 %v336_v26, %v419_v1 }
  0x19   :  { %v137_v35 = vadd.f32 %v364_v19, %v89_v28  ;;  %v90_v36 = vadd.f32 %v433_v7, %v67_v29  ;;  %v182_v38 = vsel %vm150_vm8, %v134_v24, %v166_v32  ;;  %v337_v41 = vunpack.c.h.bf16 %v379_v15 }
  0x1a   :  { %v183_v39 = vsel %vm151_vm9, %v135_v25, %v167_v33  ;;  %v301_v43 = vpack.c.bf16 %v182_v38, %v182_v38  ;;  %vm152_vm10 = vcmp.ge.f32.partialorder %v136_v34, 0.0  ;;  %v168_v45 = vmul.f32 0.2, %v136_v34 }
  0x1b   :  { %v302_v44 = vpack.c.bf16 %v183_v39, %v183_v39  ;;  %vm153_vm11 = vcmp.ge.f32.partialorder %v137_v35, 0.0  ;;  %v169_v46 = vmul.f32 0.2, %v137_v35  ;;  %v138_v47 = vadd.f32 %v365_v30, %v90_v36 }
  0x1c   :  { %v91_v48 = vadd.f32 %v433_v7, %v68_v37  ;;  %263 = vst.msk [vmem:[%s579_s4 + $0x1c] sm:$0xf] %vm255_vm0, %v301_v43  ;;  %v184_v49 = vsel %vm152_vm10, %v136_v34, %v168_v45  ;;  %v69_v50 = vmul.f32 %v337_v41, %v419_v1  ;;  %v369_v51 = vunpack.c.h.bf16 %v386_v31 }
  0x1d   :  { %264 = vst.msk [vmem:[%s579_s4 + $0x20] sm:$0xf] %vm255_vm0, %v302_v44  ;;  %v340_v52 = vunpack.c.l.bf16 %v380_v42  ;;  %v303_v54 = vpack.c.bf16 %v184_v49, %v184_v49  ;;  %v185_v55 = vsel %vm153_vm11, %v137_v35, %v169_v46  ;;  %vm154_vm12 = vcmp.ge.f32.partialorder %v138_v47, 0.0 }
  0x1e   :  { %v170_v56 = vmul.f32 0.2, %v138_v47  ;;  %v304_v57 = vpack.c.bf16 %v185_v55, %v185_v55  ;;  %v139_v58 = vadd.f32 %v368_v40, %v91_v48  ;;  %v92_v59 = vadd.f32 %v433_v7, %v69_v50 }
  0x1f   :  { %v70_v60 = vmul.f32 %v340_v52, %v419_v1  ;;  %265 = vst.msk [vmem:[%s579_s4 + $0x24] sm:$0xf] %vm255_vm0, %v303_v54  ;;  %v372_v62 = vunpack.c.l.bf16 %v387_v53  ;;  %v341_v63 = vunpack.c.h.bf16 %v380_v42  ;;  %v373_v6 = vunpack.c.h.bf16 %v387_v53 }
  0x20   :  { %v186_v61 = vsel %vm154_vm12, %v138_v47, %v170_v56  ;;  %266 = vst.msk [vmem:[%s579_s4 + $0x28] sm:$0xf] %vm255_vm0, %v304_v57  ;;  %vm155_vm13 = vcmp.ge.f32.partialorder %v139_v58, 0.0  ;;  %v171_v2 = vmul.f32 0.2, %v139_v58  ;;  %v140_v3 = vadd.f32 %v369_v51, %v92_v59 }
  0x21   :  { %v305_v0 = vpack.c.bf16 %v186_v61, %v186_v61  ;;  %v93_v4 = vadd.f32 %v433_v7, %v70_v60  ;;  %v71_v5 = vmul.f32 %v341_v63, %v419_v1 }
  0x22   :  { %v187_v8 = vsel %vm155_vm13, %v139_v58, %v171_v2  ;;  %vm156_vm14 = vcmp.ge.f32.partialorder %v140_v3, 0.0  ;;  %v172_v9 = vmul.f32 0.2, %v140_v3 }
  0x23   :  { %267 = vst.msk [vmem:[%s579_s4 + $0x2c] sm:$0xf] %vm255_vm0, %v305_v0  ;;  %v306_v10 = vpack.c.bf16 %v187_v8, %v187_v8  ;;  %v141_v11 = vadd.f32 %v372_v62, %v93_v4  ;;  %v94_v12 = vadd.f32 %v433_v7, %v71_v5 }
  0x24   :  { %v188_v13 = vsel %vm156_vm14, %v140_v3, %v172_v9 }
  0x25   :  { %268 = vst.msk [vmem:[%s579_s4 + $0x30] sm:$0xf] %vm255_vm0, %v306_v10  ;;  %v307_v1 = vpack.c.bf16 %v188_v13, %v188_v13  ;;  %vm157_vm15 = vcmp.ge.f32.partialorder %v141_v11, 0.0  ;;  %v173_v14 = vmul.f32 0.2, %v141_v11  ;;  %v142_v15 = vadd.f32 %v373_v6, %v94_v12 }
  0x27   :  { %269 = vst.msk [vmem:[%s579_s4 + $0x34] sm:$0xf] %vm255_vm0, %v307_v1  ;;  %v189_v16 = vsel %vm157_vm15, %v141_v11, %v173_v14  ;;  %vm158_vm1 = vcmp.ge.f32.partialorder %v142_v15, 0.0  ;;  %v174_v17 = vmul.f32 0.2, %v142_v15 }
  0x28   :  { %v308_v18 = vpack.c.bf16 %v189_v16, %v189_v16 }
  0x29   :  { %v190_v7 = vsel %vm158_vm1, %v142_v15, %v174_v17 }
  0x2a   :  { %270 = vst.msk [vmem:[%s579_s4 + $0x38] sm:$0xf] %vm255_vm0, %v308_v18  ;;  %v309_v19 = vpack.c.bf16 %v190_v7, %v190_v7 }
  0x2c   :  { %271 = vst.msk [vmem:[%s579_s4 + $0x3c] sm:$0xf] %vm255_vm0, %v309_v19 }

// kernel: decoder_forward.28
= control target key start
LH: loop header
LB: loop body
LE: loop exit
PB: predicated region body
PF: predicated region fallthrough
CT: control target
= control target key end

     0   :  { %vm204_vm0 = vcmask 257024   ;;  %s448_s0 = inlined_call_operand.vmem [shape: bf16[128,32], index: 0, kind: input, shape index: {}]   ;;  %s449_s1 = inlined_call_operand.vmem [shape: f32[1,32], index: 1, kind: input, shape index: {}]   ;;  %s450_s2 = inlined_call_operand.vmem [shape: f32[1,32], index: 2, kind: input, shape index: {}]   ;;  %s451_s3 = inlined_call_operand.vmem [shape: bf16[128,32], index: 3, kind: output, shape index: {}]  }
   0x1   :  { %v260_v0 = vld [vmem:[%s448_s0] sm:$0xff]   ;;  %v291_v4 = vld [vmem:[%s448_s0 + $0x8] sm:$0xff]   ;;  %v292_v5 = vld [vmem:[%s448_s0 + $0x10] sm:$0xff]  }
   0x2   :  { %v324_v1 = vld [vmem:[%s449_s1] ss:$0 sm:$0xff]  ;;  %v261_v2 = vunpack.c.l.bf16 %v260_v0  ;;  %v262_v3 = vunpack.c.h.bf16 %v260_v0  ;;  %v293_v6 = vld [vmem:[%s448_s0 + $0x18] sm:$0xff]   ;;  %v265_v8 = vunpack.c.l.bf16 %v291_v4  ;;  %v266_v9 = vunpack.c.h.bf16 %v291_v4  ;;  %v295_v40 = vld [vmem:[%s448_s0 + $0x28] sm:$0xff]  }
   0x3   :  { %v338_v7 = vld [vmem:[%s450_s2] ss:$0 sm:$0xff]  ;;  %v269_v10 = vunpack.c.l.bf16 %v292_v5  ;;  %v270_v11 = vunpack.c.h.bf16 %v292_v5  ;;  %v273_v14 = vunpack.c.l.bf16 %v293_v6  ;;  %v274_v15 = vunpack.c.h.bf16 %v293_v6  ;;  %v296_v52 = vld [vmem:[%s448_s0 + $0x30] sm:$0xff]  }
   0x4   :  { %v53_v12 = vmul.f32 %v261_v2, %v324_v1  ;;  %v54_v13 = vmul.f32 %v262_v3, %v324_v1  ;;  %v55_v16 = vmul.f32 %v265_v8, %v324_v1  ;;  %v56_v17 = vmul.f32 %v266_v9, %v324_v1  ;;  %v294_v39 = vld [vmem:[%s448_s0 + $0x20] sm:$0xff]  }
   0x5   :  { %v57_v18 = vmul.f32 %v269_v10, %v324_v1  ;;  %v58_v19 = vmul.f32 %v270_v11, %v324_v1  ;;  %v59_v22 = vmul.f32 %v273_v14, %v324_v1  ;;  %v60_v23 = vmul.f32 %v274_v15, %v324_v1 }
   0x6   :  { %v76_v20 = vadd.f32 %v338_v7, %v53_v12  ;;  %v77_v21 = vadd.f32 %v338_v7, %v54_v13  ;;  %v78_v24 = vadd.f32 %v338_v7, %v55_v16  ;;  %v79_v25 = vadd.f32 %v338_v7, %v56_v17  ;;  %v297_v17 = vld [vmem:[%s448_s0 + $0x38] sm:$0xff]  }
   0x7   :  { %v80_v26 = vadd.f32 %v338_v7, %v57_v18  ;;  %v81_v27 = vadd.f32 %v338_v7, %v58_v19  ;;  %v82_v46 = vadd.f32 %v338_v7, %v59_v22  ;;  %v83_v47 = vadd.f32 %v338_v7, %v60_v23 }
   0x8   :  { %vm92_vm1 = vcmp.ge.f32.partialorder %v76_v20, 0.0  ;;  %v108_v28 = vmul.f32 0.2, %v76_v20  ;;  %vm93_vm2 = vcmp.ge.f32.partialorder %v77_v21, 0.0  ;;  %v109_v29 = vmul.f32 0.2, %v77_v21 }
   0x9   :  { %vm94_vm3 = vcmp.ge.f32.partialorder %v78_v24, 0.0  ;;  %v110_v30 = vmul.f32 0.2, %v78_v24  ;;  %vm95_vm4 = vcmp.ge.f32.partialorder %v79_v25, 0.0  ;;  %v111_v31 = vmul.f32 0.2, %v79_v25 }
   0xa   :  { %v124_v32 = vsel %vm92_vm1, %v76_v20, %v108_v28  ;;  %v125_v33 = vsel %vm93_vm2, %v77_v21, %v109_v29  ;;  %vm96_vm5 = vcmp.ge.f32.partialorder %v80_v26, 0.0  ;;  %v112_v34 = vmul.f32 0.2, %v80_v26 }
   0xb   :  { %v243_v35 = vpack.c.bf16 %v124_v32, %v124_v32  ;;  %v244_v36 = vpack.c.bf16 %v125_v33, %v125_v33  ;;  %v126_v37 = vsel %vm94_vm3, %v78_v24, %v110_v30  ;;  %v127_v38 = vsel %vm95_vm4, %v79_v25, %v111_v31 }
   0xc   :  { %v245_v41 = vpack.c.bf16 %v126_v37, %v126_v37  ;;  %v246_v42 = vpack.c.bf16 %v127_v38, %v127_v38  ;;  %v128_v43 = vsel %vm96_vm5, %v80_v26, %v112_v34  ;;  %vm97_vm6 = vcmp.ge.f32.partialorder %v81_v27, 0.0 }
   0xd   :  { %205 = vst.msk [vmem:[%s451_s3] sm:$0xf] %vm204_vm0, %v243_v35  ;;  %206 = vst.msk [vmem:[%s451_s3 + $0x4] sm:$0xf] %vm204_vm0, %v244_v36  ;;  %v247_v44 = vpack.c.bf16 %v128_v43, %v128_v43  ;;  %v113_v45 = vmul.f32 0.2, %v81_v27  ;;  %v277_v48 = vunpack.c.l.bf16 %v294_v39  ;;  %v278_v49 = vunpack.c.h.bf16 %v294_v39 }
   0xe   :  { %207 = vst.msk [vmem:[%s451_s3 + $0x8] sm:$0xf] %vm204_vm0, %v245_v41  ;;  %208 = vst.msk [vmem:[%s451_s3 + $0xc] sm:$0xf] %vm204_vm0, %v246_v42  ;;  %v281_v50 = vunpack.c.l.bf16 %v295_v40  ;;  %v282_v51 = vunpack.c.h.bf16 %v295_v40  ;;  %vm98_vm7 = vcmp.ge.f32.partialorder %v82_v46, 0.0  ;;  %vm99_vm8 = vcmp.ge.f32.partialorder %v83_v47, 0.0 }
   0xf   :  { %209 = vst.msk [vmem:[%s451_s3 + $0x10] sm:$0xf] %vm204_vm0, %v247_v44  ;;  %v129_v53 = vsel %vm97_vm6, %v81_v27, %v113_v45  ;;  %v114_v54 = vmul.f32 0.2, %v82_v46  ;;  %v115_v56 = vmul.f32 0.2, %v83_v47  ;;  %v61_v57 = vmul.f32 %v277_v48, %v324_v1 }
  0x10   :  { %v248_v55 = vpack.c.bf16 %v129_v53, %v129_v53  ;;  %v62_v58 = vmul.f32 %v278_v49, %v324_v1  ;;  %v63_v60 = vmul.f32 %v281_v50, %v324_v1  ;;  %v64_v61 = vmul.f32 %v282_v51, %v324_v1 }
  0x11   :  { %v130_v59 = vsel %vm98_vm7, %v82_v46, %v114_v54  ;;  %v285_v62 = vunpack.c.l.bf16 %v296_v52  ;;  %v131_v0 = vsel %vm99_vm8, %v83_v47, %v115_v56  ;;  %v84_v2 = vadd.f32 %v338_v7, %v61_v57 }
  0x12   :  { %210 = vst.msk [vmem:[%s451_s3 + $0x14] sm:$0xf] %vm204_vm0, %v248_v55  ;;  %v249_v63 = vpack.c.bf16 %v130_v59, %v130_v59  ;;  %v85_v3 = vadd.f32 %v338_v7, %v62_v58  ;;  %v250_v4 = vpack.c.bf16 %v131_v0, %v131_v0  ;;  %v86_v5 = vadd.f32 %v338_v7, %v63_v60 }
  0x13   :  { %v87_v6 = vadd.f32 %v338_v7, %v64_v61  ;;  %v65_v8 = vmul.f32 %v285_v62, %v324_v1  ;;  %vm100_vm9 = vcmp.ge.f32.partialorder %v84_v2, 0.0  ;;  %v116_v9 = vmul.f32 0.2, %v84_v2 }
  0x14   :  { %211 = vst.msk [vmem:[%s451_s3 + $0x18] sm:$0xf] %vm204_vm0, %v249_v63  ;;  %vm101_vm10 = vcmp.ge.f32.partialorder %v85_v3, 0.0  ;;  %v117_v10 = vmul.f32 0.2, %v85_v3  ;;  %vm102_vm11 = vcmp.ge.f32.partialorder %v86_v5, 0.0  ;;  %v286_v16 = vunpack.c.h.bf16 %v296_v52 }
  0x15   :  { %212 = vst.msk [vmem:[%s451_s3 + $0x1c] sm:$0xf] %vm204_vm0, %v250_v4  ;;  %v118_v11 = vmul.f32 0.2, %v86_v5  ;;  %vm103_vm12 = vcmp.ge.f32.partialorder %v87_v6, 0.0  ;;  %v132_v13 = vsel %vm100_vm9, %v84_v2, %v116_v9  ;;  %v88_v15 = vadd.f32 %v338_v7, %v65_v8 }
  0x16   :  { %v119_v12 = vmul.f32 0.2, %v87_v6  ;;  %v133_v14 = vsel %vm101_vm10, %v85_v3, %v117_v10  ;;  %v251_v18 = vpack.c.bf16 %v132_v13, %v132_v13  ;;  %v66_v25 = vmul.f32 %v286_v16, %v324_v1 }
  0x17   :  { %v252_v19 = vpack.c.bf16 %v133_v14, %v133_v14  ;;  %v134_v20 = vsel %vm102_vm11, %v86_v5, %v118_v11  ;;  %vm104_vm13 = vcmp.ge.f32.partialorder %v88_v15, 0.0  ;;  %v120_v24 = vmul.f32 0.2, %v88_v15 }
  0x18   :  { %v135_v21 = vsel %vm103_vm12, %v87_v6, %v119_v12  ;;  %v253_v22 = vpack.c.bf16 %v134_v20, %v134_v20  ;;  %213 = vst.msk [vmem:[%s451_s3 + $0x20] sm:$0xf] %vm204_vm0, %v251_v18  ;;  %v289_v26 = vunpack.c.l.bf16 %v297_v17  ;;  %v290_v27 = vunpack.c.h.bf16 %v297_v17 }
  0x19   :  { %v254_v23 = vpack.c.bf16 %v135_v21, %v135_v21  ;;  %214 = vst.msk [vmem:[%s451_s3 + $0x24] sm:$0xf] %vm204_vm0, %v252_v19  ;;  %v136_v28 = vsel %vm104_vm13, %v88_v15, %v120_v24  ;;  %v89_v30 = vadd.f32 %v338_v7, %v66_v25 }
  0x1a   :  { %215 = vst.msk [vmem:[%s451_s3 + $0x28] sm:$0xf] %vm204_vm0, %v253_v22  ;;  %v255_v29 = vpack.c.bf16 %v136_v28, %v136_v28  ;;  %v67_v31 = vmul.f32 %v289_v26, %v324_v1  ;;  %v68_v32 = vmul.f32 %v290_v27, %v324_v1 }
  0x1b   :  { %216 = vst.msk [vmem:[%s451_s3 + $0x2c] sm:$0xf] %vm204_vm0, %v254_v23  ;;  %vm105_vm14 = vcmp.ge.f32.partialorder %v89_v30, 0.0  ;;  %v121_v33 = vmul.f32 0.2, %v89_v30 }
  0x1c   :  { %217 = vst.msk [vmem:[%s451_s3 + $0x30] sm:$0xf] %vm204_vm0, %v255_v29  ;;  %v90_v34 = vadd.f32 %v338_v7, %v67_v31  ;;  %v91_v35 = vadd.f32 %v338_v7, %v68_v32 }
  0x1d   :  { %v137_v36 = vsel %vm105_vm14, %v89_v30, %v121_v33 }
  0x1e   :  { %vm106_vm15 = vcmp.ge.f32.partialorder %v90_v34, 0.0  ;;  %v122_v37 = vmul.f32 0.2, %v90_v34  ;;  %vm107_vm1 = vcmp.ge.f32.partialorder %v91_v35, 0.0  ;;  %v256_v38 = vpack.c.bf16 %v137_v36, %v137_v36 }
  0x1f   :  { %v123_v39 = vmul.f32 0.2, %v91_v35 }
  0x20   :  { %v138_v40 = vsel %vm106_vm15, %v90_v34, %v122_v37  ;;  %218 = vst.msk [vmem:[%s451_s3 + $0x34] sm:$0xf] %vm204_vm0, %v256_v38 }
  0x21   :  { %v257_v1 = vpack.c.bf16 %v138_v40, %v138_v40  ;;  %v139_v41 = vsel %vm107_vm1, %v91_v35, %v123_v39 }
  0x22   :  { %v258_v42 = vpack.c.bf16 %v139_v41, %v139_v41 }
  0x23   :  { %219 = vst.msk [vmem:[%s451_s3 + $0x38] sm:$0xf] %vm204_vm0, %v257_v1 }
  0x24   :  { %220 = vst.msk [vmem:[%s451_s3 + $0x3c] sm:$0xf] %vm204_vm0, %v258_v42 }

// kernel: decoder_forward.19
= control target key start
LH: loop header
LB: loop body
LE: loop exit
PB: predicated region body
PF: predicated region fallthrough
CT: control target
= control target key end

     0   :  { %s1935_s18 = smov 0   ;;  %s2291_s0 = inlined_call_operand.vmem [shape: bf16[2,10,10,16], index: 0, kind: input, shape index: {}]   ;;  %s2292_s1 = inlined_call_operand.vmem [shape: bf16[9,16,16], index: 1, kind: input, shape index: {}]   ;;  %s2293_s2 = inlined_call_operand.vmem [shape: f32[1,16], index: 2, kind: input, shape index: {}]   ;;  %s2294_s3 = inlined_call_operand.vmem [shape: bf16[2,64,16], index: 3, kind: output, shape index: {0}]   ;;  %s2295_s4 = inlined_call_operand.vmem [shape: f32[2,1,16], index: 4, kind: output, shape index: {1}]   ;;  %s2296_s5 = inlined_call_operand.vmem [shape: f32[2,1,16], index: 5, kind: output, shape index: {2}]  }
   0x1 LB: > { %s1543_s19 = sadd.s32 4294967295, %s1903_s18   ;;  %p1547_p0 = scmp.ge.s32.totalorder %s1903_s18, 1  ;;  %s1903_s18 = sphi %s1935_s18, %s16_s18  }
   0x2   : > { %p192_p1 = scmp.lt.s32.totalorder %s1903_s18, 3 }
   0x4   : > { %p193_p2 = pnand %p1547_p0, %p192_p1 }
   0x5   : > { %v1879_v0 = vld [vmem:[%s2292_s1 + $0x8] sm:$0xff] (!%p193_p2)   ;;  %p226_p3 = scmp.lt.s32.totalorder (!%p193_p2), %s1543_s19, 1  ;;  %v1949_v1 = vld [vmem:[%s2292_s1 + $0x20] sm:$0xff] (!%p193_p2)   ;;  %vm265_vm0 = vsmask.f32 (!%p193_p2), 3328  ;;  %vm401_vm2 = vcmask (!%p193_p2), 130048  }
   0x6   : > { %196 = sbr.rel (%p193_p2) target bundleno = 346 (0x15a), region = 32  ;;  %1714 = vmatprep.subr.bf16.mxu1 (!%p193_p2), %v1879_v0  ;;  %v1956_v2 = vld [vmem:[%s2292_s1] sm:$0xff] (!%p193_p2)   ;;  %1754 = vmatprep.subr.bf16.mxu0 (!%p193_p2), %v1949_v1  ;;  %v1965_v3 = vld [vmem:[%s2292_s1 + $0x28] sm:$0xff] (!%p193_p2)   ;;  %vm266_vm1 = vsmask.f32 (!%p193_p2), 7440  ;;  %vm590_vm4 = vcmask (!%p193_p2), 1042432  }
   0x7   : > { %1715 = vmatpush3.bf16.msra.mxu1 (!%p193_p2), %v1879_v0  ;;  %1755 = vmatpush3.bf16.msra.mxu0 (!%p193_p2), %v1949_v1  ;;  %vm2008_vm3 = vmor (!%p193_p2), %vm265_vm0, %vm266_vm1  ;;  %vm591_vm5 = vcmask (!%p193_p2), 1046532   ;;  %vm1429_vm7 = vcmask (!%p193_p2), 125952   ;;  %vm1365_vm8 = vcmask (!%p193_p2), 122880  }
   0x8   : > { %1724 = vmatprep.subr.bf16.mxu1 (!%p193_p2), %v1956_v2  ;;  %1764 = vmatprep.subr.bf16.mxu0 (!%p193_p2), %v1965_v3  ;;  %vm2079_vm6 = vmor (!%p193_p2), %vm590_vm4, %vm591_vm5 }
   0xd   : > { %s2302_s19 = smov (!%p226_p3, %s1543_s19), 1 }
   0xe   : > { %s1870_s26 = smul.u32 80, %s2302_s19  ;;  %s1660_s21 = sshll.u32 %s2302_s19, 5 }
   0xf   : > { %s2246_s24 = scalar_lea.vmem %s2294_s3, %s1660_s21  ;;  %s238_s27 = scalar_lea.vmem %s2295_s4, %s2302_s19 }
  0x10   : > { %s1970_s6 = scalar_lea.vmem %s2291_s0, %s1870_s26  ;;  %s241_s30 = scalar_lea.vmem %s2296_s5, %s2302_s19 }
  0x11   : > { %v1974_v4 = vld [vmem:[%s1970_s6] sm:$0xf]  ;;  %v1977_v5 = vld [vmem:[%s1970_s6 + $0x4] sm:$0x1]  ;;  %v1980_v6 = vld [vmem:[%s1970_s6 + $0x8] sm:$0xf] }
  0x12   : > { %v1983_v7 = vld [vmem:[%s1970_s6 + $0xc] sm:$0x1]  ;;  %v269_v8 = vshrl.u32 %v1974_v4, 16  ;;  %v272_v9 = vshll.u32 %v1974_v4, 16  ;;  %v278_v10 = vshll.u32 %v1977_v5, 16  ;;  %v283_v11 = vshrl.u32 %v1980_v6, 16 }
  0x13   : > { %v286_v12 = vshll.u32 %v1980_v6, 16  ;;  %v292_v13 = vshll.u32 %v1983_v7, 16  ;;  %v1992_v14 = vld [vmem:[%s1970_s6 + $0x10] sm:$0xf]  ;;  %v599_v18 = vrot.slane %v1983_v7, 5  ;;  %v1562_v7 = vcombine.low %v1974_v4, %v1980_v6 }
  0x14   : > { %v271_v15 = vrot.slane %v269_v8, 4  ;;  %v274_v16 = vrot.slane %v272_v9, 5  ;;  %v285_v17 = vrot.slane %v283_v11, 4  ;;  %v1996_v19 = vld [vmem:[%s1970_s6 + $0x14] sm:$0x1]  ;;  %v280_v20 = vrot.slane %v278_v10, 5 }
  0x15   : > { %v288_v21 = vrot.slane %v286_v12, 5  ;;  %v1999_v22 = vld [vmem:[%s1970_s6 + $0x18] sm:$0xf]  ;;  %v2002_v23 = vld [vmem:[%s1970_s6 + $0x1c] sm:$0x1]  ;;  %v294_v25 = vrot.slane %v292_v13, 5 }
  0x16   : > { %v275_v24 = vor.u32 %v274_v16, %v271_v15  ;;  %v297_v26 = vshrl.u32 %v1992_v14, 16  ;;  %v300_v27 = vshll.u32 %v1992_v14, 16  ;;  %v2013_v30 = vld [vmem:[%s1970_s6 + $0x20] sm:$0xf]  ;;  %v306_v31 = vshll.u32 %v1996_v19, 16 }
  0x17   : > { %v289_v29 = vor.u32 %v288_v21, %v285_v17  ;;  %v311_v32 = vshrl.u32 %v1999_v22, 16  ;;  %v314_v33 = vshll.u32 %v1999_v22, 16  ;;  %v2019_v35 = vld [vmem:[%s1970_s6 + $0x24] sm:$0x1]  ;;  %v320_v38 = vshll.u32 %v2002_v23, 16 }
  0x18   : > { %v276_v34 = vrot.slane %v275_v24, 4  ;;  %v299_v36 = vrot.slane %v297_v26, 4  ;;  %v302_v37 = vrot.slane %v300_v27, 5  ;;  %v308_v40 = vrot.slane %v306_v31, 5  ;;  %v2026_v47 = vld [vmem:[%s1970_s6 + $0x28] sm:$0xf] }
  0x19   : > { %v290_v39 = vrot.slane %v289_v29, 4  ;;  %v313_v41 = vrot.slane %v311_v32, 4  ;;  %v316_v42 = vrot.slane %v314_v33, 5  ;;  %v322_v45 = vrot.slane %v320_v38, 5  ;;  %v2033_v52 = vld [vmem:[%s1970_s6 + $0x2c] sm:$0x1] }
  0x1a   : > { %v281_v43 = vsel %vm2008_vm3, %v276_v34, %v280_v20  ;;  %v303_v44 = vor.u32 %v302_v37, %v299_v36  ;;  %v325_v46 = vshrl.u32 %v2013_v30, 16  ;;  %v328_v50 = vshll.u32 %v2013_v30, 16  ;;  %v2036_v53 = vld [vmem:[%s1970_s6 + $0x30] sm:$0xf]  ;;  %v2040_v58 = vld [vmem:[%s1970_s6 + $0x34] sm:$0x1] }
  0x1b   : > { %v295_v48 = vsel %vm2008_vm3, %v290_v39, %v294_v25  ;;  %v317_v49 = vor.u32 %v316_v42, %v313_v41  ;;  %v334_v51 = vshll.u32 %v2019_v35, 16  ;;  %v603_v57 = vrot.slane %v1996_v19, 5  ;;  %v2044_v63 = vld [vmem:[%s1970_s6 + $0x38] sm:$0xf]  ;;  %v2058_v20 = vld [vmem:[%s1970_s6 + $0x3c] sm:$0x1] }
  0x1c   : > { %v1553_v54 = vcombine.low %v281_v43, %v295_v48  ;;  %v304_v55 = vrot.slane %v303_v44, 4  ;;  %v327_v56 = vrot.slane %v325_v46, 4  ;;  %v330_v60 = vrot.slane %v328_v50, 5  ;;  %v2064_v24 = vld [vmem:[%s2292_s1 + $0x10] sm:$0xff]  }
  0x1d   : > { %v318_v59 = vrot.slane %v317_v49, 4  ;;  %v336_v61 = vrot.slane %v334_v51, 5  ;;  %v607_v62 = vrot.slane %v2002_v23, 5  ;;  %v611_v8 = vrot.slane %v2019_v35, 5 }
  0x1e   : > { %1716 = vmatprep.mubr.msk.bf16.mxu1 %vm401_vm2, %v1553_v54  ;;  %v309_v0 = vsel %vm2008_vm3, %v304_v55, %v308_v40  ;;  %v339_v9 = vshrl.u32 %v2026_v47, 16  ;;  %v342_v10 = vshll.u32 %v2026_v47, 16  ;;  %v331_v12 = vor.u32 %v330_v60, %v327_v56 }
  0x1f   : > { %v323_v11 = vsel %vm2008_vm3, %v318_v59, %v322_v45  ;;  %v1603_v13 = vcombine.low %v295_v48, %v309_v0  ;;  %v348_v15 = vshll.u32 %v2033_v52, 16  ;;  %v353_v21 = vshrl.u32 %v2036_v53, 16  ;;  %v1883_v45 = vld [vmem:[%s2292_s1 + $0x30] sm:$0xff]  }
  0x20   : > { %v2055_v16 = vcombine.low %v309_v0, %v323_v11  ;;  %v341_v17 = vrot.slane %v339_v9, 4  ;;  %v344_v19 = vrot.slane %v342_v10, 5  ;;  %v332_v25 = vrot.slane %v331_v12, 4 }
  0x21   : > { %1756 = vmatprep.mubr.msk.bf16.mxu0 %vm401_vm2, %v1603_v13  ;;  %v350_v26 = vrot.slane %v348_v15, 5  ;;  %v356_v27 = vshll.u32 %v2036_v53, 16  ;;  %v362_v29 = vshll.u32 %v2040_v58, 16  ;;  %v355_v32 = vrot.slane %v353_v21, 4  ;;  %v2143_v21 = vld [vmem:[%s1970_s6 + $0x44] sm:$0x1] }
  0x22   : > { %1717 = vmatmul.mubr.msk.bf16.vlgmr.msra.gmra.mrb[0].mxu1 %vm401_vm2, %v2055_v16  ;;  %v345_v31 = vor.u32 %v344_v19, %v341_v17  ;;  %v367_v33 = vshrl.u32 %v2044_v63, 16  ;;  %v370_v34 = vshll.u32 %v2044_v63, 16  ;;  %v337_v36 = vsel %vm2008_vm3, %v332_v25, %v336_v61  ;;  %v2140_v19 = vld [vmem:[%s1970_s6 + $0x40] sm:$0xf] }
  0x23   : > { %1725 = vmatpush3.bf16.msra.mxu1 %v1956_v2  ;;  %v358_v37 = vrot.slane %v356_v27, 5  ;;  %v364_v38 = vrot.slane %v362_v29, 5  ;;  %v376_v39 = vshll.u32 %v2058_v20, 16  ;;  %v1604_v40 = vcombine.low %v323_v11, %v337_v36  ;;  %v1889_v27 = vld [vmem:[%s2292_s1 + $0x38] sm:$0xff]  }
  0x24   : > { %v346_v41 = vrot.slane %v345_v31, 4  ;;  %v369_v42 = vrot.slane %v367_v33, 4  ;;  %v372_v43 = vrot.slane %v370_v34, 5  ;;  %1734 = vmatprep.subr.bf16.mxu1 %v2064_v24  ;;  %v1572_v48 = vrot.slane %v1980_v6, 9 }
  0x25   : > { %v359_v2 = vor.u32 %v358_v37, %v355_v32  ;;  %v378_v46 = vrot.slane %v376_v39, 5  ;;  %v1573_v49 = vrot.slane %v1992_v14, 9  ;;  %1757 = vmatmul.mubr.msk.bf16.vlgmr.msra.gmra.mrb[0].mxu0 %vm401_vm2, %v1604_v40  ;;  %v1574_v54 = vrot.slane %v1999_v22, 9  ;;  %v262_v37 = vld [vmem:[%s1970_s6 + $0x4c] sm:$0x1] }
  0x26   : > { %v2092_v50 = vsel %vm2008_vm3, %v346_v41, %v350_v26  ;;  %v373_v51 = vor.u32 %v372_v43, %v369_v42  ;;  %v1575_v55 = vrot.slane %v2013_v30, 9  ;;  %1765 = vmatpush3.bf16.msra.mxu0 %v1965_v3  ;;  %v600_v60 = vsel %vm2079_vm6, %v1572_v48, %v599_v18 }
  0x27   : > { %v2098_v56 = vcombine.low %v337_v36, %v2092_v50  ;;  %v360_v59 = vrot.slane %v359_v2, 4  ;;  %v604_v61 = vsel %vm2079_vm6, %v1573_v49, %v603_v57  ;;  %1774 = vmatprep.subr.bf16.mxu0 %v1883_v45  ;;  %v1576_v18 = vrot.slane %v2026_v47, 9  ;;  %v261_v36 = vld [vmem:[%s1970_s6 + $0x48] sm:$0xf] }
  0x28   : > { %v374_v0 = vrot.slane %v373_v51, 4  ;;  %v1615_v9 = vcombine.low %v600_v60, %v604_v61  ;;  %v615_v10 = vrot.slane %v2033_v52, 5  ;;  %v1577_v11 = vrot.slane %v2036_v53, 9 }
  0x29   : > { %1720 = vmatprep.mubr.msk.bf16.mxu1 %vm401_vm2, %v2098_v56  ;;  %v2110_v3 = vsel %vm2008_vm3, %v360_v59, %v364_v38  ;;  %v619_v12 = vrot.slane %v2040_v58, 5  ;;  %v608_v15 = vsel %vm2079_vm6, %v1574_v54, %v607_v62  ;;  %v612_v17 = vsel %vm2079_vm6, %v1575_v55, %v611_v8 }
  0x2a   : > { %v2117_v57 = vsel %vm2008_vm3, %v374_v0, %v378_v46  ;;  %1766 = vmatprep.mubr.msk.bf16.mxu0 %vm401_vm2, %v1615_v9  ;;  %v616_v52 = vsel %vm2079_vm6, %v1576_v18, %v615_v10  ;;  %v1616_v23 = vcombine.low %v608_v15, %v612_v17  ;;  %v1578_v35 = vrot.slane %v2044_v63, 9 }
  0x2b   : > { %v2125_v13 = vcombine.low %v2110_v3, %v2117_v57  ;;  %v620_v58 = vsel %vm2079_vm6, %v1577_v11, %v619_v12  ;;  %v623_v8 = vrot.slane %v2058_v20, 5  ;;  %v1612_v25 = vrot.slane %v2140_v19, 9 }
  0x2c   : > { %v1617_v62 = vcombine.low %v616_v52, %v620_v58  ;;  %v947_v26 = vrot.slane %v2143_v21, 5  ;;  %v1563_v29 = vcombine.low %v1992_v14, %v1999_v22  ;;  %v595_v31 = vrot.slane %v1977_v5, 5  ;;  %v1890_v5 = vld [vmem:[%s2292_s1 + $0x18] sm:$0xff]  }
  0x2d   : > { %1721 = vmatmul.mubr.msk.bf16.gmra.mrb[4].mxu1 %vm401_vm2, %v2125_v13  ;;  %v1564_v32 = vcombine.low %v2013_v30, %v2026_v47  ;;  %v624_v20 = vsel %vm2079_vm6, %v1578_v35, %v623_v8  ;;  %v1571_v34 = vrot.slane %v1974_v4, 9  ;;  %v1640_v38 = vrot.slane %v261_v36, 9 }
  0x2e   : > { %1726 = vmatprep.mubr.msk.bf16.mxu1 %vm401_vm2, %v1562_v7  ;;  %v2166_v33 = vsel %vm2079_vm6, %v1612_v25, %v947_v26  ;;  %v1240_v39 = vrot.slane %v262_v37, 5  ;;  %v1565_v42 = vcombine.low %v2036_v53, %v2044_v63  ;;  %v1583_v44 = vcombine.low %v612_v17, %v616_v52 }
  0x2f   : > { %v1618_v40 = vcombine.low %v624_v20, %v2166_v33  ;;  %v596_v41 = vsel %vm2079_vm6, %v1571_v34, %v595_v31  ;;  %v1137_v2 = vshrl.u32 %v261_v36, 16  ;;  %v1140_v46 = vshll.u32 %v261_v36, 16 }
  0x30   : > { %v2180_v4 = vsel %vm2079_vm6, %v1640_v38, %v1240_v39  ;;  %v1581_v43 = vcombine.low %v596_v41, %v600_v60  ;;  %v832_v48 = vshrl.u32 %v2140_v19, 16  ;;  %v835_v49 = vshll.u32 %v2140_v19, 16 }
  0x31   : > { %1767 = vmatmul.mubr.msk.bf16.vlgmr.msra.gmra.mrb[0].mxu0 %vm401_vm2, %v1616_v23  ;;  %v1626_v51 = vcombine.low %v2140_v19, %v261_v36  ;;  %v1139_v59 = vrot.slane %v1137_v2, 4  ;;  %v1142_v60 = vrot.slane %v1140_v46, 5  ;;  %v1592_v0 = vcombine.low %v1980_v6, %v1992_v14 }
  0x32   : > { %1775 = vmatpush3.bf16.msra.mxu0 %v1883_v45  ;;  %1770 = vmatprep.mubr.msk.bf16.mxu0 %vm401_vm2, %v1617_v62  ;;  %v1582_v45 = vcombine.low %v604_v61, %v608_v15  ;;  %v834_v54 = vrot.slane %v832_v48, 4  ;;  %v837_v55 = vrot.slane %v835_v49, 5  ;;  %v1584_v61 = vcombine.low %v620_v58, %v624_v20 }
  0x33   : > { %1784 = vmatprep.subr.bf16.mxu0 %v1889_v27  ;;  %v841_v7 = vshll.u32 %v2143_v21, 16  ;;  %v1143_v18 = vor.u32 %v1142_v60, %v1139_v59  ;;  %v1146_v10 = vshll.u32 %v262_v37, 16  ;;  %v1593_v52 = vcombine.low %v1999_v22, %v2013_v30 }
  0x34   : > { %v838_v9 = vor.u32 %v837_v55, %v834_v54  ;;  %v1594_v6 = vcombine.low %v2026_v47, %v2036_v53  ;;  %v1595_v30 = vcombine.low %v2044_v63, %v2140_v19  ;;  %v1605_v47 = vcombine.low %v2092_v50, %v2110_v3 }
  0x35   : > { %1727 = vmatmul.mubr.msk.bf16.vlgmr.msra.gmra.mrb[0].mxu1 %vm401_vm2, %v1563_v29  ;;  %v843_v12 = vrot.slane %v841_v7, 5  ;;  %v1144_v15 = vrot.slane %v1143_v18, 4  ;;  %v1148_v17 = vrot.slane %v1146_v10, 5  ;;  %v1643_v28 = vcombine.low %v2166_v33, %v2180_v4 }
  0x36   : > { %1735 = vmatpush3.bf16.msra.mxu1 %v2064_v24  ;;  %1730 = vmatprep.mubr.msk.bf16.mxu1 %vm401_vm2, %v1564_v32  ;;  %v1892_v24 = vld [vmem:[%s2292_s1 + $0x40] sm:$0xff]   ;;  %v839_v11 = vrot.slane %v838_v9, 4 }
  0x37   : > { %1744 = vmatprep.subr.bf16.mxu1 %v1890_v5 }
  0x38   : > { %v844_v14 = vsel %vm2008_vm3, %v839_v11, %v843_v12 }
  0x39   : > { %1771 = vmatmul.mubr.msk.bf16.gmra.mrb[4].mxu0 %vm401_vm2, %v1618_v40 }
  0x3a   : > { %1776 = vmatprep.mubr.msk.bf16.mxu0 %vm401_vm2, %v1563_v29 }
  0x3d   : > { %1731 = vmatmul.mubr.msk.bf16.gmra.mrb[4].mxu1 %vm401_vm2, %v1565_v42 }
  0x3e   : > { %1736 = vmatprep.mubr.msk.bf16.mxu1 %vm401_vm2, %v1581_v43 }
  0x41   : > { %1777 = vmatmul.mubr.msk.bf16.vlgmr.msra.gmra.mrb[0].mxu0 %vm401_vm2, %v1564_v32 }
  0x42   : > { %1785 = vmatpush3.bf16.msra.mxu0 %v1889_v27  ;;  %1780 = vmatprep.mubr.msk.bf16.mxu0 %vm401_vm2, %v1565_v42 }
  0x43   : > { %1794 = vmatprep.subr.bf16.mxu0 %v1892_v24 }
  0x45   : > { %1737 = vmatmul.mubr.msk.bf16.vlgmr.msra.gmra.mrb[0].mxu1 %vm401_vm2, %v1582_v45 }
  0x46   : > { %1745 = vmatpush3.bf16.msra.mxu1 %v1890_v5  ;;  %1740 = vmatprep.mubr.msk.bf16.mxu1 %vm401_vm2, %v1583_v44 }
  0x47   : > { %1804 = vmatprep.subr.bf16.mxu1 %v1949_v1 }
  0x49   : > { %1781 = vmatmul.mubr.msk.bf16.gmra.mrb[4].mxu0 %vm401_vm2, %v1626_v51 }
  0x4a   : > { %1786 = vmatprep.mubr.msk.bf16.mxu0 %vm401_vm2, %v2055_v16  ;;  %v1149_v16 = vsel %vm2008_vm3, %v1144_v15, %v1148_v17 }
  0x4b   : > { %v1634_v22 = vcombine.low %v844_v14, %v1149_v16 }
  0x4d   : > { %1741 = vmatmul.mubr.msk.bf16.gmra.mrb[4].mxu1 %vm401_vm2, %v1584_v61 }
  0x4e   : > { %1746 = vmatprep.mubr.msk.bf16.mxu1 %vm401_vm2, %v1592_v0 }
  0x51   : > { %1787 = vmatmul.mubr.msk.bf16.vlgmr.msra.gmra.mrb[0].mxu0 %vm401_vm2, %v2098_v56 }
  0x52   : > { %1795 = vmatpush3.bf16.msra.mxu0 %v1892_v24  ;;  %1790 = vmatprep.mubr.msk.bf16.mxu0 %vm401_vm2, %v2125_v13  ;;  %v1649_v13 = vld [vmem:[%s2293_s2] ss:$0 sm:$0xff] }
  0x55   : > { %1747 = vmatmul.mubr.msk.bf16.vlgmr.msra.gmra.mrb[0].mxu1 %vm401_vm2, %v1593_v52 }
  0x56   : > { %1805 = vmatpush3.bf16.msra.mxu1 %v1949_v1  ;;  %1750 = vmatprep.mubr.msk.bf16.mxu1 %vm401_vm2, %v1594_v6  ;;  %v1606_v1 = vcombine.low %v2117_v57, %v844_v14 }
  0x59   : > { %1791 = vmatmul.mubr.msk.bf16.gmra.mrb[4].mxu0 %vm401_vm2, %v1634_v22 }
  0x5a   : > { %1796 = vmatprep.mubr.msk.bf16.mxu0 %vm401_vm2, %v1582_v45 }
  0x5d   : > { %1751 = vmatmul.mubr.msk.bf16.gmra.mrb[4].mxu1 %vm401_vm2, %v1595_v30 }
  0x5e   : > { %1760 = vmatprep.mubr.msk.bf16.mxu1 %vm401_vm2, %v1605_v47 }
  0x61   : > { %1797 = vmatmul.mubr.msk.bf16.vlgmr.msra.gmra.mrb[0].mxu0 %vm401_vm2, %v1583_v44 }
  0x62   : > { %1800 = vmatprep.mubr.msk.bf16.mxu0 %vm401_vm2, %v1584_v61 }
  0x69   : > { %1761 = vmatmul.mubr.msk.bf16.vlgmr.msra.gmra.mrb[4].mxu1 %vm401_vm2, %v1606_v1  ;;  %1801 = vmatmul.mubr.msk.bf16.gmra.mrb[4].mxu0 %vm401_vm2, %v1643_v28 }
 0x128   : > { %v1748_v53 = vpop.f32.mrb[0].mxu1 }
 0x129   : > { %v792_v63 = vpop.f32.mrb[1].mxu1 }
 0x12a   : > { %v1749_v50 = vpop.f32.mrb[2].mxu1 }
 0x12b   : > { %v795_v56 = vpop.f32.mrb[3].mxu1 }
 0x134   : > { %v1798_v3 = vpop.f32.mrb[0].mxu0 }
 0x135   : > { %v1806_v58 = vadd.f32 %v1798_v3, %v1748_v53  ;;  %v1290_v19 = vpop.f32.mrb[1].mxu0 }
 0x136   : > { %v1807_v57 = vadd.f32 %v1290_v19, %v792_v63  ;;  %v1799_v21 = vpop.f32.mrb[2].mxu0 }
 0x137   : > { %v1338_v23 = vadd.f32 %v1806_v58, %v1649_v13  ;;  %v1808_v35 = vadd.f32 %v1799_v21, %v1749_v50  ;;  %v1293_v62 = vpop.f32.mrb[3].mxu0 }
 0x138   : > { %v1336_v8 = vadd.f32 %v1807_v57, %v1649_v13  ;;  %v1809_v25 = vadd.f32 %v1293_v62, %v795_v56 }
 0x139   : > { %v1663_v26 = vpack.c.bf16 %v1338_v23, %v1338_v23  ;;  %v1339_v27 = vadd.f32 %v1808_v35, %v1649_v13  ;;  %v1369_v20 = vmul.f32 %v1338_v23, %v1338_v23  ;;  %v1347_v45 = vsel %vm401_vm2, %v1338_v23, 0.0 }
 0x13a   : > { %v1367_v29 = vmul.f32 %v1336_v8, %v1336_v8  ;;  %v1661_v31 = vpack.c.bf16 %v1336_v8, %v1336_v8  ;;  %v1337_v32 = vadd.f32 %v1809_v25, %v1649_v13  ;;  %v1344_v5 = vsel %vm401_vm2, %v1336_v8, 0.0 }
 0x13b   : > { %1432 = vst.msk [vmem:[%s2246_s24 + $0x8] sm:$0xf] %vm1429_vm7, %v1663_v26  ;;  %v1664_v33 = vpack.c.bf16 %v1339_v27, %v1339_v27  ;;  %v1370_v4 = vmul.f32 %v1339_v27, %v1339_v27  ;;  %v1378_v61 = vsel %vm401_vm2, %v1369_v20, 0.0  ;;  %v1349_v7 = vsel %vm401_vm2, %v1339_v27, 0.0 }
 0x13c   : > { %v1762_v34 = vpop.f32.mrb[4].mxu1  ;;  %1430 = vst.msk [vmem:[%s2246_s24] sm:$0xf] %vm1429_vm7, %v1661_v31  ;;  %v1345_v36 = vsel %vm401_vm2, %v1337_v32, 0.0  ;;  %v1368_v37 = vmul.f32 %v1337_v32, %v1337_v32  ;;  %v1662_v38 = vpack.c.bf16 %v1337_v32, %v1337_v32  ;;  %v1802_v39 = vpop.f32.mrb[4].mxu0  ;;  %v1375_v44 = vsel %vm401_vm2, %v1367_v29, 0.0 }
 0x13d   : > { %v921_v40 = vpop.f32.mrb[5].mxu1  ;;  %1433 = vst.msk [vmem:[%s2246_s24 + $0xc] sm:$0xf] %vm1429_vm7, %v1664_v33  ;;  %v1346_v41 = vadd.f32 %v1345_v36, %v1344_v5  ;;  %v1810_v42 = vadd.f32 %v1802_v39, %v1762_v34  ;;  %v1306_v43 = vpop.f32.mrb[5].mxu0  ;;  %v1380_v18 = vsel %vm401_vm2, %v1370_v4, 0.0 }
 0x13e   : > { %v1763_v24 = vpop.f32.mrb[6].mxu1  ;;  %v1376_v2 = vsel %vm401_vm2, %v1368_v37, 0.0  ;;  %1431 = vst.msk [vmem:[%s2246_s24 + $0x4] sm:$0xf] %vm1429_vm7, %v1662_v38  ;;  %v1811_v46 = vadd.f32 %v1306_v43, %v921_v40  ;;  %v1803_v48 = vpop.f32.mrb[6].mxu0 }
 0x13f   : > { %v924_v49 = vpop.f32.mrb[7].mxu1  ;;  %v1348_v51 = vadd.f32 %v1347_v45, %v1346_v41  ;;  %v1377_v54 = vadd.f32 %v1376_v2, %v1375_v44  ;;  %v1342_v55 = vadd.f32 %v1810_v42, %v1649_v13  ;;  %v1812_v59 = vadd.f32 %v1803_v48, %v1763_v24  ;;  %v1309_v60 = vpop.f32.mrb[7].mxu0 }
 0x140   : > { %v1340_v0 = vadd.f32 %v1811_v46, %v1649_v13  ;;  %v1813_v9 = vadd.f32 %v1309_v60, %v924_v49 }
 0x141   : > { %v1379_v10 = vadd.f32 %v1378_v61, %v1377_v54  ;;  %v1667_v11 = vpack.c.bf16 %v1342_v55, %v1342_v55  ;;  %v1350_v12 = vadd.f32 %v1349_v7, %v1348_v51  ;;  %v1343_v14 = vadd.f32 %v1812_v59, %v1649_v13 }
 0x142   : > { %v1351_v15 = vsel %vm401_vm2, %v1340_v0, 0.0  ;;  %v1371_v17 = vmul.f32 %v1340_v0, %v1340_v0  ;;  %v1665_v52 = vpack.c.bf16 %v1340_v0, %v1340_v0  ;;  %v1341_v16 = vadd.f32 %v1813_v9, %v1649_v13 }
 0x143   : > { %1436 = vst.msk [vmem:[%s2246_s24 + $0x18] sm:$0xf] %vm1429_vm7, %v1667_v11  ;;  %v1381_v6 = vadd.f32 %v1380_v18, %v1379_v10  ;;  %v1352_v22 = vadd.f32 %v1351_v15, %v1350_v12  ;;  %v1668_v1 = vpack.c.bf16 %v1343_v14, %v1343_v14  ;;  %v1373_v28 = vmul.f32 %v1342_v55, %v1342_v55 }
 0x144   : > { %v1382_v30 = vsel %vm401_vm2, %v1371_v17, 0.0  ;;  %1434 = vst.msk [vmem:[%s2246_s24 + $0x10] sm:$0xf] %vm1429_vm7, %v1665_v52  ;;  %v1353_v53 = vsel %vm401_vm2, %v1341_v16, 0.0  ;;  %v1372_v63 = vmul.f32 %v1341_v16, %v1341_v16  ;;  %v1666_v50 = vpack.c.bf16 %v1341_v16, %v1341_v16 }
 0x145   : > { %v1383_v47 = vadd.f32 %v1382_v30, %v1381_v6  ;;  %1437 = vst.msk [vmem:[%s2246_s24 + $0x1c] sm:$0xf] %vm1429_vm7, %v1668_v1  ;;  %v1354_v56 = vadd.f32 %v1353_v53, %v1352_v22  ;;  %v1355_v3 = vsel %vm401_vm2, %v1342_v55, 0.0  ;;  %v1374_v58 = vmul.f32 %v1343_v14, %v1343_v14 }
 0x146   : > { %v1384_v13 = vsel %vm401_vm2, %v1372_v63, 0.0  ;;  %1435 = vst.msk [vmem:[%s2246_s24 + $0x14] sm:$0xf] %vm1429_vm7, %v1666_v50  ;;  %v1386_v21 = vsel %vm401_vm2, %v1373_v28, 0.0  ;;  %v1357_v23 = vsel %vm401_vm2, %v1343_v14, 0.0 }
 0x147   : > { %v1356_v19 = vadd.f32 %v1355_v3, %v1354_v56  ;;  %v1385_v57 = vadd.f32 %v1384_v13, %v1383_v47  ;;  %v1388_v8 = vsel %vm401_vm2, %v1374_v58, 0.0 }
 0x149   : > { %v1358_v35 = vadd.f32 %v1357_v23, %v1356_v19  ;;  %v1387_v62 = vadd.f32 %v1386_v21, %v1385_v57 }
 0x14b   : > { %v1359_v25 = vrot.slane %v1358_v35, 4  ;;  %v1389_v26 = vadd.f32 %v1388_v8, %v1387_v62 }
 0x14d   : > { %v1360_v27 = vadd.f32 %v1359_v25, %v1358_v35  ;;  %v1390_v29 = vrot.slane %v1389_v26, 4 }
 0x14f   : > { %v1361_v31 = vrot.slane %v1360_v27, 2  ;;  %v1391_v32 = vadd.f32 %v1390_v29, %v1389_v26 }
 0x151   : > { %v1362_v20 = vadd.f32 %v1361_v31, %v1360_v27  ;;  %v1392_v33 = vrot.slane %v1391_v32, 2 }
 0x153   : > { %v1363_v34 = vrot.slane %v1362_v20, 1  ;;  %v1393_v5 = vadd.f32 %v1392_v33, %v1391_v32 }
 0x155   : > { %v1364_v36 = vadd.f32 %v1363_v34, %v1362_v20  ;;  %v1394_v37 = vrot.slane %v1393_v5, 1 }
 0x157   : > { %1366 = vst.msk [vmem:[%s238_s27] sm:$0x1] %vm1365_vm8, %v1364_v36  ;;  %v1395_v38 = vadd.f32 %v1394_v37, %v1393_v5 }
 0x159   : > { %1396 = vst.msk [vmem:[%s241_s30] sm:$0x1] %vm1365_vm8, %v1395_v38 }
 0x15a PF: > { %s16_s18 = sadd.s32 1, %s1903_s18  }
 0x15b   : > { %p13_p4 = scmp.ge.s32.totalorder %s16_s18, 4  }
 0x15d   :  { %15 = sbr.rel (!%p13_p4) target bundleno = 1 (0x1), region = 94 }

// kernel: decoder_forward.27
= control target key start
LH: loop header
LB: loop body
LE: loop exit
PB: predicated region body
PF: predicated region fallthrough
CT: control target
= control target key end

     0   :  { %s1936_s18 = smov 0   ;;  %s2292_s0 = inlined_call_operand.vmem [shape: bf16[2,10,10,16], index: 0, kind: input, shape index: {}]   ;;  %s2293_s1 = inlined_call_operand.vmem [shape: bf16[9,16,32], index: 1, kind: input, shape index: {}]   ;;  %s2294_s2 = inlined_call_operand.vmem [shape: f32[1,32], index: 2, kind: input, shape index: {}]   ;;  %s2295_s3 = inlined_call_operand.vmem [shape: bf16[2,64,32], index: 3, kind: output, shape index: {0}]   ;;  %s2296_s4 = inlined_call_operand.vmem [shape: f32[2,1,32], index: 4, kind: output, shape index: {1}]   ;;  %s2297_s5 = inlined_call_operand.vmem [shape: f32[2,1,32], index: 5, kind: output, shape index: {2}]  }
   0x1 LB: > { %s1544_s19 = sadd.s32 4294967295, %s1904_s18   ;;  %p1548_p0 = scmp.ge.s32.totalorder %s1904_s18, 1  ;;  %s1904_s18 = sphi %s1936_s18, %s16_s18  }
   0x2   : > { %p192_p1 = scmp.lt.s32.totalorder %s1904_s18, 3 }
   0x4   : > { %p193_p2 = pnand %p1548_p0, %p192_p1 }
   0x5   : > { %v1880_v0 = vld [vmem:[%s2293_s1 + $0x8] sm:$0xff] (!%p193_p2)   ;;  %p226_p3 = scmp.lt.s32.totalorder (!%p193_p2), %s1544_s19, 1  ;;  %v1950_v1 = vld [vmem:[%s2293_s1 + $0x20] sm:$0xff] (!%p193_p2)   ;;  %vm265_vm0 = vsmask.f32 (!%p193_p2), 3328  ;;  %vm401_vm2 = vcmask (!%p193_p2), 130048  }
   0x6   : > { %196 = sbr.rel (%p193_p2) target bundleno = 346 (0x15a), region = 32  ;;  %1715 = vmatprep.subr.bf16.mxu1 (!%p193_p2), %v1880_v0  ;;  %v1957_v2 = vld [vmem:[%s2293_s1] sm:$0xff] (!%p193_p2)   ;;  %1755 = vmatprep.subr.bf16.mxu0 (!%p193_p2), %v1950_v1  ;;  %v1966_v3 = vld [vmem:[%s2293_s1 + $0x28] sm:$0xff] (!%p193_p2)   ;;  %vm266_vm1 = vsmask.f32 (!%p193_p2), 7440  ;;  %vm590_vm4 = vcmask (!%p193_p2), 1042432  }
   0x7   : > { %1716 = vmatpush3.bf16.msra.mxu1 (!%p193_p2), %v1880_v0  ;;  %1756 = vmatpush3.bf16.msra.mxu0 (!%p193_p2), %v1950_v1  ;;  %vm2009_vm3 = vmor (!%p193_p2), %vm265_vm0, %vm266_vm1  ;;  %vm591_vm5 = vcmask (!%p193_p2), 1046532   ;;  %vm1430_vm7 = vcmask (!%p193_p2), 257024   ;;  %vm1344_vm8 = vcmask (!%p193_p2), 261120   ;;  %vm1366_vm9 = vcmask (!%p193_p2), 253952  }
   0x8   : > { %1725 = vmatprep.subr.bf16.mxu1 (!%p193_p2), %v1957_v2  ;;  %1765 = vmatprep.subr.bf16.mxu0 (!%p193_p2), %v1966_v3  ;;  %vm2080_vm6 = vmor (!%p193_p2), %vm590_vm4, %vm591_vm5 }
   0xd   : > { %s2303_s19 = smov (!%p226_p3, %s1544_s19), 1 }
   0xe   : > { %s1871_s26 = smul.u32 80, %s2303_s19  ;;  %s1661_s21 = sshll.u32 %s2303_s19, 5 }
   0xf   : > { %s2247_s24 = scalar_lea.vmem %s2295_s3, %s1661_s21  ;;  %s238_s27 = scalar_lea.vmem %s2296_s4, %s2303_s19 }
  0x10   : > { %s1971_s6 = scalar_lea.vmem %s2292_s0, %s1871_s26  ;;  %s241_s30 = scalar_lea.vmem %s2297_s5, %s2303_s19 }
  0x11   : > { %v1975_v4 = vld [vmem:[%s1971_s6] sm:$0xf]  ;;  %v1978_v5 = vld [vmem:[%s1971_s6 + $0x4] sm:$0x1]  ;;  %v1981_v6 = vld [vmem:[%s1971_s6 + $0x8] sm:$0xf] }
  0x12   : > { %v1984_v7 = vld [vmem:[%s1971_s6 + $0xc] sm:$0x1]  ;;  %v269_v8 = vshrl.u32 %v1975_v4, 16  ;;  %v272_v9 = vshll.u32 %v1975_v4, 16  ;;  %v278_v10 = vshll.u32 %v1978_v5, 16  ;;  %v283_v11 = vshrl.u32 %v1981_v6, 16 }
  0x13   : > { %v286_v12 = vshll.u32 %v1981_v6, 16  ;;  %v292_v13 = vshll.u32 %v1984_v7, 16  ;;  %v1993_v14 = vld [vmem:[%s1971_s6 + $0x10] sm:$0xf]  ;;  %v599_v18 = vrot.slane %v1984_v7, 5  ;;  %v1563_v7 = vcombine.low %v1975_v4, %v1981_v6 }
  0x14   : > { %v271_v15 = vrot.slane %v269_v8, 4  ;;  %v274_v16 = vrot.slane %v272_v9, 5  ;;  %v285_v17 = vrot.slane %v283_v11, 4  ;;  %v1997_v19 = vld [vmem:[%s1971_s6 + $0x14] sm:$0x1]  ;;  %v280_v20 = vrot.slane %v278_v10, 5 }
  0x15   : > { %v288_v21 = vrot.slane %v286_v12, 5  ;;  %v2000_v22 = vld [vmem:[%s1971_s6 + $0x18] sm:$0xf]  ;;  %v2003_v23 = vld [vmem:[%s1971_s6 + $0x1c] sm:$0x1]  ;;  %v294_v25 = vrot.slane %v292_v13, 5 }
  0x16   : > { %v275_v24 = vor.u32 %v274_v16, %v271_v15  ;;  %v297_v26 = vshrl.u32 %v1993_v14, 16  ;;  %v300_v27 = vshll.u32 %v1993_v14, 16  ;;  %v2014_v30 = vld [vmem:[%s1971_s6 + $0x20] sm:$0xf]  ;;  %v306_v31 = vshll.u32 %v1997_v19, 16 }
  0x17   : > { %v289_v29 = vor.u32 %v288_v21, %v285_v17  ;;  %v311_v32 = vshrl.u32 %v2000_v22, 16  ;;  %v314_v33 = vshll.u32 %v2000_v22, 16  ;;  %v2020_v35 = vld [vmem:[%s1971_s6 + $0x24] sm:$0x1]  ;;  %v320_v38 = vshll.u32 %v2003_v23, 16 }
  0x18   : > { %v276_v34 = vrot.slane %v275_v24, 4  ;;  %v299_v36 = vrot.slane %v297_v26, 4  ;;  %v302_v37 = vrot.slane %v300_v27, 5  ;;  %v308_v40 = vrot.slane %v306_v31, 5  ;;  %v2027_v47 = vld [vmem:[%s1971_s6 + $0x28] sm:$0xf] }
  0x19   : > { %v290_v39 = vrot.slane %v289_v29, 4  ;;  %v313_v41 = vrot.slane %v311_v32, 4  ;;  %v316_v42 = vrot.slane %v314_v33, 5  ;;  %v322_v45 = vrot.slane %v320_v38, 5  ;;  %v2034_v52 = vld [vmem:[%s1971_s6 + $0x2c] sm:$0x1] }
  0x1a   : > { %v281_v43 = vsel %vm2009_vm3, %v276_v34, %v280_v20  ;;  %v303_v44 = vor.u32 %v302_v37, %v299_v36  ;;  %v325_v46 = vshrl.u32 %v2014_v30, 16  ;;  %v328_v50 = vshll.u32 %v2014_v30, 16  ;;  %v2037_v53 = vld [vmem:[%s1971_s6 + $0x30] sm:$0xf]  ;;  %v2041_v58 = vld [vmem:[%s1971_s6 + $0x34] sm:$0x1] }
  0x1b   : > { %v295_v48 = vsel %vm2009_vm3, %v290_v39, %v294_v25  ;;  %v317_v49 = vor.u32 %v316_v42, %v313_v41  ;;  %v334_v51 = vshll.u32 %v2020_v35, 16  ;;  %v603_v57 = vrot.slane %v1997_v19, 5  ;;  %v2045_v63 = vld [vmem:[%s1971_s6 + $0x38] sm:$0xf]  ;;  %v2059_v20 = vld [vmem:[%s1971_s6 + $0x3c] sm:$0x1] }
  0x1c   : > { %v1554_v54 = vcombine.low %v281_v43, %v295_v48  ;;  %v304_v55 = vrot.slane %v303_v44, 4  ;;  %v327_v56 = vrot.slane %v325_v46, 4  ;;  %v330_v60 = vrot.slane %v328_v50, 5  ;;  %v2065_v24 = vld [vmem:[%s2293_s1 + $0x10] sm:$0xff]  }
  0x1d   : > { %v318_v59 = vrot.slane %v317_v49, 4  ;;  %v336_v61 = vrot.slane %v334_v51, 5  ;;  %v607_v62 = vrot.slane %v2003_v23, 5  ;;  %v611_v8 = vrot.slane %v2020_v35, 5 }
  0x1e   : > { %1717 = vmatprep.mubr.msk.bf16.mxu1 %vm401_vm2, %v1554_v54  ;;  %v309_v0 = vsel %vm2009_vm3, %v304_v55, %v308_v40  ;;  %v339_v9 = vshrl.u32 %v2027_v47, 16  ;;  %v342_v10 = vshll.u32 %v2027_v47, 16  ;;  %v331_v12 = vor.u32 %v330_v60, %v327_v56 }
  0x1f   : > { %v323_v11 = vsel %vm2009_vm3, %v318_v59, %v322_v45  ;;  %v1604_v13 = vcombine.low %v295_v48, %v309_v0  ;;  %v348_v15 = vshll.u32 %v2034_v52, 16  ;;  %v353_v21 = vshrl.u32 %v2037_v53, 16  ;;  %v1884_v45 = vld [vmem:[%s2293_s1 + $0x30] sm:$0xff]  }
  0x20   : > { %v2056_v16 = vcombine.low %v309_v0, %v323_v11  ;;  %v341_v17 = vrot.slane %v339_v9, 4  ;;  %v344_v19 = vrot.slane %v342_v10, 5  ;;  %v332_v25 = vrot.slane %v331_v12, 4 }
  0x21   : > { %1757 = vmatprep.mubr.msk.bf16.mxu0 %vm401_vm2, %v1604_v13  ;;  %v350_v26 = vrot.slane %v348_v15, 5  ;;  %v356_v27 = vshll.u32 %v2037_v53, 16  ;;  %v362_v29 = vshll.u32 %v2041_v58, 16  ;;  %v355_v32 = vrot.slane %v353_v21, 4  ;;  %v2144_v21 = vld [vmem:[%s1971_s6 + $0x44] sm:$0x1] }
  0x22   : > { %1718 = vmatmul.mubr.msk.bf16.vlgmr.msra.gmra.mrb[0].mxu1 %vm401_vm2, %v2056_v16  ;;  %v345_v31 = vor.u32 %v344_v19, %v341_v17  ;;  %v367_v33 = vshrl.u32 %v2045_v63, 16  ;;  %v370_v34 = vshll.u32 %v2045_v63, 16  ;;  %v337_v36 = vsel %vm2009_vm3, %v332_v25, %v336_v61  ;;  %v2141_v19 = vld [vmem:[%s1971_s6 + $0x40] sm:$0xf] }
  0x23   : > { %1726 = vmatpush3.bf16.msra.mxu1 %v1957_v2  ;;  %v358_v37 = vrot.slane %v356_v27, 5  ;;  %v364_v38 = vrot.slane %v362_v29, 5  ;;  %v376_v39 = vshll.u32 %v2059_v20, 16  ;;  %v1605_v40 = vcombine.low %v323_v11, %v337_v36  ;;  %v1890_v27 = vld [vmem:[%s2293_s1 + $0x38] sm:$0xff]  }
  0x24   : > { %v346_v41 = vrot.slane %v345_v31, 4  ;;  %v369_v42 = vrot.slane %v367_v33, 4  ;;  %v372_v43 = vrot.slane %v370_v34, 5  ;;  %1735 = vmatprep.subr.bf16.mxu1 %v2065_v24  ;;  %v1573_v48 = vrot.slane %v1981_v6, 9 }
  0x25   : > { %v359_v2 = vor.u32 %v358_v37, %v355_v32  ;;  %v378_v46 = vrot.slane %v376_v39, 5  ;;  %v1574_v49 = vrot.slane %v1993_v14, 9  ;;  %1758 = vmatmul.mubr.msk.bf16.vlgmr.msra.gmra.mrb[0].mxu0 %vm401_vm2, %v1605_v40  ;;  %v1575_v54 = vrot.slane %v2000_v22, 9  ;;  %v262_v37 = vld [vmem:[%s1971_s6 + $0x4c] sm:$0x1] }
  0x26   : > { %v2093_v50 = vsel %vm2009_vm3, %v346_v41, %v350_v26  ;;  %v373_v51 = vor.u32 %v372_v43, %v369_v42  ;;  %v1576_v55 = vrot.slane %v2014_v30, 9  ;;  %1766 = vmatpush3.bf16.msra.mxu0 %v1966_v3  ;;  %v600_v60 = vsel %vm2080_vm6, %v1573_v48, %v599_v18 }
  0x27   : > { %v2099_v56 = vcombine.low %v337_v36, %v2093_v50  ;;  %v360_v59 = vrot.slane %v359_v2, 4  ;;  %v604_v61 = vsel %vm2080_vm6, %v1574_v49, %v603_v57  ;;  %1775 = vmatprep.subr.bf16.mxu0 %v1884_v45  ;;  %v1577_v18 = vrot.slane %v2027_v47, 9  ;;  %v261_v36 = vld [vmem:[%s1971_s6 + $0x48] sm:$0xf] }
  0x28   : > { %v374_v0 = vrot.slane %v373_v51, 4  ;;  %v1616_v9 = vcombine.low %v600_v60, %v604_v61  ;;  %v615_v10 = vrot.slane %v2034_v52, 5  ;;  %v1578_v11 = vrot.slane %v2037_v53, 9 }
  0x29   : > { %1721 = vmatprep.mubr.msk.bf16.mxu1 %vm401_vm2, %v2099_v56  ;;  %v2111_v3 = vsel %vm2009_vm3, %v360_v59, %v364_v38  ;;  %v619_v12 = vrot.slane %v2041_v58, 5  ;;  %v608_v15 = vsel %vm2080_vm6, %v1575_v54, %v607_v62  ;;  %v612_v17 = vsel %vm2080_vm6, %v1576_v55, %v611_v8 }
  0x2a   : > { %v2118_v57 = vsel %vm2009_vm3, %v374_v0, %v378_v46  ;;  %1767 = vmatprep.mubr.msk.bf16.mxu0 %vm401_vm2, %v1616_v9  ;;  %v616_v52 = vsel %vm2080_vm6, %v1577_v18, %v615_v10  ;;  %v1617_v23 = vcombine.low %v608_v15, %v612_v17  ;;  %v1579_v35 = vrot.slane %v2045_v63, 9 }
  0x2b   : > { %v2126_v13 = vcombine.low %v2111_v3, %v2118_v57  ;;  %v620_v58 = vsel %vm2080_vm6, %v1578_v11, %v619_v12  ;;  %v623_v8 = vrot.slane %v2059_v20, 5  ;;  %v1613_v25 = vrot.slane %v2141_v19, 9 }
  0x2c   : > { %v1618_v62 = vcombine.low %v616_v52, %v620_v58  ;;  %v947_v26 = vrot.slane %v2144_v21, 5  ;;  %v1564_v29 = vcombine.low %v1993_v14, %v2000_v22  ;;  %v595_v31 = vrot.slane %v1978_v5, 5  ;;  %v1891_v5 = vld [vmem:[%s2293_s1 + $0x18] sm:$0xff]  }
  0x2d   : > { %1722 = vmatmul.mubr.msk.bf16.gmra.mrb[4].mxu1 %vm401_vm2, %v2126_v13  ;;  %v1565_v32 = vcombine.low %v2014_v30, %v2027_v47  ;;  %v624_v20 = vsel %vm2080_vm6, %v1579_v35, %v623_v8  ;;  %v1572_v34 = vrot.slane %v1975_v4, 9  ;;  %v1641_v38 = vrot.slane %v261_v36, 9 }
  0x2e   : > { %1727 = vmatprep.mubr.msk.bf16.mxu1 %vm401_vm2, %v1563_v7  ;;  %v2167_v33 = vsel %vm2080_vm6, %v1613_v25, %v947_v26  ;;  %v1240_v39 = vrot.slane %v262_v37, 5  ;;  %v1566_v42 = vcombine.low %v2037_v53, %v2045_v63  ;;  %v1584_v44 = vcombine.low %v612_v17, %v616_v52 }
  0x2f   : > { %v1619_v40 = vcombine.low %v624_v20, %v2167_v33  ;;  %v596_v41 = vsel %vm2080_vm6, %v1572_v34, %v595_v31  ;;  %v1137_v2 = vshrl.u32 %v261_v36, 16  ;;  %v1140_v46 = vshll.u32 %v261_v36, 16 }
  0x30   : > { %v2181_v4 = vsel %vm2080_vm6, %v1641_v38, %v1240_v39  ;;  %v1582_v43 = vcombine.low %v596_v41, %v600_v60  ;;  %v832_v48 = vshrl.u32 %v2141_v19, 16  ;;  %v835_v49 = vshll.u32 %v2141_v19, 16 }
  0x31   : > { %1768 = vmatmul.mubr.msk.bf16.vlgmr.msra.gmra.mrb[0].mxu0 %vm401_vm2, %v1617_v23  ;;  %v1627_v51 = vcombine.low %v2141_v19, %v261_v36  ;;  %v1139_v59 = vrot.slane %v1137_v2, 4  ;;  %v1142_v60 = vrot.slane %v1140_v46, 5  ;;  %v1593_v0 = vcombine.low %v1981_v6, %v1993_v14 }
  0x32   : > { %1776 = vmatpush3.bf16.msra.mxu0 %v1884_v45  ;;  %1771 = vmatprep.mubr.msk.bf16.mxu0 %vm401_vm2, %v1618_v62  ;;  %v1583_v45 = vcombine.low %v604_v61, %v608_v15  ;;  %v834_v54 = vrot.slane %v832_v48, 4  ;;  %v837_v55 = vrot.slane %v835_v49, 5  ;;  %v1585_v61 = vcombine.low %v620_v58, %v624_v20 }
  0x33   : > { %1785 = vmatprep.subr.bf16.mxu0 %v1890_v27  ;;  %v841_v7 = vshll.u32 %v2144_v21, 16  ;;  %v1143_v18 = vor.u32 %v1142_v60, %v1139_v59  ;;  %v1146_v10 = vshll.u32 %v262_v37, 16  ;;  %v1594_v52 = vcombine.low %v2000_v22, %v2014_v30 }
  0x34   : > { %v838_v9 = vor.u32 %v837_v55, %v834_v54  ;;  %v1595_v6 = vcombine.low %v2027_v47, %v2037_v53  ;;  %v1596_v30 = vcombine.low %v2045_v63, %v2141_v19  ;;  %v1606_v47 = vcombine.low %v2093_v50, %v2111_v3 }
  0x35   : > { %1728 = vmatmul.mubr.msk.bf16.vlgmr.msra.gmra.mrb[0].mxu1 %vm401_vm2, %v1564_v29  ;;  %v843_v12 = vrot.slane %v841_v7, 5  ;;  %v1144_v15 = vrot.slane %v1143_v18, 4  ;;  %v1148_v17 = vrot.slane %v1146_v10, 5  ;;  %v1644_v28 = vcombine.low %v2167_v33, %v2181_v4 }
  0x36   : > { %1736 = vmatpush3.bf16.msra.mxu1 %v2065_v24  ;;  %1731 = vmatprep.mubr.msk.bf16.mxu1 %vm401_vm2, %v1565_v32  ;;  %v1893_v24 = vld [vmem:[%s2293_s1 + $0x40] sm:$0xff]   ;;  %v839_v11 = vrot.slane %v838_v9, 4 }
  0x37   : > { %1745 = vmatprep.subr.bf16.mxu1 %v1891_v5 }
  0x38   : > { %v844_v14 = vsel %vm2009_vm3, %v839_v11, %v843_v12 }
  0x39   : > { %1772 = vmatmul.mubr.msk.bf16.gmra.mrb[4].mxu0 %vm401_vm2, %v1619_v40 }
  0x3a   : > { %1777 = vmatprep.mubr.msk.bf16.mxu0 %vm401_vm2, %v1564_v29 }
  0x3d   : > { %1732 = vmatmul.mubr.msk.bf16.gmra.mrb[4].mxu1 %vm401_vm2, %v1566_v42 }
  0x3e   : > { %1737 = vmatprep.mubr.msk.bf16.mxu1 %vm401_vm2, %v1582_v43 }
  0x41   : > { %1778 = vmatmul.mubr.msk.bf16.vlgmr.msra.gmra.mrb[0].mxu0 %vm401_vm2, %v1565_v32 }
  0x42   : > { %1786 = vmatpush3.bf16.msra.mxu0 %v1890_v27  ;;  %1781 = vmatprep.mubr.msk.bf16.mxu0 %vm401_vm2, %v1566_v42 }
  0x43   : > { %1795 = vmatprep.subr.bf16.mxu0 %v1893_v24 }
  0x45   : > { %1738 = vmatmul.mubr.msk.bf16.vlgmr.msra.gmra.mrb[0].mxu1 %vm401_vm2, %v1583_v45 }
  0x46   : > { %1746 = vmatpush3.bf16.msra.mxu1 %v1891_v5  ;;  %1741 = vmatprep.mubr.msk.bf16.mxu1 %vm401_vm2, %v1584_v44 }
  0x47   : > { %1805 = vmatprep.subr.bf16.mxu1 %v1950_v1 }
  0x49   : > { %1782 = vmatmul.mubr.msk.bf16.gmra.mrb[4].mxu0 %vm401_vm2, %v1627_v51 }
  0x4a   : > { %1787 = vmatprep.mubr.msk.bf16.mxu0 %vm401_vm2, %v2056_v16  ;;  %v1149_v16 = vsel %vm2009_vm3, %v1144_v15, %v1148_v17 }
  0x4b   : > { %v1635_v22 = vcombine.low %v844_v14, %v1149_v16 }
  0x4d   : > { %1742 = vmatmul.mubr.msk.bf16.gmra.mrb[4].mxu1 %vm401_vm2, %v1585_v61 }
  0x4e   : > { %1747 = vmatprep.mubr.msk.bf16.mxu1 %vm401_vm2, %v1593_v0 }
  0x51   : > { %1788 = vmatmul.mubr.msk.bf16.vlgmr.msra.gmra.mrb[0].mxu0 %vm401_vm2, %v2099_v56 }
  0x52   : > { %1796 = vmatpush3.bf16.msra.mxu0 %v1893_v24  ;;  %1791 = vmatprep.mubr.msk.bf16.mxu0 %vm401_vm2, %v2126_v13  ;;  %v1650_v13 = vld [vmem:[%s2294_s2] ss:$0 sm:$0xff] }
  0x55   : > { %1748 = vmatmul.mubr.msk.bf16.vlgmr.msra.gmra.mrb[0].mxu1 %vm401_vm2, %v1594_v52 }
  0x56   : > { %1806 = vmatpush3.bf16.msra.mxu1 %v1950_v1  ;;  %1751 = vmatprep.mubr.msk.bf16.mxu1 %vm401_vm2, %v1595_v6  ;;  %v1607_v1 = vcombine.low %v2118_v57, %v844_v14 }
  0x59   : > { %1792 = vmatmul.mubr.msk.bf16.gmra.mrb[4].mxu0 %vm401_vm2, %v1635_v22 }
  0x5a   : > { %1797 = vmatprep.mubr.msk.bf16.mxu0 %vm401_vm2, %v1583_v45 }
  0x5d   : > { %1752 = vmatmul.mubr.msk.bf16.gmra.mrb[4].mxu1 %vm401_vm2, %v1596_v30 }
  0x5e   : > { %1761 = vmatprep.mubr.msk.bf16.mxu1 %vm401_vm2, %v1606_v47 }
  0x61   : > { %1798 = vmatmul.mubr.msk.bf16.vlgmr.msra.gmra.mrb[0].mxu0 %vm401_vm2, %v1584_v44 }
  0x62   : > { %1801 = vmatprep.mubr.msk.bf16.mxu0 %vm401_vm2, %v1585_v61 }
  0x69   : > { %1762 = vmatmul.mubr.msk.bf16.vlgmr.msra.gmra.mrb[4].mxu1 %vm401_vm2, %v1607_v1  ;;  %1802 = vmatmul.mubr.msk.bf16.gmra.mrb[4].mxu0 %vm401_vm2, %v1644_v28 }
 0x128   : > { %v1749_v53 = vpop.f32.mrb[0].mxu1 }
 0x129   : > { %v792_v63 = vpop.f32.mrb[1].mxu1 }
 0x12a   : > { %v1750_v50 = vpop.f32.mrb[2].mxu1 }
 0x12b   : > { %v795_v56 = vpop.f32.mrb[3].mxu1 }
 0x134   : > { %v1799_v3 = vpop.f32.mrb[0].mxu0 }
 0x135   : > { %v1807_v58 = vadd.f32 %v1799_v3, %v1749_v53  ;;  %v1290_v19 = vpop.f32.mrb[1].mxu0 }
 0x136   : > { %v1808_v57 = vadd.f32 %v1290_v19, %v792_v63  ;;  %v1800_v21 = vpop.f32.mrb[2].mxu0 }
 0x137   : > { %v1338_v23 = vadd.f32 %v1807_v58, %v1650_v13  ;;  %v1809_v35 = vadd.f32 %v1800_v21, %v1750_v50  ;;  %v1293_v62 = vpop.f32.mrb[3].mxu0 }
 0x138   : > { %v1336_v8 = vadd.f32 %v1808_v57, %v1650_v13  ;;  %v1810_v25 = vadd.f32 %v1293_v62, %v795_v56 }
 0x139   : > { %v1664_v26 = vpack.c.bf16 %v1338_v23, %v1338_v23  ;;  %v1339_v27 = vadd.f32 %v1809_v35, %v1650_v13  ;;  %v1370_v20 = vmul.f32 %v1338_v23, %v1338_v23  ;;  %v1348_v45 = vsel %vm1344_vm8, %v1338_v23, 0.0 }
 0x13a   : > { %v1368_v29 = vmul.f32 %v1336_v8, %v1336_v8  ;;  %v1662_v31 = vpack.c.bf16 %v1336_v8, %v1336_v8  ;;  %v1337_v32 = vadd.f32 %v1810_v25, %v1650_v13  ;;  %v1345_v5 = vsel %vm1344_vm8, %v1336_v8, 0.0 }
 0x13b   : > { %1433 = vst.msk [vmem:[%s2247_s24 + $0x8] sm:$0xf] %vm1430_vm7, %v1664_v26  ;;  %v1665_v33 = vpack.c.bf16 %v1339_v27, %v1339_v27  ;;  %v1371_v4 = vmul.f32 %v1339_v27, %v1339_v27  ;;  %v1379_v61 = vsel %vm1344_vm8, %v1370_v20, 0.0  ;;  %v1350_v7 = vsel %vm1344_vm8, %v1339_v27, 0.0 }
 0x13c   : > { %v1763_v34 = vpop.f32.mrb[4].mxu1  ;;  %1431 = vst.msk [vmem:[%s2247_s24] sm:$0xf] %vm1430_vm7, %v1662_v31  ;;  %v1346_v36 = vsel %vm1344_vm8, %v1337_v32, 0.0  ;;  %v1369_v37 = vmul.f32 %v1337_v32, %v1337_v32  ;;  %v1663_v38 = vpack.c.bf16 %v1337_v32, %v1337_v32  ;;  %v1803_v39 = vpop.f32.mrb[4].mxu0  ;;  %v1376_v44 = vsel %vm1344_vm8, %v1368_v29, 0.0 }
 0x13d   : > { %v921_v40 = vpop.f32.mrb[5].mxu1  ;;  %1434 = vst.msk [vmem:[%s2247_s24 + $0xc] sm:$0xf] %vm1430_vm7, %v1665_v33  ;;  %v1347_v41 = vadd.f32 %v1346_v36, %v1345_v5  ;;  %v1811_v42 = vadd.f32 %v1803_v39, %v1763_v34  ;;  %v1306_v43 = vpop.f32.mrb[5].mxu0  ;;  %v1381_v18 = vsel %vm1344_vm8, %v1371_v4, 0.0 }
 0x13e   : > { %v1764_v24 = vpop.f32.mrb[6].mxu1  ;;  %v1377_v2 = vsel %vm1344_vm8, %v1369_v37, 0.0  ;;  %1432 = vst.msk [vmem:[%s2247_s24 + $0x4] sm:$0xf] %vm1430_vm7, %v1663_v38  ;;  %v1812_v46 = vadd.f32 %v1306_v43, %v921_v40  ;;  %v1804_v48 = vpop.f32.mrb[6].mxu0 }
 0x13f   : > { %v924_v49 = vpop.f32.mrb[7].mxu1  ;;  %v1349_v51 = vadd.f32 %v1348_v45, %v1347_v41  ;;  %v1378_v54 = vadd.f32 %v1377_v2, %v1376_v44  ;;  %v1342_v55 = vadd.f32 %v1811_v42, %v1650_v13  ;;  %v1813_v59 = vadd.f32 %v1804_v48, %v1764_v24  ;;  %v1309_v60 = vpop.f32.mrb[7].mxu0 }
 0x140   : > { %v1340_v0 = vadd.f32 %v1812_v46, %v1650_v13  ;;  %v1814_v9 = vadd.f32 %v1309_v60, %v924_v49 }
 0x141   : > { %v1380_v10 = vadd.f32 %v1379_v61, %v1378_v54  ;;  %v1668_v11 = vpack.c.bf16 %v1342_v55, %v1342_v55  ;;  %v1351_v12 = vadd.f32 %v1350_v7, %v1349_v51  ;;  %v1343_v14 = vadd.f32 %v1813_v59, %v1650_v13 }
 0x142   : > { %v1352_v15 = vsel %vm1344_vm8, %v1340_v0, 0.0  ;;  %v1372_v17 = vmul.f32 %v1340_v0, %v1340_v0  ;;  %v1666_v52 = vpack.c.bf16 %v1340_v0, %v1340_v0  ;;  %v1341_v16 = vadd.f32 %v1814_v9, %v1650_v13 }
 0x143   : > { %1437 = vst.msk [vmem:[%s2247_s24 + $0x18] sm:$0xf] %vm1430_vm7, %v1668_v11  ;;  %v1382_v6 = vadd.f32 %v1381_v18, %v1380_v10  ;;  %v1353_v22 = vadd.f32 %v1352_v15, %v1351_v12  ;;  %v1669_v1 = vpack.c.bf16 %v1343_v14, %v1343_v14  ;;  %v1374_v28 = vmul.f32 %v1342_v55, %v1342_v55 }
 0x144   : > { %v1383_v30 = vsel %vm1344_vm8, %v1372_v17, 0.0  ;;  %1435 = vst.msk [vmem:[%s2247_s24 + $0x10] sm:$0xf] %vm1430_vm7, %v1666_v52  ;;  %v1354_v53 = vsel %vm1344_vm8, %v1341_v16, 0.0  ;;  %v1373_v63 = vmul.f32 %v1341_v16, %v1341_v16  ;;  %v1667_v50 = vpack.c.bf16 %v1341_v16, %v1341_v16 }
 0x145   : > { %v1384_v47 = vadd.f32 %v1383_v30, %v1382_v6  ;;  %1438 = vst.msk [vmem:[%s2247_s24 + $0x1c] sm:$0xf] %vm1430_vm7, %v1669_v1  ;;  %v1355_v56 = vadd.f32 %v1354_v53, %v1353_v22  ;;  %v1356_v3 = vsel %vm1344_vm8, %v1342_v55, 0.0  ;;  %v1375_v58 = vmul.f32 %v1343_v14, %v1343_v14 }
 0x146   : > { %v1385_v13 = vsel %vm1344_vm8, %v1373_v63, 0.0  ;;  %1436 = vst.msk [vmem:[%s2247_s24 + $0x14] sm:$0xf] %vm1430_vm7, %v1667_v50  ;;  %v1387_v21 = vsel %vm1344_vm8, %v1374_v28, 0.0  ;;  %v1358_v23 = vsel %vm1344_vm8, %v1343_v14, 0.0 }
 0x147   : > { %v1357_v19 = vadd.f32 %v1356_v3, %v1355_v56  ;;  %v1386_v57 = vadd.f32 %v1385_v13, %v1384_v47  ;;  %v1389_v8 = vsel %vm1344_vm8, %v1375_v58, 0.0 }
 0x149   : > { %v1359_v35 = vadd.f32 %v1358_v23, %v1357_v19  ;;  %v1388_v62 = vadd.f32 %v1387_v21, %v1386_v57 }
 0x14b   : > { %v1360_v25 = vrot.slane %v1359_v35, 4  ;;  %v1390_v26 = vadd.f32 %v1389_v8, %v1388_v62 }
 0x14d   : > { %v1361_v27 = vadd.f32 %v1360_v25, %v1359_v35  ;;  %v1391_v29 = vrot.slane %v1390_v26, 4 }
 0x14f   : > { %v1362_v31 = vrot.slane %v1361_v27, 2  ;;  %v1392_v32 = vadd.f32 %v1391_v29, %v1390_v26 }
 0x151   : > { %v1363_v20 = vadd.f32 %v1362_v31, %v1361_v27  ;;  %v1393_v33 = vrot.slane %v1392_v32, 2 }
 0x153   : > { %v1364_v34 = vrot.slane %v1363_v20, 1  ;;  %v1394_v5 = vadd.f32 %v1393_v33, %v1392_v32 }
 0x155   : > { %v1365_v36 = vadd.f32 %v1364_v34, %v1363_v20  ;;  %v1395_v37 = vrot.slane %v1394_v5, 1 }
 0x157   : > { %1367 = vst.msk [vmem:[%s238_s27] sm:$0x1] %vm1366_vm9, %v1365_v36  ;;  %v1396_v38 = vadd.f32 %v1395_v37, %v1394_v5 }
 0x159   : > { %1397 = vst.msk [vmem:[%s241_s30] sm:$0x1] %vm1366_vm9, %v1396_v38 }
 0x15a PF: > { %s16_s18 = sadd.s32 1, %s1904_s18  }
 0x15b   : > { %p13_p4 = scmp.ge.s32.totalorder %s16_s18, 4  }
 0x15d   :  { %15 = sbr.rel (!%p13_p4) target bundleno = 1 (0x1), region = 94 }

// kernel: decoder_forward.29
= control target key start
LH: loop header
LB: loop body
LE: loop exit
PB: predicated region body
PF: predicated region fallthrough
CT: control target
= control target key end

     0   :  { %11 = vsyncpa [#allocation3], 0  ;;  %s6221_s0 = inlined_call_operand.vmem [shape: bf16[2,18,18,8], index: 0, kind: input, shape index: {}]   ;;  %s6222_s1 = inlined_call_operand.vmem [shape: bf16[9,8,4], index: 1, kind: input, shape index: {}]   ;;  %s6223_s2 = inlined_call_operand.vmem [shape: f32[1,4], index: 2, kind: input, shape index: {}]   ;;  %s6224_s3 = inlined_call_operand.vmem [shape: f32[2,256,4], index: 3, kind: output, shape index: {0}]   ;;  %s6225_s4 = inlined_call_operand.hbm [shape: f32[2,1,4], index: 4, kind: output, shape index: {1}]   ;;  %s6226_s5 = inlined_call_operand.hbm [shape: f32[2,1,4], index: 5, kind: output, shape index: {2}]  }
   0x1   :  { %13 = vsyncpa [#allocation3 + $0x1], 0 }
   0x2   :  { %14 = vsyncpa [#allocation5], 0 }
   0x3   :  { %16 = vsyncpa [#allocation5 + $0x1], 0  ;;  %s4862_s18 = smov 0   ;;  %s4864_s19 = smov 0  }
   0x4   :  { %s4866_s20 = smov 0   ;;  %s4868_s21 = smov 0  }
   0x5 LB: > { %s4883_s22 = sadd.s32 4294967295, %s4828_s21   ;;  %s3543_s23 = sadd.s32 4294967294, %s4828_s21   ;;  %s4828_s21 = sphi %s4868_s21, %s6309_s21   ;;  %s4824_s20 = sphi %s4866_s20, %s6308_s20   ;;  %s4820_s19 = sphi %s4864_s19, %s6307_s19   ;;  %s4816_s18 = sphi %s4862_s18, %s6306_s18  }
   0x6   : > { %s4887_s24 = sadd.s32 1, %s4828_s21   ;;  %s123_s25 = sadd.s32 1, %s4824_s20 }
   0x7   : > { %s120_s26 = ssub.s32 %s4828_s21, %s4887_s24  ;;  %p133_p0 = scmp.ne.s32.totalorder %s4824_s20, %s4820_s19 }
   0x8   : > { %p121_p1 = scmp.eq.s32.totalorder %s120_s26, 0  ;;  %p134_p2 = scmp.eq.s32.totalorder %s4883_s22, 1 }
   0x9   : > { %p139_p3 = scmp.ne.s32.totalorder %s4820_s19, %s4816_s18  ;;  %p140_p4 = scmp.eq.s32.totalorder %s3543_s23, 1 }
   0xa   : > { %s4898_s27 = scalar_select %p121_p1, %s4824_s20, %s123_s25  }
   0xb   : > { %p4900_p5 = por %p134_p2, %p133_p0  ;;  %p4904_p6 = por %p140_p4, %p139_p3 }
   0xc   : > { %p3546_p7 = scmp.ge.s32.totalorder %s4828_s21, 1  ;;  %p198_p8 = scmp.lt.s32.totalorder %s4828_s21, 3 }
   0xe   : > { %p199_p9 = pnand %p3546_p7, %p198_p8 }
  0x10   : > { %202 = sbr.rel (%p199_p9) target bundleno = 642 (0x282), region = 32 }
  0x17   : > { %v3550_v0 = vld [vmem:[%s6222_s1 + $0x4] sm:$0xf]  ;;  %vm786_vm0 = vcmask 1043456   ;;  %v3682_v1 = vld [vmem:[%s6222_s1 + $0x10] sm:$0xf]  ;;  %p234_p10 = scmp.lt.s32.totalorder %s4883_s22, 1 }
  0x18   : > { %4529 = vmatprep.subr.msk.bf16.mxu1 %vm786_vm0, %v3550_v0  ;;  %4533 = vmatprep.subr.msk.bf16.mxu0 %vm786_vm0, %v3682_v1  ;;  %v788_v2 = vsel %vm786_vm0, %v3550_v0, 0  ;;  %v4921_v3 = vsel %vm786_vm0, %v3682_v1, 0  ;;  %v299_v4 = vld [vmem:[%s6222_s1] sm:$0xf]  ;;  %v3701_v5 = vld [vmem:[%s6222_s1 + $0x14] sm:$0xf] }
  0x19   : > { %6260 = vst [vmem:[#allocation8_spill] sm:$0xff] %v4921_v3  ;;  %3966 = vmatpush3.bf16.msra.mxu1 %v788_v2  ;;  %4102 = vmatpush3.bf16.msra.mxu0 %v4921_v3  ;;  %s4925_s9 = scalar_select %p234_p10, %s4883_s22, 1  ;;  %vm300_vm1 = vsmask.f32 3328  ;;  %vm301_vm2 = vsmask.f32 7440 }
  0x1a   : > { %4530 = vmatprep.subr.msk.bf16.mxu1 %vm786_vm0, %v299_v4  ;;  %4535 = vmatprep.subr.msk.bf16.mxu0 %vm786_vm0, %v3701_v5  ;;  %v4942_v6 = vsel %vm786_vm0, %v299_v4, 0  ;;  %v4945_v7 = vsel %vm786_vm0, %v3701_v5, 0  ;;  %v4950_v8 = vld [vmem:[%s6222_s1 + $0x18] sm:$0xf]  ;;  %vm737_vm3 = vcmask 64512   ;;  %vm4986_vm4 = vmor %vm300_vm1, %vm301_vm2  ;;  %vm1259_vm5 = vcmask 1042432  }
  0x1b   : > { %s4539_s14 = smul.u32 216, %s4925_s9  ;;  %v4974_v20 = vsel %vm786_vm0, %v4950_v8, 0  ;;  %vm1260_vm6 = vcmask 1046532   ;;  %vm2999_vm8 = vcmask 31744   ;;  %s6121_s26 = sand.u32 1, %s4820_s19   ;;  %vm3069_vm9 = vcmask 24576  }
  0x1c   : > { %vm5167_vm7 = vmor %vm1259_vm5, %vm1260_vm6  ;;  %s3807_s30 = sshll.u32 %s4883_s22, 4  ;;  %s227_s6 = scalar_lea.vmem [#allocation2], %s6121_s26 }
  0x1d   : > { %s4939_s17 = scalar_lea.vmem %s6221_s0, %s4539_s14  ;;  %s3422_s7 = sshll.u32 %s227_s6, 4  ;;  %s6139_s7 = int_to_ptr.vmem [resolvable:$true] %s3422_s7 }
  0x1e   : > { %v4953_v9 = vld [vmem:[%s4939_s17] sm:$0xf]  ;;  %v4956_v10 = vld [vmem:[%s4939_s17 + $0x4] sm:$0xf]  ;;  %v247_v11 = vld [vmem:[%s4939_s17 + $0x8] sm:$0x1]  ;;  %s6137_s12 = scalar_lea.hbm %s6225_s4, %s3807_s30  ;;  %s6147_s15 = scalar_lea.hbm %s6226_s5, %s3807_s30 }
  0x1f   : > { %v304_v12 = vshrl.u32 %v4953_v9, 16  ;;  %v307_v13 = vshll.u32 %v4953_v9, 16  ;;  %v313_v14 = vshll.u32 %v4956_v10, 16  ;;  %v317_v15 = vshrl.u32 %v4956_v10, 16  ;;  %v4964_v16 = vld [vmem:[%s4939_s17 + $0xc] sm:$0xf] }
  0x20   : > { %v323_v17 = vshll.u32 %v247_v11, 16  ;;  %v4967_v18 = vld [vmem:[%s4939_s17 + $0x10] sm:$0xf]  ;;  %v4970_v19 = vld [vmem:[%s4939_s17 + $0x14] sm:$0x1]  ;;  %v328_v26 = vshrl.u32 %v4964_v16, 16 }
  0x21   : > { %v306_v21 = vrot.slane %v304_v12, 4  ;;  %v309_v22 = vrot.slane %v307_v13, 5  ;;  %v315_v23 = vrot.slane %v313_v14, 5  ;;  %v319_v24 = vrot.slane %v317_v15, 4  ;;  %v4982_v33 = vld [vmem:[%s4939_s17 + $0x18] sm:$0xf] }
  0x22   : > { %v325_v25 = vrot.slane %v323_v17, 5  ;;  %v331_v27 = vshll.u32 %v4964_v16, 16  ;;  %v337_v28 = vshll.u32 %v4967_v18, 16  ;;  %v341_v31 = vshrl.u32 %v4967_v18, 16  ;;  %v4995_v39 = vld [vmem:[%s4939_s17 + $0x1c] sm:$0xf] }
  0x23   : > { %v310_v29 = vor.u32 %v309_v22, %v306_v21  ;;  %v320_v30 = vor.u32 %v319_v24, %v315_v23  ;;  %v347_v32 = vshll.u32 %v4970_v19, 16  ;;  %v330_v35 = vrot.slane %v328_v26, 4  ;;  %v4999_v46 = vld [vmem:[%s4939_s17 + $0x20] sm:$0x1]  ;;  %v5009_v57 = vld [vmem:[%s4939_s17 + $0x24] sm:$0xf] }
  0x24   : > { %v333_v36 = vrot.slane %v331_v27, 5  ;;  %v339_v37 = vrot.slane %v337_v28, 5  ;;  %v4992_v38 = vcombine.low %v4964_v16, %v4967_v18  ;;  %v343_v42 = vrot.slane %v341_v31, 4  ;;  %v5014_v62 = vld [vmem:[%s4939_s17 + $0x28] sm:$0xf]  ;;  %s233_s8 = scalar_lea.vmem [#allocation4], %s6121_s26 }
  0x25   : > { %v311_v40 = vrot.slane %v310_v29, 4  ;;  %v321_v41 = vrot.slane %v320_v30, 4  ;;  %v349_v43 = vrot.slane %v347_v32, 5  ;;  %v1274_v45 = vrot.slane %v4970_v19, 5  ;;  %v5022_v4 = vld [vmem:[%s4939_s17 + $0x2c] sm:$0x1] }
  0x26   : > { %v334_v44 = vor.u32 %v333_v36, %v330_v35  ;;  %v352_v47 = vshrl.u32 %v4982_v33, 16  ;;  %v355_v48 = vshll.u32 %v4982_v33, 16  ;;  %v344_v51 = vor.u32 %v343_v42, %v339_v37  ;;  %v5028_v14 = vld [vmem:[%s4939_s17 + $0x30] sm:$0xf]  ;;  %v5040_v28 = vld [vmem:[%s4939_s17 + $0x34] sm:$0xf] }
  0x27   : > { %v316_v49 = vsel %vm4986_vm4, %v311_v40, %v315_v23  ;;  %v326_v50 = vsel %vm4986_vm4, %v321_v41, %v325_v25  ;;  %v361_v52 = vshll.u32 %v4995_v39, 16  ;;  %v365_v60 = vshrl.u32 %v4995_v39, 16  ;;  %v5035_v23 = vld [vmem:[%s6222_s1 + $0x8] sm:$0xf]  ;;  %v5047_v32 = vld [vmem:[%s4939_s17 + $0x38] sm:$0x1] }
  0x28   : > { %v3551_v53 = vcombine.low %v316_v49, %v326_v50  ;;  %v335_v54 = vrot.slane %v334_v44, 4  ;;  %v354_v55 = vrot.slane %v352_v47, 4  ;;  %v357_v56 = vrot.slane %v355_v48, 5  ;;  %v5055_v48 = vld [vmem:[%s4939_s17 + $0x3c] sm:$0xf]  ;;  %s3435_s10 = sshll.u32 %s233_s8, 4  ;;  %s6149_s10 = int_to_ptr.vmem [resolvable:$true] %s3435_s10 }
  0x29   : > { %v345_v58 = vrot.slane %v344_v51, 4  ;;  %v363_v59 = vrot.slane %v361_v52, 5  ;;  %v371_v61 = vshll.u32 %v4999_v46, 16  ;;  %v1278_v1 = vrot.slane %v4995_v39, 5  ;;  %v5063_v52 = vld [vmem:[%s4939_s17 + $0x40] sm:$0xf] }
  0x2a   : > { %3967 = vmatprep.mubr.msk.bf16.mxu1 %vm737_vm3, %v3551_v53  ;;  %v340_v63 = vsel %vm4986_vm4, %v335_v54, %v339_v37  ;;  %v358_v0 = vor.u32 %v357_v56, %v354_v55  ;;  %v1281_v2 = vrot.slane %v4999_v46, 5  ;;  %v367_v11 = vrot.slane %v365_v60, 4  ;;  %s3403_s16 = scalar_lea.sflag [#allocation3], %s6121_s26 }
  0x2b   : > { %v350_v5 = vsel %vm4986_vm4, %v345_v58, %v349_v43  ;;  %v373_v12 = vrot.slane %v371_v61, 5  ;;  %v376_v13 = vshrl.u32 %v5009_v57, 16  ;;  %v379_v21 = vshll.u32 %v5009_v57, 16 }
  0x2c   : > { %v3552_v15 = vcombine.low %v340_v63, %v350_v5  ;;  %v359_v17 = vrot.slane %v358_v0, 4  ;;  %v385_v22 = vshll.u32 %v5014_v62, 16  ;;  %v368_v24 = vor.u32 %v367_v11, %v363_v59  ;;  %v5075_v5 = vld [vmem:[%s4939_s17 + $0x44] sm:$0x1] }
  0x2d   : > { %v378_v25 = vrot.slane %v376_v13, 4  ;;  %v389_v26 = vshrl.u32 %v5014_v62, 16  ;;  %v395_v27 = vshll.u32 %v5022_v4, 16  ;;  %v381_v30 = vrot.slane %v379_v21, 5  ;;  %v5080_v13 = vld [vmem:[%s4939_s17 + $0x48] sm:$0xf] }
  0x2e   : > { %4103 = vmatprep.mubr.msk.bf16.mxu0 %vm737_vm3, %v3552_v15  ;;  %3968 = vmatmul.mubr.msk.bf16.vlgmr.msra.gmra.mrb[0].mxu1 %vm737_vm3, %v3552_v15  ;;  %v364_v29 = vsel %vm4986_vm4, %v359_v17, %v363_v59  ;;  %v387_v31 = vrot.slane %v385_v22, 5  ;;  %v400_v35 = vshrl.u32 %v5028_v14, 16  ;;  %v369_v36 = vrot.slane %v368_v24, 4  ;;  %v5087_v24 = vld [vmem:[%s4939_s17 + $0x4c] sm:$0xf] }
  0x2f   : > { %4000 = vmatpush3.bf16.msra.mxu1 %v4942_v6  ;;  %v391_v37 = vrot.slane %v389_v26, 4  ;;  %v397_v40 = vrot.slane %v395_v27, 5  ;;  %v403_v41 = vshll.u32 %v5028_v14, 16  ;;  %v382_v42 = vor.u32 %v381_v30, %v378_v25 }
  0x30   : > { %v402_v43 = vrot.slane %v400_v35, 4  ;;  %v409_v44 = vshll.u32 %v5040_v28, 16  ;;  %v413_v47 = vshrl.u32 %v5040_v28, 16  ;;  %4531 = vmatprep.subr.msk.bf16.mxu1 %vm786_vm0, %v5035_v23  ;;  %v374_v49 = vsel %vm4986_vm4, %v369_v36, %v373_v12 }
  0x31   : > { %v392_v6 = vor.u32 %v391_v37, %v387_v31  ;;  %v405_v50 = vrot.slane %v403_v41, 5  ;;  %v419_v51 = vshll.u32 %v5047_v32, 16  ;;  %v5065_v53 = vcombine.low %v364_v29, %v374_v49 }
  0x32   : > { %v383_v54 = vrot.slane %v382_v42, 4  ;;  %v411_v55 = vrot.slane %v409_v44, 5  ;;  %v415_v56 = vrot.slane %v413_v47, 4  ;;  %v424_v61 = vshrl.u32 %v5055_v48, 16  ;;  %v5109_v42 = vld [vmem:[%s4939_s17 + $0x54] sm:$0xf] }
  0x33   : > { %6263 = vst [vmem:[#allocation9_spill] sm:$0xff] %v5065_v53  ;;  %v393_v58 = vrot.slane %v392_v6, 4  ;;  %v406_v59 = vor.u32 %v405_v50, %v402_v43  ;;  %v421_v60 = vrot.slane %v419_v51, 5  ;;  %4104 = vmatmul.mubr.msk.bf16.vlgmr.msra.gmra.mrb[0].mxu0 %vm737_vm3, %v5065_v53  ;;  %3971 = vmatprep.mubr.msk.bf16.mxu1 %vm737_vm3, %v5065_v53  ;;  %v427_v11 = vshll.u32 %v5055_v48, 16  ;;  %6265 = vst [vmem:[#allocation11_spill] sm:$0xff] %v5109_v42 }
  0x34   : > { %v388_v63 = vsel %vm4986_vm4, %v383_v54, %v387_v31  ;;  %v416_v0 = vor.u32 %v415_v56, %v411_v55  ;;  %v433_v12 = vshll.u32 %v5063_v52, 16  ;;  %4136 = vmatpush3.bf16.msra.mxu0 %v4945_v7  ;;  %v426_v21 = vrot.slane %v424_v61, 4  ;;  %v5114_v6 = vld [vmem:[%s4939_s17 + $0x58] sm:$0xf] }
  0x35   : > { %v398_v15 = vsel %vm4986_vm4, %v393_v58, %v397_v40  ;;  %v407_v17 = vrot.slane %v406_v59, 4  ;;  %v437_v22 = vshrl.u32 %v5063_v52, 16  ;;  %v429_v27 = vrot.slane %v427_v11, 5  ;;  %4536 = vmatprep.subr.msk.bf16.mxu0 %vm786_vm0, %v4950_v8  ;;  %v5104_v8 = vld [vmem:[%s4939_s17 + $0x50] sm:$0x1] }
  0x36   : > { %v5089_v25 = vcombine.low %v388_v63, %v398_v15  ;;  %v417_v26 = vrot.slane %v416_v0, 4  ;;  %v435_v29 = vrot.slane %v433_v12, 5  ;;  %v443_v31 = vshll.u32 %v5075_v5, 16  ;;  %v5127_v11 = vld [vmem:[%s4939_s17 + $0x5c] sm:$0x1] }
  0x37   : > { %v412_v7 = vsel %vm4986_vm4, %v407_v17, %v411_v55  ;;  %v439_v30 = vrot.slane %v437_v22, 4  ;;  %v448_v35 = vshrl.u32 %v5080_v13, 16  ;;  %v430_v37 = vor.u32 %v429_v27, %v426_v21  ;;  %v5131_v15 = vld [vmem:[%s4939_s17 + $0x60] sm:$0xf]  ;;  %v5136_v27 = vld [vmem:[%s4939_s17 + $0x64] sm:$0xf] }
  0x38   : > { %6264 = vst [vmem:[#allocation10_spill] sm:$0xff] %v5089_v25  ;;  %4107 = vmatprep.mubr.msk.bf16.mxu0 %vm737_vm3, %v5089_v25  ;;  %3972 = vmatmul.mubr.msk.bf16.gmra.mrb[4].mxu1 %vm737_vm3, %v5089_v25  ;;  %v422_v36 = vsel %vm4986_vm4, %v417_v26, %v421_v60  ;;  %v451_v40 = vshll.u32 %v5080_v13, 16  ;;  %v457_v41 = vshll.u32 %v5087_v24, 16  ;;  %v445_v47 = vrot.slane %v443_v31, 5  ;;  %v5348_v25 = vld [vmem:[%s4939_s17 + $0xa8] sm:$0xf] }
  0x39   : > { %v5111_v43 = vcombine.low %v412_v7, %v422_v36  ;;  %v440_v44 = vor.u32 %v439_v30, %v435_v29  ;;  %v450_v49 = vrot.slane %v448_v35, 4  ;;  %v431_v50 = vrot.slane %v430_v37, 4 }
  0x3a   : > { %v453_v51 = vrot.slane %v451_v40, 5  ;;  %v459_v54 = vrot.slane %v457_v41, 5  ;;  %v461_v55 = vshrl.u32 %v5087_v24, 16  ;;  %v467_v58 = vshll.u32 %v5104_v8, 16 }
  0x3b   : > { %6266 = vst [vmem:[#allocation12_spill] sm:$0xff] %v5111_v43  ;;  %3975 = vmatprep.mubr.msk.bf16.mxu1 %vm737_vm3, %v5111_v43  ;;  %v441_v56 = vrot.slane %v440_v44, 4  ;;  %v472_v59 = vshrl.u32 %v5109_v42, 16  ;;  %v475_v60 = vshll.u32 %v5109_v42, 16  ;;  %4108 = vmatmul.mubr.msk.bf16.gmra.mrb[4].mxu0 %vm737_vm3, %v5111_v43  ;;  %v436_v61 = vsel %vm4986_vm4, %v431_v50, %v435_v29 }
  0x3c   : > { %v454_v63 = vor.u32 %v453_v51, %v450_v49  ;;  %v463_v0 = vrot.slane %v461_v55, 4  ;;  %v481_v12 = vshll.u32 %v5114_v6, 16  ;;  %v469_v21 = vrot.slane %v467_v58, 5 }
  0x3d   : > { %v446_v17 = vsel %vm4986_vm4, %v441_v56, %v445_v47  ;;  %v474_v22 = vrot.slane %v472_v59, 4  ;;  %v477_v26 = vrot.slane %v475_v60, 5  ;;  %v485_v36 = vshrl.u32 %v5114_v6, 16  ;;  %v5150_v47 = vld [vmem:[%s4939_s17 + $0x68] sm:$0x1] }
  0x3e   : > { %v5138_v7 = vcombine.low %v436_v61, %v446_v17  ;;  %v455_v29 = vrot.slane %v454_v63, 4  ;;  %v464_v30 = vor.u32 %v463_v0, %v459_v54  ;;  %v483_v31 = vrot.slane %v481_v12, 5 }
  0x3f   : > { %v478_v35 = vor.u32 %v477_v26, %v474_v22  ;;  %v491_v37 = vshll.u32 %v5127_v11, 16  ;;  %v496_v40 = vshrl.u32 %v5131_v15, 16  ;;  %v499_v49 = vshll.u32 %v5131_v15, 16 }
  0x40   : > { %6267 = vst [vmem:[#allocation13_spill] sm:$0xff] %v5138_v7  ;;  %4111 = vmatprep.mubr.msk.bf16.mxu0 %vm737_vm3, %v5138_v7  ;;  %3976 = vmatmul.mubr.msk.bf16.gmra.mrb[8].mxu1 %vm737_vm3, %v5138_v7  ;;  %v460_v41 = vsel %vm4986_vm4, %v455_v29, %v459_v54  ;;  %v465_v44 = vrot.slane %v464_v30, 4  ;;  %v505_v50 = vshll.u32 %v5136_v27, 16  ;;  %v487_v55 = vrot.slane %v485_v36, 4  ;;  %v5158_v54 = vld [vmem:[%s4939_s17 + $0x6c] sm:$0xf] }
  0x41   : > { %v479_v51 = vrot.slane %v478_v35, 4  ;;  %v493_v56 = vrot.slane %v491_v37, 5  ;;  %v498_v58 = vrot.slane %v496_v40, 4  ;;  %v501_v60 = vrot.slane %v499_v49, 5  ;;  %v5174_v36 = vld [vmem:[%s4939_s17 + $0x70] sm:$0xf] }
  0x42   : > { %v470_v59 = vsel %vm4986_vm4, %v465_v44, %v469_v21  ;;  %v507_v61 = vrot.slane %v505_v50, 5  ;;  %v509_v63 = vshrl.u32 %v5136_v27, 16  ;;  %v488_v17 = vor.u32 %v487_v55, %v483_v31  ;;  %v5325_v7 = vld [vmem:[%s4939_s17 + $0xa0] sm:$0xf] }
  0x43   : > { %v5160_v0 = vcombine.low %v460_v41, %v470_v59  ;;  %v484_v12 = vsel %vm4986_vm4, %v479_v51, %v483_v31  ;;  %v515_v22 = vshll.u32 %v5150_v47, 16  ;;  %v502_v21 = vor.u32 %v501_v60, %v498_v58  ;;  %v5187_v51 = vld [vmem:[%s4939_s17 + $0x74] sm:$0x1] }
  0x44   : > { %v511_v29 = vrot.slane %v509_v63, 4  ;;  %v3616_v30 = vrot.slane %v4964_v16, 9  ;;  %v1271_v35 = vrot.slane %v4967_v18, 5  ;;  %v489_v31 = vrot.slane %v488_v17, 4 }
  0x45   : > { %6268 = vst [vmem:[#allocation14_spill] sm:$0xff] %v5160_v0  ;;  %4112 = vmatmul.mubr.msk.bf16.gmra.mrb[8].mxu0 %vm737_vm3, %v5160_v0  ;;  %3979 = vmatprep.mubr.msk.bf16.mxu1 %vm737_vm3, %v5160_v0  ;;  %v517_v37 = vrot.slane %v515_v22, 5  ;;  %v520_v40 = vshrl.u32 %v5158_v54, 16  ;;  %v523_v41 = vshll.u32 %v5158_v54, 16  ;;  %v503_v44 = vrot.slane %v502_v21, 4 }
  0x46   : > { %v512_v49 = vor.u32 %v511_v29, %v507_v61  ;;  %v1272_v16 = vsel %vm5167_vm7, %v3616_v30, %v1271_v35  ;;  %v1273_v18 = vrot.slane %v1271_v35, 4  ;;  %v494_v50 = vsel %vm4986_vm4, %v489_v31, %v493_v56  ;;  %v5199_v56 = vld [vmem:[%s4939_s17 + $0x78] sm:$0xf]  ;;  %v5215_v31 = vld [vmem:[%s4939_s17 + $0x7c] sm:$0xf] }
  0x47   : > { %v522_v55 = vrot.slane %v520_v40, 4  ;;  %v525_v58 = vrot.slane %v523_v41, 5  ;;  %v529_v59 = vshll.u32 %v5174_v36, 16  ;;  %v5190_v60 = vcombine.low %v484_v12, %v494_v50 }
  0x48   : > { %v508_v63 = vsel %vm4986_vm4, %v503_v44, %v507_v61  ;;  %v513_v17 = vrot.slane %v512_v49, 4  ;;  %v1275_v22 = vsel %vm5167_vm7, %v1273_v18, %v1274_v45  ;;  %v533_v35 = vshrl.u32 %v5174_v36, 16  ;;  %v5220_v49 = vld [vmem:[%s4939_s17 + $0x80] sm:$0x1] }
  0x49   : > { %6271 = vst [vmem:[#allocation15_spill] sm:$0xff] %v5190_v60  ;;  %v5201_v21 = vcombine.low %v1272_v16, %v1275_v22  ;;  %v526_v29 = vor.u32 %v525_v58, %v522_v55  ;;  %v531_v30 = vrot.slane %v529_v59, 5  ;;  %4115 = vmatprep.mubr.msk.bf16.mxu0 %vm737_vm3, %v5190_v60  ;;  %3980 = vmatmul.mubr.msk.bf16.gmra.mrb[12].mxu1 %vm737_vm3, %v5190_v60  ;;  %v539_v45 = vshll.u32 %v5187_v51, 16  ;;  %v5318_v60 = vld [vmem:[%s4939_s17 + $0x9c] sm:$0xf] }
  0x4a   : > { %v518_v19 = vsel %vm4986_vm4, %v513_v17, %v517_v37  ;;  %v3617_v61 = vrot.slane %v4982_v33, 9  ;;  %v1280_v12 = vrot.slane %v1278_v1, 4  ;;  %v535_v44 = vrot.slane %v533_v35, 4 }
  0x4b   : > { %6272 = vst [vmem:[#allocation16_spill] sm:$0xff] %v5201_v21  ;;  %v5217_v40 = vcombine.low %v508_v63, %v518_v19  ;;  %v527_v41 = vrot.slane %v526_v29, 4  ;;  %v544_v16 = vshrl.u32 %v5199_v56, 16  ;;  %v541_v18 = vrot.slane %v539_v45, 5  ;;  %v5246_v29 = vld [vmem:[%s4939_s17 + $0x84] sm:$0xf] }
  0x4c   : > { %v1279_v37 = vsel %vm5167_vm7, %v3617_v61, %v1278_v1  ;;  %v1282_v50 = vsel %vm5167_vm7, %v1280_v12, %v1281_v2  ;;  %v547_v55 = vshll.u32 %v5199_v56, 16  ;;  %v536_v59 = vor.u32 %v535_v44, %v531_v30 }
  0x4d   : > { %6273 = vst [vmem:[#allocation17_spill] sm:$0xff] %v5217_v40  ;;  %4116 = vmatmul.mubr.msk.bf16.gmra.mrb[12].mxu0 %vm737_vm3, %v5217_v40  ;;  %3983 = vmatprep.mubr.msk.bf16.mxu1 %vm737_vm3, %v5217_v40  ;;  %v532_v58 = vsel %vm4986_vm4, %v527_v41, %v531_v30  ;;  %v5238_v63 = vcombine.low %v1279_v37, %v1282_v50  ;;  %v546_v1 = vrot.slane %v544_v16, 4  ;;  %v553_v2 = vshll.u32 %v5215_v31, 16  ;;  %v5252_v16 = vld [vmem:[%s4939_s17 + $0x88] sm:$0xf] }
  0x4e   : > { %4137 = vmatprep.mubr.msk.bf16.mxu0 %vm737_vm3, %v5201_v21  ;;  %v549_v46 = vrot.slane %v547_v55, 5  ;;  %v557_v17 = vshrl.u32 %v5215_v31, 16  ;;  %v563_v22 = vshll.u32 %v5220_v49, 16  ;;  %v537_v35 = vrot.slane %v536_v59, 4 }
  0x4f   : > { %6274 = vst [vmem:[#allocation18_spill] sm:$0xff] %v5238_v63  ;;  %v3618_v30 = vrot.slane %v5009_v57, 9  ;;  %v1285_v19 = vrot.slane %v5014_v62, 5  ;;  %v1288_v45 = vrot.slane %v5022_v4, 5  ;;  %v555_v12 = vrot.slane %v553_v2, 5 }
  0x50   : > { %v550_v61 = vor.u32 %v549_v46, %v546_v1  ;;  %v559_v41 = vrot.slane %v557_v17, 4  ;;  %v565_v44 = vrot.slane %v563_v22, 5  ;;  %v542_v37 = vsel %vm4986_vm4, %v537_v35, %v541_v18  ;;  %v5262_v1 = vld [vmem:[%s4939_s17 + $0x8c] sm:$0x1] }
  0x51   : > { %v1286_v50 = vsel %vm5167_vm7, %v3618_v30, %v1285_v19  ;;  %v1287_v55 = vrot.slane %v1285_v19, 4  ;;  %v568_v59 = vshrl.u32 %v5246_v29, 16  ;;  %v5259_v3 = vcombine.low %v532_v58, %v542_v37 }
  0x52   : > { %v551_v40 = vrot.slane %v550_v61, 4  ;;  %v560_v4 = vor.u32 %v559_v41, %v555_v12  ;;  %v571_v46 = vshll.u32 %v5246_v29, 16  ;;  %v577_v18 = vshll.u32 %v5252_v16, 16  ;;  %v5276_v61 = vld [vmem:[%s4939_s17 + $0x90] sm:$0xf] }
  0x53   : > { %6275 = vst [vmem:[#allocation19_spill] sm:$0xff] %v5259_v3  ;;  %v1289_v2 = vsel %vm5167_vm7, %v1287_v55, %v1288_v45  ;;  %v570_v17 = vrot.slane %v568_v59, 4  ;;  %v581_v22 = vshrl.u32 %v5252_v16, 16  ;;  %3984 = vmatmul.mubr.msk.bf16.gmra.mrb[16].mxu1 %vm737_vm3, %v5259_v3  ;;  %v5281_v45 = vld [vmem:[%s6222_s1 + $0x1c] sm:$0xf]  ;;  %v1292_v59 = vrot.slane %v5040_v28, 5 }
  0x54   : > { %v556_v58 = vsel %vm4986_vm4, %v551_v40, %v555_v12  ;;  %v561_v35 = vrot.slane %v560_v4, 4  ;;  %v5273_v30 = vcombine.low %v1286_v50, %v1289_v2  ;;  %v573_v19 = vrot.slane %v571_v46, 5  ;;  %6277 = vst [vmem:[#allocation21_spill] sm:$0xff] %v5281_v45  ;;  %v5295_v46 = vld [vmem:[%s4939_s17 + $0x94] sm:$0xf] }
  0x55   : > { %4138 = vmatmul.mubr.msk.bf16.vlgmr.msra.gmra.mrb[0].mxu0 %vm737_vm3, %v5238_v63  ;;  %v579_v41 = vrot.slane %v577_v18, 5  ;;  %v583_v37 = vrot.slane %v581_v22, 4  ;;  %v587_v40 = vshll.u32 %v5262_v1, 16  ;;  %v3619_v12 = vrot.slane %v5028_v14, 9  ;;  %v5300_v3 = vld [vmem:[%s4939_s17 + $0x98] sm:$0x1] }
  0x56   : > { %6276 = vst [vmem:[#allocation20_spill] sm:$0xff] %v5273_v30  ;;  %4170 = vmatpush3.bf16.msra.mxu0 %v4974_v20  ;;  %v566_v50 = vsel %vm4986_vm4, %v561_v35, %v565_v44  ;;  %4141 = vmatprep.mubr.msk.bf16.mxu0 %vm737_vm3, %v5273_v30  ;;  %v574_v55 = vor.u32 %v573_v19, %v570_v17  ;;  %v1295_v4 = vrot.slane %v5047_v32, 5  ;;  %v592_v20 = vshrl.u32 %v5276_v61, 16 }
  0x57   : > { %v5297_v2 = vcombine.low %v556_v58, %v566_v50  ;;  %v584_v18 = vor.u32 %v583_v37, %v579_v41  ;;  %v589_v22 = vrot.slane %v587_v40, 5  ;;  %4537 = vmatprep.subr.msk.bf16.mxu0 %vm786_vm0, %v5281_v45  ;;  %v1293_v17 = vsel %vm5167_vm7, %v3619_v12, %v1292_v59 }
  0x58   : > { %v575_v44 = vrot.slane %v574_v55, 4  ;;  %v1294_v35 = vrot.slane %v1292_v59, 4  ;;  %v595_v32 = vshll.u32 %v5276_v61, 16  ;;  %v594_v19 = vrot.slane %v592_v20, 4 }
  0x59   : > { %6278 = vst [vmem:[#allocation22_spill] sm:$0xff] %v5297_v2  ;;  %3987 = vmatprep.mubr.msk.bf16.mxu1 %vm737_vm3, %v5297_v2  ;;  %v585_v58 = vrot.slane %v584_v18, 4  ;;  %v601_v37 = vshll.u32 %v5295_v46, 16  ;;  %v605_v40 = vshrl.u32 %v5295_v46, 16  ;;  %v611_v59 = vshll.u32 %v5300_v3, 16 }
  0x5a   : > { %v580_v50 = vsel %vm4986_vm4, %v575_v44, %v579_v41  ;;  %v1296_v55 = vsel %vm5167_vm7, %v1294_v35, %v1295_v4  ;;  %v597_v12 = vrot.slane %v595_v32, 5  ;;  %v3620_v4 = vrot.slane %v5055_v48, 9 }
  0x5b   : > { %v590_v2 = vsel %vm4986_vm4, %v585_v58, %v589_v22  ;;  %v5322_v18 = vcombine.low %v1293_v17, %v1296_v55  ;;  %v603_v20 = vrot.slane %v601_v37, 5  ;;  %v607_v0 = vrot.slane %v605_v40, 4  ;;  %v5338_v58 = vld [vmem:[%s4939_s17 + $0xa4] sm:$0x1] }
  0x5c   : > { %v5327_v43 = vcombine.low %v580_v50, %v590_v2  ;;  %v598_v41 = vor.u32 %v597_v12, %v594_v19  ;;  %v613_v44 = vrot.slane %v611_v59, 5  ;;  %v1299_v32 = vrot.slane %v5063_v52, 5 }
  0x5d   : > { %6279 = vst [vmem:[#allocation23_spill] sm:$0xff] %v5322_v18  ;;  %4142 = vmatmul.mubr.msk.bf16.gmra.mrb[4].mxu0 %vm737_vm3, %v5322_v18  ;;  %v608_v35 = vor.u32 %v607_v0, %v603_v20  ;;  %v1302_v22 = vrot.slane %v5075_v5, 5  ;;  %v616_v17 = vshrl.u32 %v5318_v60, 16  ;;  %v619_v19 = vshll.u32 %v5318_v60, 16 }
  0x5e   : > { %6280 = vst [vmem:[#allocation24_spill] sm:$0xff] %v5327_v43  ;;  %3988 = vmatmul.mubr.msk.bf16.gmra.mrb[20].mxu1 %vm737_vm3, %v5327_v43  ;;  %v599_v2 = vrot.slane %v598_v41, 4  ;;  %v625_v37 = vshll.u32 %v5325_v7, 16  ;;  %v629_v0 = vshrl.u32 %v5325_v7, 16  ;;  %v1300_v5 = vsel %vm5167_vm7, %v3620_v4, %v1299_v32 }
  0x5f   : > { %v609_v40 = vrot.slane %v608_v35, 4  ;;  %v1301_v50 = vrot.slane %v1299_v32, 4  ;;  %v618_v55 = vrot.slane %v616_v17, 4  ;;  %v621_v59 = vrot.slane %v619_v19, 5  ;;  %v5357_v32 = vld [vmem:[%s4939_s17 + $0xac] sm:$0xf] }
  0x60   : > { %v604_v12 = vsel %vm4986_vm4, %v599_v2, %v603_v20  ;;  %v627_v41 = vrot.slane %v625_v37, 5  ;;  %v631_v43 = vrot.slane %v629_v0, 4  ;;  %v635_v35 = vshll.u32 %v5338_v58, 16 }
  0x61   : > { %v614_v53 = vsel %vm4986_vm4, %v609_v40, %v613_v44  ;;  %v1303_v18 = vsel %vm5167_vm7, %v1301_v50, %v1302_v22  ;;  %v3621_v4 = vrot.slane %v5080_v13, 9  ;;  %v622_v2 = vor.u32 %v621_v59, %v618_v55 }
  0x62   : > { %v5359_v17 = vcombine.low %v604_v12, %v614_v53  ;;  %v5361_v20 = vcombine.low %v1300_v5, %v1303_v18  ;;  %v632_v19 = vor.u32 %v631_v43, %v627_v41  ;;  %v637_v37 = vrot.slane %v635_v35, 5  ;;  %v5371_v18 = vld [vmem:[%s4939_s17 + $0xb0] sm:$0x1] }
  0x63   : > { %v1306_v0 = vrot.slane %v5087_v24, 5  ;;  %v1309_v44 = vrot.slane %v5104_v8, 5  ;;  %v640_v22 = vshrl.u32 %v5348_v25, 16  ;;  %v623_v53 = vrot.slane %v622_v2, 4 }
  0x64   : > { %6281 = vst [vmem:[#allocation25_spill] sm:$0xff] %v5359_v17  ;;  %6282 = vst [vmem:[#allocation26_spill] sm:$0xff] %v5361_v20  ;;  %3991 = vmatprep.mubr.msk.bf16.mxu1 %vm737_vm3, %v5359_v17  ;;  %4145 = vmatprep.mubr.msk.bf16.mxu0 %vm737_vm3, %v5361_v20  ;;  %v633_v40 = vrot.slane %v632_v19, 4  ;;  %v643_v43 = vshll.u32 %v5348_v25, 16  ;;  %v649_v5 = vshll.u32 %v5357_v32, 16  ;;  %v653_v12 = vshrl.u32 %v5357_v32, 16 }
  0x65   : > { %v1307_v8 = vsel %vm5167_vm7, %v3621_v4, %v1306_v0  ;;  %v1308_v50 = vrot.slane %v1306_v0, 4  ;;  %v642_v55 = vrot.slane %v640_v22, 4  ;;  %v628_v59 = vsel %vm4986_vm4, %v623_v53, %v627_v41  ;;  %v5383_v17 = vld [vmem:[%s4939_s17 + $0xb4] sm:$0xf]  ;;  %v5395_v53 = vld [vmem:[%s4939_s17 + $0xb8] sm:$0xf] }
  0x66   : > { %v638_v35 = vsel %vm4986_vm4, %v633_v40, %v637_v37  ;;  %v645_v2 = vrot.slane %v643_v43, 5  ;;  %v651_v19 = vrot.slane %v649_v5, 5  ;;  %v655_v0 = vrot.slane %v653_v12, 4 }
  0x67   : > { %v5385_v20 = vcombine.low %v628_v59, %v638_v35  ;;  %v1310_v4 = vsel %vm5167_vm7, %v1308_v50, %v1309_v44  ;;  %v659_v22 = vshll.u32 %v5371_v18, 16  ;;  %v3622_v41 = vrot.slane %v5109_v42, 9  ;;  %v5401_v44 = vld [vmem:[%s4939_s17 + $0xbc] sm:$0x1] }
  0x68   : > { %v5390_v30 = vcombine.low %v1307_v8, %v1310_v4  ;;  %v646_v63 = vor.u32 %v645_v2, %v642_v55  ;;  %v1313_v37 = vrot.slane %v5114_v6, 5  ;;  %v656_v40 = vor.u32 %v655_v0, %v651_v19 }
  0x69   : > { %6283 = vst [vmem:[#allocation27_spill] sm:$0xff] %v5385_v20  ;;  %3992 = vmatmul.mubr.msk.bf16.gmra.mrb[24].mxu1 %vm737_vm3, %v5385_v20  ;;  %v661_v43 = vrot.slane %v659_v22, 5  ;;  %v1316_v5 = vrot.slane %v5127_v11, 5  ;;  %v664_v50 = vshrl.u32 %v5383_v17, 16  ;;  %v667_v59 = vshll.u32 %v5383_v17, 16 }
  0x6a   : > { %6284 = vst [vmem:[#allocation28_spill] sm:$0xff] %v5390_v30  ;;  %4146 = vmatmul.mubr.msk.bf16.gmra.mrb[8].mxu0 %vm737_vm3, %v5390_v30  ;;  %v647_v8 = vrot.slane %v646_v63, 4  ;;  %v1314_v55 = vsel %vm5167_vm7, %v3622_v41, %v1313_v37  ;;  %v1315_v12 = vrot.slane %v1313_v37, 4  ;;  %v657_v35 = vrot.slane %v656_v40, 4 }
  0x6b   : > { %v666_v2 = vrot.slane %v664_v50, 4  ;;  %v673_v4 = vshll.u32 %v5395_v53, 16  ;;  %v677_v11 = vshrl.u32 %v5395_v53, 16  ;;  %v669_v20 = vrot.slane %v667_v59, 5 }
  0x6c   : > { %v652_v0 = vsel %vm4986_vm4, %v647_v8, %v651_v19  ;;  %v1317_v22 = vsel %vm5167_vm7, %v1315_v12, %v1316_v5  ;;  %v683_v63 = vshll.u32 %v5401_v44, 16  ;;  %v662_v41 = vsel %vm4986_vm4, %v657_v35, %v661_v43 }
  0x6d   : > { %v5418_v37 = vcombine.low %v1314_v55, %v1317_v22  ;;  %v675_v40 = vrot.slane %v673_v4, 5  ;;  %v679_v50 = vrot.slane %v677_v11, 4  ;;  %v5420_v30 = vcombine.low %v652_v0, %v662_v41 }
  0x6e   : > { %v670_v21 = vor.u32 %v669_v20, %v666_v2  ;;  %v685_v45 = vrot.slane %v683_v63, 5  ;;  %v3623_v42 = vrot.slane %v5131_v15, 9  ;;  %v1320_v5 = vrot.slane %v5136_v27, 5 }
  0x6f   : > { %4149 = vmatprep.mubr.msk.bf16.mxu0 %vm737_vm3, %v5418_v37  ;;  %v680_v19 = vor.u32 %v679_v50, %v675_v40  ;;  %v1323_v8 = vrot.slane %v5150_v47, 5  ;;  %v3624_v43 = vrot.slane %v5158_v54, 9  ;;  %3995 = vmatprep.mubr.msk.bf16.mxu1 %vm737_vm3, %v5420_v30  ;;  %v3583_v20 = vcombine.low %v4953_v9, %v4956_v10 }
  0x70   : > { %v671_v55 = vrot.slane %v670_v21, 4  ;;  %v1327_v12 = vrot.slane %v5174_v36, 5  ;;  %v1330_v59 = vrot.slane %v5187_v51, 5  ;;  %v1321_v2 = vsel %vm5167_vm7, %v3623_v42, %v1320_v5 }
  0x71   : > { %v681_v35 = vrot.slane %v680_v19, 4  ;;  %v1322_v4 = vrot.slane %v1320_v5, 4  ;;  %v1334_v47 = vrot.slane %v5215_v31, 5  ;;  %v3625_v9 = vrot.slane %v5199_v56, 9 }
  0x72   : > { %v676_v11 = vsel %vm4986_vm4, %v671_v55, %v675_v40  ;;  %v1328_v21 = vsel %vm5167_vm7, %v3624_v43, %v1327_v12  ;;  %v1329_v0 = vrot.slane %v1327_v12, 4  ;;  %v1337_v42 = vrot.slane %v5220_v49, 5 }
  0x73   : > { %v686_v10 = vsel %vm4986_vm4, %v681_v35, %v685_v45  ;;  %v1324_v51 = vsel %vm5167_vm7, %v1322_v4, %v1323_v8  ;;  %v1336_v22 = vrot.slane %v1334_v47, 4  ;;  %v3626_v19 = vrot.slane %v5246_v29, 9 }
  0x74   : > { %v5447_v63 = vcombine.low %v676_v11, %v686_v10  ;;  %v5449_v41 = vcombine.low %v1321_v2, %v1324_v51  ;;  %v1331_v40 = vsel %vm5167_vm7, %v1329_v0, %v1330_v59  ;;  %v1341_v5 = vrot.slane %v5252_v16, 5 }
  0x75   : > { %v5453_v50 = vcombine.low %v1328_v21, %v1331_v40  ;;  %v1344_v49 = vrot.slane %v5262_v1, 5  ;;  %v1335_v45 = vsel %vm5167_vm7, %v3625_v9, %v1334_v47  ;;  %v1338_v8 = vsel %vm5167_vm7, %v1336_v22, %v1337_v42 }
  0x76   : > { %3996 = vmatmul.mubr.msk.bf16.gmra.mrb[28].mxu1 %vm737_vm3, %v5447_v63  ;;  %4150 = vmatmul.mubr.msk.bf16.gmra.mrb[12].mxu0 %vm737_vm3, %v5449_v41  ;;  %v1343_v43 = vrot.slane %v1341_v5, 4  ;;  %v1348_v55 = vrot.slane %v5295_v46, 5  ;;  %v1355_v12 = vrot.slane %v5325_v7, 5  ;;  %v1342_v59 = vsel %vm5167_vm7, %v3626_v19, %v1341_v5 }
  0x77   : > { %4001 = vmatprep.mubr.msk.bf16.mxu1 %vm737_vm3, %v3583_v20  ;;  %4153 = vmatprep.mubr.msk.bf16.mxu0 %vm737_vm3, %v5453_v50  ;;  %v5475_v20 = vcombine.low %v1335_v45, %v1338_v8  ;;  %v3627_v35 = vrot.slane %v5276_v61, 9  ;;  %v1351_v4 = vrot.slane %v5300_v3, 5  ;;  %v5481_v47 = vcombine.low %v4982_v33, %v4995_v39  ;;  %v5493_v3 = vld [vmem:[%s6222_s1 + $0xc] sm:$0xf] }
  0x78   : > { %v1345_v1 = vsel %vm5167_vm7, %v1343_v43, %v1344_v49  ;;  %v1350_v2 = vrot.slane %v1348_v55, 4  ;;  %v3628_v11 = vrot.slane %v5318_v60, 9  ;;  %v1473_v21 = vsel %vm786_vm0, %v5035_v23, 0 }
  0x79   : > { %v5486_v0 = vcombine.low %v1342_v59, %v1345_v1  ;;  %v1357_v9 = vrot.slane %v1355_v12, 4  ;;  %v1358_v10 = vrot.slane %v5338_v58, 5  ;;  %v1362_v51 = vrot.slane %v5357_v32, 5 }
  0x7a   : > { %v1349_v33 = vsel %vm5167_vm7, %v3627_v35, %v1348_v55  ;;  %v1352_v39 = vsel %vm5167_vm7, %v1350_v2, %v1351_v4  ;;  %v5507_v23 = vcombine.low %v5009_v57, %v5014_v62  ;;  %v1356_v58 = vsel %vm5167_vm7, %v3628_v11, %v1355_v12 }
  0x7b   : > { %v5513_v22 = vcombine.low %v5131_v15, %v5136_v27  ;;  %v1359_v42 = vsel %vm5167_vm7, %v1357_v9, %v1358_v10  ;;  %v3629_v40 = vrot.slane %v5348_v25, 9  ;;  %v1369_v19 = vrot.slane %v5395_v53, 5 }
  0x7c   : > { %v5523_v57 = vcombine.low %v5158_v54, %v5174_v36  ;;  %v5527_v62 = vcombine.low %v1349_v33, %v1352_v39  ;;  %v1364_v15 = vrot.slane %v1362_v51, 4  ;;  %v1365_v27 = vrot.slane %v5371_v18, 5  ;;  %v295_v18 = vld [vmem:[%s4939_s17 + $0xc8] sm:$0x1] }
  0x7d   : > { %v5532_v5 = vcombine.low %v5199_v56, %v5215_v31  ;;  %v5536_v49 = vcombine.low %v5246_v29, %v5252_v16  ;;  %v5540_v54 = vcombine.low %v5276_v61, %v5295_v46  ;;  %v5544_v36 = vcombine.low %v5318_v60, %v5325_v7  ;;  %v5563_v61 = vld [vmem:[%s4939_s17 + $0xc4] sm:$0xf] }
  0x7e   : > { %4002 = vmatmul.mubr.msk.bf16.vlgmr.msra.gmra.mrb[0].mxu1 %vm737_vm3, %v4992_v38  ;;  %4154 = vmatmul.mubr.msk.bf16.gmra.mrb[16].mxu0 %vm737_vm3, %v5475_v20  ;;  %v5548_v45 = vcombine.low %v5348_v25, %v5357_v32  ;;  %v5552_v56 = vcombine.low %v5028_v14, %v5040_v28  ;;  %v5554_v31 = vcombine.low %v1356_v58, %v1359_v42  ;;  %v3630_v16 = vrot.slane %v5383_v17, 9  ;;  %v6285_v42 = vld [vmem:[#allocation11_spill] sm:$0xff] }
  0x7f   : > { %4034 = vmatpush3.bf16.msra.mxu1 %v1473_v21  ;;  %4005 = vmatprep.mubr.msk.bf16.mxu1 %vm737_vm3, %v5481_v47  ;;  %v5558_v29 = vcombine.low %v5383_v17, %v5395_v53  ;;  %v1371_v7 = vrot.slane %v1369_v19, 4  ;;  %v1372_v60 = vrot.slane %v5401_v44, 5  ;;  %v1363_v14 = vsel %vm5167_vm7, %v3629_v40, %v1362_v51  ;;  %v5583_v17 = vld [vmem:[%s4939_s17 + $0xc0] sm:$0xf] }
  0x80   : > { %4157 = vmatprep.mubr.msk.bf16.mxu0 %vm737_vm3, %v5486_v0  ;;  %4532 = vmatprep.subr.msk.bf16.mxu1 %vm786_vm0, %v5493_v3  ;;  %v1366_v28 = vsel %vm5167_vm7, %v1364_v15, %v1365_v27  ;;  %v2105_v25 = vrot.slane %v5563_v61, 5  ;;  %v1370_v46 = vsel %vm5167_vm7, %v3630_v16, %v1369_v19  ;;  %v5588_v53 = vcombine.low %v5055_v48, %v5063_v52 }
  0x81   : > { %v1373_v32 = vsel %vm5167_vm7, %v1371_v7, %v1372_v60  ;;  %v5590_v44 = vcombine.low %v1363_v14, %v1366_v28  ;;  %v5594_v8 = vcombine.low %v5080_v13, %v5087_v24  ;;  %v1875_v43 = vshrl.u32 %v5583_v17, 16  ;;  %v3756_v60 = vld [vmem:[%s6222_s1 + $0x20] sm:$0xf]  ;;  %v4730_v14 = vld [vmem:[%s4939_s17 + $0x4] sm:$0xf] }
  0x82   : > { %v1878_v55 = vshll.u32 %v5583_v17, 16  ;;  %v1884_v12 = vshll.u32 %v5563_v61, 16  ;;  %v1888_v59 = vshrl.u32 %v5563_v61, 16  ;;  %v5600_v1 = vcombine.low %v1370_v46, %v1373_v32  ;;  %v4732_v32 = vld [vmem:[%s4939_s17] sm:$0xf] }
  0x83   : > { %v3700_v35 = vrot.slane %v5583_v17, 9  ;;  %v2107_v48 = vrot.slane %v2105_v25, 4  ;;  %v2108_v52 = vrot.slane %v295_v18, 5  ;;  %v1877_v2 = vrot.slane %v1875_v43, 4 }
  0x84   : > { %v1880_v4 = vrot.slane %v1878_v55, 5  ;;  %v1886_v11 = vrot.slane %v1884_v12, 5  ;;  %v1890_v21 = vrot.slane %v1888_v59, 4  ;;  %v1894_v9 = vshll.u32 %v295_v18, 16 }
  0x85   : > { %v2106_v10 = vsel %vm5167_vm7, %v3700_v35, %v2105_v25  ;;  %v2109_v51 = vsel %vm5167_vm7, %v2107_v48, %v2108_v52  ;;  %v5617_v40 = vcombine.low %v6285_v42, %v5114_v6  ;;  %v6286_v6 = vld [vmem:[#allocation21_spill] sm:$0xff]  ;;  %v1264_v28 = vrot.slane %v4730_v14, 5  ;;  %v4731_v25 = vld [vmem:[%s4939_s17 + $0x8] sm:$0x1]  ;;  %v6288_v52 = vld [vmem:[#allocation18_spill] sm:$0xff] }
  0x86   : > { %4006 = vmatmul.mubr.msk.bf16.gmra.mrb[4].mxu1 %vm737_vm3, %v5507_v23  ;;  %4158 = vmatmul.mubr.msk.bf16.gmra.mrb[20].mxu0 %vm737_vm3, %v5527_v62  ;;  %v1881_v13 = vor.u32 %v1880_v4, %v1877_v2  ;;  %v1891_v24 = vor.u32 %v1890_v21, %v1886_v11  ;;  %v1896_v58 = vrot.slane %v1894_v9, 5  ;;  %v5619_v19 = vcombine.low %v2106_v10, %v2109_v51  ;;  %v6287_v48 = vld [vmem:[#allocation16_spill] sm:$0xff]  ;;  %v4733_v2 = vld [vmem:[%s6222_s1 + $0x10] sm:$0xf]  ;;  %v6290_v4 = vld [vmem:[#allocation23_spill] sm:$0xff] }
  0x87   : > { %4009 = vmatprep.mubr.msk.bf16.mxu1 %vm737_vm3, %v5552_v56  ;;  %4161 = vmatprep.mubr.msk.bf16.mxu0 %vm737_vm3, %v5554_v31  ;;  %v2553_v7 = vsel %vm786_vm0, %v6286_v6, 0  ;;  %v1267_v46 = vrot.slane %v4731_v25, 5  ;;  %v3615_v18 = vrot.slane %v4732_v32, 9  ;;  %v1266_v43 = vrot.slane %v1264_v28, 4  ;;  %v6291_v21 = vld [vmem:[#allocation26_spill] sm:$0xff]  ;;  %v6298_v42 = vld [vmem:[#allocation15_spill] sm:$0xff] }
  0x88   : > { %v1882_v33 = vrot.slane %v1881_v13, 4  ;;  %v1892_v39 = vrot.slane %v1891_v24, 4  ;;  %v1679_v35 = vsel %vm786_vm0, %v5493_v3, 0  ;;  %v6289_v3 = vld [vmem:[#allocation20_spill] sm:$0xff]  ;;  %v5714_v24 = vld [vmem:[%s4939_s17 + $0xcc] sm:$0xf] }
  0x89   : > { %v1265_v55 = vsel %vm5167_vm7, %v3615_v18, %v1264_v28  ;;  %v1268_v12 = vsel %vm5167_vm7, %v1266_v43, %v1267_v46  ;;  %v6292_v13 = vld [vmem:[#allocation28_spill] sm:$0xff]  ;;  %v5717_v9 = vld [vmem:[%s4939_s17 + $0xd0] sm:$0xf]  ;;  %v2765_v10 = vsel %vm786_vm0, %v3756_v60, 0  ;;  %v6294_v51 = vld [vmem:[#allocation10_spill] sm:$0xff]  ;;  %v2524_v14 = vshll.u32 %v5714_v24, 16 }
  0x8a   : > { %v1887_v15 = vsel %vm4986_vm4, %v1882_v33, %v1886_v11  ;;  %v1897_v27 = vsel %vm4986_vm4, %v1892_v39, %v1896_v58  ;;  %v3632_v59 = vcombine.low %v1265_v55, %v1268_v12  ;;  %v5703_v11 = vcombine.low %v5583_v17, %v5563_v61  ;;  %v6293_v17 = vld [vmem:[#allocation9_spill] sm:$0xff]  ;;  %v6295_v33 = vld [vmem:[#allocation12_spill] sm:$0xff]  ;;  %v6297_v58 = vld [vmem:[#allocation14_spill] sm:$0xff] }
  0x8b   : > { %v5625_v16 = vcombine.low %v1887_v15, %v1897_v27  ;;  %v3720_v61 = vcombine.low %v5714_v24, %v5717_v9  ;;  %v6296_v39 = vld [vmem:[#allocation13_spill] sm:$0xff]  ;;  %v6300_v27 = vld [vmem:[#allocation19_spill] sm:$0xff]  ;;  %v6301_v6 = vld [vmem:[#allocation22_spill] sm:$0xff]  ;;  %v2534_v28 = vshrl.u32 %v5717_v9, 16  ;;  %v2526_v32 = vrot.slane %v2524_v14, 5 }
  0x8c   : > { %v6299_v15 = vld [vmem:[#allocation17_spill] sm:$0xff]  ;;  %v6303_v25 = vld [vmem:[#allocation8_spill] sm:$0xff]  ;;  %v298_v55 = vld [vmem:[%s4939_s17 + $0xd4] sm:$0x1]  ;;  %v2751_v34 = vrot.slane %v5717_v9, 5  ;;  %s3811_s17 = sshll.u32 %s4925_s9, 8 }
  0x8d   : > { %v6304_v46 = vld [vmem:[#allocation25_spill] sm:$0xff]  ;;  %v2536_v43 = vrot.slane %v2534_v28, 4  ;;  %v6305_v12 = vld [vmem:[#allocation27_spill] sm:$0xff]  ;;  %s5928_s25 = scalar_lea.vmem %s6224_s3, %s3811_s17  ;;  %s4734_s17 = scalar_lea.vmem %s6139_s7, 16 }
  0x8e   : > { %4010 = vmatmul.mubr.msk.bf16.gmra.mrb[8].mxu1 %vm737_vm3, %v5588_v53  ;;  %4162 = vmatmul.mubr.msk.bf16.gmra.mrb[24].mxu0 %vm737_vm3, %v5590_v44  ;;  %p4735_p11 = scmp.ne.s32.totalorder %s6139_s7, %s4734_s17  ;;  %s4830_s9 = smov [#allocation2]  }
  0x8f   : > { %4013 = vmatprep.mubr.msk.bf16.mxu1 %vm737_vm3, %v5594_v8  ;;  %4165 = vmatprep.mubr.msk.bf16.mxu0 %vm737_vm3, %v5600_v1  ;;  %s4738_s23 = sshll.u32 %s4830_s9, 4  ;;  %s4739_s23 = int_to_ptr.vmem [resolvable:$false] %s4738_s23 }
  0x90   : > { %p4736_p12 = pnand %p4735_p11, %p4900_p5  ;;  %s4740_s22 = scalar_lea.vmem %s4739_s23, 32 }
  0x91   : > { %p4741_p0 = scmp.lt.s32.totalorder %s6139_s7, %s4739_s23  ;;  %p4742_p1 = scmp.lt.s32.totalorder %s4740_s22, %s4734_s17 }
  0x92   : > { %p4737_p13 = pneg %p4736_p12 }
  0x93   : > { %p4743_p2 = por %p4742_p1, %p4741_p0 }
  0x95   : > { %p4744_p3 = pnand %p4743_p2, %p4737_p13 }
  0x96   : > { %4014 = vmatmul.mubr.msk.bf16.gmra.mrb[12].mxu1 %vm737_vm3, %v5617_v40  ;;  %4166 = vmatmul.mubr.msk.bf16.gmra.mrb[28].mxu0 %vm737_vm3, %v5619_v19 }
  0x97   : > { %4017 = vmatprep.mubr.msk.bf16.mxu1 %vm737_vm3, %v5513_v22  ;;  %4171 = vmatprep.mubr.msk.bf16.mxu0 %vm737_vm3, %v5481_v47 }
  0x9e   : > { %4018 = vmatmul.mubr.msk.bf16.gmra.mrb[16].mxu1 %vm737_vm3, %v5523_v57  ;;  %4172 = vmatmul.mubr.msk.bf16.vlgmr.msra.gmra.mrb[0].mxu0 %vm737_vm3, %v5507_v23 }
  0x9f   : > { %4204 = vmatpush3.bf16.msra.mxu0 %v2553_v7  ;;  %4021 = vmatprep.mubr.msk.bf16.mxu1 %vm737_vm3, %v5532_v5  ;;  %v6302_v7 = vld [vmem:[#allocation24_spill] sm:$0xff] }
  0xa0   : > { %4175 = vmatprep.mubr.msk.bf16.mxu0 %vm737_vm3, %v5552_v56  ;;  %4538 = vmatprep.subr.msk.bf16.mxu0 %vm786_vm0, %v3756_v60  ;;  %v2521_v60 = vshrl.u32 %v5714_v24, 16 }
  0xa6   : > { %4022 = vmatmul.mubr.msk.bf16.gmra.mrb[20].mxu1 %vm737_vm3, %v5536_v49  ;;  %4176 = vmatmul.mubr.msk.bf16.gmra.mrb[4].mxu0 %vm737_vm3, %v5588_v53 }
  0xa7   : > { %4025 = vmatprep.mubr.msk.bf16.mxu1 %vm737_vm3, %v5540_v54  ;;  %4179 = vmatprep.mubr.msk.bf16.mxu0 %vm737_vm3, %v5594_v8 }
  0xae   : > { %4026 = vmatmul.mubr.msk.bf16.gmra.mrb[24].mxu1 %vm737_vm3, %v5544_v36  ;;  %4180 = vmatmul.mubr.msk.bf16.gmra.mrb[8].mxu0 %vm737_vm3, %v5617_v40 }
  0xaf   : > { %4029 = vmatprep.mubr.msk.bf16.mxu1 %vm737_vm3, %v5548_v45  ;;  %4183 = vmatprep.mubr.msk.bf16.mxu0 %vm737_vm3, %v5513_v22 }
  0xb6   : > { %4030 = vmatmul.mubr.msk.bf16.gmra.mrb[28].mxu1 %vm737_vm3, %v5558_v29  ;;  %4184 = vmatmul.mubr.msk.bf16.gmra.mrb[12].mxu0 %vm737_vm3, %v5523_v57 }
  0xb7   : > { %4035 = vmatprep.mubr.msk.bf16.mxu1 %vm737_vm3, %v3632_v59  ;;  %4187 = vmatprep.mubr.msk.bf16.mxu0 %vm737_vm3, %v5532_v5 }
  0xbe   : > { %4036 = vmatmul.mubr.msk.bf16.vlgmr.msra.gmra.mrb[0].mxu1 %vm737_vm3, %v6287_v48  ;;  %4188 = vmatmul.mubr.msk.bf16.gmra.mrb[16].mxu0 %vm737_vm3, %v5536_v49 }
  0xbf   : > { %4068 = vmatpush3.bf16.msra.mxu1 %v1679_v35  ;;  %4039 = vmatprep.mubr.msk.bf16.mxu1 %vm737_vm3, %v6288_v52  ;;  %v2540_v35 = vshll.u32 %v298_v55, 16 }
  0xc0   : > { %4191 = vmatprep.mubr.msk.bf16.mxu0 %vm737_vm3, %v5540_v54  ;;  %4534 = vmatprep.subr.msk.bf16.mxu1 %vm786_vm0, %v4733_v2 }
  0xc6   : > { %4040 = vmatmul.mubr.msk.bf16.gmra.mrb[4].mxu1 %vm737_vm3, %v6289_v3  ;;  %4192 = vmatmul.mubr.msk.bf16.gmra.mrb[20].mxu0 %vm737_vm3, %v5544_v36 }
  0xc7   : > { %4043 = vmatprep.mubr.msk.bf16.mxu1 %vm737_vm3, %v6290_v4  ;;  %4195 = vmatprep.mubr.msk.bf16.mxu0 %vm737_vm3, %v5548_v45 }
  0xce   : > { %4044 = vmatmul.mubr.msk.bf16.gmra.mrb[8].mxu1 %vm737_vm3, %v6291_v21  ;;  %4196 = vmatmul.mubr.msk.bf16.gmra.mrb[24].mxu0 %vm737_vm3, %v5558_v29 }
  0xcf   : > { %4047 = vmatprep.mubr.msk.bf16.mxu1 %vm737_vm3, %v6292_v13  ;;  %4199 = vmatprep.mubr.msk.bf16.mxu0 %vm737_vm3, %v5703_v11 }
  0xd6   : > { %4048 = vmatmul.mubr.msk.bf16.gmra.mrb[12].mxu1 %vm737_vm3, %v5418_v37  ;;  %4200 = vmatmul.mubr.msk.bf16.gmra.mrb[28].mxu0 %vm737_vm3, %v3720_v61  ;;  %v2542_v61 = vrot.slane %v2540_v35, 5 }
  0xd7   : > { %4051 = vmatprep.mubr.msk.bf16.mxu1 %vm737_vm3, %v5449_v41  ;;  %4205 = vmatprep.mubr.msk.bf16.mxu0 %vm737_vm3, %v6293_v17 }
  0xde   : > { %4052 = vmatmul.mubr.msk.bf16.gmra.mrb[16].mxu1 %vm737_vm3, %v5453_v50  ;;  %4206 = vmatmul.mubr.msk.bf16.vlgmr.msra.gmra.mrb[0].mxu0 %vm737_vm3, %v6294_v51 }
  0xdf   : > { %4238 = vmatpush3.bf16.msra.mxu0 %v2765_v10  ;;  %4055 = vmatprep.mubr.msk.bf16.mxu1 %vm737_vm3, %v5475_v20 }
  0xe0   : > { %4209 = vmatprep.mubr.msk.bf16.mxu0 %vm737_vm3, %v6295_v33 }
  0xe6   : > { %4056 = vmatmul.mubr.msk.bf16.gmra.mrb[20].mxu1 %vm737_vm3, %v5486_v0  ;;  %4210 = vmatmul.mubr.msk.bf16.gmra.mrb[4].mxu0 %vm737_vm3, %v6296_v39 }
  0xe7   : > { %4059 = vmatprep.mubr.msk.bf16.mxu1 %vm737_vm3, %v5527_v62  ;;  %4213 = vmatprep.mubr.msk.bf16.mxu0 %vm737_vm3, %v6297_v58 }
  0xee   : > { %4060 = vmatmul.mubr.msk.bf16.gmra.mrb[24].mxu1 %vm737_vm3, %v5554_v31  ;;  %4214 = vmatmul.mubr.msk.bf16.gmra.mrb[8].mxu0 %vm737_vm3, %v6298_v42 }
  0xef   : > { %4063 = vmatprep.mubr.msk.bf16.mxu1 %vm737_vm3, %v5590_v44  ;;  %4217 = vmatprep.mubr.msk.bf16.mxu0 %vm737_vm3, %v6299_v15 }
  0xf6   : > { %4064 = vmatmul.mubr.msk.bf16.gmra.mrb[28].mxu1 %vm737_vm3, %v5600_v1  ;;  %4218 = vmatmul.mubr.msk.bf16.gmra.mrb[12].mxu0 %vm737_vm3, %v6300_v27 }
  0xf7   : > { %4069 = vmatprep.mubr.msk.bf16.mxu1 %vm737_vm3, %v4992_v38  ;;  %4221 = vmatprep.mubr.msk.bf16.mxu0 %vm737_vm3, %v6301_v6  ;;  %v2530_v38 = vshll.u32 %v5717_v9, 16 }
  0xf9   : > { %v2532_v18 = vrot.slane %v2530_v38, 5 }
  0xfb   : > { %v2537_v59 = vor.u32 %v2536_v43, %v2532_v18 }
  0xfd   : > { %v2538_v2 = vrot.slane %v2537_v59, 4 }
  0xfe   : > { %4070 = vmatmul.mubr.msk.bf16.vlgmr.msra.gmra.mrb[0].mxu1 %vm737_vm3, %v5481_v47  ;;  %4222 = vmatmul.mubr.msk.bf16.gmra.mrb[16].mxu0 %vm737_vm3, %v6302_v7  ;;  %v2523_v47 = vrot.slane %v2521_v60, 4 }
  0xff   : > { %4272 = vmatpush3.bf16.msra.mxu1 %v6303_v25  ;;  %4073 = vmatprep.mubr.msk.bf16.mxu1 %vm737_vm3, %v5507_v23 }
 0x100   : > { %4225 = vmatprep.mubr.msk.bf16.mxu0 %vm737_vm3, %v6304_v46  ;;  %v2527_v23 = vor.u32 %v2526_v32, %v2523_v47 }
 0x102   : > { %v2528_v48 = vrot.slane %v2527_v23, 4 }
 0x106   : > { %4074 = vmatmul.mubr.msk.bf16.gmra.mrb[4].mxu1 %vm737_vm3, %v5552_v56  ;;  %4226 = vmatmul.mubr.msk.bf16.gmra.mrb[20].mxu0 %vm737_vm3, %v6305_v12  ;;  %v2533_v56 = vsel %vm4986_vm4, %v2528_v48, %v2532_v18 }
 0x107   : > { %4077 = vmatprep.mubr.msk.bf16.mxu1 %vm737_vm3, %v5588_v53  ;;  %4229 = vmatprep.mubr.msk.bf16.mxu0 %vm737_vm3, %v5420_v30  ;;  %v2543_v53 = vsel %vm4986_vm4, %v2538_v2, %v2542_v61 }
 0x108   : > { %v3738_v17 = vcombine.low %v2533_v56, %v2543_v53 }
 0x10e   : > { %4078 = vmatmul.mubr.msk.bf16.gmra.mrb[8].mxu1 %vm737_vm3, %v5594_v8  ;;  %4230 = vmatmul.mubr.msk.bf16.gmra.mrb[24].mxu0 %vm737_vm3, %v5447_v63 }
 0x10f   : > { %4081 = vmatprep.mubr.msk.bf16.mxu1 %vm737_vm3, %v5617_v40  ;;  %4233 = vmatprep.mubr.msk.bf16.mxu0 %vm737_vm3, %v5625_v16 }
 0x116   : > { %4082 = vmatmul.mubr.msk.bf16.gmra.mrb[12].mxu1 %vm737_vm3, %v5513_v22  ;;  %4234 = vmatmul.mubr.msk.bf16.gmra.mrb[28].mxu0 %vm737_vm3, %v3738_v17 }
 0x117   : > { %4085 = vmatprep.mubr.msk.bf16.mxu1 %vm737_vm3, %v5523_v57  ;;  %4239 = vmatprep.mubr.msk.bf16.mxu0 %vm737_vm3, %v6288_v52 }
 0x11e   : > { %4086 = vmatmul.mubr.msk.bf16.gmra.mrb[16].mxu1 %vm737_vm3, %v5532_v5  ;;  %4240 = vmatmul.mubr.msk.bf16.vlgmr.msra.gmra.mrb[0].mxu0 %vm737_vm3, %v6289_v3 }
 0x11f   : > { %4089 = vmatprep.mubr.msk.bf16.mxu1 %vm737_vm3, %v5536_v49  ;;  %4243 = vmatprep.mubr.msk.bf16.mxu0 %vm737_vm3, %v6290_v4 }
 0x126   : > { %4090 = vmatmul.mubr.msk.bf16.gmra.mrb[20].mxu1 %vm737_vm3, %v5540_v54  ;;  %4244 = vmatmul.mubr.msk.bf16.gmra.mrb[4].mxu0 %vm737_vm3, %v6291_v21 }
 0x127   : > { %4093 = vmatprep.mubr.msk.bf16.mxu1 %vm737_vm3, %v5544_v36  ;;  %4247 = vmatprep.mubr.msk.bf16.mxu0 %vm737_vm3, %v6292_v13 }
 0x12e   : > { %4094 = vmatmul.mubr.msk.bf16.gmra.mrb[24].mxu1 %vm737_vm3, %v5548_v45  ;;  %4248 = vmatmul.mubr.msk.bf16.gmra.mrb[8].mxu0 %vm737_vm3, %v5418_v37  ;;  %v3755_v37 = vrot.slane %v5714_v24, 9 }
 0x12f   : > { %4097 = vmatprep.mubr.msk.bf16.mxu1 %vm737_vm3, %v5558_v29  ;;  %4251 = vmatprep.mubr.msk.bf16.mxu0 %vm737_vm3, %v5449_v41  ;;  %v2753_v41 = vrot.slane %v2751_v34, 4 }
 0x136   : > { %4098 = vmatmul.mubr.msk.bf16.gmra.mrb[28].mxu1 %vm737_vm3, %v5703_v11  ;;  %4252 = vmatmul.mubr.msk.bf16.gmra.mrb[12].mxu0 %vm737_vm3, %v5453_v50  ;;  %v2754_v50 = vrot.slane %v298_v55, 5 }
 0x137   : > { %4119 = vmatprep.mubr.msk.bf16.mxu1 %vm737_vm3, %v6300_v27  ;;  %4255 = vmatprep.mubr.msk.bf16.mxu0 %vm737_vm3, %v5475_v20  ;;  %v2752_v20 = vsel %vm5167_vm7, %v3755_v37, %v2751_v34 }
 0x13e   : > { %4120 = vmatmul.mubr.msk.bf16.vlgmr.msra.gmra.mrb[16].mxu1 %vm737_vm3, %v6301_v6  ;;  %4256 = vmatmul.mubr.msk.bf16.gmra.mrb[16].mxu0 %vm737_vm3, %v5486_v0  ;;  %v2755_v0 = vsel %vm5167_vm7, %v2753_v41, %v2754_v50 }
 0x13f   : > { %4123 = vmatprep.mubr.msk.bf16.mxu1 %vm737_vm3, %v6302_v7  ;;  %4259 = vmatprep.mubr.msk.bf16.mxu0 %vm737_vm3, %v5527_v62  ;;  %v3757_v22 = vcombine.low %v2752_v20, %v2755_v0 }
 0x146   : > { %4124 = vmatmul.mubr.msk.bf16.gmra.mrb[20].mxu1 %vm737_vm3, %v6304_v46  ;;  %4260 = vmatmul.mubr.msk.bf16.gmra.mrb[20].mxu0 %vm737_vm3, %v5554_v31 }
 0x147   : > { %4127 = vmatprep.mubr.msk.bf16.mxu1 %vm737_vm3, %v6305_v12  ;;  %4263 = vmatprep.mubr.msk.bf16.mxu0 %vm737_vm3, %v5590_v44 }
 0x14e   : > { %4128 = vmatmul.mubr.msk.bf16.gmra.mrb[24].mxu1 %vm737_vm3, %v5420_v30  ;;  %4264 = vmatmul.mubr.msk.bf16.gmra.mrb[24].mxu0 %vm737_vm3, %v5600_v1 }
 0x14f   : > { %4131 = vmatprep.mubr.msk.bf16.mxu1 %vm737_vm3, %v5447_v63  ;;  %4267 = vmatprep.mubr.msk.bf16.mxu0 %vm737_vm3, %v5619_v19 }
 0x156   : > { %4132 = vmatmul.mubr.msk.bf16.gmra.mrb[28].mxu1 %vm737_vm3, %v5625_v16  ;;  %4268 = vmatmul.mubr.msk.bf16.gmra.mrb[28].mxu0 %vm737_vm3, %v3757_v22  ;;  %v5886_v16 = vld [vmem:[%s6223_s2] ss:$0 sm:$0xff] }
 0x1d1   : > { %v4071_v30 = vpop.f32.mrb[0].mxu1 }
 0x1d2   : > { %v1715_v57 = vpop.f32.mrb[1].mxu1 }
 0x1d3   : > { %v4072_v62 = vpop.f32.mrb[2].mxu1 }
 0x1d4   : > { %v1718_v5 = vpop.f32.mrb[3].mxu1 }
 0x1d9   : > { %v4075_v63 = vpop.f32.mrb[4].mxu1 }
 0x1da   : > { %v1731_v49 = vpop.f32.mrb[5].mxu1 }
 0x1db   : > { %v4076_v54 = vpop.f32.mrb[6].mxu1 }
 0x1dc   : > { %v1734_v36 = vpop.f32.mrb[7].mxu1 }
 0x1e1   : > { %v5867_v45 = vpop.f32.mrb[8].mxu1 }
 0x1e2   : > { %v5869_v31 = vpop.f32.mrb[9].mxu1 }
 0x1e3   : > { %v5871_v26 = vpop.f32.mrb[10].mxu1 }
 0x1e4   : > { %v5873_v29 = vpop.f32.mrb[11].mxu1 }
 0x1e9   : > { %v5875_v44 = vpop.f32.mrb[12].mxu1 }
 0x1ea   : > { %v5877_v8 = vpop.f32.mrb[13].mxu1 }
 0x1eb   : > { %v5879_v1 = vpop.f32.mrb[14].mxu1 }
 0x1ec   : > { %v5881_v40 = vpop.f32.mrb[15].mxu1 }
 0x1f1   : > { %v4241_v19 = vpop.f32.mrb[0].mxu0 }
 0x1f2   : > { %v4273_v52 = vadd.f32 %v4241_v19, %v4071_v30  ;;  %v2801_v3 = vpop.f32.mrb[1].mxu0 }
 0x1f3   : > { %v4274_v4 = vadd.f32 %v2801_v3, %v1715_v57  ;;  %v4242_v11 = vpop.f32.mrb[2].mxu0 }
 0x1f4   : > { %v2969_v21 = vadd.f32 %v4273_v52, %v5886_v16  ;;  %v4275_v13 = vadd.f32 %v4242_v11, %v4072_v62  ;;  %v2804_v24 = vpop.f32.mrb[3].mxu0 }
 0x1f5   : > { %v2967_v9 = vadd.f32 %v4274_v4, %v5886_v16  ;;  %v4276_v10 = vadd.f32 %v2804_v24, %v1718_v5 }
 0x1f6   : > { %v3777_v51 = vmul.f32 -1.442695, %v2969_v21  ;;  %v2970_v33 = vadd.f32 %v4275_v13, %v5886_v16  ;;  %v3003_v15 = vsel %vm2999_vm8, %v2969_v21, 0.0  ;;  %v3073_v27 = vmul.f32 %v2969_v21, %v2969_v21 }
 0x1f7   : > { %v3071_v39 = vmul.f32 %v2967_v9, %v2967_v9  ;;  %v3775_v58 = vmul.f32 -1.442695, %v2967_v9  ;;  %v2968_v42 = vadd.f32 %v4276_v10, %v5886_v16  ;;  %v3000_v6 = vsel %vm2999_vm8, %v2967_v9, 0.0 }
 0x1f8   : > { %4602 = vpow2.f32 %v3777_v51  ;;  %v3005_v7 = vsel %vm2999_vm8, %v2970_v33, 0.0  ;;  %v3778_v60 = vmul.f32 -1.442695, %v2970_v33  ;;  %v3074_v25 = vmul.f32 %v2970_v33, %v2970_v33 }
 0x1f9   : > { %4604 = vpow2.f32 %v3775_v58  ;;  %v3001_v14 = vsel %vm2999_vm8, %v2968_v42, 0.0  ;;  %v4245_v28 = vpop.f32.mrb[4].mxu0  ;;  %v3072_v46 = vmul.f32 %v2968_v42, %v2968_v42  ;;  %v3776_v47 = vmul.f32 -1.442695, %v2968_v42 }
 0x1fa   : > { %v3002_v38 = vadd.f32 %v3001_v14, %v3000_v6  ;;  %v2817_v32 = vpop.f32.mrb[5].mxu0  ;;  %v3103_v18 = vsel %vm2999_vm8, %v3071_v39, 0.0  ;;  %4606 = vpow2.f32 %v3778_v60  ;;  %v4277_v43 = vadd.f32 %v4245_v28, %v4075_v63 }
 0x1fb   : > { %v4278_v55 = vadd.f32 %v2817_v32, %v1731_v49  ;;  %v4246_v12 = vpop.f32.mrb[6].mxu0  ;;  %v3104_v59 = vsel %vm2999_vm8, %v3072_v46, 0.0  ;;  %4608 = vpow2.f32 %v3776_v47  ;;  %v3106_v17 = vsel %vm2999_vm8, %v3073_v27, 0.0 }
 0x1fc   : > { %v3004_v23 = vadd.f32 %v3003_v15, %v3002_v38  ;;  %v4279_v35 = vadd.f32 %v4246_v12, %v4076_v54  ;;  %v2820_v48 = vpop.f32.mrb[7].mxu0  ;;  %v3105_v2 = vadd.f32 %v3104_v59, %v3103_v18  ;;  %v2973_v61 = vadd.f32 %v4277_v43, %v5886_v16 }
 0x1fd   : > { %v2971_v56 = vadd.f32 %v4278_v55, %v5886_v16  ;;  %v4280_v53 = vadd.f32 %v2820_v48, %v1734_v36  ;;  %v3108_v41 = vsel %vm2999_vm8, %v3074_v25, 0.0 }
 0x1fe   : > { %v3006_v34 = vadd.f32 %v3005_v7, %v3004_v23  ;;  %v2974_v37 = vadd.f32 %v4279_v35, %v5886_v16  ;;  %v3107_v50 = vadd.f32 %v3106_v17, %v3105_v2  ;;  %v3781_v20 = vmul.f32 -1.442695, %v2973_v61 }
 0x1ff   : > { %v3011_v0 = vsel %vm2999_vm8, %v2973_v61, 0.0  ;;  %v3007_v22 = vsel %vm2999_vm8, %v2971_v56, 0.0  ;;  %v3075_v30 = vmul.f32 %v2971_v56, %v2971_v56  ;;  %v3779_v57 = vmul.f32 -1.442695, %v2971_v56 }
 0x200   : > { %v3077_v62 = vmul.f32 %v2973_v61, %v2973_v61  ;;  %4610 = vpow2.f32 %v3781_v20  ;;  %v3008_v5 = vadd.f32 %v3007_v22, %v3006_v34  ;;  %v3109_v63 = vadd.f32 %v3108_v41, %v3107_v50 }
 0x201   : > { %v4249_v49 = vpop.f32.mrb[8].mxu0  ;;  %v3110_v36 = vsel %vm2999_vm8, %v3075_v30, 0.0  ;;  %4612 = vpow2.f32 %v3779_v57  ;;  %v3013_v19 = vsel %vm2999_vm8, %v2974_v37, 0.0  ;;  %v3782_v52 = vmul.f32 -1.442695, %v2974_v37 }
 0x202   : > { %v4603_v54 = vpop.eup %4602  ;;  %v2833_v3 = vpop.f32.mrb[9].mxu0  ;;  %v3111_v21 = vadd.f32 %v3110_v36, %v3109_v63  ;;  %v2972_v13 = vadd.f32 %v4280_v53, %v5886_v16  ;;  %v4281_v24 = vadd.f32 %v4249_v49, %v5867_v45  ;;  %v3078_v51 = vmul.f32 %v2974_v37, %v2974_v37 }
 0x203   : > { %v4605_v4 = vpop.eup %4604  ;;  %v3271_v11 = vadd.f32 1.0, %v4603_v54  ;;  %v4250_v9 = vpop.f32.mrb[10].mxu0  ;;  %4614 = vpow2.f32 %v3782_v52  ;;  %v4282_v33 = vadd.f32 %v2833_v3, %v5869_v31  ;;  %v3114_v25 = vsel %vm2999_vm8, %v3077_v62, 0.0 }
 0x204   : > { %v3269_v10 = vadd.f32 1.0, %v4605_v4  ;;  %v2836_v39 = vpop.f32.mrb[11].mxu0  ;;  %v4607_v58 = vpop.eup %4606  ;;  %v3009_v42 = vsel %vm2999_vm8, %v2972_v13, 0.0  ;;  %v3076_v15 = vmul.f32 %v2972_v13, %v2972_v13  ;;  %v3780_v27 = vmul.f32 -1.442695, %v2972_v13 }
 0x205   : > { %4616 = vrcp.f32 %v3271_v11  ;;  %v4609_v6 = vpop.eup %4608  ;;  %v3272_v7 = vadd.f32 1.0, %v4607_v58  ;;  %v3010_v60 = vadd.f32 %v3009_v42, %v3008_v5  ;;  %v2977_v45 = vadd.f32 %v4281_v24, %v5886_v16 }
 0x206   : > { %4618 = vrcp.f32 %v3269_v10  ;;  %v3270_v14 = vadd.f32 1.0, %v4609_v6  ;;  %v3112_v28 = vsel %vm2999_vm8, %v3076_v15, 0.0  ;;  %v2975_v31 = vadd.f32 %v4282_v33, %v5886_v16 }
 0x207   : > { %4620 = vpow2.f32 %v3780_v27  ;;  %v3012_v38 = vadd.f32 %v3011_v0, %v3010_v60  ;;  %v3113_v46 = vadd.f32 %v3112_v28, %v3111_v21  ;;  %v3116_v47 = vsel %vm2999_vm8, %v3078_v51, 0.0 }
 0x208   : > { %4622 = vrcp.f32 %v3272_v7  ;;  %v3785_v32 = vmul.f32 -1.442695, %v2977_v45  ;;  %v3015_v18 = vsel %vm2999_vm8, %v2975_v31, 0.0  ;;  %v3079_v23 = vmul.f32 %v2975_v31, %v2975_v31 }
 0x209   : > { %4624 = vrcp.f32 %v3270_v14  ;;  %v4253_v43 = vpop.f32.mrb[12].mxu0  ;;  %v3115_v55 = vadd.f32 %v3114_v25, %v3113_v46  ;;  %v3014_v12 = vadd.f32 %v3013_v19, %v3012_v38  ;;  %v3783_v59 = vmul.f32 -1.442695, %v2975_v31 }
 0x20a   : > { %v2849_v35 = vpop.f32.mrb[13].mxu0  ;;  %v4611_v48 = vpop.eup %4610  ;;  %v3081_v2 = vmul.f32 %v2977_v45, %v2977_v45  ;;  %4626 = vpow2.f32 %v3785_v32  ;;  %v4283_v61 = vadd.f32 %v4250_v9, %v5871_v26  ;;  %v4284_v56 = vadd.f32 %v2836_v39, %v5873_v29 }
 0x20b   : > { %v5920_v53 = vpop.f32.mrb[14].mxu0  ;;  %v4613_v17 = vpop.eup %4612  ;;  %v3275_v34 = vadd.f32 1.0, %v4611_v48  ;;  %v3016_v37 = vadd.f32 %v3015_v18, %v3014_v12  ;;  %v3117_v41 = vadd.f32 %v3116_v47, %v3115_v55  ;;  %v3118_v50 = vsel %vm2999_vm8, %v3079_v23, 0.0 }
 0x20c   : > { %v5923_v20 = vpop.f32.mrb[15].mxu0  ;;  %v3273_v0 = vadd.f32 1.0, %v4613_v17  ;;  %4628 = vpow2.f32 %v3783_v59  ;;  %v2978_v26 = vadd.f32 %v4283_v61, %v5886_v16  ;;  %v2976_v29 = vadd.f32 %v4284_v56, %v5886_v16 }
 0x20d   : > { %v4615_v22 = vpop.eup %4614  ;;  %4630 = vrcp.f32 %v3275_v34  ;;  %v3119_v30 = vadd.f32 %v3118_v50, %v3117_v41  ;;  %v4285_v57 = vadd.f32 %v4253_v43, %v5875_v44  ;;  %v4286_v62 = vadd.f32 %v2849_v35, %v5877_v8 }
 0x20e   : > { %4632 = vrcp.f32 %v3273_v0  ;;  %v3276_v63 = vadd.f32 1.0, %v4615_v22  ;;  %v3019_v49 = vsel %vm2999_vm8, %v2977_v45, 0.0  ;;  %v3082_v54 = vmul.f32 %v2978_v26, %v2978_v26 }
 0x20f   : > { %v4617_v5 = vpop.eup %4616  ;;  %v3786_v19 = vmul.f32 -1.442695, %v2978_v26  ;;  %v3017_v52 = vsel %vm2999_vm8, %v2976_v29, 0.0  ;;  %v3080_v3 = vmul.f32 %v2976_v29, %v2976_v29  ;;  %v3784_v4 = vmul.f32 -1.442695, %v2976_v29 }
 0x210   : > { %v4619_v36 = vpop.eup %4618  ;;  %3367 = vst.msk [vmem:[%s5928_s25 + $0x10] sm:$0xff] %vm2999_vm8, %v4617_v5  ;;  %4634 = vrcp.f32 %v3276_v63  ;;  %v3122_v44 = vsel %vm2999_vm8, %v3081_v2, 0.0  ;;  %v3018_v8 = vadd.f32 %v3017_v52, %v3016_v37  ;;  %v2981_v21 = vadd.f32 %v4285_v57, %v5886_v16 }
 0x211   : > { %v4621_v11 = vpop.eup %4620  ;;  %3365 = vst.msk [vmem:[%s5928_s25] sm:$0xff] %vm2999_vm8, %v4619_v36  ;;  %v4121_v13 = vpop.f32.mrb[16].mxu1  ;;  %4636 = vpow2.f32 %v3786_v19  ;;  %v3120_v51 = vsel %vm2999_vm8, %v3080_v3, 0.0  ;;  %v2979_v33 = vadd.f32 %v4286_v62, %v5886_v16  ;;  %v3021_v15 = vsel %vm2999_vm8, %v2978_v26, 0.0 }
 0x212   : > { %v4257_v24 = vpop.f32.mrb[16].mxu0  ;;  %v4623_v9 = vpop.eup %4622  ;;  %v3274_v10 = vadd.f32 1.0, %v4621_v11  ;;  %v3020_v27 = vadd.f32 %v3019_v49, %v3018_v8  ;;  %v3121_v6 = vadd.f32 %v3120_v51, %v3119_v30  ;;  %4638 = vpow2.f32 %v3784_v4 }
 0x213   : > { %v2007_v39 = vpop.f32.mrb[17].mxu1  ;;  %v2865_v58 = vpop.f32.mrb[17].mxu0  ;;  %3368 = vst.msk [vmem:[%s5928_s25 + $0x18] sm:$0xff] %vm2999_vm8, %v4623_v9  ;;  %v3124_v45 = vsel %vm2999_vm8, %v3082_v54, 0.0  ;;  %v3789_v14 = vmul.f32 -1.442695, %v2981_v21  ;;  %v3083_v32 = vmul.f32 %v2979_v33, %v2979_v33  ;;  %v3085_v55 = vmul.f32 %v2981_v21, %v2981_v21 }
 0x214   : > { %v4625_v42 = vpop.eup %4624  ;;  %v4122_v7 = vpop.f32.mrb[18].mxu1  ;;  %4640 = vrcp.f32 %v3274_v10  ;;  %v3023_v28 = vsel %vm2999_vm8, %v2979_v33, 0.0  ;;  %v3123_v46 = vadd.f32 %v3122_v44, %v3121_v6  ;;  %v3022_v47 = vadd.f32 %v3021_v15, %v3020_v27 }
 0x215   : > { %v4258_v60 = vpop.f32.mrb[18].mxu0  ;;  %3366 = vst.msk [vmem:[%s5928_s25 + $0x8] sm:$0xff] %vm2999_vm8, %v4625_v42  ;;  %v2010_v31 = vpop.f32.mrb[19].mxu1  ;;  %v3787_v18 = vmul.f32 -1.442695, %v2979_v33  ;;  %4642 = vpow2.f32 %v3789_v14  ;;  %v4287_v12 = vadd.f32 %v5920_v53, %v5879_v1  ;;  %v3126_v48 = vsel %vm2999_vm8, %v3083_v32, 0.0 }
 0x216   : > { %v2868_v25 = vpop.f32.mrb[19].mxu0  ;;  %v4627_v38 = vpop.eup %4626  ;;  %v3024_v59 = vadd.f32 %v3023_v28, %v3022_v47  ;;  %v3125_v35 = vadd.f32 %v3124_v45, %v3123_v46  ;;  %v4288_v17 = vadd.f32 %v5923_v20, %v5881_v40  ;;  %v4289_v1 = vadd.f32 %v4257_v24, %v4121_v13 }
 0x217   : > { %v3279_v43 = vadd.f32 1.0, %v4627_v38  ;;  %v4629_v23 = vpop.eup %4628  ;;  %4644 = vpow2.f32 %v3787_v18  ;;  %v2982_v56 = vadd.f32 %v4287_v12, %v5886_v16  ;;  %v4290_v53 = vadd.f32 %v2865_v58, %v2007_v39 }
 0x218   : > { %v4631_v2 = vpop.eup %4630  ;;  %v3277_v61 = vadd.f32 1.0, %v4629_v23  ;;  %v3127_v37 = vadd.f32 %v3126_v48, %v3125_v35  ;;  %v4291_v41 = vadd.f32 %v4258_v60, %v4122_v7  ;;  %v3027_v40 = vsel %vm2999_vm8, %v2981_v21, 0.0 }
 0x219   : > { %4646 = vrcp.f32 %v3279_v43  ;;  %v4633_v34 = vpop.eup %4632  ;;  %3371 = vst.msk [vmem:[%s5928_s25 + $0x30] sm:$0xff] %vm2999_vm8, %v4631_v2  ;;  %v4125_v50 = vpop.f32.mrb[20].mxu1  ;;  %v3790_v26 = vmul.f32 -1.442695, %v2982_v56  ;;  %v3130_v20 = vsel %vm2999_vm8, %v3085_v55, 0.0  ;;  %v2980_v57 = vadd.f32 %v4288_v17, %v5886_v16 }
 0x21a   : > { %v4261_v0 = vpop.f32.mrb[20].mxu0  ;;  %3369 = vst.msk [vmem:[%s5928_s25 + $0x20] sm:$0xff] %vm2999_vm8, %v4633_v34  ;;  %4648 = vrcp.f32 %v3277_v61  ;;  %v5961_v29 = vpop.f32.mrb[21].mxu1  ;;  %v2985_v62 = vadd.f32 %v4289_v1, %v5886_v16  ;;  %v2983_v54 = vadd.f32 %v4290_v53, %v5886_v16  ;;  %v4292_v36 = vadd.f32 %v2868_v25, %v2010_v31 }
 0x21b   : > { %v5963_v22 = vpop.f32.mrb[21].mxu0  ;;  %v4635_v30 = vpop.eup %4634  ;;  %4650 = vpow2.f32 %v3790_v26  ;;  %v4293_v19 = vadd.f32 %v4261_v0, %v4125_v50  ;;  %v3025_v44 = vsel %vm2999_vm8, %v2980_v57, 0.0  ;;  %v3084_v8 = vmul.f32 %v2980_v57, %v2980_v57 }
 0x21c   : > { %v5969_v5 = vpop.f32.mrb[22].mxu1  ;;  %v5971_v63 = vpop.f32.mrb[22].mxu0  ;;  %3372 = vst.msk [vmem:[%s5928_s25 + $0x38] sm:$0xff] %vm2999_vm8, %v4635_v30  ;;  %v3788_v21 = vmul.f32 -1.442695, %v2980_v57  ;;  %v3029_v9 = vsel %vm2999_vm8, %v2982_v56, 0.0  ;;  %v3086_v10 = vmul.f32 %v2982_v56, %v2982_v56  ;;  %v3026_v51 = vadd.f32 %v3025_v44, %v3024_v59 }
 0x21d   : > { %v4637_v49 = vpop.eup %4636  ;;  %v5976_v52 = vpop.f32.mrb[23].mxu1  ;;  %v3128_v33 = vsel %vm2999_vm8, %v3084_v8, 0.0  ;;  %v3793_v39 = vmul.f32 -1.442695, %v2985_v62  ;;  %v2986_v58 = vadd.f32 %v4291_v41, %v5886_v16  ;;  %v3031_v6 = vsel %vm2999_vm8, %v2983_v54, 0.0 }
 0x21e   : > { %v5978_v3 = vpop.f32.mrb[23].mxu0  ;;  %v4639_v4 = vpop.eup %4638  ;;  %v3280_v11 = vadd.f32 1.0, %v4637_v49  ;;  %v3028_v15 = vadd.f32 %v3027_v40, %v3026_v51  ;;  %v3129_v27 = vadd.f32 %v3128_v33, %v3127_v37  ;;  %v3087_v45 = vmul.f32 %v2983_v54, %v2983_v54 }
 0x21f   : > { %v4641_v13 = vpop.eup %4640  ;;  %v3278_v24 = vadd.f32 1.0, %v4639_v4  ;;  %v3791_v14 = vmul.f32 -1.442695, %v2983_v54  ;;  %v3132_v43 = vsel %vm2999_vm8, %v3086_v10, 0.0  ;;  %v3089_v55 = vmul.f32 %v2985_v62, %v2985_v62 }
 0x220   : > { %3370 = vst.msk [vmem:[%s5928_s25 + $0x28] sm:$0xff] %vm2999_vm8, %v4641_v13  ;;  %4652 = vrcp.f32 %v3280_v11  ;;  %v4643_v42 = vpop.eup %4642  ;;  %v3131_v46 = vadd.f32 %v3130_v20, %v3129_v27  ;;  %v3030_v47 = vadd.f32 %v3029_v9, %v3028_v15  ;;  %v3134_v12 = vsel %vm2999_vm8, %v3087_v45, 0.0 }
 0x221   : > { %4654 = vrcp.f32 %v3278_v24  ;;  %v4645_v7 = vpop.eup %4644  ;;  %v3283_v60 = vadd.f32 1.0, %v4643_v42  ;;  %v5987_v28 = vpop.f32.mrb[24].mxu1  ;;  %v3794_v61 = vmul.f32 -1.442695, %v2986_v58  ;;  %v3035_v34 = vsel %vm2999_vm8, %v2985_v62, 0.0 }
 0x222   : > { %4656 = vpow2.f32 %v3788_v21  ;;  %v5989_v31 = vpop.f32.mrb[24].mxu0  ;;  %v3281_v38 = vadd.f32 1.0, %v4645_v7  ;;  %v5991_v32 = vpop.f32.mrb[25].mxu1  ;;  %v3032_v48 = vadd.f32 %v3031_v6, %v3030_v47  ;;  %v3133_v2 = vadd.f32 %v3132_v43, %v3131_v46 }
 0x223   : > { %v4647_v25 = vpop.eup %4646  ;;  %4658 = vpow2.f32 %v3793_v39  ;;  %v5993_v18 = vpop.f32.mrb[25].mxu0  ;;  %v2984_v37 = vadd.f32 %v4292_v36, %v5886_v16  ;;  %v2989_v1 = vadd.f32 %v4293_v19, %v5886_v16  ;;  %v4294_v50 = vadd.f32 %v5963_v22, %v5961_v29 }
 0x224   : > { %3375 = vst.msk [vmem:[%s5928_s25 + $0x50] sm:$0xff] %vm2999_vm8, %v4647_v25  ;;  %4660 = vrcp.f32 %v3283_v60  ;;  %v5999_v23 = vpop.f32.mrb[26].mxu1  ;;  %v6001_v59 = vpop.f32.mrb[26].mxu0  ;;  %v3135_v41 = vadd.f32 %v3134_v12, %v3133_v2  ;;  %v4295_v0 = vadd.f32 %v5971_v63, %v5969_v5  ;;  %v3138_v57 = vsel %vm2999_vm8, %v3089_v55, 0.0 }
 0x225   : > { %v4649_v35 = vpop.eup %4648  ;;  %4662 = vrcp.f32 %v3281_v38  ;;  %v6003_v56 = vpop.f32.mrb[27].mxu1  ;;  %v3033_v30 = vsel %vm2999_vm8, %v2984_v37, 0.0  ;;  %v3088_v40 = vmul.f32 %v2984_v37, %v2984_v37  ;;  %v3792_v20 = vmul.f32 -1.442695, %v2984_v37 }
 0x226   : > { %v6005_v17 = vpop.f32.mrb[27].mxu0  ;;  %3373 = vst.msk [vmem:[%s5928_s25 + $0x40] sm:$0xff] %vm2999_vm8, %v4649_v35  ;;  %4664 = vpow2.f32 %v3791_v14  ;;  %v4651_v53 = vpop.eup %4650  ;;  %v3090_v62 = vmul.f32 %v2986_v58, %v2986_v58  ;;  %v3034_v49 = vadd.f32 %v3033_v30, %v3032_v48  ;;  %v3797_v54 = vmul.f32 -1.442695, %v2989_v1 }
 0x227   : > { %4666 = vpow2.f32 %v3794_v61  ;;  %v3284_v26 = vadd.f32 1.0, %v4651_v53  ;;  %v3037_v19 = vsel %vm2999_vm8, %v2986_v58, 0.0  ;;  %v3136_v29 = vsel %vm2999_vm8, %v3088_v40, 0.0 }
 0x228   : > { %v2987_v22 = vadd.f32 %v4294_v50, %v5886_v16  ;;  %v3036_v11 = vadd.f32 %v3035_v34, %v3034_v49  ;;  %v3137_v44 = vadd.f32 %v3136_v29, %v3135_v41  ;;  %v2990_v8 = vadd.f32 %v4295_v0, %v5886_v16 }
 0x229   : > { %4668 = vrcp.f32 %v3284_v26  ;;  %v4133_v5 = vpop.f32.mrb[28].mxu1  ;;  %v4269_v63 = vpop.f32.mrb[28].mxu0  ;;  %v3140_v15 = vsel %vm2999_vm8, %v3090_v62, 0.0  ;;  %v3043_v25 = vsel %vm2999_vm8, %v2989_v1, 0.0  ;;  %v3093_v35 = vmul.f32 %v2989_v1, %v2989_v1 }
 0x22a   : > { %v4653_v36 = vpop.eup %4652  ;;  %4670 = vpow2.f32 %v3792_v20  ;;  %v6024_v21 = vpop.f32.mrb[29].mxu1  ;;  %v3039_v9 = vsel %vm2999_vm8, %v2987_v22, 0.0  ;;  %v3091_v10 = vmul.f32 %v2987_v22, %v2987_v22  ;;  %v3795_v51 = vmul.f32 -1.442695, %v2987_v22 }
 0x22b   : > { %v4655_v4 = vpop.eup %4654  ;;  %3376 = vst.msk [vmem:[%s5928_s25 + $0x58] sm:$0xff] %vm2999_vm8, %v4653_v36  ;;  %v6026_v13 = vpop.f32.mrb[29].mxu0  ;;  %4672 = vpow2.f32 %v3797_v54  ;;  %v3139_v27 = vadd.f32 %v3138_v57, %v3137_v44  ;;  %v3038_v6 = vadd.f32 %v3037_v19, %v3036_v11  ;;  %v3798_v55 = vmul.f32 -1.442695, %v2990_v8 }
 0x22c   : > { %v4657_v24 = vpop.eup %4656  ;;  %3374 = vst.msk [vmem:[%s5928_s25 + $0x48] sm:$0xff] %vm2999_vm8, %v4655_v4  ;;  %v6031_v33 = vpop.f32.mrb[30].mxu1  ;;  %v3142_v38 = vsel %vm2999_vm8, %v3091_v10, 0.0  ;;  %4674 = vpow2.f32 %v3795_v51  ;;  %v4296_v48 = vadd.f32 %v5978_v3, %v5976_v52  ;;  %v4297_v2 = vadd.f32 %v5989_v31, %v5987_v28 }
 0x22d   : > { %v6033_v39 = vpop.f32.mrb[30].mxu0  ;;  %v4659_v58 = vpop.eup %4658  ;;  %v3282_v42 = vadd.f32 1.0, %v4657_v24  ;;  %v3040_v47 = vadd.f32 %v3039_v9, %v3038_v6  ;;  %v3141_v43 = vadd.f32 %v3140_v15, %v3139_v27  ;;  %v4298_v53 = vadd.f32 %v5993_v18, %v5991_v32 }
 0x22e   : > { %v6036_v7 = vpop.f32.mrb[31].mxu1  ;;  %v6038_v60 = vpop.f32.mrb[31].mxu0  ;;  %v3287_v14 = vadd.f32 1.0, %v4659_v58  ;;  %v2988_v50 = vadd.f32 %v4296_v48, %v5886_v16  ;;  %v2993_v0 = vadd.f32 %v4297_v2, %v5886_v16  ;;  %v4299_v1 = vadd.f32 %v6001_v59, %v5999_v23 }
 0x22f   : > { %v4661_v45 = vpop.eup %4660  ;;  %4676 = vrcp.f32 %v3282_v42  ;;  %v3143_v37 = vadd.f32 %v3142_v38, %v3141_v43  ;;  %v2991_v52 = vadd.f32 %v4298_v53, %v5886_v16  ;;  %v4300_v3 = vadd.f32 %v6005_v17, %v6003_v56 }
 0x230   : > { %v4663_v46 = vpop.eup %4662  ;;  %3379 = vst.msk [vmem:[%s5928_s25 + $0x70] sm:$0xff] %vm2999_vm8, %v4661_v45  ;;  %4678 = vrcp.f32 %v3287_v14  ;;  %v4301_v28 = vadd.f32 %v4269_v63, %v4133_v5  ;;  %v3041_v26 = vsel %vm2999_vm8, %v2988_v50, 0.0  ;;  %v3092_v32 = vmul.f32 %v2988_v50, %v2988_v50 }
 0x231   : > { %v4665_v12 = vpop.eup %4664  ;;  %3377 = vst.msk [vmem:[%s5928_s25 + $0x60] sm:$0xff] %vm2999_vm8, %v4663_v46  ;;  %4680 = vpow2.f32 %v3798_v55  ;;  %v3796_v18 = vmul.f32 -1.442695, %v2988_v50  ;;  %v3146_v40 = vsel %vm2999_vm8, %v3093_v35, 0.0  ;;  %v3045_v23 = vsel %vm2999_vm8, %v2990_v8, 0.0 }
 0x232   : > { %v4667_v61 = vpop.eup %4666  ;;  %v3285_v34 = vadd.f32 1.0, %v4665_v12  ;;  %v3094_v59 = vmul.f32 %v2990_v8, %v2990_v8  ;;  %v3042_v20 = vadd.f32 %v3041_v26, %v3040_v47  ;;  %v3144_v56 = vsel %vm2999_vm8, %v3092_v32, 0.0 }
 0x233   : > { %v3288_v41 = vadd.f32 1.0, %v4667_v61  ;;  %v4669_v31 = vpop.eup %4668  ;;  %v3801_v17 = vmul.f32 -1.442695, %v2993_v0  ;;  %v3145_v36 = vadd.f32 %v3144_v56, %v3143_v37  ;;  %v3047_v19 = vsel %vm2999_vm8, %v2991_v52, 0.0 }
 0x234   : > { %4682 = vrcp.f32 %v3285_v34  ;;  %v4671_v30 = vpop.eup %4670  ;;  %3380 = vst.msk [vmem:[%s5928_s25 + $0x78] sm:$0xff] %vm2999_vm8, %v4669_v31  ;;  %v3044_v54 = vadd.f32 %v3043_v25, %v3042_v20  ;;  %v3095_v22 = vmul.f32 %v2991_v52, %v2991_v52  ;;  %v3799_v5 = vmul.f32 -1.442695, %v2991_v52 }
 0x235   : > { %4684 = vrcp.f32 %v3288_v41  ;;  %v4673_v57 = vpop.eup %4672  ;;  %v3286_v62 = vadd.f32 1.0, %v4671_v30  ;;  %v2994_v63 = vadd.f32 %v4299_v1, %v5886_v16  ;;  %v3147_v44 = vadd.f32 %v3146_v40, %v3145_v36 }
 0x236   : > { %4686 = vpow2.f32 %v3796_v18  ;;  %v3291_v49 = vadd.f32 1.0, %v4673_v57  ;;  %v4675_v29 = vpop.eup %4674  ;;  %v3046_v8 = vadd.f32 %v3045_v23, %v3044_v54  ;;  %v3148_v9 = vsel %vm2999_vm8, %v3094_v59, 0.0 }
 0x237   : > { %4688 = vrcp.f32 %v3286_v62  ;;  %v3289_v11 = vadd.f32 1.0, %v4675_v29  ;;  %v3097_v10 = vmul.f32 %v2993_v0, %v2993_v0  ;;  %v3150_v51 = vsel %vm2999_vm8, %v3095_v22, 0.0 }
 0x238   : > { %4690 = vrcp.f32 %v3291_v49  ;;  %v3048_v42 = vadd.f32 %v3047_v19, %v3046_v8  ;;  %v3149_v15 = vadd.f32 %v3148_v9, %v3147_v44  ;;  %v3802_v27 = vmul.f32 -1.442695, %v2994_v63 }
 0x239   : > { %v4677_v4 = vpop.eup %4676  ;;  %4692 = vpow2.f32 %v3801_v17  ;;  %v3051_v45 = vsel %vm2999_vm8, %v2993_v0, 0.0  ;;  %v2992_v14 = vadd.f32 %v4300_v3, %v5886_v16  ;;  %v6076_v46 = vadd.f32 %v4301_v28, %v5886_v16 }
 0x23a   : > { %v4679_v24 = vpop.eup %4678  ;;  %3378 = vst.msk [vmem:[%s5928_s25 + $0x68] sm:$0xff] %vm2999_vm8, %v4677_v4  ;;  %4694 = vrcp.f32 %v3289_v11  ;;  %v3151_v38 = vadd.f32 %v3150_v51, %v3149_v15  ;;  %v4302_v47 = vadd.f32 %v6026_v13, %v6024_v21  ;;  %v3154_v48 = vsel %vm2999_vm8, %v3097_v10, 0.0 }
 0x23b   : > { %v4681_v58 = vpop.eup %4680  ;;  %3383 = vst.msk [vmem:[%s5928_s25 + $0x90] sm:$0xff] %vm2999_vm8, %v4679_v24  ;;  %4696 = vpow2.f32 %v3799_v5  ;;  %v3049_v55 = vsel %vm2999_vm8, %v2992_v14, 0.0  ;;  %v3096_v12 = vmul.f32 %v2992_v14, %v2992_v14  ;;  %v3800_v35 = vmul.f32 -1.442695, %v2992_v14 }
 0x23c   : > { %v3292_v6 = vadd.f32 1.0, %v4681_v58  ;;  %4698 = vpow2.f32 %v3802_v27  ;;  %v3098_v2 = vmul.f32 %v2994_v63, %v2994_v63  ;;  %v3050_v61 = vadd.f32 %v3049_v55, %v3048_v42 }
 0x23d   : > { %v3805_v34 = vmul.f32 -1.442695, %v6076_v46  ;;  %v3152_v21 = vsel %vm2999_vm8, %v3096_v12, 0.0  ;;  %v2995_v13 = vadd.f32 %v4302_v47, %v5886_v16  ;;  %v4303_v53 = vadd.f32 %v6033_v39, %v6031_v33 }
 0x23e   : > { %v4683_v25 = vpop.eup %4682  ;;  %4700 = vrcp.f32 %v3292_v6  ;;  %v3053_v50 = vsel %vm2999_vm8, %v2994_v63, 0.0  ;;  %v3052_v0 = vadd.f32 %v3051_v45, %v3050_v61  ;;  %v3153_v1 = vadd.f32 %v3152_v21, %v3151_v38 }
 0x23f   : > { %v4685_v43 = vpop.eup %4684  ;;  %3381 = vst.msk [vmem:[%s5928_s25 + $0x80] sm:$0xff] %vm2999_vm8, %v4683_v25  ;;  %4702 = vpow2.f32 %v3800_v35  ;;  %v3055_v3 = vsel %vm2999_vm8, %v2995_v13, 0.0  ;;  %v3099_v28 = vmul.f32 %v2995_v13, %v2995_v13  ;;  %v3803_v31 = vmul.f32 -1.442695, %v2995_v13 }
 0x240   : > { %3384 = vst.msk [vmem:[%s5928_s25 + $0x98] sm:$0xff] %vm2999_vm8, %v4685_v43  ;;  %v4687_v37 = vpop.eup %4686  ;;  %4704 = vpow2.f32 %v3805_v34  ;;  %v3155_v32 = vadd.f32 %v3154_v48, %v3153_v1  ;;  %v3054_v18 = vadd.f32 %v3053_v50, %v3052_v0  ;;  %v2998_v33 = vadd.f32 %v4303_v53, %v5886_v16 }
 0x241   : > { %v3290_v41 = vadd.f32 1.0, %v4687_v37  ;;  %v4689_v52 = vpop.eup %4688  ;;  %v3156_v30 = vsel %vm2999_vm8, %v3098_v2, 0.0  ;;  %v3158_v40 = vsel %vm2999_vm8, %v3099_v28, 0.0  ;;  %v4304_v23 = vadd.f32 %v6038_v60, %v6036_v7 }
 0x242   : > { %v4691_v26 = vpop.eup %4690  ;;  %3382 = vst.msk [vmem:[%s5928_s25 + $0x88] sm:$0xff] %vm2999_vm8, %v4689_v52  ;;  %v3056_v57 = vadd.f32 %v3055_v3, %v3054_v18  ;;  %v3157_v62 = vadd.f32 %v3156_v30, %v3155_v32  ;;  %v3806_v17 = vmul.f32 -1.442695, %v2998_v33  ;;  %v3101_v7 = vmul.f32 %v6076_v46, %v6076_v46 }
 0x243   : > { %4706 = vrcp.f32 %v3290_v41  ;;  %v4693_v39 = vpop.eup %4692  ;;  %3387 = vst.msk [vmem:[%s5928_s25 + $0xb0] sm:$0xff] %vm2999_vm8, %v4691_v26  ;;  %v2996_v49 = vadd.f32 %v4304_v23, %v5886_v16  ;;  %v3059_v16 = vsel %vm2999_vm8, %v6076_v46, 0.0  ;;  %v3102_v44 = vmul.f32 %v2998_v33, %v2998_v33 }
 0x244   : > { %4708 = vpow2.f32 %v3803_v31  ;;  %v4695_v59 = vpop.eup %4694  ;;  %v3295_v20 = vadd.f32 1.0, %v4693_v39  ;;  %v3159_v19 = vadd.f32 %v3158_v40, %v3157_v62  ;;  %v3061_v51 = vsel %vm2999_vm8, %v2998_v33, 0.0 }
 0x245   : > { %v4697_v56 = vpop.eup %4696  ;;  %3385 = vst.msk [vmem:[%s5928_s25 + $0xa0] sm:$0xff] %vm2999_vm8, %v4695_v59  ;;  %v3057_v60 = vsel %vm2999_vm8, %v2996_v49, 0.0  ;;  %v3100_v63 = vmul.f32 %v2996_v49, %v2996_v49  ;;  %v3804_v4 = vmul.f32 -1.442695, %v2996_v49  ;;  %v3162_v15 = vsel %vm2999_vm8, %v3101_v7, 0.0 }
 0x246   : > { %v4699_v54 = vpop.eup %4698  ;;  %4710 = vrcp.f32 %v3295_v20  ;;  %v3293_v36 = vadd.f32 1.0, %v4697_v56  ;;  %v3058_v5 = vadd.f32 %v3057_v60, %v3056_v57  ;;  %v3164_v38 = vsel %vm2999_vm8, %v3102_v44, 0.0 }
 0x247   : > { %v3296_v22 = vadd.f32 1.0, %v4699_v54  ;;  %4712 = vpow2.f32 %v3806_v17  ;;  %v3160_v9 = vsel %vm2999_vm8, %v3100_v63, 0.0 }
 0x248   : > { %v4701_v29 = vpop.eup %4700  ;;  %4714 = vrcp.f32 %v3293_v36  ;;  %v3060_v24 = vadd.f32 %v3059_v16, %v3058_v5  ;;  %v3161_v58 = vadd.f32 %v3160_v9, %v3159_v19 }
 0x249   : > { %3388 = vst.msk [vmem:[%s5928_s25 + $0xb8] sm:$0xff] %vm2999_vm8, %v4701_v29  ;;  %v4703_v11 = vpop.eup %4702  ;;  %4716 = vrcp.f32 %v3296_v22 }
 0x24a   : > { %v3294_v8 = vadd.f32 1.0, %v4703_v11  ;;  %4718 = vpow2.f32 %v3804_v4  ;;  %v4705_v10 = vpop.eup %4704  ;;  %v3062_v6 = vadd.f32 %v3061_v51, %v3060_v24  ;;  %v3163_v14 = vadd.f32 %v3162_v15, %v3161_v58 }
 0x24b   : > { %v3299_v27 = vadd.f32 1.0, %v4705_v10 }
 0x24c   : > { %4720 = vrcp.f32 %v3294_v8  ;;  %v3063_v46 = vrot.slane %v3062_v6, 4  ;;  %v3165_v47 = vadd.f32 %v3164_v38, %v3163_v14 }
 0x24d   : > { %v4707_v42 = vpop.eup %4706  ;;  %4722 = vrcp.f32 %v3299_v27 }
 0x24e   : > { %v4709_v45 = vpop.eup %4708  ;;  %3386 = vst.msk [vmem:[%s5928_s25 + $0xa8] sm:$0xff] %vm2999_vm8, %v4707_v42  ;;  %v3064_v55 = vadd.f32 %v3063_v46, %v3062_v6  ;;  %v3166_v35 = vrot.slane %v3165_v47, 4 }
 0x24f   : > { %v3297_v25 = vadd.f32 1.0, %v4709_v45 }
 0x250   : > { %v4711_v43 = vpop.eup %4710  ;;  %v3065_v61 = vrot.slane %v3064_v55, 2  ;;  %v3167_v37 = vadd.f32 %v3166_v35, %v3165_v47 }
 0x251   : > { %4724 = vrcp.f32 %v3297_v25  ;;  %v4713_v12 = vpop.eup %4712  ;;  %3391 = vst.msk [vmem:[%s5928_s25 + $0xd0] sm:$0xff] %vm2999_vm8, %v4711_v43 }
 0x252   : > { %v4715_v48 = vpop.eup %4714  ;;  %v3300_v2 = vadd.f32 1.0, %v4713_v12  ;;  %v3066_v13 = vadd.f32 %v3065_v61, %v3064_v55  ;;  %v3168_v41 = vrot.slane %v3167_v37, 2 }
 0x253   : > { %v4717_v34 = vpop.eup %4716  ;;  %3389 = vst.msk [vmem:[%s5928_s25 + $0xc0] sm:$0xff] %vm2999_vm8, %v4715_v48 }
 0x254   : > { %v4719_v21 = vpop.eup %4718  ;;  %3392 = vst.msk [vmem:[%s5928_s25 + $0xd8] sm:$0xff] %vm2999_vm8, %v4717_v34  ;;  %4726 = vrcp.f32 %v3300_v2  ;;  %v3067_v0 = vrot.slane %v3066_v13, 1  ;;  %v3169_v1 = vadd.f32 %v3168_v41, %v3167_v37 }
 0x255   : > { %v3298_v53 = vadd.f32 1.0, %v4719_v21 }
 0x256   : > { %v4721_v50 = vpop.eup %4720  ;;  %v3068_v3 = vadd.f32 %v3067_v0, %v3066_v13  ;;  %v3170_v28 = vrot.slane %v3169_v1, 1 }
 0x257   : > { %3390 = vst.msk [vmem:[%s5928_s25 + $0xc8] sm:$0xff] %vm2999_vm8, %v4721_v50  ;;  %4728 = vrcp.f32 %v3298_v53  ;;  %v4723_v52 = vpop.eup %4722 }
 0x258   : > { %3395 = vst.msk [vmem:[%s5928_s25 + $0xf0] sm:$0xff] %vm2999_vm8, %v4723_v52 }
 0x259   : > { %3070 = vst.msk [vmem:[%s227_s6] sm:$0x1] %vm3069_vm9, %v3068_v3 }
 0x25b   : > { %v4725_v31 = vpop.eup %4724 }
 0x25c   : > { %3393 = vst.msk [vmem:[%s5928_s25 + $0xe0] sm:$0xff] %vm2999_vm8, %v4725_v31 }
 0x25d   : > { %4747 = shalt.err (!%p4744_p3)
}
 0x25e   : > { %s4748_s30 = scalar_lea.hbm %s6137_s12, 16  ;;  %s4752_s13 = scalar_lea.hbm %s6225_s4, 32 }
 0x25f   : > { %p4749_p4 = scmp.ne.s32.totalorder %s6137_s12, %s4748_s30  ;;  %p4753_p9 = scmp.lt.u32.totalorder %s6137_s12, %s6225_s4 }
 0x260   : > { %p4754_p10 = scmp.lt.u32.totalorder %s4752_s13, %s4748_s30  ;;  %p4756_p12 = scmp.lt.u32.totalorder %s4748_s30, %s6137_s12 }
 0x261   : > { %p4750_p7 = pnand %p4749_p4, %p4900_p5 }
 0x262   : > { %p4755_p11 = por %p4754_p10, %p4753_p9 }
 0x263   : > { %p4751_p8 = pneg %p4750_p7 }
 0x264   : > { %p4757_p13 = por %p4756_p12, %p4755_p11 }
 0x266   : > { %p4758_p0 = pnand %p4757_p13, %p4751_p8 }
 0x268   : > { %4761 = shalt.err (!%p4758_p0)
}
 0x269   : > { %4540 = dma.vmem_to_hbm [thread:$0]  (%p4900_p5), %s6139_s7, 16, %s6137_s12, %s3403_s16   ;;  %v3171_v26 = vadd.f32 %v3170_v28, %v3169_v1  ;;  %v4727_v32 = vpop.eup %4726 }
 0x26a   : > { %s3407_s17 = scalar_lea.sflag [#allocation5], %s6121_s26  ;;  %s4762_s23 = scalar_lea.vmem %s6149_s10, 16 }
 0x26b   : > { %3172 = vst.msk [vmem:[%s233_s8] sm:$0x1] %vm3069_vm9, %v3171_v26  ;;  %p4763_p1 = scmp.ne.s32.totalorder %s6149_s10, %s4762_s23  ;;  %s4831_s22 = smov [#allocation4]  }
 0x26c   : > { %s4766_s30 = sshll.u32 %s4831_s22, 4  ;;  %s4767_s30 = int_to_ptr.vmem [resolvable:$false] %s4766_s30 }
 0x26d   : > { %p4764_p2 = pnand %p4763_p1, %p4900_p5  ;;  %s4768_s6 = scalar_lea.vmem %s4767_s30, 32 }
 0x26e   : > { %p4769_p4 = scmp.lt.s32.totalorder %s6149_s10, %s4767_s30  ;;  %p4770_p7 = scmp.lt.s32.totalorder %s4768_s6, %s4762_s23 }
 0x26f   : > { %p4765_p3 = pneg %p4764_p2 }
 0x270   : > { %p4771_p8 = por %p4770_p7, %p4769_p4 }
 0x272   : > { %p4772_p9 = pnand %p4771_p8, %p4765_p3 }
 0x274   : > { %4775 = shalt.err (!%p4772_p9)
}
 0x275   : > { %s4776_s26 = scalar_lea.hbm %s6147_s15, 16  ;;  %s4780_s12 = scalar_lea.hbm %s6226_s5, 32 }
 0x276   : > { %p4777_p10 = scmp.ne.s32.totalorder %s6147_s15, %s4776_s26  ;;  %p4781_p13 = scmp.lt.u32.totalorder %s6147_s15, %s6226_s5 }
 0x277   : > { %p4782_p0 = scmp.lt.u32.totalorder %s4780_s12, %s4776_s26  ;;  %p4784_p2 = scmp.lt.u32.totalorder %s4776_s26, %s6147_s15 }
 0x278   : > { %p4778_p11 = pnand %p4777_p10, %p4900_p5 }
 0x279   : > { %p4783_p1 = por %p4782_p0, %p4781_p13 }
 0x27a   : > { %p4779_p12 = pneg %p4778_p11 }
 0x27b   : > { %p4785_p3 = por %p4784_p2, %p4783_p1 }
 0x27d   : > { %p4786_p4 = pnand %p4785_p3, %p4779_p12 }
 0x27f   : > { %4789 = shalt.err (!%p4786_p4)
}
 0x280   : > { %4541 = dma.vmem_to_hbm [thread:$0]  (%p4900_p5), %s6149_s10, 16, %s6147_s15, %s3407_s17   ;;  %3396 = vst.msk [vmem:[%s5928_s25 + $0xf8] sm:$0xff] %vm2999_vm8, %v4727_v32  ;;  %v4729_v18 = vpop.eup %4728 }
 0x281   : > { %3394 = vst.msk [vmem:[%s5928_s25 + $0xe8] sm:$0xff] %vm2999_vm8, %v4729_v18 }
 0x282 PF: > { %p4551_p7 = scmp.ge.s32.totalorder %s4828_s21, 2  ;;  %s3455_s13 = sand.u32 1, %s4816_s18  }
 0x283   : > { %s3456_s14 = scalar_lea.sflag [#allocation3], %s3455_s13 }
 0x284   : > { %p4545_p8 = pnand %p4551_p7, %p4904_p6 }
 0x286   : > { %4807 = dma.done.wait (!%p4545_p8), %s3456_s14, 16  }
 0x287   : > { %4809 = vsyncadd (!%p4545_p8), %s3456_s14, 4294967280  ;;  %s3464_s28 = scalar_lea.sflag [#allocation5], %s3455_s13 }
 0x288   : > { %4811 = dma.done.wait (!%p4545_p8), %s3464_s28, 16  }
 0x289   : > { %4813 = vsyncadd (!%p4545_p8), %s3464_s28, 4294967280  ;;  %p19_p5 = scmp.ge.s32.totalorder %s4887_s24, 4   ;;  %s6306_s18 = smov %s4820_s19 }
 0x28a   : > { %s6307_s19 = smov %s4824_s20  ;;  %s6308_s20 = smov %s4898_s27 }
 0x28b   : > { %s6309_s21 = smov %s4887_s24  ;;  %21 = sbr.rel (!%p19_p5) target bundleno = 5 (0x5), region = 104 }
 0x292   :  { %3468 = vsyncpa [#allocation3], 1 }
 0x293   :  { %3470 = vsyncpa [#allocation3 + $0x1], 1 }
 0x294   :  { %3471 = vsyncpa [#allocation5], 1 }
 0x295   :  { %3473 = vsyncpa [#allocation5 + $0x1], 1 }

</bundles_post_ra>
